<compile_context>
chip_gen: v7x
topology: tpu7x:2x2x1
jax: 0.10.0
libtpu: 0.0.40
codegen_flags: <defaults>
</compile_context>

<pallas_src>
import functools

import jax
import jax.numpy as jnp
from jax import lax
from jax.experimental import pallas as pl
from jax.experimental.pallas import tpu as pltpu

EPS = 1e-5                                 # torch LayerNorm default
_VMEM_LIMIT_BYTES = 48 * 1024 * 1024       # safe on v7x (64 MiB), ample on v5e/v6e
_TARGET_TOKENS_PER_STEP = 1024             # rows (tokens) per grid step target


# ----------------------------------------------------------------------------
# small in-kernel helpers
# ----------------------------------------------------------------------------
def _layernorm(x, g, b):
    # one-pass statistics: mean and mean-of-squares (halves XLU reductions)
    mu = jnp.mean(x, axis=-1, keepdims=True)
    ms = jnp.mean(x * x, axis=-1, keepdims=True)
    var = ms - mu * mu
    return (x - mu) * lax.rsqrt(var + EPS) * g + b


def _gelu_tanh(x):
    # tanh-form GELU: transcendental lands on the EUP slot, few VALU ops.
    c = 0.7978845608028654  # sqrt(2/pi)
    return 0.5 * x * (1.0 + jnp.tanh(c * (x + 0.044715 * x * x * x)))


# ----------------------------------------------------------------------------
# fused Swin block kernel
# ----------------------------------------------------------------------------
def _swin_block_kernel(x_ref, mask_ref, g1_ref, b1_ref, wqkv_ref, wp_ref,
                       bp_ref, g2_ref, b2_ref, w1_ref, bb1_ref, w2_ref,
                       bb2_ref, o_ref, *, num_heads, group_rows, group_windows):
    """Full Swin block for a batch of window groups.

    x_ref: (R, C) f32 tokens of whole windows, already shifted / window-
    partitioned in the wrapper and packed `group_windows` windows per group of
    `group_rows` rows.  Computes (per window / per token):
        y   = x + proj(window_attn(norm1(x)))
        out = y + mlp(norm2(y))
    """
    x = x_ref[...]                                   # (R, C) f32
    R, C = x.shape
    GN = group_rows
    ngrp = R // GN
    hd = C // num_heads

    # ---- norm1 ----
    xn = _layernorm(x, g1_ref[...], b1_ref[...]).astype(jnp.bfloat16)

    # ---- packed QKV projection (softmax scale already folded into Q cols);
    #      single lane-dense f32 -> bf16 cast before the head split ----
    qkv = jnp.dot(xn, wqkv_ref[...],
                  preferred_element_type=jnp.float32).astype(jnp.bfloat16)   # (R, 3C)

    # ---- grouped block-diagonal window attention, per head ----
    outs = []
    for h in range(num_heads):                       # small static unroll (heads)
        q = qkv[:, h * hd:(h + 1) * hd].reshape(ngrp, GN, hd)
        k = qkv[:, C + h * hd:C + (h + 1) * hd].reshape(ngrp, GN, hd)
        v = qkv[:, 2 * C + h * hd:2 * C + (h + 1) * hd].reshape(ngrp, GN, hd)
        s = jnp.einsum('gnd,gmd->gnm', q, k,
                       preferred_element_type=jnp.float32)      # (ngrp, GN, GN)
        if group_windows > 1:                        # block-diagonal -inf mask
            s = s + mask_ref[...]
        s = s - jnp.max(s, axis=-1, keepdims=True)
        p = jnp.exp(s)
        p = p * pl.reciprocal(jnp.sum(p, axis=-1, keepdims=True), approx=True)
        o = jnp.einsum('gnm,gmd->gnd', p.astype(jnp.bfloat16), v,
                       preferred_element_type=jnp.float32)      # (ngrp, GN, hd)
        outs.append(o.reshape(R, hd))
    attn = jnp.concatenate(outs, axis=-1).astype(jnp.bfloat16)  # (R, C)

    # ---- single full-width output projection + residual 1 ----
    y = x + jnp.dot(attn, wp_ref[...],
                    preferred_element_type=jnp.float32) + bp_ref[...]

    # ---- norm2 + MLP (tanh GELU) + residual 2 ----
    yn = _layernorm(y, g2_ref[...], b2_ref[...]).astype(jnp.bfloat16)
    h1 = jnp.dot(yn, w1_ref[...], preferred_element_type=jnp.float32) + bb1_ref[...]
    h1 = _gelu_tanh(h1).astype(jnp.bfloat16)
    y2 = jnp.dot(h1, w2_ref[...], preferred_element_type=jnp.float32) + bb2_ref[...]
    o_ref[...] = y + y2


# ----------------------------------------------------------------------------
# Pallas wrapper (tiling / grouping decisions)
# ----------------------------------------------------------------------------
def _choose_group(win_tokens):
    """Windows packed per attention group: score matrix ~128 lanes wide and the
    group row count a multiple of 8 (sublane aligned)."""
    g = max(1, 128 // win_tokens)
    while (g * win_tokens) % 8 != 0:
        g += 1                                   # g<=8 always reaches a multiple of 8
    return g


def _pick_groups_per_step(n_groups, group_rows):
    gps = max(1, min(n_groups, _TARGET_TOKENS_PER_STEP // max(1, group_rows)))
    if n_groups >= 2:
        # keep grid >= 2 so both v7x TensorCores get work
        gps = min(gps, (n_groups + 1) // 2)
    return gps


def fused_swin_block_pallas(tokens2d, p, num_heads, win_tokens):
    R0, C = tokens2d.shape                     # R0 = n_windows * win_tokens
    G = _choose_group(win_tokens)
    GN = G * win_tokens
    n_groups = pl.cdiv(R0, GN)
    gps = _pick_groups_per_step(n_groups, GN)
    grid = pl.cdiv(n_groups, gps)
    rows_per_step = gps * GN
    R = grid * rows_per_step
    if R != R0:
        # remainder-safe: pad with whole zero windows (block-diagonal attention
        # keeps them from contaminating real windows); sliced off below.
        tokens2d = jnp.pad(tokens2d, ((0, R - R0), (0, 0)))

    # block-diagonal window mask for one group (0 inside a window, -1e30 across)
    widx = jnp.arange(GN) // win_tokens
    mask = jnp.where(widx[:, None] == widx[None, :], 0.0, -1e30).astype(jnp.float32)

    H4 = p["w1"].shape[-1]
    kern = functools.partial(_swin_block_kernel, num_heads=num_heads,
                             group_rows=GN, group_windows=G)
    const = lambda i: (0, 0)
    out = pl.pallas_call(
        kern,
        out_shape=jax.ShapeDtypeStruct((R, C), jnp.float32),
        grid=(grid,),
        in_specs=[pl.BlockSpec((rows_per_step, C), lambda i: (i, 0)),   # x
                  pl.BlockSpec((GN, GN), const),                        # block-diag mask
                  pl.BlockSpec((1, C), const),                          # g1
                  pl.BlockSpec((1, C), const),                          # b1
                  pl.BlockSpec((C, 3 * C), const),                      # wqkv (bf16)
                  pl.BlockSpec((C, C), const),                          # wproj (bf16)
                  pl.BlockSpec((1, C), const),                          # bproj
                  pl.BlockSpec((1, C), const),                          # g2
                  pl.BlockSpec((1, C), const),                          # b2
                  pl.BlockSpec((C, H4), const),                         # w1 (bf16)
                  pl.BlockSpec((1, H4), const),                         # bb1
                  pl.BlockSpec((H4, C), const),                         # w2 (bf16)
                  pl.BlockSpec((1, C), const)],                         # bb2
        out_specs=pl.BlockSpec((rows_per_step, C), lambda i: (i, 0)),
        compiler_params=pltpu.CompilerParams(
            dimension_semantics=("parallel",),
            vmem_limit_bytes=_VMEM_LIMIT_BYTES),
    )(tokens2d, mask, p["g1"], p["b1"], p["wqkv"], p["wp"], p["bp"],
      p["g2"], p["b2"], p["w1"], p["bb1"], p["w2"], p["bb2"])
    if R != R0:
        out = out[:R0]
    return out


# ----------------------------------------------------------------------------
# JAX glue: window partition/reverse, shifts, parameter prep, full module
# ----------------------------------------------------------------------------
def fix_window(ws, h, w):
    return (ws[0] if 0 < ws[0] <= h else h, ws[1] if 0 < ws[1] <= w else w)


def fix_shift(shift, ws):
    return (min(shift[0], (ws[0] + 1) // 2), min(shift[1], (ws[1] + 1) // 2))


def window_partition(x, ws):
    B, H, W, C = x.shape
    x = x.reshape(B, H // ws[0], ws[0], W // ws[1], ws[1], C)
    x = x.transpose(0, 1, 3, 2, 4, 5)
    return x.reshape(-1, ws[0] * ws[1], C)


def window_reverse(windows, ws, H, W, B):
    C = windows.shape[-1]
    x = windows.reshape(B, H // ws[0], W // ws[1], ws[0], ws[1], C)
    x = x.transpose(0, 1, 3, 2, 4, 5)
    return x.reshape(B, H, W, C)


def _prep_block_params(p, num_heads):
    """Fold the softmax scale into Wq and cast matmul weights to bf16."""
    C = p["wqkv"].shape[0]
    hd = C // num_heads
    scale = float(hd ** (-0.5))
    wqkv = p["wqkv"].astype(jnp.float32)
    wqkv = wqkv.at[:, :C].multiply(scale)      # Q columns only
    bf = jnp.bfloat16
    return {"g1": p["g1"], "b1": p["b1"],
            "wqkv": wqkv.astype(bf),
            "wp": p["wproj"].astype(bf), "bp": p["bproj"],
            "g2": p["g2"], "b2": p["b2"],
            "w1": p["w1"].astype(bf), "bb1": p["bb1"],
            "w2": p["w2"].astype(bf), "bb2": p["bb2"]}


def swin_block_forward(x, pk, window_size, shift_size, num_heads):
    B, H, W, C = x.shape
    ws = fix_window(window_size, H, W)
    shift = fix_shift(shift_size, ws)
    assert H % ws[0] == 0 and W % ws[1] == 0   # win_padding path not implemented
    sx = jnp.roll(x, shift=(-shift[0], -shift[1]), axis=(1, 2)) if any(shift) else x
    N = ws[0] * ws[1]
    tokens = window_partition(sx, ws).reshape(-1, C)          # (nW*B*N, C)
    out = fused_swin_block_pallas(tokens, pk, num_heads, N)
    n_windows = (B * H * W) // N
    out = window_reverse(out.reshape(n_windows, N, C), ws, H, W, B)
    if any(shift):
        out = jnp.roll(out, shift=(shift[0], shift[1]), axis=(1, 2))
    return out   # both residuals + MLP already applied inside the kernel


def swin_transformer_block_twice_forward(x, params, *, num_heads,
                                          window_size1, window_size2, shift_size):
    B, H, W, Cin = x.shape
    # conv_patch (3x3, 'same', Cin->Cin) and proj0 (Cin->dim): skinny channel
    # counts gain nothing from Pallas (perf review) -> plain XLA.
    y = lax.conv_general_dilated(x, params["conv_w"], (1, 1), "SAME",
                                 dimension_numbers=("NHWC", "HWIO", "NHWC"))
    y = y + params["conv_b"]
    x = y @ params["proj0_w"] + params["proj0_b"]             # (B,H,W,dim)
    # interleaved block1 (no shift) / block2 (shifted) pairs
    for p1, p2 in zip(params["block1"], params["block2"]):
        pk1 = _prep_block_params(p1, num_heads)
        pk2 = _prep_block_params(p2, num_heads)
        x = swin_block_forward(x, pk1, window_size1, (0, 0), num_heads)
        x = swin_block_forward(x, pk2, window_size2, shift_size, num_heads)
    # proj1 (dim -> c_out, c_out << 128): plain XLA, avoids masked partial stores
    x = x @ params["proj1_w"] + params["proj1_b"]
    return x


# ----------------------------------------------------------------------------
# deterministic synthetic parameters
# ----------------------------------------------------------------------------
def init_params(key, c_in, c_out, dim, block_num):
    keys = iter(jax.random.split(key, 8 + 16 * block_num))

    def nrm(shape, s=0.02):
        return (s * jax.random.normal(next(keys), shape)).astype(jnp.float32)

    def block():
        return {
            "g1": jnp.ones((1, dim), jnp.float32),
            "b1": jnp.zeros((1, dim), jnp.float32),
            "wqkv": nrm((dim, 3 * dim)),
            "wproj": nrm((dim, dim)),
            "bproj": nrm((1, dim)),
            "g2": jnp.ones((1, dim), jnp.float32),
            "b2": jnp.zeros((1, dim), jnp.float32),
            "w1": nrm((dim, 4 * dim)),
            "bb1": nrm((1, 4 * dim)),
            "w2": nrm((4 * dim, dim)),
            "bb2": nrm((1, dim)),
        }

    return {
        "conv_w": nrm((3, 3, c_in, c_in)),   # HWIO
        "conv_b": nrm((1, c_in)),
        "proj0_w": nrm((c_in, dim)),
        "proj0_b": nrm((1, dim)),
        "proj1_w": nrm((dim, c_out)),
        "proj1_b": nrm((1, c_out)),
        "block1": [block() for _ in range(block_num)],
        "block2": [block() for _ in range(block_num)],
    }


# ----------------------------------------------------------------------------
if __name__ == "__main__":
    B, H, W = 2, 16, 16
    c_in, c_out, dim, num_heads = 4, 4, 128, 4   # dim=128 -> lane-dense channels
    window_size1 = (4, 4)
    window_size2 = (4, 4)
    shift_size = (3, 3)   # fix_shift clamps to (2, 2) for 4x4 windows
    block_num = 2

    key = jax.random.PRNGKey(0)
    kx, kp = jax.random.split(key)
    x = jax.random.normal(kx, (B, H, W, c_in), dtype=jnp.float32)
    params = init_params(kp, c_in, c_out, dim, block_num)

    fwd = jax.jit(functools.partial(
        swin_transformer_block_twice_forward,
        num_heads=num_heads, window_size1=window_size1,
        window_size2=window_size2, shift_size=shift_size))

    out = fwd(x, params)
    jax.block_until_ready(out)
    assert out.shape == (B, H, W, c_out)
    assert bool(jnp.all(jnp.isfinite(out)))
    print("KERNEL_OK")
</pallas_src>

<mosaic_0001>
module attributes {stable_mosaic.version = 11 : i64} {
  func.func @_swin_block_kernel(%arg0: i32, %arg1: memref<256x128xf32, #tpu.memory_space<vmem>>, %arg2: memref<128x128xf32, #tpu.memory_space<vmem>>, %arg3: memref<1x128xf32, #tpu.memory_space<vmem>>, %arg4: memref<1x128xf32, #tpu.memory_space<vmem>>, %arg5: memref<128x384xbf16, #tpu.memory_space<vmem>>, %arg6: memref<128x128xbf16, #tpu.memory_space<vmem>>, %arg7: memref<1x128xf32, #tpu.memory_space<vmem>>, %arg8: memref<1x128xf32, #tpu.memory_space<vmem>>, %arg9: memref<1x128xf32, #tpu.memory_space<vmem>>, %arg10: memref<128x512xbf16, #tpu.memory_space<vmem>>, %arg11: memref<1x512xf32, #tpu.memory_space<vmem>>, %arg12: memref<512x128xbf16, #tpu.memory_space<vmem>>, %arg13: memref<1x128xf32, #tpu.memory_space<vmem>>, %arg14: memref<256x128xf32, #tpu.memory_space<vmem>>) attributes {dimension_semantics = [#tpu.dimension_semantics<parallel>], iteration_bounds = array<i64: 2>, scalar_prefetch = 0 : i64, scratch_operands = 0 : i64, tpu.core_type = #tpu.core_type<tc>, window_params = [{transform_indices = @transform_0, window_bounds = array<i64: 256, 128>}, {pipeline_mode = #tpu.pipeline_mode<synchronous>, transform_indices = @transform_1, window_bounds = array<i64: 128, 128>}, {pipeline_mode = #tpu.pipeline_mode<synchronous>, transform_indices = @transform_2, window_bounds = array<i64: 1, 128>}, {pipeline_mode = #tpu.pipeline_mode<synchronous>, transform_indices = @transform_3, window_bounds = array<i64: 1, 128>}, {pipeline_mode = #tpu.pipeline_mode<synchronous>, transform_indices = @transform_4, window_bounds = array<i64: 128, 384>}, {pipeline_mode = #tpu.pipeline_mode<synchronous>, transform_indices = @transform_5, window_bounds = array<i64: 128, 128>}, {pipeline_mode = #tpu.pipeline_mode<synchronous>, transform_indices = @transform_6, window_bounds = array<i64: 1, 128>}, {pipeline_mode = #tpu.pipeline_mode<synchronous>, transform_indices = @transform_7, window_bounds = array<i64: 1, 128>}, {pipeline_mode = #tpu.pipeline_mode<synchronous>, transform_indices = @transform_8, window_bounds = array<i64: 1, 128>}, {pipeline_mode = #tpu.pipeline_mode<synchronous>, transform_indices = @transform_9, window_bounds = array<i64: 128, 512>}, {pipeline_mode = #tpu.pipeline_mode<synchronous>, transform_indices = @transform_10, window_bounds = array<i64: 1, 512>}, {pipeline_mode = #tpu.pipeline_mode<synchronous>, transform_indices = @transform_11, window_bounds = array<i64: 512, 128>}, {pipeline_mode = #tpu.pipeline_mode<synchronous>, transform_indices = @transform_12, window_bounds = array<i64: 1, 128>}, {transform_indices = @transform_13, window_bounds = array<i64: 256, 128>}]} {
    %c0 = arith.constant 0 : index
    %c0_0 = arith.constant 0 : index
    %0 = vector.load %arg1[%c0, %c0_0] : memref<256x128xf32, #tpu.memory_space<vmem>>, vector<256x128xf32>
    %c0_1 = arith.constant 0 : index
    %c0_2 = arith.constant 0 : index
    %1 = vector.load %arg3[%c0_1, %c0_2] : memref<1x128xf32, #tpu.memory_space<vmem>>, vector<1x128xf32>
    %c0_3 = arith.constant 0 : index
    %c0_4 = arith.constant 0 : index
    %2 = vector.load %arg4[%c0_3, %c0_4] : memref<1x128xf32, #tpu.memory_space<vmem>>, vector<1x128xf32>
    %cst = arith.constant dense<0.000000e+00> : vector<256xf32>
    %3 = vector.multi_reduction <add>, %0, %cst [1] : vector<256x128xf32> to vector<256xf32>
    %4 = vector.shape_cast %3 : vector<256xf32> to vector<256x1xf32>
    %cst_5 = arith.constant 1.280000e+02 : f32
    %5 = vector.broadcast %cst_5 : f32 to vector<256x1xf32>
    %6 = arith.divf %4, %5 : vector<256x1xf32>
    %7 = arith.mulf %0, %0 : vector<256x128xf32>
    %cst_6 = arith.constant dense<0.000000e+00> : vector<256xf32>
    %8 = vector.multi_reduction <add>, %7, %cst_6 [1] : vector<256x128xf32> to vector<256xf32>
    %9 = vector.shape_cast %8 : vector<256xf32> to vector<256x1xf32>
    %cst_7 = arith.constant 1.280000e+02 : f32
    %10 = vector.broadcast %cst_7 : f32 to vector<256x1xf32>
    %11 = arith.divf %9, %10 : vector<256x1xf32>
    %12 = arith.mulf %6, %6 : vector<256x1xf32>
    %13 = arith.subf %11, %12 : vector<256x1xf32>
    %14 = vector.broadcast %6 : vector<256x1xf32> to vector<256x128xf32>
    %15 = arith.subf %0, %14 : vector<256x128xf32>
    %cst_8 = arith.constant 9.99999974E-6 : f32
    %16 = vector.broadcast %cst_8 : f32 to vector<256x1xf32>
    %17 = arith.addf %13, %16 : vector<256x1xf32>
    %18 = math.rsqrt %17 : vector<256x1xf32>
    %19 = vector.broadcast %18 : vector<256x1xf32> to vector<256x128xf32>
    %20 = arith.mulf %15, %19 : vector<256x128xf32>
    %21 = vector.broadcast %1 : vector<1x128xf32> to vector<256x128xf32>
    %22 = arith.mulf %20, %21 : vector<256x128xf32>
    %23 = vector.broadcast %2 : vector<1x128xf32> to vector<256x128xf32>
    %24 = arith.addf %22, %23 : vector<256x128xf32>
    %25 = arith.truncf %24 : vector<256x128xf32> to vector<256x128xbf16>
    %c0_9 = arith.constant 0 : index
    %c0_10 = arith.constant 0 : index
    %26 = vector.load %arg5[%c0_9, %c0_10] : memref<128x384xbf16, #tpu.memory_space<vmem>>, vector<128x384xbf16>
    %cst_11 = arith.constant dense<0.000000e+00> : vector<256x384xf32>
    %27 = tpu.matmul %25, %26, %cst_11 {dimension_numbers = #tpu.dot_dimension_numbers<[1], [0], [0], [1], [0, 0, 1, 1], [], []>} : vector<256x128xbf16>, vector<128x384xbf16>, vector<256x384xf32> -> vector<256x384xf32>
    %28 = arith.truncf %27 : vector<256x384xf32> to vector<256x384xbf16>
    %29 = vector.extract_strided_slice %28 {offsets = [0, 0], sizes = [256, 32], strides = [1, 1]} : vector<256x384xbf16> to vector<256x32xbf16>
    %30 = vector.shape_cast %29 : vector<256x32xbf16> to vector<2x128x32xbf16>
    %31 = vector.extract_strided_slice %28 {offsets = [0, 128], sizes = [256, 32], strides = [1, 1]} : vector<256x384xbf16> to vector<256x32xbf16>
    %32 = vector.shape_cast %31 : vector<256x32xbf16> to vector<2x128x32xbf16>
    %33 = vector.extract_strided_slice %28 {offsets = [0, 256], sizes = [256, 32], strides = [1, 1]} : vector<256x384xbf16> to vector<256x32xbf16>
    %34 = vector.shape_cast %33 : vector<256x32xbf16> to vector<2x128x32xbf16>
    "tpu.trace_start"() <{level = 10 : i32, message = "gnd,gmd->gnm"}> : () -> ()
    %cst_12 = arith.constant dense<0.000000e+00> : vector<2x128x128xf32>
    %35 = tpu.matmul %30, %32, %cst_12 {dimension_numbers = #tpu.dot_dimension_numbers<[2], [2], [1], [1], [0, 0, 0, 1, 1, 1], [0], [0]>} : vector<2x128x32xbf16>, vector<2x128x32xbf16>, vector<2x128x128xf32> -> vector<2x128x128xf32>
    "tpu.trace_stop"() : () -> ()
    %c0_13 = arith.constant 0 : index
    %c0_14 = arith.constant 0 : index
    %36 = vector.load %arg2[%c0_13, %c0_14] : memref<128x128xf32, #tpu.memory_space<vmem>>, vector<128x128xf32>
    %37 = vector.shape_cast %36 : vector<128x128xf32> to vector<1x128x128xf32>
    %38 = vector.broadcast %37 : vector<1x128x128xf32> to vector<2x128x128xf32>
    %39 = arith.addf %35, %38 : vector<2x128x128xf32>
    %cst_15 = arith.constant dense<0xFF800000> : vector<2x128xf32>
    %40 = vector.multi_reduction <maximumf>, %39, %cst_15 [2] : vector<2x128x128xf32> to vector<2x128xf32>
    %41 = vector.shape_cast %40 : vector<2x128xf32> to vector<2x128x1xf32>
    %42 = vector.broadcast %41 : vector<2x128x1xf32> to vector<2x128x128xf32>
    %43 = arith.subf %39, %42 : vector<2x128x128xf32>
    %44 = math.exp %43 : vector<2x128x128xf32>
    %cst_16 = arith.constant dense<0.000000e+00> : vector<2x128xf32>
    %45 = vector.multi_reduction <add>, %44, %cst_16 [2] : vector<2x128x128xf32> to vector<2x128xf32>
    %46 = vector.shape_cast %45 : vector<2x128xf32> to vector<2x128x1xf32>
    %47 = tpu.reciprocal %46 {approx = true} : vector<2x128x1xf32> -> vector<2x128x1xf32>
    %48 = vector.broadcast %47 : vector<2x128x1xf32> to vector<2x128x128xf32>
    %49 = arith.mulf %44, %48 : vector<2x128x128xf32>
    %50 = arith.truncf %49 : vector<2x128x128xf32> to vector<2x128x128xbf16>
    "tpu.trace_start"() <{level = 10 : i32, message = "gnm,gmd->gnd"}> : () -> ()
    %cst_17 = arith.constant dense<0.000000e+00> : vector<2x128x32xf32>
    %51 = tpu.matmul %50, %34, %cst_17 {dimension_numbers = #tpu.dot_dimension_numbers<[2], [1], [1], [2], [0, 0, 0, 1, 1, 2], [0], [0]>} : vector<2x128x128xbf16>, vector<2x128x32xbf16>, vector<2x128x32xf32> -> vector<2x128x32xf32>
    "tpu.trace_stop"() : () -> ()
    %52 = vector.shape_cast %51 : vector<2x128x32xf32> to vector<256x32xf32>
    %53 = vector.extract_strided_slice %28 {offsets = [0, 32], sizes = [256, 32], strides = [1, 1]} : vector<256x384xbf16> to vector<256x32xbf16>
    %54 = vector.shape_cast %53 : vector<256x32xbf16> to vector<2x128x32xbf16>
    %55 = vector.extract_strided_slice %28 {offsets = [0, 160], sizes = [256, 32], strides = [1, 1]} : vector<256x384xbf16> to vector<256x32xbf16>
    %56 = vector.shape_cast %55 : vector<256x32xbf16> to vector<2x128x32xbf16>
    %57 = vector.extract_strided_slice %28 {offsets = [0, 288], sizes = [256, 32], strides = [1, 1]} : vector<256x384xbf16> to vector<256x32xbf16>
    %58 = vector.shape_cast %57 : vector<256x32xbf16> to vector<2x128x32xbf16>
    "tpu.trace_start"() <{level = 10 : i32, message = "gnd,gmd->gnm"}> : () -> ()
    %cst_18 = arith.constant dense<0.000000e+00> : vector<2x128x128xf32>
    %59 = tpu.matmul %54, %56, %cst_18 {dimension_numbers = #tpu.dot_dimension_numbers<[2], [2], [1], [1], [0, 0, 0, 1, 1, 1], [0], [0]>} : vector<2x128x32xbf16>, vector<2x128x32xbf16>, vector<2x128x128xf32> -> vector<2x128x128xf32>
    "tpu.trace_stop"() : () -> ()
    %c0_19 = arith.constant 0 : index
    %c0_20 = arith.constant 0 : index
    %60 = vector.load %arg2[%c0_19, %c0_20] : memref<128x128xf32, #tpu.memory_space<vmem>>, vector<128x128xf32>
    %61 = vector.shape_cast %60 : vector<128x128xf32> to vector<1x128x128xf32>
    %62 = vector.broadcast %61 : vector<1x128x128xf32> to vector<2x128x128xf32>
    %63 = arith.addf %59, %62 : vector<2x128x128xf32>
    %cst_21 = arith.constant dense<0xFF800000> : vector<2x128xf32>
    %64 = vector.multi_reduction <maximumf>, %63, %cst_21 [2] : vector<2x128x128xf32> to vector<2x128xf32>
    %65 = vector.shape_cast %64 : vector<2x128xf32> to vector<2x128x1xf32>
    %66 = vector.broadcast %65 : vector<2x128x1xf32> to vector<2x128x128xf32>
    %67 = arith.subf %63, %66 : vector<2x128x128xf32>
    %68 = math.exp %67 : vector<2x128x128xf32>
    %cst_22 = arith.constant dense<0.000000e+00> : vector<2x128xf32>
    %69 = vector.multi_reduction <add>, %68, %cst_22 [2] : vector<2x128x128xf32> to vector<2x128xf32>
    %70 = vector.shape_cast %69 : vector<2x128xf32> to vector<2x128x1xf32>
    %71 = tpu.reciprocal %70 {approx = true} : vector<2x128x1xf32> -> vector<2x128x1xf32>
    %72 = vector.broadcast %71 : vector<2x128x1xf32> to vector<2x128x128xf32>
    %73 = arith.mulf %68, %72 : vector<2x128x128xf32>
    %74 = arith.truncf %73 : vector<2x128x128xf32> to vector<2x128x128xbf16>
    "tpu.trace_start"() <{level = 10 : i32, message = "gnm,gmd->gnd"}> : () -> ()
    %cst_23 = arith.constant dense<0.000000e+00> : vector<2x128x32xf32>
    %75 = tpu.matmul %74, %58, %cst_23 {dimension_numbers = #tpu.dot_dimension_numbers<[2], [1], [1], [2], [0, 0, 0, 1, 1, 2], [0], [0]>} : vector<2x128x128xbf16>, vector<2x128x32xbf16>, vector<2x128x32xf32> -> vector<2x128x32xf32>
    "tpu.trace_stop"() : () -> ()
    %76 = vector.shape_cast %75 : vector<2x128x32xf32> to vector<256x32xf32>
    %77 = vector.extract_strided_slice %28 {offsets = [0, 64], sizes = [256, 32], strides = [1, 1]} : vector<256x384xbf16> to vector<256x32xbf16>
    %78 = vector.shape_cast %77 : vector<256x32xbf16> to vector<2x128x32xbf16>
    %79 = vector.extract_strided_slice %28 {offsets = [0, 192], sizes = [256, 32], strides = [1, 1]} : vector<256x384xbf16> to vector<256x32xbf16>
    %80 = vector.shape_cast %79 : vector<256x32xbf16> to vector<2x128x32xbf16>
    %81 = vector.extract_strided_slice %28 {offsets = [0, 320], sizes = [256, 32], strides = [1, 1]} : vector<256x384xbf16> to vector<256x32xbf16>
    %82 = vector.shape_cast %81 : vector<256x32xbf16> to vector<2x128x32xbf16>
    "tpu.trace_start"() <{level = 10 : i32, message = "gnd,gmd->gnm"}> : () -> ()
    %cst_24 = arith.constant dense<0.000000e+00> : vector<2x128x128xf32>
    %83 = tpu.matmul %78, %80, %cst_24 {dimension_numbers = #tpu.dot_dimension_numbers<[2], [2], [1], [1], [0, 0, 0, 1, 1, 1], [0], [0]>} : vector<2x128x32xbf16>, vector<2x128x32xbf16>, vector<2x128x128xf32> -> vector<2x128x128xf32>
    "tpu.trace_stop"() : () -> ()
    %c0_25 = arith.constant 0 : index
    %c0_26 = arith.constant 0 : index
    %84 = vector.load %arg2[%c0_25, %c0_26] : memref<128x128xf32, #tpu.memory_space<vmem>>, vector<128x128xf32>
    %85 = vector.shape_cast %84 : vector<128x128xf32> to vector<1x128x128xf32>
    %86 = vector.broadcast %85 : vector<1x128x128xf32> to vector<2x128x128xf32>
    %87 = arith.addf %83, %86 : vector<2x128x128xf32>
    %cst_27 = arith.constant dense<0xFF800000> : vector<2x128xf32>
    %88 = vector.multi_reduction <maximumf>, %87, %cst_27 [2] : vector<2x128x128xf32> to vector<2x128xf32>
    %89 = vector.shape_cast %88 : vector<2x128xf32> to vector<2x128x1xf32>
    %90 = vector.broadcast %89 : vector<2x128x1xf32> to vector<2x128x128xf32>
    %91 = arith.subf %87, %90 : vector<2x128x128xf32>
    %92 = math.exp %91 : vector<2x128x128xf32>
    %cst_28 = arith.constant dense<0.000000e+00> : vector<2x128xf32>
    %93 = vector.multi_reduction <add>, %92, %cst_28 [2] : vector<2x128x128xf32> to vector<2x128xf32>
    %94 = vector.shape_cast %93 : vector<2x128xf32> to vector<2x128x1xf32>
    %95 = tpu.reciprocal %94 {approx = true} : vector<2x128x1xf32> -> vector<2x128x1xf32>
    %96 = vector.broadcast %95 : vector<2x128x1xf32> to vector<2x128x128xf32>
    %97 = arith.mulf %92, %96 : vector<2x128x128xf32>
    %98 = arith.truncf %97 : vector<2x128x128xf32> to vector<2x128x128xbf16>
    "tpu.trace_start"() <{level = 10 : i32, message = "gnm,gmd->gnd"}> : () -> ()
    %cst_29 = arith.constant dense<0.000000e+00> : vector<2x128x32xf32>
    %99 = tpu.matmul %98, %82, %cst_29 {dimension_numbers = #tpu.dot_dimension_numbers<[2], [1], [1], [2], [0, 0, 0, 1, 1, 2], [0], [0]>} : vector<2x128x128xbf16>, vector<2x128x32xbf16>, vector<2x128x32xf32> -> vector<2x128x32xf32>
    "tpu.trace_stop"() : () -> ()
    %100 = vector.shape_cast %99 : vector<2x128x32xf32> to vector<256x32xf32>
    %101 = vector.extract_strided_slice %28 {offsets = [0, 96], sizes = [256, 32], strides = [1, 1]} : vector<256x384xbf16> to vector<256x32xbf16>
    %102 = vector.shape_cast %101 : vector<256x32xbf16> to vector<2x128x32xbf16>
    %103 = vector.extract_strided_slice %28 {offsets = [0, 224], sizes = [256, 32], strides = [1, 1]} : vector<256x384xbf16> to vector<256x32xbf16>
    %104 = vector.shape_cast %103 : vector<256x32xbf16> to vector<2x128x32xbf16>
    %105 = vector.extract_strided_slice %28 {offsets = [0, 352], sizes = [256, 32], strides = [1, 1]} : vector<256x384xbf16> to vector<256x32xbf16>
    %106 = vector.shape_cast %105 : vector<256x32xbf16> to vector<2x128x32xbf16>
    "tpu.trace_start"() <{level = 10 : i32, message = "gnd,gmd->gnm"}> : () -> ()
    %cst_30 = arith.constant dense<0.000000e+00> : vector<2x128x128xf32>
    %107 = tpu.matmul %102, %104, %cst_30 {dimension_numbers = #tpu.dot_dimension_numbers<[2], [2], [1], [1], [0, 0, 0, 1, 1, 1], [0], [0]>} : vector<2x128x32xbf16>, vector<2x128x32xbf16>, vector<2x128x128xf32> -> vector<2x128x128xf32>
    "tpu.trace_stop"() : () -> ()
    %c0_31 = arith.constant 0 : index
    %c0_32 = arith.constant 0 : index
    %108 = vector.load %arg2[%c0_31, %c0_32] : memref<128x128xf32, #tpu.memory_space<vmem>>, vector<128x128xf32>
    %109 = vector.shape_cast %108 : vector<128x128xf32> to vector<1x128x128xf32>
    %110 = vector.broadcast %109 : vector<1x128x128xf32> to vector<2x128x128xf32>
    %111 = arith.addf %107, %110 : vector<2x128x128xf32>
    %cst_33 = arith.constant dense<0xFF800000> : vector<2x128xf32>
    %112 = vector.multi_reduction <maximumf>, %111, %cst_33 [2] : vector<2x128x128xf32> to vector<2x128xf32>
    %113 = vector.shape_cast %112 : vector<2x128xf32> to vector<2x128x1xf32>
    %114 = vector.broadcast %113 : vector<2x128x1xf32> to vector<2x128x128xf32>
    %115 = arith.subf %111, %114 : vector<2x128x128xf32>
    %116 = math.exp %115 : vector<2x128x128xf32>
    %cst_34 = arith.constant dense<0.000000e+00> : vector<2x128xf32>
    %117 = vector.multi_reduction <add>, %116, %cst_34 [2] : vector<2x128x128xf32> to vector<2x128xf32>
    %118 = vector.shape_cast %117 : vector<2x128xf32> to vector<2x128x1xf32>
    %119 = tpu.reciprocal %118 {approx = true} : vector<2x128x1xf32> -> vector<2x128x1xf32>
    %120 = vector.broadcast %119 : vector<2x128x1xf32> to vector<2x128x128xf32>
    %121 = arith.mulf %116, %120 : vector<2x128x128xf32>
    %122 = arith.truncf %121 : vector<2x128x128xf32> to vector<2x128x128xbf16>
    "tpu.trace_start"() <{level = 10 : i32, message = "gnm,gmd->gnd"}> : () -> ()
    %cst_35 = arith.constant dense<0.000000e+00> : vector<2x128x32xf32>
    %123 = tpu.matmul %122, %106, %cst_35 {dimension_numbers = #tpu.dot_dimension_numbers<[2], [1], [1], [2], [0, 0, 0, 1, 1, 2], [0], [0]>} : vector<2x128x128xbf16>, vector<2x128x32xbf16>, vector<2x128x32xf32> -> vector<2x128x32xf32>
    "tpu.trace_stop"() : () -> ()
    %124 = vector.shape_cast %123 : vector<2x128x32xf32> to vector<256x32xf32>
    %125 = tpu.concatenate %52, %76, %100, %124 in 1 : vector<256x32xf32>, vector<256x32xf32>, vector<256x32xf32>, vector<256x32xf32> -> vector<256x128xf32>
    %126 = arith.truncf %125 : vector<256x128xf32> to vector<256x128xbf16>
    %c0_36 = arith.constant 0 : index
    %c0_37 = arith.constant 0 : index
    %127 = vector.load %arg6[%c0_36, %c0_37] : memref<128x128xbf16, #tpu.memory_space<vmem>>, vector<128x128xbf16>
    %cst_38 = arith.constant dense<0.000000e+00> : vector<256x128xf32>
    %128 = tpu.matmul %126, %127, %cst_38 {dimension_numbers = #tpu.dot_dimension_numbers<[1], [0], [0], [1], [0, 0, 1, 1], [], []>} : vector<256x128xbf16>, vector<128x128xbf16>, vector<256x128xf32> -> vector<256x128xf32>
    %129 = arith.addf %0, %128 : vector<256x128xf32>
    %c0_39 = arith.constant 0 : index
    %c0_40 = arith.constant 0 : index
    %130 = vector.load %arg7[%c0_39, %c0_40] : memref<1x128xf32, #tpu.memory_space<vmem>>, vector<1x128xf32>
    %131 = vector.broadcast %130 : vector<1x128xf32> to vector<256x128xf32>
    %132 = arith.addf %129, %131 : vector<256x128xf32>
    %c0_41 = arith.constant 0 : index
    %c0_42 = arith.constant 0 : index
    %133 = vector.load %arg8[%c0_41, %c0_42] : memref<1x128xf32, #tpu.memory_space<vmem>>, vector<1x128xf32>
    %c0_43 = arith.constant 0 : index
    %c0_44 = arith.constant 0 : index
    %134 = vector.load %arg9[%c0_43, %c0_44] : memref<1x128xf32, #tpu.memory_space<vmem>>, vector<1x128xf32>
    %cst_45 = arith.constant dense<0.000000e+00> : vector<256xf32>
    %135 = vector.multi_reduction <add>, %132, %cst_45 [1] : vector<256x128xf32> to vector<256xf32>
    %136 = vector.shape_cast %135 : vector<256xf32> to vector<256x1xf32>
    %cst_46 = arith.constant 1.280000e+02 : f32
    %137 = vector.broadcast %cst_46 : f32 to vector<256x1xf32>
    %138 = arith.divf %136, %137 : vector<256x1xf32>
    %139 = arith.mulf %132, %132 : vector<256x128xf32>
    %cst_47 = arith.constant dense<0.000000e+00> : vector<256xf32>
    %140 = vector.multi_reduction <add>, %139, %cst_47 [1] : vector<256x128xf32> to vector<256xf32>
    %141 = vector.shape_cast %140 : vector<256xf32> to vector<256x1xf32>
    %cst_48 = arith.constant 1.280000e+02 : f32
    %142 = vector.broadcast %cst_48 : f32 to vector<256x1xf32>
    %143 = arith.divf %141, %142 : vector<256x1xf32>
    %144 = arith.mulf %138, %138 : vector<256x1xf32>
    %145 = arith.subf %143, %144 : vector<256x1xf32>
    %146 = vector.broadcast %138 : vector<256x1xf32> to vector<256x128xf32>
    %147 = arith.subf %132, %146 : vector<256x128xf32>
    %cst_49 = arith.constant 9.99999974E-6 : f32
    %148 = vector.broadcast %cst_49 : f32 to vector<256x1xf32>
    %149 = arith.addf %145, %148 : vector<256x1xf32>
    %150 = math.rsqrt %149 : vector<256x1xf32>
    %151 = vector.broadcast %150 : vector<256x1xf32> to vector<256x128xf32>
    %152 = arith.mulf %147, %151 : vector<256x128xf32>
    %153 = vector.broadcast %133 : vector<1x128xf32> to vector<256x128xf32>
    %154 = arith.mulf %152, %153 : vector<256x128xf32>
    %155 = vector.broadcast %134 : vector<1x128xf32> to vector<256x128xf32>
    %156 = arith.addf %154, %155 : vector<256x128xf32>
    %157 = arith.truncf %156 : vector<256x128xf32> to vector<256x128xbf16>
    %c0_50 = arith.constant 0 : index
    %c0_51 = arith.constant 0 : index
    %158 = vector.load %arg10[%c0_50, %c0_51] : memref<128x512xbf16, #tpu.memory_space<vmem>>, vector<128x512xbf16>
    %cst_52 = arith.constant dense<0.000000e+00> : vector<256x512xf32>
    %159 = tpu.matmul %157, %158, %cst_52 {dimension_numbers = #tpu.dot_dimension_numbers<[1], [0], [0], [1], [0, 0, 1, 1], [], []>} : vector<256x128xbf16>, vector<128x512xbf16>, vector<256x512xf32> -> vector<256x512xf32>
    %c0_53 = arith.constant 0 : index
    %c0_54 = arith.constant 0 : index
    %160 = vector.load %arg11[%c0_53, %c0_54] : memref<1x512xf32, #tpu.memory_space<vmem>>, vector<1x512xf32>
    %161 = vector.broadcast %160 : vector<1x512xf32> to vector<256x512xf32>
    %162 = arith.addf %159, %161 : vector<256x512xf32>
    %cst_55 = arith.constant 5.000000e-01 : f32
    %163 = vector.broadcast %cst_55 : f32 to vector<256x512xf32>
    %164 = arith.mulf %163, %162 : vector<256x512xf32>
    %cst_56 = arith.constant 4.471500e-02 : f32
    %165 = vector.broadcast %cst_56 : f32 to vector<256x512xf32>
    %166 = arith.mulf %165, %162 : vector<256x512xf32>
    %167 = arith.mulf %166, %162 : vector<256x512xf32>
    %168 = arith.mulf %167, %162 : vector<256x512xf32>
    %169 = arith.addf %162, %168 : vector<256x512xf32>
    %cst_57 = arith.constant 0.797884583 : f32
    %170 = vector.broadcast %cst_57 : f32 to vector<256x512xf32>
    %171 = arith.mulf %170, %169 : vector<256x512xf32>
    %172 = math.tanh %171 : vector<256x512xf32>
    %cst_58 = arith.constant 1.000000e+00 : f32
    %173 = vector.broadcast %cst_58 : f32 to vector<256x512xf32>
    %174 = arith.addf %173, %172 : vector<256x512xf32>
    %175 = arith.mulf %164, %174 : vector<256x512xf32>
    %176 = arith.truncf %175 : vector<256x512xf32> to vector<256x512xbf16>
    %c0_59 = arith.constant 0 : index
    %c0_60 = arith.constant 0 : index
    %177 = vector.load %arg12[%c0_59, %c0_60] : memref<512x128xbf16, #tpu.memory_space<vmem>>, vector<512x128xbf16>
    %cst_61 = arith.constant dense<0.000000e+00> : vector<256x128xf32>
    %178 = tpu.matmul %176, %177, %cst_61 {dimension_numbers = #tpu.dot_dimension_numbers<[1], [0], [0], [1], [0, 0, 1, 1], [], []>} : vector<256x512xbf16>, vector<512x128xbf16>, vector<256x128xf32> -> vector<256x128xf32>
    %c0_62 = arith.constant 0 : index
    %c0_63 = arith.constant 0 : index
    %179 = vector.load %arg13[%c0_62, %c0_63] : memref<1x128xf32, #tpu.memory_space<vmem>>, vector<1x128xf32>
    %180 = vector.broadcast %179 : vector<1x128xf32> to vector<256x128xf32>
    %181 = arith.addf %178, %180 : vector<256x128xf32>
    %182 = arith.addf %132, %181 : vector<256x128xf32>
    %c0_64 = arith.constant 0 : index
    %c0_65 = arith.constant 0 : index
    %183 = vector.load %arg14[%c0_64, %c0_65] : memref<256x128xf32, #tpu.memory_space<vmem>>, vector<256x128xf32>
    tpu.vector_store %arg14[%c0_64, %c0_65], %182 {strides = array<i32>} : memref<256x128xf32, #tpu.memory_space<vmem>>, vector<256x128xf32>,
    return
  }
  func.func @transform_0(%arg0: i32) -> (i32, i32) {
    %c0_i32 = arith.constant 0 : i32
    %c0_i32_0 = arith.constant 0 : i32
    return %arg0, %c0_i32 : i32, i32
  }
  func.func @transform_1(%arg0: i32) -> (i32, i32) {
    %c0_i32 = arith.constant 0 : i32
    %c0_i32_0 = arith.constant 0 : i32
    %c0_i32_1 = arith.constant 0 : i32
    return %c0_i32, %c0_i32_0 : i32, i32
  }
  func.func @transform_2(%arg0: i32) -> (i32, i32) {
    %c0_i32 = arith.constant 0 : i32
    %c0_i32_0 = arith.constant 0 : i32
    %c0_i32_1 = arith.constant 0 : i32
    return %c0_i32, %c0_i32_0 : i32, i32
  }
  func.func @transform_3(%arg0: i32) -> (i32, i32) {
    %c0_i32 = arith.constant 0 : i32
    %c0_i32_0 = arith.constant 0 : i32
    %c0_i32_1 = arith.constant 0 : i32
    return %c0_i32, %c0_i32_0 : i32, i32
  }
  func.func @transform_4(%arg0: i32) -> (i32, i32) {
    %c0_i32 = arith.constant 0 : i32
    %c0_i32_0 = arith.constant 0 : i32
    %c0_i32_1 = arith.constant 0 : i32
    return %c0_i32, %c0_i32_0 : i32, i32
  }
  func.func @transform_5(%arg0: i32) -> (i32, i32) {
    %c0_i32 = arith.constant 0 : i32
    %c0_i32_0 = arith.constant 0 : i32
    %c0_i32_1 = arith.constant 0 : i32
    return %c0_i32, %c0_i32_0 : i32, i32
  }
  func.func @transform_6(%arg0: i32) -> (i32, i32) {
    %c0_i32 = arith.constant 0 : i32
    %c0_i32_0 = arith.constant 0 : i32
    %c0_i32_1 = arith.constant 0 : i32
    return %c0_i32, %c0_i32_0 : i32, i32
  }
  func.func @transform_7(%arg0: i32) -> (i32, i32) {
    %c0_i32 = arith.constant 0 : i32
    %c0_i32_0 = arith.constant 0 : i32
    %c0_i32_1 = arith.constant 0 : i32
    return %c0_i32, %c0_i32_0 : i32, i32
  }
  func.func @transform_8(%arg0: i32) -> (i32, i32) {
    %c0_i32 = arith.constant 0 : i32
    %c0_i32_0 = arith.constant 0 : i32
    %c0_i32_1 = arith.constant 0 : i32
    return %c0_i32, %c0_i32_0 : i32, i32
  }
  func.func @transform_9(%arg0: i32) -> (i32, i32) {
    %c0_i32 = arith.constant 0 : i32
    %c0_i32_0 = arith.constant 0 : i32
    %c0_i32_1 = arith.constant 0 : i32
    return %c0_i32, %c0_i32_0 : i32, i32
  }
  func.func @transform_10(%arg0: i32) -> (i32, i32) {
    %c0_i32 = arith.constant 0 : i32
    %c0_i32_0 = arith.constant 0 : i32
    %c0_i32_1 = arith.constant 0 : i32
    return %c0_i32, %c0_i32_0 : i32, i32
  }
  func.func @transform_11(%arg0: i32) -> (i32, i32) {
    %c0_i32 = arith.constant 0 : i32
    %c0_i32_0 = arith.constant 0 : i32
    %c0_i32_1 = arith.constant 0 : i32
    return %c0_i32, %c0_i32_0 : i32, i32
  }
  func.func @transform_12(%arg0: i32) -> (i32, i32) {
    %c0_i32 = arith.constant 0 : i32
    %c0_i32_0 = arith.constant 0 : i32
    %c0_i32_1 = arith.constant 0 : i32
    return %c0_i32, %c0_i32_0 : i32, i32
  }
  func.func @transform_13(%arg0: i32) -> (i32, i32) {
    %c0_i32 = arith.constant 0 : i32
    %c0_i32_0 = arith.constant 0 : i32
    return %arg0, %c0_i32 : i32, i32
  }
}

</mosaic_0001>

<bundles_post_ra>
// kernel: swin_transformer_block_twice_forward.4
= control target key start
LH: loop header
LB: loop body
LE: loop exit
PB: predicated region body
PF: predicated region fallthrough
CT: control target
= control target key end

     0   :  { %s11768_s25 = smov 0   ;;  %s17883_s0 = inlined_call_operand.vmem [shape: f32[512,128], index: 0, kind: input, shape index: {}]   ;;  %s17884_s1 = inlined_call_operand.vmem [shape: f32[128,128], index: 1, kind: input, shape index: {}]   ;;  %s17885_s2 = inlined_call_operand.vmem [shape: f32[1,128], index: 2, kind: input, shape index: {}]   ;;  %s17886_s3 = inlined_call_operand.vmem [shape: f32[1,128], index: 3, kind: input, shape index: {}]   ;;  %s17887_s4 = inlined_call_operand.vmem [shape: bf16[128,384], index: 4, kind: input, shape index: {}]   ;;  %s17888_s5 = inlined_call_operand.vmem [shape: bf16[128,128], index: 5, kind: input, shape index: {}]   ;;  %s17889_s6 = inlined_call_operand.vmem [shape: f32[1,128], index: 6, kind: input, shape index: {}]   ;;  %s17890_s7 = inlined_call_operand.vmem [shape: f32[1,128], index: 7, kind: input, shape index: {}]   ;;  %s17891_s8 = inlined_call_operand.vmem [shape: f32[1,128], index: 8, kind: input, shape index: {}]   ;;  %s17892_s9 = inlined_call_operand.vmem [shape: bf16[128,512], index: 9, kind: input, shape index: {}]   ;;  %s17893_s10 = inlined_call_operand.vmem [shape: f32[1,512], index: 10, kind: input, shape index: {}]   ;;  %s17894_s11 = inlined_call_operand.vmem [shape: bf16[512,128], index: 11, kind: input, shape index: {}]   ;;  %s17895_s12 = inlined_call_operand.vmem [shape: f32[1,128], index: 12, kind: input, shape index: {}]   ;;  %s17896_s13 = inlined_call_operand.vmem [shape: f32[512,128], index: 13, kind: output, shape index: {}]  }
   0x1 LB: > { %s8976_s26 = sadd.s32 4294967295, %s11692_s25   ;;  %p8980_p0 = scmp.ge.s32.totalorder %s11692_s25, 1  ;;  %s11692_s25 = sphi %s11768_s25, %s23_s25  }
   0x2   : > { %p388_p1 = scmp.lt.s32.totalorder %s11692_s25, 3 }
   0x4   : > { %p389_p2 = pnand %p8980_p0, %p388_p1 }
   0x6   : > { %392 = sbr.rel (%p389_p2) target bundleno = 4925 (0x133d), region = 72 }
   0xd   : > { %s8981_s27 = sshll.u32 %s8976_s26, 5  ;;  %v10621_v0 = vld [vmem:[%s17887_s4 + $0x4] ss:$12 sps:$4 sm:$0xff]   ;;  %v10623_v10 = vld [vmem:[%s17887_s4] ss:$12 sps:$4 sm:$0xff]   ;;  %v17897_v42 = vmov 0  }
   0xe   : > { %p433_p3 = scmp.lt.s32.totalorder %s8981_s27, 63  ;;  %1148 = vmatprep.subr.bf16.mxu0 %v10621_v0  ;;  %10289 = vmatprep.subr.bf16.mxu1 %v10621_v0  ;;  %v10624_v12 = vld [vmem:[%s17887_s4 + $0x1c] ss:$12 sps:$4 sm:$0xff]   ;;  %v10626_v14 = vld [vmem:[%s17887_s4 + $0x18] ss:$12 sps:$4 sm:$0xff]   ;;  %vm1566_vm0 = vcmask 261120  }
   0xf   : > { %1149 = vmatpush1.bf16.msra.mxu0 %v10623_v10  ;;  %10297 = vmatpush1.bf16.msra.mxu1 %v10623_v10  ;;  %v10627_v17 = vld [vmem:[%s17887_s4 + $0x34] ss:$12 sps:$4 sm:$0xff]   ;;  %v10629_v18 = vld [vmem:[%s17887_s4 + $0x30] ss:$12 sps:$4 sm:$0xff]   ;;  %v10630_v20 = vld [vmem:[%s17887_s4 + $0x4c] ss:$12 sps:$4 sm:$0xff]  }
  0x10   : > { %s19045_s27 = smov (!%p433_p3, %s8981_s27), 63  ;;  %1150 = vmatprep.subr.bf16.mxu0 %v10624_v12  ;;  %10290 = vmatprep.subr.bf16.mxu1 %v10624_v12  ;;  %v10632_v22 = vld [vmem:[%s17887_s4 + $0x48] ss:$12 sps:$4 sm:$0xff]   ;;  %v10633_v25 = vld [vmem:[%s17887_s4 + $0x64] ss:$12 sps:$4 sm:$0xff]   ;;  %s11695_s15 = smov 96  }
  0x11   : > { %s8982_s28 = sshll.u32 %s19045_s27, 3  ;;  %v10635_v26 = vld [vmem:[%s17887_s4 + $0x60] ss:$12 sps:$4 sm:$0xff]   ;;  %v10636_v29 = vld [vmem:[%s17887_s4 + $0x7c] ss:$12 sps:$4 sm:$0xff]   ;;  %1180 = vmatprep.mubr.bf16.mxu0 %v17897_v42  ;;  %1300 = vmatprep.mubr.bf16.mxu1 %v17897_v42  ;;  %s11696_s20 = smov 64  }
  0x12   : > { %s11784_s14 = scalar_lea.vmem %s17883_s0, %s8982_s28  ;;  %v10638_v30 = vld [vmem:[%s17887_s4 + $0x78] ss:$12 sps:$4 sm:$0xff]   ;;  %v10639_v33 = vld [vmem:[%s17887_s4 + $0x94] ss:$12 sps:$4 sm:$0xff]   ;;  %v10641_v35 = vld [vmem:[%s17887_s4 + $0x90] ss:$12 sps:$4 sm:$0xff]  }
  0x13   : > { %v11790_v1 = vld [vmem:[%s11784_s14] sm:$0xff]  ;;  %v11793_v2 = vld [vmem:[%s11784_s14 + $0x8] sm:$0xff]  ;;  %v11802_v5 = vld [vmem:[%s11784_s14 + $0x10] sm:$0xff]  ;;  %1151 = vmatpush1.bf16.msra.mxu0 %v10626_v14  ;;  %10298 = vmatpush1.bf16.msra.mxu1 %v10626_v14  ;;  %s11697_s22 = smov 32   ;;  %vm5567_vm1 = vcmask 523264   ;;  %vm5600_vm2 = vcmask 785408  }
  0x14   : > { %479 = vadd.xlane.f32.xlu0 %v11790_v1  ;;  %v576_v3 = vmul.f32 %v11790_v1, %v11790_v1  ;;  %v577_v4 = vmul.f32 %v11793_v2, %v11793_v2  ;;  %v11805_v6 = vld [vmem:[%s11784_s14 + $0x18] sm:$0xff]  ;;  %v578_v7 = vmul.f32 %v11802_v5, %v11802_v5  ;;  %v11814_v9 = vld [vmem:[%s11784_s14 + $0x20] sm:$0xff]  ;;  %v11820_v11 = vld [vmem:[%s11784_s14 + $0x28] sm:$0xff]  ;;  %1152 = vmatprep.subr.bf16.mxu0 %v10627_v17 }
  0x15   : > { %v579_v8 = vmul.f32 %v11805_v6, %v11805_v6  ;;  %v580_v13 = vmul.f32 %v11814_v9, %v11814_v9  ;;  %v581_v15 = vmul.f32 %v11820_v11, %v11820_v11  ;;  %v11835_v16 = vld [vmem:[%s11784_s14 + $0x30] sm:$0xff]  ;;  %v11844_v19 = vld [vmem:[%s11784_s14 + $0x38] sm:$0xff]  ;;  %10291 = vmatprep.subr.bf16.mxu1 %v10627_v17  ;;  %v11859_v24 = vld [vmem:[%s11784_s14 + $0x40] sm:$0xff] }
  0x16   : > { %608 = vadd.xlane.f32.xlu1 %v576_v3  ;;  %v582_v21 = vmul.f32 %v11835_v16, %v11835_v16  ;;  %v583_v23 = vmul.f32 %v11844_v19, %v11844_v19  ;;  %v11868_v27 = vld [vmem:[%s11784_s14 + $0x48] sm:$0xff]  ;;  %v584_v28 = vmul.f32 %v11859_v24, %v11859_v24  ;;  %v11883_v32 = vld [vmem:[%s11784_s14 + $0x50] sm:$0xff]  ;;  %v11889_v34 = vld [vmem:[%s11784_s14 + $0x58] sm:$0xff] }
  0x17   : > { %1153 = vmatpush1.bf16.msra.mxu0 %v10629_v18  ;;  %10299 = vmatpush1.bf16.msra.mxu1 %v10629_v18  ;;  %v585_v31 = vmul.f32 %v11868_v27, %v11868_v27  ;;  %v586_v36 = vmul.f32 %v11883_v32, %v11883_v32  ;;  %v10642_v37 = vld [vmem:[%s17887_s4 + $0xac] ss:$12 sps:$4 sm:$0xff]   ;;  %v10644_v38 = vld [vmem:[%s17887_s4 + $0xa8] ss:$12 sps:$4 sm:$0xff]   ;;  %v587_v39 = vmul.f32 %v11889_v34, %v11889_v34  ;;  %v11907_v40 = vld [vmem:[%s11784_s14 + $0x60] sm:$0xff] }
  0x18   : > { %481 = vadd.xlane.f32.xlu0 %v11793_v2  ;;  %1154 = vmatprep.subr.bf16.mxu0 %v10630_v20  ;;  %v11910_v41 = vld [vmem:[%s11784_s14 + $0x68] sm:$0xff]  ;;  %v588_v43 = vmul.f32 %v11907_v40, %v11907_v40  ;;  %v11921_v45 = vld [vmem:[%s11784_s14 + $0x70] sm:$0xff]  ;;  %v11924_v46 = vld [vmem:[%s11784_s14 + $0x78] sm:$0xff] }
  0x19   : > { %10292 = vmatprep.subr.bf16.mxu1 %v10630_v20  ;;  %v589_v44 = vmul.f32 %v11910_v41, %v11910_v41  ;;  %v590_v47 = vmul.f32 %v11921_v45, %v11921_v45  ;;  %v591_v48 = vmul.f32 %v11924_v46, %v11924_v46  ;;  %v11933_v49 = vld [vmem:[%s11784_s14 + $0x80] sm:$0xff]  ;;  %v11936_v50 = vld [vmem:[%s11784_s14 + $0x88] sm:$0xff]  ;;  %v11945_v53 = vld [vmem:[%s11784_s14 + $0x90] sm:$0xff] }
  0x1a   : > { %610 = vadd.xlane.f32.xlu1 %v577_v4  ;;  %v592_v51 = vmul.f32 %v11933_v49, %v11933_v49  ;;  %v593_v52 = vmul.f32 %v11936_v50, %v11936_v50  ;;  %v11948_v54 = vld [vmem:[%s11784_s14 + $0x98] sm:$0xff]  ;;  %v594_v55 = vmul.f32 %v11945_v53, %v11945_v53  ;;  %v11957_v57 = vld [vmem:[%s11784_s14 + $0xa0] sm:$0xff]  ;;  %v11960_v58 = vld [vmem:[%s11784_s14 + $0xa8] sm:$0xff] }
  0x1b   : > { %1155 = vmatpush1.bf16.msra.mxu0 %v10632_v22  ;;  %10300 = vmatpush1.bf16.msra.mxu1 %v10632_v22  ;;  %v595_v56 = vmul.f32 %v11948_v54, %v11948_v54  ;;  %v596_v59 = vmul.f32 %v11957_v57, %v11957_v57  ;;  %v597_v60 = vmul.f32 %v11960_v58, %v11960_v58  ;;  %v11969_v61 = vld [vmem:[%s11784_s14 + $0xb0] sm:$0xff]  ;;  %v11972_v62 = vld [vmem:[%s11784_s14 + $0xb8] sm:$0xff]  ;;  %v11981_v3 = vld [vmem:[%s11784_s14 + $0xc0] sm:$0xff] }
  0x1c   : > { %483 = vadd.xlane.f32.xlu0 %v11802_v5  ;;  %1156 = vmatprep.subr.bf16.mxu0 %v10633_v25  ;;  %v598_v63 = vmul.f32 %v11969_v61, %v11969_v61  ;;  %v599_v0 = vmul.f32 %v11972_v62, %v11972_v62  ;;  %v11984_v4 = vld [vmem:[%s11784_s14 + $0xc8] sm:$0xff]  ;;  %v11993_v10 = vld [vmem:[%s11784_s14 + $0xd0] sm:$0xff]  ;;  %v11996_v12 = vld [vmem:[%s11784_s14 + $0xd8] sm:$0xff] }
  0x1d   : > { %10293 = vmatprep.subr.bf16.mxu1 %v10633_v25  ;;  %v603_v14 = vmul.f32 %v11996_v12, %v11996_v12  ;;  %v12008_v17 = vld [vmem:[%s11784_s14 + $0xe8] sm:$0xff]  ;;  %v12020_v22 = vld [vmem:[%s11784_s14 + $0xf8] sm:$0xff] }
  0x1e   : > { %485 = vadd.xlane.f32.xlu1 %v11805_v6  ;;  %v605_v20 = vmul.f32 %v12008_v17, %v12008_v17  ;;  %v607_v25 = vmul.f32 %v12020_v22, %v12020_v22 }
  0x1f   : > { %1157 = vmatpush1.bf16.msra.mxu0 %v10635_v26  ;;  %10301 = vmatpush1.bf16.msra.mxu1 %v10635_v26  ;;  %v12031_v26 = vld [vmem:[%s17887_s4 + $0x8] ss:$12 sps:$4 sm:$0xff]  }
  0x20   : > { %612 = vadd.xlane.f32.xlu0 %v578_v7  ;;  %1158 = vmatprep.subr.bf16.mxu0 %v10636_v29  ;;  %v600_v7 = vmul.f32 %v11981_v3, %v11981_v3 }
  0x21   : > { %10294 = vmatprep.subr.bf16.mxu1 %v10636_v29 }
  0x22   : > { %614 = vadd.xlane.f32.xlu1 %v579_v8  ;;  %v601_v8 = vmul.f32 %v11984_v4, %v11984_v4 }
  0x23   : > { %1159 = vmatpush1.bf16.msra.mxu0 %v10638_v30  ;;  %10302 = vmatpush1.bf16.msra.mxu1 %v10638_v30 }
  0x24   : > { %487 = vadd.xlane.f32.xlu0 %v11814_v9  ;;  %1160 = vmatprep.subr.bf16.mxu0 %v10639_v33 }
  0x25   : > { %10295 = vmatprep.subr.bf16.mxu1 %v10639_v33 }
  0x26   : > { %489 = vadd.xlane.f32.xlu1 %v11820_v11 }
  0x27   : > { %1161 = vmatpush1.bf16.msra.mxu0 %v10641_v35  ;;  %10303 = vmatpush1.bf16.msra.mxu1 %v10641_v35 }
  0x28   : > { %616 = vadd.xlane.f32.xlu0 %v580_v13  ;;  %1162 = vmatprep.subr.bf16.mxu0 %v10642_v37  ;;  %v602_v13 = vmul.f32 %v11993_v10, %v11993_v10 }
  0x29   : > { %10296 = vmatprep.subr.bf16.mxu1 %v10642_v37 }
  0x2a   : > { %618 = vadd.xlane.f32.xlu1 %v581_v15  ;;  %v12005_v15 = vld [vmem:[%s11784_s14 + $0xe0] sm:$0xff] }
  0x2b   : > { %1163 = vmatpush1.bf16.msra.mxu0 %v10644_v38  ;;  %10304 = vmatpush1.bf16.msra.mxu1 %v10644_v38  ;;  %v604_v18 = vmul.f32 %v12005_v15, %v12005_v15 }
  0x2c   : > { %491 = vadd.xlane.f32.xlu0 %v11835_v16  ;;  %9681 = vmatprep.subr.bf16.mxu1 %v12031_v26 }
  0x2e   : > { %493 = vadd.xlane.f32.xlu1 %v11844_v19 }
  0x30   : > { %620 = vadd.xlane.f32.xlu0 %v582_v21  ;;  %v12017_v21 = vld [vmem:[%s11784_s14 + $0xf0] sm:$0xff] }
  0x32   : > { %622 = vadd.xlane.f32.xlu1 %v583_v23  ;;  %v606_v23 = vmul.f32 %v12017_v21, %v12017_v21 }
  0x34   : > { %495 = vadd.xlane.f32.xlu0 %v11859_v24 }
  0x36   : > { %497 = vadd.xlane.f32.xlu1 %v11868_v27 }
  0x38   : > { %624 = vadd.xlane.f32.xlu0 %v584_v28 }
  0x3a   : > { %626 = vadd.xlane.f32.xlu1 %v585_v31 }
  0x3c   : > { %499 = vadd.xlane.f32.xlu0 %v11883_v32 }
  0x3e   : > { %501 = vadd.xlane.f32.xlu1 %v11889_v34 }
  0x40   : > { %628 = vadd.xlane.f32.xlu0 %v586_v36 }
  0x42   : > { %630 = vadd.xlane.f32.xlu1 %v587_v39 }
  0x44   : > { %503 = vadd.xlane.f32.xlu0 %v11907_v40 }
  0x46   : > { %505 = vadd.xlane.f32.xlu1 %v11910_v41 }
  0x48   : > { %632 = vadd.xlane.f32.xlu0 %v588_v43 }
  0x4a   : > { %634 = vadd.xlane.f32.xlu1 %v589_v44 }
  0x4c   : > { %507 = vadd.xlane.f32.xlu0 %v11921_v45 }
  0x4e   : > { %509 = vadd.xlane.f32.xlu1 %v11924_v46 }
  0x50   : > { %636 = vadd.xlane.f32.xlu0 %v590_v47 }
  0x52   : > { %638 = vadd.xlane.f32.xlu1 %v591_v48 }
  0x54   : > { %511 = vadd.xlane.f32.xlu0 %v11933_v49 }
  0x56   : > { %513 = vadd.xlane.f32.xlu1 %v11936_v50 }
  0x58   : > { %640 = vadd.xlane.f32.xlu0 %v592_v51 }
  0x5a   : > { %642 = vadd.xlane.f32.xlu1 %v593_v52 }
  0x5c   : > { %515 = vadd.xlane.f32.xlu0 %v11945_v53 }
  0x5e   : > { %517 = vadd.xlane.f32.xlu1 %v11948_v54 }
  0x60   : > { %644 = vadd.xlane.f32.xlu0 %v594_v55 }
  0x62   : > { %646 = vadd.xlane.f32.xlu1 %v595_v56 }
  0x64   : > { %519 = vadd.xlane.f32.xlu0 %v11957_v57 }
  0x66   : > { %521 = vadd.xlane.f32.xlu1 %v11960_v58 }
  0x68   : > { %648 = vadd.xlane.f32.xlu0 %v596_v59 }
  0x6a   : > { %650 = vadd.xlane.f32.xlu1 %v597_v60 }
  0x6c   : > { %523 = vadd.xlane.f32.xlu0 %v11969_v61 }
  0x6e   : > { %525 = vadd.xlane.f32.xlu1 %v11972_v62 }
  0x70   : > { %652 = vadd.xlane.f32.xlu0 %v598_v63 }
  0x72   : > { %654 = vadd.xlane.f32.xlu1 %v599_v0 }
  0x74   : > { %527 = vadd.xlane.f32.xlu0 %v11981_v3 }
  0x76   : > { %529 = vadd.xlane.f32.xlu1 %v11984_v4 }
  0x78   : > { %656 = vadd.xlane.f32.xlu0 %v600_v7 }
  0x7a   : > { %658 = vadd.xlane.f32.xlu1 %v601_v8 }
  0x7c   : > { %531 = vadd.xlane.f32.xlu0 %v11993_v10 }
  0x7e   : > { %533 = vadd.xlane.f32.xlu1 %v11996_v12 }
  0x80   : > { %660 = vadd.xlane.f32.xlu0 %v602_v13 }
  0x82   : > { %662 = vadd.xlane.f32.xlu1 %v603_v14 }
  0x84   : > { %535 = vadd.xlane.f32.xlu0 %v12005_v15 }
  0x86   : > { %537 = vadd.xlane.f32.xlu1 %v12008_v17 }
  0x88   : > { %664 = vadd.xlane.f32.xlu0 %v604_v18 }
  0x8a   : > { %666 = vadd.xlane.f32.xlu1 %v605_v20 }
  0x8c   : > { %539 = vadd.xlane.f32.xlu0 %v12017_v21 }
  0x8e   : > { %541 = vadd.xlane.f32.xlu1 %v12020_v22 }
  0x90   : > { %668 = vadd.xlane.f32.xlu0 %v606_v23 }
  0x92   : > { %670 = vadd.xlane.f32.xlu1 %v607_v25 }
  0xa1   : > { %v480_v28 = vpop.xlane.xlu0 %479 }
  0xa2   : > { %v544_v29 = vmul.f32 0.0078125, %v480_v28 }
  0xa3   : > { %v609_v30 = vpop.xlane.xlu1 %608 }
  0xa4   : > { %v704_v31 = vmul.f32 %v544_v29, %v544_v29  ;;  %v672_v33 = vmul.f32 0.0078125, %v609_v30  ;;  %v768_v25 = vsub.f32 %v11790_v1, %v544_v29 }
  0xa5   : > { %v482_v35 = vpop.xlane.xlu0 %481 }
  0xa6   : > { %v736_v36 = vsub.f32 %v672_v33, %v704_v31  ;;  %v545_v37 = vmul.f32 0.0078125, %v482_v35 }
  0xa7   : > { %v611_v38 = vpop.xlane.xlu1 %610 }
  0xa8   : > { %v800_v39 = vadd.f32 1e-05, %v736_v36  ;;  %v705_v43 = vmul.f32 %v545_v37, %v545_v37  ;;  %v673_v44 = vmul.f32 0.0078125, %v611_v38  ;;  %v769_v1 = vsub.f32 %v11793_v2, %v545_v37 }
  0xa9   : > { %v484_v47 = vpop.xlane.xlu0 %483 }
  0xaa   : > { %10741 = vrsqrt.f32 %v800_v39  ;;  %v737_v48 = vsub.f32 %v673_v44, %v705_v43  ;;  %v546_v51 = vmul.f32 0.0078125, %v484_v47  ;;  %v12044_v43 = vld [vmem:[%s17885_s2] ss:$0 sm:$0xff] }
  0xab   : > { %v486_v52 = vpop.xlane.xlu1 %485 }
  0xac   : > { %v801_v55 = vadd.f32 1e-05, %v737_v48  ;;  %v706_v56 = vmul.f32 %v546_v51, %v546_v51  ;;  %v547_v59 = vmul.f32 0.0078125, %v486_v52 }
  0xad   : > { %v613_v60 = vpop.xlane.xlu0 %612 }
  0xae   : > { %10743 = vrsqrt.f32 %v801_v55  ;;  %v674_v63 = vmul.f32 0.0078125, %v613_v60  ;;  %v707_v7 = vmul.f32 %v547_v59, %v547_v59 }
  0xaf   : > { %v615_v0 = vpop.xlane.xlu1 %614 }
  0xb0   : > { %v738_v8 = vsub.f32 %v674_v63, %v706_v56  ;;  %v675_v13 = vmul.f32 0.0078125, %v615_v0 }
  0xb1   : > { %v488_v14 = vpop.xlane.xlu0 %487 }
  0xb2   : > { %v802_v18 = vadd.f32 1e-05, %v738_v8  ;;  %v739_v20 = vsub.f32 %v675_v13, %v707_v7  ;;  %v12034_v23 = vmul.f32 0.0078125, %v488_v14  ;;  %v12055_v8 = vld [vmem:[%s17886_s3] ss:$0 sm:$0xff] }
  0xb3   : > { %v490_v28 = vpop.xlane.xlu1 %489 }
  0xb4   : > { %v10742_v30 = vpop.eup %10741  ;;  %10745 = vrsqrt.f32 %v802_v18  ;;  %v803_v31 = vadd.f32 1e-05, %v739_v20  ;;  %v708_v33 = vmul.f32 %v12034_v23, %v12034_v23  ;;  %v12039_v35 = vmul.f32 0.0078125, %v490_v28 }
  0xb5   : > { %v617_v36 = vpop.xlane.xlu0 %616  ;;  %v864_v38 = vmul.f32 %v10742_v30, %v768_v25  ;;  %v770_v18 = vsub.f32 %v11802_v5, %v546_v51 }
  0xb6   : > { %10747 = vrsqrt.f32 %v803_v31  ;;  %v676_v39 = vmul.f32 0.0078125, %v617_v36  ;;  %v709_v47 = vmul.f32 %v12039_v35, %v12039_v35  ;;  %v771_v36 = vsub.f32 %v11805_v6, %v547_v59 }
  0xb7   : > { %v619_v29 = vpop.xlane.xlu1 %618  ;;  %v902_v60 = vmul.f32 %v12044_v43, %v864_v38 }
  0xb8   : > { %v10744_v44 = vpop.eup %10743  ;;  %v740_v48 = vsub.f32 %v676_v39, %v708_v33  ;;  %v677_v52 = vmul.f32 0.0078125, %v619_v29 }
  0xb9   : > { %v492_v55 = vpop.xlane.xlu0 %491  ;;  %v865_v56 = vmul.f32 %v10744_v44, %v769_v1  ;;  %v940_v28 = vadd.f32 %v12055_v8, %v902_v60 }
  0xba   : > { %v804_v63 = vadd.f32 1e-05, %v740_v48  ;;  %v741_v0 = vsub.f32 %v677_v52, %v709_v47  ;;  %v12050_v7 = vmul.f32 0.0078125, %v492_v55 }
  0xbb   : > { %v494_v2 = vpop.xlane.xlu1 %493  ;;  %v903_v37 = vmul.f32 %v12044_v43, %v865_v56 }
  0xbc   : > { %10749 = vrsqrt.f32 %v804_v63  ;;  %v805_v13 = vadd.f32 1e-05, %v741_v0  ;;  %v710_v14 = vmul.f32 %v12050_v7, %v12050_v7  ;;  %v12061_v20 = vmul.f32 0.0078125, %v494_v2 }
  0xbd   : > { %v621_v25 = vpop.xlane.xlu0 %620  ;;  %v941_v30 = vadd.f32 %v12055_v8, %v903_v37  ;;  %v772_v2 = vsub.f32 %v11814_v9, %v12034_v23 }
  0xbe   : > { %v10746_v31 = vpop.eup %10745  ;;  %10751 = vrsqrt.f32 %v805_v13  ;;  %v678_v33 = vmul.f32 0.0078125, %v621_v25  ;;  %v711_v5 = vmul.f32 %v12061_v20, %v12061_v20 }
  0xbf   : > { %v623_v38 = vpop.xlane.xlu1 %622  ;;  %v12066_v39 = vpack.c.bf16 %v941_v30, %v940_v28  ;;  %v866_v1 = vmul.f32 %v10746_v31, %v770_v18  ;;  %v773_v30 = vsub.f32 %v11820_v11, %v12039_v35 }
  0xc0   : > { %v10748_v29 = vpop.eup %10747  ;;  %v742_v51 = vsub.f32 %v678_v33, %v710_v14  ;;  %v679_v44 = vmul.f32 0.0078125, %v623_v38 }
  0xc1   : > { %v496_v47 = vpop.xlane.xlu0 %495  ;;  %1181 = vmatmul.mubr.bf16.vlgmr.msra.gmra.mrb[0].mxu0 %v12066_v39  ;;  %v867_v48 = vmul.f32 %v10748_v29, %v771_v36  ;;  %v904_v52 = vmul.f32 %v12044_v43, %v866_v1 }
  0xc2   : > { %v806_v55 = vadd.f32 1e-05, %v742_v51  ;;  %v743_v56 = vsub.f32 %v679_v44, %v711_v5  ;;  %v12072_v60 = vmul.f32 0.0078125, %v496_v47  ;;  %1190 = vmatprep.mubr.bf16.mxu0 %v17897_v42 }
  0xc3   : > { %v498_v6 = vpop.xlane.xlu1 %497  ;;  %v905_v59 = vmul.f32 %v12044_v43, %v867_v48  ;;  %v942_v14 = vadd.f32 %v12055_v8, %v904_v52 }
  0xc4   : > { %10753 = vrsqrt.f32 %v806_v55  ;;  %v807_v63 = vadd.f32 1e-05, %v743_v56  ;;  %v712_v0 = vmul.f32 %v12072_v60, %v12072_v60  ;;  %v12080_v37 = vmul.f32 0.0078125, %v498_v6 }
  0xc5   : > { %v625_v13 = vpop.xlane.xlu0 %624  ;;  %v943_v18 = vadd.f32 %v12055_v8, %v905_v59  ;;  %v774_v56 = vsub.f32 %v11835_v16, %v12050_v7 }
  0xc6   : > { %v10750_v25 = vpop.eup %10749  ;;  %10755 = vrsqrt.f32 %v807_v63  ;;  %v680_v28 = vmul.f32 0.0078125, %v625_v13  ;;  %v713_v9 = vmul.f32 %v12080_v37, %v12080_v37 }
  0xc7   : > { %v627_v31 = vpop.xlane.xlu1 %626  ;;  %v12086_v33 = vpack.c.bf16 %v943_v18, %v942_v14  ;;  %v868_v36 = vmul.f32 %v10750_v25, %v772_v2  ;;  %v775_v14 = vsub.f32 %v11844_v19, %v12061_v20 }
  0xc8   : > { %v10752_v38 = vpop.eup %10751  ;;  %v744_v23 = vsub.f32 %v680_v28, %v712_v0  ;;  %v681_v1 = vmul.f32 0.0078125, %v627_v31 }
  0xc9   : > { %v500_v29 = vpop.xlane.xlu0 %499  ;;  %1191 = vmatmul.mubr.bf16.gmra.mrb[4].mxu0 %v12086_v33  ;;  %v869_v5 = vmul.f32 %v10752_v38, %v773_v30  ;;  %v906_v51 = vmul.f32 %v12044_v43, %v868_v36 }
  0xca   : > { %v808_v44 = vadd.f32 1e-05, %v744_v23  ;;  %v745_v47 = vsub.f32 %v681_v1, %v713_v9  ;;  %v12092_v48 = vmul.f32 0.0078125, %v500_v29  ;;  %1200 = vmatprep.mubr.bf16.mxu0 %v17897_v42 }
  0xcb   : > { %v502_v11 = vpop.xlane.xlu1 %501  ;;  %v907_v35 = vmul.f32 %v12044_v43, %v869_v5  ;;  %v944_v63 = vadd.f32 %v12055_v8, %v906_v51 }
  0xcc   : > { %10757 = vrsqrt.f32 %v808_v44  ;;  %v809_v52 = vadd.f32 1e-05, %v745_v47  ;;  %v714_v55 = vmul.f32 %v12092_v48, %v12092_v48  ;;  %v12100_v6 = vmul.f32 0.0078125, %v502_v11 }
  0xcd   : > { %v629_v59 = vpop.xlane.xlu0 %628  ;;  %v945_v0 = vadd.f32 %v12055_v8, %v907_v35  ;;  %v776_v44 = vsub.f32 %v11859_v24, %v12072_v60 }
  0xce   : > { %v10754_v2 = vpop.eup %10753  ;;  %10759 = vrsqrt.f32 %v809_v52  ;;  %v682_v13 = vmul.f32 0.0078125, %v629_v59  ;;  %v715_v16 = vmul.f32 %v12100_v6, %v12100_v6  ;;  %v777_v59 = vsub.f32 %v11868_v27, %v12080_v37 }
  0xcf   : > { %v631_v18 = vpop.xlane.xlu1 %630  ;;  %v12106_v25 = vpack.c.bf16 %v945_v0, %v944_v63  ;;  %v870_v28 = vmul.f32 %v10754_v2, %v774_v56 }
  0xd0   : > { %v10756_v30 = vpop.eup %10755  ;;  %v746_v7 = vsub.f32 %v682_v13, %v714_v55  ;;  %v683_v31 = vmul.f32 0.0078125, %v631_v18 }
  0xd1   : > { %v504_v36 = vpop.xlane.xlu0 %503  ;;  %1201 = vmatmul.mubr.bf16.gmra.mrb[8].mxu0 %v12106_v25  ;;  %v871_v38 = vmul.f32 %v10756_v30, %v775_v14  ;;  %v908_v9 = vmul.f32 %v12044_v43, %v870_v28 }
  0xd2   : > { %v810_v23 = vadd.f32 1e-05, %v746_v7  ;;  %v747_v1 = vsub.f32 %v683_v31, %v715_v16  ;;  %v12112_v29 = vmul.f32 0.0078125, %v504_v36  ;;  %1210 = vmatprep.mubr.bf16.mxu0 %v17897_v42 }
  0xd3   : > { %v506_v19 = vpop.xlane.xlu1 %505  ;;  %v909_v20 = vmul.f32 %v12044_v43, %v871_v38  ;;  %v946_v35 = vadd.f32 %v12055_v8, %v908_v9  ;;  %v778_v9 = vsub.f32 %v11883_v32, %v12092_v48 }
  0xd4   : > { %10761 = vrsqrt.f32 %v810_v23  ;;  %v811_v5 = vadd.f32 1e-05, %v747_v1  ;;  %v716_v51 = vmul.f32 %v12112_v29, %v12112_v29  ;;  %v12120_v47 = vmul.f32 0.0078125, %v506_v19 }
  0xd5   : > { %v633_v11 = vpop.xlane.xlu0 %632  ;;  %v947_v52 = vadd.f32 %v12055_v8, %v909_v20 }
  0xd6   : > { %v10758_v55 = vpop.eup %10757  ;;  %10763 = vrsqrt.f32 %v811_v5  ;;  %v684_v56 = vmul.f32 0.0078125, %v633_v11  ;;  %v717_v24 = vmul.f32 %v12120_v47, %v12120_v47 }
  0xd7   : > { %v635_v63 = vpop.xlane.xlu1 %634  ;;  %v12126_v0 = vpack.c.bf16 %v947_v52, %v946_v35  ;;  %v872_v2 = vmul.f32 %v10758_v55, %v776_v44  ;;  %v779_v44 = vsub.f32 %v11889_v34, %v12100_v6 }
  0xd8   : > { %v10760_v13 = vpop.eup %10759  ;;  %v748_v60 = vsub.f32 %v684_v56, %v716_v51  ;;  %v685_v14 = vmul.f32 0.0078125, %v635_v63 }
  0xd9   : > { %v508_v18 = vpop.xlane.xlu0 %507  ;;  %1211 = vmatmul.mubr.bf16.gmra.mrb[12].mxu0 %v12126_v0  ;;  %v873_v28 = vmul.f32 %v10760_v13, %v777_v59  ;;  %v910_v30 = vmul.f32 %v12044_v43, %v872_v2 }
  0xda   : > { %v812_v16 = vadd.f32 1e-05, %v748_v60  ;;  %v749_v7 = vsub.f32 %v685_v14, %v717_v24  ;;  %v12132_v31 = vmul.f32 0.0078125, %v508_v18  ;;  %1220 = vmatprep.mubr.bf16.mxu0 %v17897_v42 }
  0xdb   : > { %v510_v27 = vpop.xlane.xlu1 %509  ;;  %v911_v37 = vmul.f32 %v12044_v43, %v873_v28  ;;  %v948_v19 = vadd.f32 %v12055_v8, %v910_v30  ;;  %v780_v28 = vsub.f32 %v11907_v40, %v12112_v29 }
  0xdc   : > { %10765 = vrsqrt.f32 %v812_v16  ;;  %v813_v36 = vadd.f32 1e-05, %v749_v7  ;;  %v718_v38 = vmul.f32 %v12132_v31, %v12132_v31  ;;  %v12140_v23 = vmul.f32 0.0078125, %v510_v27 }
  0xdd   : > { %v637_v1 = vpop.xlane.xlu0 %636  ;;  %v949_v20 = vadd.f32 %v12055_v8, %v911_v37 }
  0xde   : > { %v10762_v5 = vpop.eup %10761  ;;  %10767 = vrsqrt.f32 %v813_v36  ;;  %v686_v51 = vmul.f32 0.0078125, %v637_v1  ;;  %v719_v32 = vmul.f32 %v12140_v23, %v12140_v23 }
  0xdf   : > { %v639_v11 = vpop.xlane.xlu1 %638  ;;  %v12146_v35 = vpack.c.bf16 %v949_v20, %v948_v19  ;;  %v874_v52 = vmul.f32 %v10762_v5, %v778_v9 }
  0xe0   : > { %v10764_v55 = vpop.eup %10763  ;;  %v750_v48 = vsub.f32 %v686_v51, %v718_v38  ;;  %v687_v56 = vmul.f32 0.0078125, %v639_v11  ;;  %v781_v38 = vsub.f32 %v11910_v41, %v12120_v47 }
  0xe1   : > { %v512_v59 = vpop.xlane.xlu0 %511  ;;  %1221 = vmatmul.mubr.bf16.gmra.mrb[16].mxu0 %v12146_v35  ;;  %v875_v63 = vmul.f32 %v10764_v55, %v779_v44  ;;  %v912_v2 = vmul.f32 %v12044_v43, %v874_v52 }
  0xe2   : > { %v814_v13 = vadd.f32 1e-05, %v750_v48  ;;  %v751_v24 = vsub.f32 %v687_v56, %v719_v32  ;;  %v12152_v60 = vmul.f32 0.0078125, %v512_v59  ;;  %1230 = vmatprep.mubr.bf16.mxu0 %v17897_v42  ;;  %v782_v59 = vsub.f32 %v11921_v45, %v12132_v31 }
  0xe3   : > { %v514_v34 = vpop.xlane.xlu1 %513  ;;  %v913_v6 = vmul.f32 %v12044_v43, %v875_v63  ;;  %v950_v7 = vadd.f32 %v12055_v8, %v912_v2 }
  0xe4   : > { %10769 = vrsqrt.f32 %v814_v13  ;;  %v815_v14 = vadd.f32 1e-05, %v751_v24  ;;  %v720_v18 = vmul.f32 %v12152_v60, %v12152_v60  ;;  %v12160_v30 = vmul.f32 0.0078125, %v514_v34 }
  0xe5   : > { %v641_v16 = vpop.xlane.xlu0 %640  ;;  %v951_v27 = vadd.f32 %v12055_v8, %v913_v6 }
  0xe6   : > { %v10766_v37 = vpop.eup %10765  ;;  %10771 = vrsqrt.f32 %v815_v14  ;;  %v688_v36 = vmul.f32 0.0078125, %v641_v16  ;;  %v721_v40 = vmul.f32 %v12160_v30, %v12160_v30  ;;  %v783_v14 = vsub.f32 %v11924_v46, %v12140_v23 }
  0xe7   : > { %v643_v9 = vpop.xlane.xlu1 %642  ;;  %v12166_v1 = vpack.c.bf16 %v951_v27, %v950_v7  ;;  %v876_v19 = vmul.f32 %v10766_v37, %v780_v28 }
  0xe8   : > { %v10768_v20 = vpop.eup %10767  ;;  %v752_v29 = vsub.f32 %v688_v36, %v720_v18  ;;  %v689_v5 = vmul.f32 0.0078125, %v643_v9 }
  0xe9   : > { %v516_v51 = vpop.xlane.xlu0 %515  ;;  %1231 = vmatmul.mubr.bf16.gmra.mrb[20].mxu0 %v12166_v1  ;;  %v877_v44 = vmul.f32 %v10768_v20, %v781_v38  ;;  %v914_v11 = vmul.f32 %v12044_v43, %v876_v19 }
  0xea   : > { %v816_v52 = vadd.f32 1e-05, %v752_v29  ;;  %v753_v55 = vsub.f32 %v689_v5, %v721_v40  ;;  %v12172_v32 = vmul.f32 0.0078125, %v516_v51  ;;  %1240 = vmatprep.mubr.bf16.mxu0 %v17897_v42  ;;  %v784_v5 = vsub.f32 %v11933_v49, %v12152_v60 }
  0xeb   : > { %v518_v41 = vpop.xlane.xlu1 %517  ;;  %v915_v47 = vmul.f32 %v12044_v43, %v877_v44  ;;  %v952_v13 = vadd.f32 %v12055_v8, %v914_v11 }
  0xec   : > { %10773 = vrsqrt.f32 %v816_v52  ;;  %v817_v48 = vadd.f32 1e-05, %v753_v55  ;;  %v722_v56 = vmul.f32 %v12172_v32, %v12172_v32  ;;  %v12180_v63 = vmul.f32 0.0078125, %v518_v41 }
  0xed   : > { %v645_v2 = vpop.xlane.xlu0 %644  ;;  %v953_v24 = vadd.f32 %v12055_v8, %v915_v47  ;;  %v785_v47 = vsub.f32 %v11936_v50, %v12160_v30 }
  0xee   : > { %v10770_v34 = vpop.eup %10769  ;;  %10775 = vrsqrt.f32 %v817_v48  ;;  %v690_v6 = vmul.f32 0.0078125, %v645_v2  ;;  %v723_v45 = vmul.f32 %v12180_v63, %v12180_v63 }
  0xef   : > { %v647_v18 = vpop.xlane.xlu1 %646  ;;  %v12186_v28 = vpack.c.bf16 %v953_v24, %v952_v13  ;;  %v878_v16 = vmul.f32 %v10770_v34, %v782_v59 }
  0xf0   : > { %v10772_v7 = vpop.eup %10771  ;;  %v754_v31 = vsub.f32 %v690_v6, %v722_v56  ;;  %v691_v27 = vmul.f32 0.0078125, %v647_v18 }
  0xf1   : > { %v520_v37 = vpop.xlane.xlu0 %519  ;;  %1241 = vmatmul.mubr.bf16.gmra.mrb[24].mxu0 %v12186_v28  ;;  %v879_v36 = vmul.f32 %v10772_v7, %v783_v14  ;;  %v916_v38 = vmul.f32 %v12044_v43, %v878_v16 }
  0xf2   : > { %v818_v9 = vadd.f32 1e-05, %v754_v31  ;;  %v755_v19 = vsub.f32 %v691_v27, %v723_v45  ;;  %v12192_v20 = vmul.f32 0.0078125, %v520_v37  ;;  %1250 = vmatprep.mubr.bf16.mxu0 %v17897_v42  ;;  %v786_v31 = vsub.f32 %v11945_v53, %v12172_v32 }
  0xf3   : > { %v522_v46 = vpop.xlane.xlu1 %521  ;;  %v917_v23 = vmul.f32 %v12044_v43, %v879_v36  ;;  %v954_v11 = vadd.f32 %v12055_v8, %v916_v38 }
  0xf4   : > { %10777 = vrsqrt.f32 %v818_v9  ;;  %v819_v40 = vadd.f32 1e-05, %v755_v19  ;;  %v724_v29 = vmul.f32 %v12192_v20, %v12192_v20  ;;  %v12200_v51 = vmul.f32 0.0078125, %v522_v46 }
  0xf5   : > { %v649_v44 = vpop.xlane.xlu0 %648  ;;  %v955_v52 = vadd.f32 %v12055_v8, %v917_v23  ;;  %v787_v46 = vsub.f32 %v11948_v54, %v12180_v63 }
  0xf6   : > { %v10774_v55 = vpop.eup %10773  ;;  %10779 = vrsqrt.f32 %v819_v40  ;;  %v692_v41 = vmul.f32 0.0078125, %v649_v44  ;;  %v725_v49 = vmul.f32 %v12200_v51, %v12200_v51 }
  0xf7   : > { %v651_v48 = vpop.xlane.xlu1 %650  ;;  %v12206_v56 = vpack.c.bf16 %v955_v52, %v954_v11  ;;  %v880_v59 = vmul.f32 %v10774_v55, %v784_v5 }
  0xf8   : > { %v10776_v2 = vpop.eup %10775  ;;  %v756_v60 = vsub.f32 %v692_v41, %v724_v29  ;;  %v693_v13 = vmul.f32 0.0078125, %v651_v48 }
  0xf9   : > { %v524_v24 = vpop.xlane.xlu0 %523  ;;  %1251 = vmatmul.mubr.bf16.gmra.mrb[28].mxu0 %v12206_v56  ;;  %v881_v34 = vmul.f32 %v10776_v2, %v785_v47  ;;  %v918_v6 = vmul.f32 %v12044_v43, %v880_v59 }
  0xfa   : > { %v820_v14 = vadd.f32 1e-05, %v756_v60  ;;  %v757_v18 = vsub.f32 %v693_v13, %v725_v49  ;;  %v12212_v16 = vmul.f32 0.0078125, %v524_v24  ;;  %1260 = vmatprep.mubr.bf16.mxu0 %v17897_v42  ;;  %v788_v49 = vsub.f32 %v11957_v57, %v12192_v20 }
  0xfb   : > { %v526_v50 = vpop.xlane.xlu1 %525  ;;  %v919_v30 = vmul.f32 %v12044_v43, %v881_v34  ;;  %v956_v36 = vadd.f32 %v12055_v8, %v918_v6 }
  0xfc   : > { %10781 = vrsqrt.f32 %v820_v14  ;;  %v821_v7 = vadd.f32 1e-05, %v757_v18  ;;  %v726_v45 = vmul.f32 %v12212_v16, %v12212_v16  ;;  %v12220_v27 = vmul.f32 0.0078125, %v526_v50 }
  0xfd   : > { %v653_v37 = vpop.xlane.xlu0 %652  ;;  %v957_v38 = vadd.f32 %v12055_v8, %v919_v30  ;;  %v789_v18 = vsub.f32 %v11960_v58, %v12200_v51 }
  0xfe   : > { %v10778_v9 = vpop.eup %10777  ;;  %10783 = vrsqrt.f32 %v821_v7  ;;  %v694_v19 = vmul.f32 0.0078125, %v653_v37  ;;  %v727_v53 = vmul.f32 %v12220_v27, %v12220_v27 }
  0xff   : > { %v655_v23 = vpop.xlane.xlu1 %654  ;;  %v12226_v40 = vpack.c.bf16 %v957_v38, %v956_v36  ;;  %v882_v29 = vmul.f32 %v10778_v9, %v786_v31 }
 0x100   : > { %v10780_v5 = vpop.eup %10779  ;;  %v758_v32 = vsub.f32 %v694_v19, %v726_v45  ;;  %v695_v44 = vmul.f32 0.0078125, %v655_v23 }
 0x101   : > { %1261 = vmatmul.mubr.bf16.gmra.mrb[32].mxu0 %v12226_v40  ;;  %v528_v11 = vpop.xlane.xlu0 %527  ;;  %v883_v52 = vmul.f32 %v10780_v5, %v787_v46  ;;  %v920_v55 = vmul.f32 %v12044_v43, %v882_v29  ;;  %v790_v5 = vsub.f32 %v11969_v61, %v12212_v16 }
 0x102   : > { %v822_v41 = vadd.f32 1e-05, %v758_v32  ;;  %v759_v47 = vsub.f32 %v695_v44, %v727_v53  ;;  %v12232_v48 = vmul.f32 0.0078125, %v528_v11  ;;  %1270 = vmatprep.mubr.bf16.mxu0 %v17897_v42 }
 0x103   : > { %v530_v54 = vpop.xlane.xlu1 %529  ;;  %v921_v63 = vmul.f32 %v12044_v43, %v883_v52  ;;  %v958_v24 = vadd.f32 %v12055_v8, %v920_v55 }
 0x104   : > { %10785 = vrsqrt.f32 %v822_v41  ;;  %v823_v59 = vadd.f32 1e-05, %v759_v47  ;;  %v728_v2 = vmul.f32 %v12232_v48, %v12232_v48  ;;  %v12240_v60 = vmul.f32 0.0078125, %v530_v54 }
 0x105   : > { %v657_v13 = vpop.xlane.xlu0 %656  ;;  %v959_v34 = vadd.f32 %v12055_v8, %v921_v63  ;;  %v791_v41 = vsub.f32 %v11972_v62, %v12220_v27 }
 0x106   : > { %v10782_v6 = vpop.eup %10781  ;;  %10787 = vrsqrt.f32 %v823_v59  ;;  %v696_v14 = vmul.f32 0.0078125, %v657_v13  ;;  %v729_v57 = vmul.f32 %v12240_v60, %v12240_v60 }
 0x107   : > { %v659_v50 = vpop.xlane.xlu1 %658  ;;  %v12246_v30 = vpack.c.bf16 %v959_v34, %v958_v24  ;;  %v884_v7 = vmul.f32 %v10782_v6, %v788_v49 }
 0x108   : > { %v10784_v45 = vpop.eup %10783  ;;  %v760_v20 = vsub.f32 %v696_v14, %v728_v2  ;;  %v697_v31 = vmul.f32 0.0078125, %v659_v50 }
 0x109   : > { %1271 = vmatmul.mubr.bf16.gmra.mrb[36].mxu0 %v12246_v30  ;;  %v532_v37 = vpop.xlane.xlu0 %531  ;;  %v885_v36 = vmul.f32 %v10784_v45, %v789_v18  ;;  %v922_v38 = vmul.f32 %v12044_v43, %v884_v7  ;;  %v792_v7 = vsub.f32 %v11981_v3, %v12232_v48 }
 0x10a   : > { %v824_v9 = vadd.f32 1e-05, %v760_v20  ;;  %v761_v19 = vsub.f32 %v697_v31, %v729_v57  ;;  %v12252_v46 = vmul.f32 0.0078125, %v532_v37  ;;  %1280 = vmatprep.mubr.bf16.mxu0 %v17897_v42 }
 0x10b   : > { %v534_v58 = vpop.xlane.xlu1 %533  ;;  %v923_v51 = vmul.f32 %v12044_v43, %v885_v36  ;;  %v960_v44 = vadd.f32 %v12055_v8, %v922_v38  ;;  %v793_v38 = vsub.f32 %v11984_v4, %v12240_v60 }
 0x10c   : > { %10789 = vrsqrt.f32 %v824_v9  ;;  %v825_v23 = vadd.f32 1e-05, %v761_v19  ;;  %v730_v29 = vmul.f32 %v12252_v46, %v12252_v46  ;;  %v12260_v53 = vmul.f32 0.0078125, %v534_v58 }
 0x10d   : > { %v661_v32 = vpop.xlane.xlu0 %660  ;;  %v961_v11 = vadd.f32 %v12055_v8, %v923_v51 }
 0x10e   : > { %v10786_v52 = vpop.eup %10785  ;;  %10791 = vrsqrt.f32 %v825_v23  ;;  %v698_v55 = vmul.f32 0.0078125, %v661_v32  ;;  %v731_v61 = vmul.f32 %v12260_v53, %v12260_v53 }
 0x10f   : > { %v663_v47 = vpop.xlane.xlu1 %662  ;;  %v12266_v54 = vpack.c.bf16 %v961_v11, %v960_v44  ;;  %v886_v63 = vmul.f32 %v10786_v52, %v790_v5 }
 0x110   : > { %v10788_v59 = vpop.eup %10787  ;;  %v762_v16 = vsub.f32 %v698_v55, %v730_v29  ;;  %v699_v2 = vmul.f32 0.0078125, %v663_v47  ;;  %v794_v47 = vsub.f32 %v11993_v10, %v12252_v46 }
 0x111   : > { %1281 = vmatmul.mubr.bf16.gmra.mrb[40].mxu0 %v12266_v54  ;;  %v536_v49 = vpop.xlane.xlu0 %535  ;;  %v887_v13 = vmul.f32 %v10788_v59, %v791_v41  ;;  %v924_v24 = vmul.f32 %v12044_v43, %v886_v63 }
 0x112   : > { %v826_v34 = vadd.f32 1e-05, %v762_v16  ;;  %v763_v6 = vsub.f32 %v699_v2, %v731_v61  ;;  %v12272_v14 = vmul.f32 0.0078125, %v536_v49  ;;  %1290 = vmatprep.mubr.bf16.mxu0 %v17897_v42 }
 0x113   : > { %v538_v62 = vpop.xlane.xlu1 %537  ;;  %v925_v27 = vmul.f32 %v12044_v43, %v887_v13  ;;  %v962_v20 = vadd.f32 %v12055_v8, %v924_v24  ;;  %v795_v13 = vsub.f32 %v11996_v12, %v12260_v53  ;;  %v10647_v53 = vld [vmem:[%s17887_s4 + $0x38] ss:$12 sps:$4 sm:$0xff]  }
 0x114   : > { %10793 = vrsqrt.f32 %v826_v34  ;;  %v827_v18 = vadd.f32 1e-05, %v763_v6  ;;  %v732_v50 = vmul.f32 %v12272_v14, %v12272_v14  ;;  %v12280_v45 = vmul.f32 0.0078125, %v538_v62  ;;  %v10646_v6 = vld [vmem:[%s17887_s4 + $0x20] ss:$12 sps:$4 sm:$0xff]  }
 0x115   : > { %v665_v57 = vpop.xlane.xlu0 %664  ;;  %v963_v31 = vadd.f32 %v12055_v8, %v925_v27 }
 0x116   : > { %v10790_v37 = vpop.eup %10789  ;;  %10795 = vrsqrt.f32 %v827_v18  ;;  %v700_v36 = vmul.f32 0.0078125, %v665_v57  ;;  %v733_v3 = vmul.f32 %v12280_v45, %v12280_v45 }
 0x117   : > { %v667_v9 = vpop.xlane.xlu1 %666  ;;  %v12286_v19 = vpack.c.bf16 %v963_v31, %v962_v20  ;;  %v888_v58 = vmul.f32 %v10790_v37, %v792_v7  ;;  %v796_v37 = vsub.f32 %v12005_v15, %v12272_v14 }
 0x118   : > { %v10792_v51 = vpop.eup %10791  ;;  %v764_v48 = vsub.f32 %v700_v36, %v732_v50  ;;  %v701_v23 = vmul.f32 0.0078125, %v667_v9 }
 0x119   : > { %1291 = vmatmul.mubr.bf16.gmra.mrb[44].mxu0 %v12286_v19  ;;  %v540_v29 = vpop.xlane.xlu0 %539  ;;  %v889_v5 = vmul.f32 %v10792_v51, %v793_v38  ;;  %v926_v32 = vmul.f32 %v12044_v43, %v888_v58  ;;  %v10648_v51 = vld [vmem:[%s17887_s4 + $0x50] ss:$12 sps:$4 sm:$0xff]  }
 0x11a   : > { %v828_v44 = vadd.f32 1e-05, %v764_v48  ;;  %v765_v11 = vsub.f32 %v701_v23, %v733_v3  ;;  %v12292_v52 = vmul.f32 0.0078125, %v540_v29 }
 0x11b   : > { %v542_v4 = vpop.xlane.xlu1 %541  ;;  %v927_v60 = vmul.f32 %v12044_v43, %v889_v5  ;;  %v964_v61 = vadd.f32 %v12055_v8, %v926_v32 }
 0x11c   : > { %10797 = vrsqrt.f32 %v828_v44  ;;  %v829_v55 = vadd.f32 1e-05, %v765_v11  ;;  %v734_v41 = vmul.f32 %v12292_v52, %v12292_v52  ;;  %v575_v63 = vmul.f32 0.0078125, %v542_v4  ;;  %v10650_v4 = vld [vmem:[%s17887_s4 + $0x80] ss:$12 sps:$4 sm:$0xff]  }
 0x11d   : > { %v669_v59 = vpop.xlane.xlu0 %668  ;;  %v965_v16 = vadd.f32 %v12055_v8, %v927_v60 }
 0x11e   : > { %v10794_v2 = vpop.eup %10793  ;;  %10799 = vrsqrt.f32 %v829_v55  ;;  %v702_v49 = vmul.f32 0.0078125, %v669_v59  ;;  %v735_v62 = vmul.f32 %v575_v63, %v575_v63  ;;  %v799_v44 = vsub.f32 %v12020_v22, %v575_v63  ;;  %v10651_v22 = vld [vmem:[%s17887_s4 + $0x98] ss:$12 sps:$4 sm:$0xff]  }
 0x11f   : > { %v671_v24 = vpop.xlane.xlu1 %670  ;;  %v12303_v34 = vpack.c.bf16 %v965_v16, %v964_v61  ;;  %v890_v10 = vmul.f32 %v10794_v2, %v794_v47  ;;  %v10652_v61 = vld [vmem:[%s17887_s4 + $0xb0] ss:$12 sps:$4 sm:$0xff]  }
 0x120   : > { %v10796_v46 = vpop.eup %10795  ;;  %v766_v27 = vsub.f32 %v702_v49, %v734_v41  ;;  %v703_v18 = vmul.f32 0.0078125, %v671_v24 }
 0x121   : > { %1301 = vmatmul.mubr.bf16.vlgmr.msra.gmra.mrb[0].mxu1 %v12303_v34  ;;  %v891_v50 = vmul.f32 %v10796_v46, %v795_v13  ;;  %v928_v7 = vmul.f32 %v12044_v43, %v890_v10 }
 0x122   : > { %v830_v57 = vadd.f32 1e-05, %v766_v27  ;;  %v767_v20 = vsub.f32 %v703_v18, %v735_v62  ;;  %9682 = vmatpush3.bf16.msra.mxu1 %v12031_v26  ;;  %1310 = vmatprep.mubr.bf16.mxu1 %v17897_v42  ;;  %v797_v26 = vsub.f32 %v12008_v17, %v12280_v45  ;;  %v10649_v17 = vld [vmem:[%s17887_s4 + $0x68] ss:$12 sps:$4 sm:$0xff]   ;;  %v798_v45 = vsub.f32 %v12017_v21, %v12292_v52 }
 0x123   : > { %9683 = vmatprep.subr.bf16.mxu1 %v10646_v6  ;;  %v929_v12 = vmul.f32 %v12044_v43, %v891_v50  ;;  %v966_v36 = vadd.f32 %v12055_v8, %v928_v7 }
 0x124   : > { %10801 = vrsqrt.f32 %v830_v57  ;;  %v831_v31 = vadd.f32 1e-05, %v767_v20 }
 0x125   : > { %v967_v38 = vadd.f32 %v12055_v8, %v929_v12 }
 0x126   : > { %v10798_v9 = vpop.eup %10797  ;;  %10803 = vrsqrt.f32 %v831_v31  ;;  %9684 = vmatpush3.bf16.msra.mxu1 %v10646_v6 }
 0x127   : > { %v985_v58 = vpack.c.bf16 %v967_v38, %v966_v36  ;;  %9685 = vmatprep.subr.bf16.mxu1 %v10647_v53  ;;  %v892_v3 = vmul.f32 %v10798_v9, %v796_v37 }
 0x128   : > { %v10800_v48 = vpop.eup %10799 }
 0x129   : > { %1311 = vmatmul.mubr.bf16.gmra.mrb[4].mxu1 %v985_v58  ;;  %v893_v15 = vmul.f32 %v10800_v48, %v797_v26  ;;  %v930_v14 = vmul.f32 %v12044_v43, %v892_v3 }
 0x12a   : > { %9686 = vmatpush3.bf16.msra.mxu1 %v10647_v53  ;;  %1320 = vmatprep.mubr.bf16.mxu1 %v17897_v42 }
 0x12b   : > { %9687 = vmatprep.subr.bf16.mxu1 %v10648_v51  ;;  %v931_v23 = vmul.f32 %v12044_v43, %v893_v15  ;;  %v968_v29 = vadd.f32 %v12055_v8, %v930_v14 }
 0x12d   : > { %v969_v5 = vadd.f32 %v12055_v8, %v931_v23 }
 0x12e   : > { %v10802_v32 = vpop.eup %10801  ;;  %9688 = vmatpush3.bf16.msra.mxu1 %v10648_v51 }
 0x12f   : > { %v986_v11 = vpack.c.bf16 %v969_v5, %v968_v29  ;;  %9689 = vmatprep.subr.bf16.mxu1 %v10649_v17  ;;  %v894_v60 = vmul.f32 %v10802_v32, %v798_v45 }
 0x130   : > { %v10804_v55 = vpop.eup %10803 }
 0x131   : > { %1321 = vmatmul.mubr.bf16.gmra.mrb[8].mxu1 %v986_v11  ;;  %v895_v41 = vmul.f32 %v10804_v55, %v799_v44  ;;  %v932_v21 = vmul.f32 %v12044_v43, %v894_v60 }
 0x132   : > { %9690 = vmatpush3.bf16.msra.mxu1 %v10649_v17  ;;  %1330 = vmatprep.mubr.bf16.mxu1 %v17897_v42 }
 0x133   : > { %9691 = vmatprep.subr.bf16.mxu1 %v10650_v4  ;;  %v933_v52 = vmul.f32 %v12044_v43, %v895_v41  ;;  %v970_v47 = vadd.f32 %v12055_v8, %v932_v21 }
 0x135   : > { %v971_v63 = vadd.f32 %v12055_v8, %v933_v52 }
 0x136   : > { %9692 = vmatpush3.bf16.msra.mxu1 %v10650_v4 }
 0x137   : > { %v987_v59 = vpack.c.bf16 %v971_v63, %v970_v47  ;;  %9693 = vmatprep.subr.bf16.mxu1 %v10651_v22 }
 0x139   : > { %1331 = vmatmul.mubr.bf16.gmra.mrb[12].mxu1 %v987_v59 }
 0x13a   : > { %9694 = vmatpush3.bf16.msra.mxu1 %v10651_v22  ;;  %9697 = vmatprep.mubr.bf16.mxu1 %v12066_v39 }
 0x13b   : > { %9695 = vmatprep.subr.bf16.mxu1 %v10652_v61 }
 0x13e   : > { %9696 = vmatpush3.bf16.msra.mxu1 %v10652_v61 }
 0x141   : > { %9698 = vmatmul.mubr.bf16.vlgmr.msra.gmra.mrb[16].mxu1 %v12086_v33 }
 0x142   : > { %9701 = vmatprep.mubr.bf16.mxu1 %v12106_v25 }
 0x149   : > { %9702 = vmatmul.mubr.bf16.gmra.mrb[20].mxu1 %v12126_v0 }
 0x14a   : > { %9705 = vmatprep.mubr.bf16.mxu1 %v12146_v35 }
 0x151   : > { %9706 = vmatmul.mubr.bf16.gmra.mrb[24].mxu1 %v12166_v1 }
 0x152   : > { %9709 = vmatprep.mubr.bf16.mxu1 %v12186_v28 }
 0x159   : > { %9710 = vmatmul.mubr.bf16.gmra.mrb[28].mxu1 %v12206_v56 }
 0x15a   : > { %9713 = vmatprep.mubr.bf16.mxu1 %v12226_v40 }
 0x161   : > { %9714 = vmatmul.mubr.bf16.gmra.mrb[32].mxu1 %v12246_v30 }
 0x162   : > { %9717 = vmatprep.mubr.bf16.mxu1 %v12266_v54 }
 0x169   : > { %9718 = vmatmul.mubr.bf16.gmra.mrb[36].mxu1 %v12286_v19 }
 0x16a   : > { %9721 = vmatprep.mubr.bf16.mxu1 %v12303_v34 }
 0x171   : > { %9722 = vmatmul.mubr.bf16.gmra.mrb[40].mxu1 %v985_v58 }
 0x172   : > { %9725 = vmatprep.mubr.bf16.mxu1 %v986_v11 }
 0x179   : > { %9726 = vmatmul.mubr.bf16.gmra.mrb[44].mxu1 %v987_v59 }
 0x194   : > { %v1182_v43 = vpop.f32.mrb[0].mxu0 }
 0x195   : > { %v1184_v8 = vpop.f32.mrb[1].mxu0 }
 0x196   : > { %v1186_v39 = vpop.f32.mrb[2].mxu0 }
 0x197   : > { %v12363_v33 = vpack.c.bf16 %v1186_v39, %v1182_v43  ;;  %v1188_v25 = vpop.f32.mrb[3].mxu0 }
 0x198   : > { %v12365_v0 = vpack.c.bf16 %v1188_v25, %v1184_v8 }
 0x199   : > { %18242 = vst [vmem:[#allocation2_spill] sm:$0xff] %v12363_v33  ;;  %2379 = vrot.lane.b32.xlu0 %v12363_v33, %s11695_s15  ;;  %9745 = vmatprep.mubr.msk.bf16.mxu1 %vm1566_vm0, %v12363_v33  ;;  %v12705_v33 = vld [vmem:[%s17884_s1 + $0x50] sm:$0xff] }
 0x19a   : > { %18243 = vst [vmem:[#allocation3_spill] sm:$0xff] %v12365_v0  ;;  %10305 = vmatprep.subr.msk.bf16.mxu1 %vm1566_vm0, %v12365_v0  ;;  %v1592_v35 = vsel %vm1566_vm0, %v12365_v0, 0  ;;  %18297 = vst [vmem:[#allocation57_spill] sm:$0xff] %v12705_v33 }
 0x19b   : > { %9730 = vmatpush3.bf16.xpose.msra.mxu1 %v1592_v35 }
 0x19c   : > { %v1192_v1 = vpop.f32.mrb[4].mxu0 }
 0x19d   : > { %2403 = vrot.lane.b32.xlu0 %v12365_v0, %s11695_s15  ;;  %v1194_v28 = vpop.f32.mrb[5].mxu0 }
 0x19e   : > { %v1196_v56 = vpop.f32.mrb[6].mxu0 }
 0x19f   : > { %v12377_v40 = vpack.c.bf16 %v1196_v56, %v1192_v1  ;;  %v1198_v30 = vpop.f32.mrb[7].mxu0 }
 0x1a0   : > { %v12379_v54 = vpack.c.bf16 %v1198_v30, %v1194_v28 }
 0x1a1   : > { %18244 = vst [vmem:[#allocation4_spill] sm:$0xff] %v12377_v40 }
 0x1a2   : > { %18245 = vst [vmem:[#allocation5_spill] sm:$0xff] %v12379_v54  ;;  %2405 = vrot.lane.b32.xlu1 %v12379_v54, %s11695_s15  ;;  %10306 = vmatprep.subr.msk.bf16.mxu1 %vm1566_vm0, %v12379_v54  ;;  %v1595_v19 = vsel %vm1566_vm0, %v12379_v54, 0 }
 0x1a3   : > { %9732 = vmatpush3.bf16.xpose.msra.mxu1 %v1595_v19 }
 0x1a4   : > { %v1202_v16 = vpop.f32.mrb[8].mxu0 }
 0x1a5   : > { %v1204_v2 = vpop.f32.mrb[9].mxu0 }
 0x1a6   : > { %v1206_v49 = vpop.f32.mrb[10].mxu0 }
 0x1a7   : > { %v12387_v13 = vpack.c.bf16 %v1206_v49, %v1202_v16  ;;  %v1208_v24 = vpop.f32.mrb[11].mxu0 }
 0x1a8   : > { %v12389_v34 = vpack.c.bf16 %v1208_v24, %v1204_v2 }
 0x1a9   : > { %18246 = vst [vmem:[#allocation6_spill] sm:$0xff] %v12387_v13 }
 0x1aa   : > { %18247 = vst [vmem:[#allocation7_spill] sm:$0xff] %v12389_v34  ;;  %10307 = vmatprep.subr.msk.bf16.mxu1 %vm1566_vm0, %v12389_v34  ;;  %v1598_v6 = vsel %vm1566_vm0, %v12389_v34, 0 }
 0x1ab   : > { %9734 = vmatpush3.bf16.xpose.msra.mxu1 %v1598_v6 }
 0x1ac   : > { %v1212_v10 = vpop.f32.mrb[12].mxu0 }
 0x1ad   : > { %v1214_v46 = vpop.f32.mrb[13].mxu0 }
 0x1ae   : > { %v1216_v62 = vpop.f32.mrb[14].mxu0 }
 0x1af   : > { %v12395_v27 = vpack.c.bf16 %v1216_v62, %v1212_v10  ;;  %v1218_v18 = vpop.f32.mrb[15].mxu0 }
 0x1b0   : > { %v12397_v50 = vpack.c.bf16 %v1218_v18, %v1214_v46 }
 0x1b1   : > { %18248 = vst [vmem:[#allocation8_spill] sm:$0xff] %v12395_v27 }
 0x1b2   : > { %18249 = vst [vmem:[#allocation9_spill] sm:$0xff] %v12397_v50  ;;  %10308 = vmatprep.subr.msk.bf16.mxu1 %vm1566_vm0, %v12397_v50  ;;  %v1601_v7 = vsel %vm1566_vm0, %v12397_v50, 0 }
 0x1b3   : > { %9736 = vmatpush3.bf16.xpose.msra.mxu1 %v1601_v7 }
 0x1b4   : > { %v1222_v57 = vpop.f32.mrb[16].mxu0 }
 0x1b5   : > { %v1224_v20 = vpop.f32.mrb[17].mxu0 }
 0x1b6   : > { %v1226_v12 = vpop.f32.mrb[18].mxu0 }
 0x1b7   : > { %v12403_v53 = vpack.c.bf16 %v1226_v12, %v1222_v57  ;;  %v1228_v31 = vpop.f32.mrb[19].mxu0 }
 0x1b8   : > { %v12405_v37 = vpack.c.bf16 %v1228_v31, %v1224_v20 }
 0x1b9   : > { %18250 = vst [vmem:[#allocation10_spill] sm:$0xff] %v12403_v53 }
 0x1ba   : > { %18251 = vst [vmem:[#allocation11_spill] sm:$0xff] %v12405_v37  ;;  %10309 = vmatprep.subr.msk.bf16.mxu1 %vm1566_vm0, %v12405_v37  ;;  %v1604_v36 = vsel %vm1566_vm0, %v12405_v37, 0 }
 0x1bb   : > { %9738 = vmatpush3.bf16.xpose.msra.mxu1 %v1604_v36 }
 0x1bc   : > { %v1232_v38 = vpop.f32.mrb[20].mxu0 }
 0x1bd   : > { %v1234_v9 = vpop.f32.mrb[21].mxu0 }
 0x1be   : > { %v1236_v26 = vpop.f32.mrb[22].mxu0 }
 0x1bf   : > { %v12411_v58 = vpack.c.bf16 %v1236_v26, %v1232_v38  ;;  %v1238_v51 = vpop.f32.mrb[23].mxu0 }
 0x1c0   : > { %v12413_v3 = vpack.c.bf16 %v1238_v51, %v1234_v9 }
 0x1c1   : > { %18252 = vst [vmem:[#allocation12_spill] sm:$0xff] %v12411_v58 }
 0x1c2   : > { %18253 = vst [vmem:[#allocation13_spill] sm:$0xff] %v12413_v3  ;;  %10310 = vmatprep.subr.msk.bf16.mxu1 %vm1566_vm0, %v12413_v3  ;;  %v1607_v48 = vsel %vm1566_vm0, %v12413_v3, 0 }
 0x1c3   : > { %9740 = vmatpush3.bf16.xpose.msra.mxu1 %v1607_v48 }
 0x1c4   : > { %v1242_v15 = vpop.f32.mrb[24].mxu0 }
 0x1c5   : > { %v1244_v14 = vpop.f32.mrb[25].mxu0 }
 0x1c6   : > { %v1246_v23 = vpop.f32.mrb[26].mxu0 }
 0x1c7   : > { %v12419_v17 = vpack.c.bf16 %v1246_v23, %v1242_v15  ;;  %v1248_v45 = vpop.f32.mrb[27].mxu0 }
 0x1c8   : > { %v12421_v29 = vpack.c.bf16 %v1248_v45, %v1244_v14 }
 0x1c9   : > { %18254 = vst [vmem:[#allocation14_spill] sm:$0xff] %v12419_v17 }
 0x1ca   : > { %18255 = vst [vmem:[#allocation15_spill] sm:$0xff] %v12421_v29  ;;  %10311 = vmatprep.subr.msk.bf16.mxu1 %vm1566_vm0, %v12421_v29  ;;  %v1610_v5 = vsel %vm1566_vm0, %v12421_v29, 0 }
 0x1cb   : > { %9742 = vmatpush3.bf16.xpose.msra.mxu1 %v1610_v5 }
 0x1cc   : > { %v1252_v32 = vpop.f32.mrb[28].mxu0 }
 0x1cd   : > { %v1254_v44 = vpop.f32.mrb[29].mxu0 }
 0x1ce   : > { %v1256_v11 = vpop.f32.mrb[30].mxu0 }
 0x1cf   : > { %v12427_v4 = vpack.c.bf16 %v1256_v11, %v1252_v32  ;;  %v1258_v60 = vpop.f32.mrb[31].mxu0 }
 0x1d0   : > { %v12429_v55 = vpack.c.bf16 %v1258_v60, %v1254_v44 }
 0x1d1   : > { %18256 = vst [vmem:[#allocation16_spill] sm:$0xff] %v12427_v4 }
 0x1d2   : > { %18257 = vst [vmem:[#allocation17_spill] sm:$0xff] %v12429_v55  ;;  %10312 = vmatprep.subr.msk.bf16.mxu1 %vm1566_vm0, %v12429_v55  ;;  %v1613_v41 = vsel %vm1566_vm0, %v12429_v55, 0 }
 0x1d3   : > { %9744 = vmatpush3.bf16.xpose.msra.mxu1 %v1613_v41 }
 0x1d4   : > { %v1262_v21 = vpop.f32.mrb[32].mxu0 }
 0x1d5   : > { %v1264_v52 = vpop.f32.mrb[33].mxu0 }
 0x1d6   : > { %v1266_v22 = vpop.f32.mrb[34].mxu0 }
 0x1d7   : > { %v12435_v47 = vpack.c.bf16 %v1266_v22, %v1262_v21  ;;  %v1268_v63 = vpop.f32.mrb[35].mxu0 }
 0x1d8   : > { %v12437_v59 = vpack.c.bf16 %v1268_v63, %v1264_v52 }
 0x1d9   : > { %18258 = vst [vmem:[#allocation18_spill] sm:$0xff] %v12435_v47  ;;  %9777 = vmatprep.mubr.msk.bf16.mxu0 %vm1566_vm0, %v12435_v47 }
 0x1da   : > { %18259 = vst [vmem:[#allocation19_spill] sm:$0xff] %v12437_v59  ;;  %9746 = vmatmul.mubr.msk.bf16.vlgmr.msra.gmra.mrb[48].mxu1 %vm1566_vm0, %v12377_v40  ;;  %10313 = vmatprep.subr.msk.bf16.mxu0 %vm1566_vm0, %v12437_v59  ;;  %v1737_v61 = vsel %vm1566_vm0, %v12437_v59, 0 }
 0x1db   : > { %9749 = vmatprep.mubr.msk.bf16.mxu1 %vm1566_vm0, %v12387_v13  ;;  %9762 = vmatpush3.bf16.xpose.msra.mxu0 %v1737_v61 }
 0x1dc   : > { %v1272_v43 = vpop.f32.mrb[36].mxu0 }
 0x1dd   : > { %v1274_v8 = vpop.f32.mrb[37].mxu0 }
 0x1de   : > { %v1276_v39 = vpop.f32.mrb[38].mxu0 }
 0x1df   : > { %v12449_v25 = vpack.c.bf16 %v1276_v39, %v1272_v43  ;;  %v1278_v35 = vpop.f32.mrb[39].mxu0 }
 0x1e0   : > { %v12451_v1 = vpack.c.bf16 %v1278_v35, %v1274_v8 }
 0x1e1   : > { %18260 = vst [vmem:[#allocation20_spill] sm:$0xff] %v12449_v25 }
 0x1e2   : > { %18261 = vst [vmem:[#allocation21_spill] sm:$0xff] %v12451_v1  ;;  %9750 = vmatmul.mubr.msk.bf16.gmra.mrb[52].mxu1 %vm1566_vm0, %v12395_v27  ;;  %10314 = vmatprep.subr.msk.bf16.mxu0 %vm1566_vm0, %v12451_v1  ;;  %v1740_v28 = vsel %vm1566_vm0, %v12451_v1, 0 }
 0x1e3   : > { %9753 = vmatprep.mubr.msk.bf16.mxu1 %vm1566_vm0, %v12403_v53  ;;  %9764 = vmatpush3.bf16.xpose.msra.mxu0 %v1740_v28 }
 0x1e4   : > { %v1282_v56 = vpop.f32.mrb[40].mxu0 }
 0x1e5   : > { %v1284_v30 = vpop.f32.mrb[41].mxu0 }
 0x1e6   : > { %v1286_v19 = vpop.f32.mrb[42].mxu0 }
 0x1e7   : > { %v12461_v16 = vpack.c.bf16 %v1286_v19, %v1282_v56  ;;  %v1288_v2 = vpop.f32.mrb[43].mxu0 }
 0x1e8   : > { %v12463_v49 = vpack.c.bf16 %v1288_v2, %v1284_v30 }
 0x1e9   : > { %18262 = vst [vmem:[#allocation22_spill] sm:$0xff] %v12461_v16 }
 0x1ea   : > { %18263 = vst [vmem:[#allocation23_spill] sm:$0xff] %v12463_v49  ;;  %9754 = vmatmul.mubr.msk.bf16.gmra.mrb[56].mxu1 %vm1566_vm0, %v12411_v58  ;;  %10315 = vmatprep.subr.msk.bf16.mxu0 %vm1566_vm0, %v12463_v49  ;;  %v1743_v24 = vsel %vm1566_vm0, %v12463_v49, 0 }
 0x1eb   : > { %9757 = vmatprep.mubr.msk.bf16.mxu1 %vm1566_vm0, %v12419_v17  ;;  %9766 = vmatpush3.bf16.xpose.msra.mxu0 %v1743_v24 }
 0x1ec   : > { %v1292_v6 = vpop.f32.mrb[44].mxu0 }
 0x1ed   : > { %v1294_v10 = vpop.f32.mrb[45].mxu0 }
 0x1ee   : > { %v1296_v46 = vpop.f32.mrb[46].mxu0 }
 0x1ef   : > { %v12473_v62 = vpack.c.bf16 %v1296_v46, %v1292_v6  ;;  %v1298_v18 = vpop.f32.mrb[47].mxu0 }
 0x1f0   : > { %v12475_v7 = vpack.c.bf16 %v1298_v18, %v1294_v10 }
 0x1f1   : > { %18264 = vst [vmem:[#allocation24_spill] sm:$0xff] %v12473_v62 }
 0x1f2   : > { %18265 = vst [vmem:[#allocation25_spill] sm:$0xff] %v12475_v7  ;;  %9758 = vmatmul.mubr.msk.bf16.gmra.mrb[60].mxu1 %vm1566_vm0, %v12427_v4  ;;  %10316 = vmatprep.subr.msk.bf16.mxu0 %vm1566_vm0, %v12475_v7  ;;  %v1746_v57 = vsel %vm1566_vm0, %v12475_v7, 0 }
 0x1f3   : > { %9768 = vmatpush3.bf16.xpose.msra.mxu0 %v1746_v57 }
 0x1f4   : > { %v1302_v20 = vpop.f32.mrb[0].mxu1 }
 0x1f5   : > { %v1304_v12 = vpop.f32.mrb[1].mxu1 }
 0x1f6   : > { %v1306_v31 = vpop.f32.mrb[2].mxu1 }
 0x1f7   : > { %v12483_v36 = vpack.c.bf16 %v1306_v31, %v1302_v20  ;;  %v1308_v38 = vpop.f32.mrb[3].mxu1 }
 0x1f8   : > { %v12485_v9 = vpack.c.bf16 %v1308_v38, %v1304_v12 }
 0x1f9   : > { %18266 = vst [vmem:[#allocation26_spill] sm:$0xff] %v12483_v36 }
 0x1fa   : > { %18267 = vst [vmem:[#allocation27_spill] sm:$0xff] %v12485_v9  ;;  %2604 = vrot.lane.b32.xlu0 %v12485_v9, %s11695_s15  ;;  %10317 = vmatprep.subr.msk.bf16.mxu0 %vm1566_vm0, %v12485_v9  ;;  %v1749_v26 = vsel %vm1566_vm0, %v12485_v9, 0  ;;  %v12687_v9 = vld [vmem:[%s17884_s1 + $0x20] sm:$0xff] }
 0x1fb   : > { %9770 = vmatpush3.bf16.xpose.msra.mxu0 %v1749_v26  ;;  %18296 = vst [vmem:[#allocation56_spill] sm:$0xff] %v12687_v9 }
 0x1fc   : > { %v1312_v51 = vpop.f32.mrb[4].mxu1 }
 0x1fd   : > { %v1314_v48 = vpop.f32.mrb[5].mxu1 }
 0x1fe   : > { %2381 = vrot.lane.b32.xlu0 %v12377_v40, %s11695_s15  ;;  %v1316_v15 = vpop.f32.mrb[6].mxu1  ;;  %v12732_v40 = vld [vmem:[%s17884_s1 + $0x48] sm:$0xff] }
 0x1ff   : > { %v12495_v14 = vpack.c.bf16 %v1316_v15, %v1312_v51  ;;  %v1318_v23 = vpop.f32.mrb[7].mxu1  ;;  %18300 = vst [vmem:[#allocation60_spill] sm:$0xff] %v12732_v40 }
 0x200   : > { %v12497_v45 = vpack.c.bf16 %v1318_v23, %v1314_v48 }
 0x201   : > { %18268 = vst [vmem:[#allocation28_spill] sm:$0xff] %v12495_v14 }
 0x202   : > { %18269 = vst [vmem:[#allocation29_spill] sm:$0xff] %v12497_v45  ;;  %2407 = vrot.lane.b32.xlu0 %v12389_v34, %s11695_s15  ;;  %2606 = vrot.lane.b32.xlu1 %v12497_v45, %s11695_s15  ;;  %v1752_v5 = vsel %vm1566_vm0, %v12497_v45, 0 }
 0x203   : > { %10318 = vmatprep.subr.msk.bf16.mxu0 %vm1566_vm0, %v12497_v45  ;;  %v12714_v45 = vld [vmem:[%s17884_s1 + $0x58] sm:$0xff] }
 0x204   : > { %9772 = vmatpush3.bf16.xpose.msra.mxu0 %v1752_v5  ;;  %v1322_v32 = vpop.f32.mrb[8].mxu1  ;;  %18298 = vst [vmem:[#allocation58_spill] sm:$0xff] %v12714_v45 }
 0x205   : > { %v1324_v44 = vpop.f32.mrb[9].mxu1 }
 0x206   : > { %2385 = vrot.lane.b32.xlu0 %v12395_v27, %s11695_s15  ;;  %2383 = vrot.lane.b32.xlu1 %v12387_v13, %s11695_s15  ;;  %v1326_v11 = vpop.f32.mrb[10].mxu1 }
 0x207   : > { %v12511_v60 = vpack.c.bf16 %v1326_v11, %v1322_v32  ;;  %v1328_v41 = vpop.f32.mrb[11].mxu1 }
 0x208   : > { %v12513_v21 = vpack.c.bf16 %v1328_v41, %v1324_v44 }
 0x209   : > { %18270 = vst [vmem:[#allocation30_spill] sm:$0xff] %v12511_v60 }
 0x20a   : > { %18271 = vst [vmem:[#allocation31_spill] sm:$0xff] %v12513_v21  ;;  %2409 = vrot.lane.b32.xlu0 %v12397_v50, %s11695_s15  ;;  %2411 = vrot.lane.b32.xlu1 %v12405_v37, %s11695_s15  ;;  %v1755_v52 = vsel %vm1566_vm0, %v12513_v21, 0  ;;  %v1565_v50 = vld [vmem:[%s17884_s1 + $0x78] sm:$0xff] }
 0x20b   : > { %10319 = vmatprep.subr.msk.bf16.mxu0 %vm1566_vm0, %v12513_v21  ;;  %v12523_v61 = vpop.permute.xlu0 %2379 }
 0x20c   : > { %9774 = vmatpush3.bf16.xpose.msra.mxu0 %v1755_v52  ;;  %v1332_v22 = vpop.f32.mrb[12].mxu1 }
 0x20d   : > { %v1334_v63 = vpop.f32.mrb[13].mxu1 }
 0x20e   : > { %2413 = vrot.lane.b32.xlu0 %v12413_v3, %s11695_s15  ;;  %2415 = vrot.lane.b32.xlu1 %v12421_v29, %s11695_s15  ;;  %v1336_v43 = vpop.f32.mrb[14].mxu1  ;;  %v1564_v29 = vld [vmem:[%s17884_s1 + $0x70] sm:$0xff] }
 0x20f   : > { %v12529_v8 = vpack.c.bf16 %v1336_v43, %v1332_v22  ;;  %v1338_v39 = vpop.f32.mrb[15].mxu1  ;;  %v2404_v56 = vpop.permute.xlu0 %2403 }
 0x210   : > { %v12531_v35 = vpack.c.bf16 %v1338_v39, %v1334_v63  ;;  %v2444_v46 = vsel %vm1566_vm0, %v2404_v56, 0 }
 0x211   : > { %18272 = vst [vmem:[#allocation32_spill] sm:$0xff] %v12529_v8 }
 0x212   : > { %18273 = vst [vmem:[#allocation33_spill] sm:$0xff] %v12531_v35  ;;  %2417 = vrot.lane.b32.xlu0 %v12429_v55, %s11695_s15  ;;  %2598 = vrot.lane.b32.xlu1 %v12451_v1, %s11695_s15  ;;  %v1758_v28 = vsel %vm1566_vm0, %v12531_v35, 0  ;;  %v12723_v1 = vld [vmem:[%s17884_s1 + $0x40] sm:$0xff] }
 0x213   : > { %10320 = vmatprep.subr.msk.bf16.mxu0 %vm1566_vm0, %v12531_v35  ;;  %18299 = vst [vmem:[#allocation59_spill] sm:$0xff] %v12723_v1 }
 0x214   : > { %9776 = vmatpush3.bf16.xpose.msra.mxu0 %v1758_v28  ;;  %v9699_v30 = vpop.f32.mrb[16].mxu1  ;;  %v2406_v18 = vpop.permute.xlu1 %2405 }
 0x215   : > { %10321 = vmatprep.subr.msk.bf16.mxu0 %vm1566_vm0, %v2404_v56  ;;  %v1375_v19 = vpop.f32.mrb[17].mxu1  ;;  %v2447_v51 = vsel %vm1566_vm0, %v2406_v18, 0 }
 0x216   : > { %2596 = vrot.lane.b32.xlu0 %v12437_v59, %s11695_s15  ;;  %2602 = vrot.lane.b32.xlu1 %v12475_v7, %s11695_s15  ;;  %v9700_v2 = vpop.f32.mrb[18].mxu1  ;;  %v12696_v59 = vld [vmem:[%s17884_s1 + $0x28] sm:$0xff] }
 0x217   : > { %v12546_v24 = vpack.c.bf16 %v9700_v2, %v9699_v30  ;;  %v1378_v6 = vpop.f32.mrb[19].mxu1 }
 0x218   : > { %v12548_v10 = vpack.c.bf16 %v1378_v6, %v1375_v19 }
 0x219   : > { %18274 = vst [vmem:[#allocation34_spill] sm:$0xff] %v12546_v24 }
 0x21a   : > { %18275 = vst [vmem:[#allocation35_spill] sm:$0xff] %v12548_v10  ;;  %2600 = vrot.lane.b32.xlu0 %v12463_v49, %s11695_s15  ;;  %9793 = vmatprep.subr.bf16.mxu1 %v12548_v10 }
 0x21b   : > { %9778 = vmatmul.mubr.msk.bf16.vlgmr.msra.gmra.mrb[48].mxu0 %vm1566_vm0, %v12449_v25  ;;  %9794 = vmatpush3.bf16.msra.mxu1 %v12548_v10 }
 0x21c   : > { %9781 = vmatprep.mubr.msk.bf16.mxu0 %vm1566_vm0, %v12461_v16  ;;  %9858 = vmatpush3.bf16.xpose.msra.mxu0 %v2444_v46  ;;  %v9703_v57 = vpop.f32.mrb[20].mxu1 }
 0x21d   : > { %9795 = vmatprep.subr.bf16.mxu1 %v12546_v24  ;;  %10322 = vmatprep.subr.msk.bf16.mxu0 %vm1566_vm0, %v2406_v18  ;;  %v1391_v20 = vpop.f32.mrb[21].mxu1 }
 0x21e   : > { %v9704_v12 = vpop.f32.mrb[22].mxu1 }
 0x21f   : > { %v12561_v31 = vpack.c.bf16 %v9704_v12, %v9703_v57  ;;  %v1394_v38 = vpop.f32.mrb[23].mxu1  ;;  %9796 = vmatpush3.bf16.msra.mxu1 %v12546_v24 }
 0x220   : > { %v12564_v26 = vpack.c.bf16 %v1394_v38, %v1391_v20 }
 0x221   : > { %18276 = vst [vmem:[#allocation36_spill] sm:$0xff] %v12561_v31 }
 0x222   : > { %18277 = vst [vmem:[#allocation37_spill] sm:$0xff] %v12564_v26  ;;  %9797 = vmatprep.subr.bf16.mxu1 %v12564_v26 }
 0x223   : > { %9782 = vmatmul.mubr.msk.bf16.gmra.mrb[52].mxu0 %vm1566_vm0, %v12473_v62  ;;  %9798 = vmatpush3.bf16.msra.mxu1 %v12564_v26 }
 0x224   : > { %9785 = vmatprep.mubr.msk.bf16.mxu0 %vm1566_vm0, %v12483_v36  ;;  %9860 = vmatpush3.bf16.xpose.msra.mxu0 %v2447_v51  ;;  %v9707_v48 = vpop.f32.mrb[24].mxu1 }
 0x225   : > { %9799 = vmatprep.subr.bf16.mxu1 %v12561_v31  ;;  %v1407_v15 = vpop.f32.mrb[25].mxu1 }
 0x226   : > { %v9708_v23 = vpop.f32.mrb[26].mxu1 }
 0x227   : > { %v12574_v5 = vpack.c.bf16 %v9708_v23, %v9707_v48  ;;  %v1410_v32 = vpop.f32.mrb[27].mxu1  ;;  %9800 = vmatpush3.bf16.msra.mxu1 %v12561_v31 }
 0x228   : > { %v12577_v44 = vpack.c.bf16 %v1410_v32, %v1407_v15 }
 0x229   : > { %18278 = vst [vmem:[#allocation38_spill] sm:$0xff] %v12574_v5 }
 0x22a   : > { %18279 = vst [vmem:[#allocation39_spill] sm:$0xff] %v12577_v44  ;;  %9801 = vmatprep.subr.bf16.mxu1 %v12577_v44 }
 0x22b   : > { %9786 = vmatmul.mubr.msk.bf16.gmra.mrb[56].mxu0 %vm1566_vm0, %v12495_v14  ;;  %9802 = vmatpush3.bf16.msra.mxu1 %v12577_v44 }
 0x22c   : > { %9789 = vmatprep.mubr.msk.bf16.mxu0 %vm1566_vm0, %v12511_v60  ;;  %v9711_v11 = vpop.f32.mrb[28].mxu1  ;;  %9803 = vmatprep.subr.bf16.mxu1 %v12574_v5 }
 0x22d   : > { %v1423_v41 = vpop.f32.mrb[29].mxu1 }
 0x22e   : > { %v9712_v52 = vpop.f32.mrb[30].mxu1 }
 0x22f   : > { %v12586_v22 = vpack.c.bf16 %v9712_v52, %v9711_v11  ;;  %v1426_v63 = vpop.f32.mrb[31].mxu1  ;;  %9804 = vmatpush3.bf16.msra.mxu1 %v12574_v5 }
 0x230   : > { %v12589_v43 = vpack.c.bf16 %v1426_v63, %v1423_v41 }
 0x231   : > { %18280 = vst [vmem:[#allocation40_spill] sm:$0xff] %v12586_v22 }
 0x232   : > { %18281 = vst [vmem:[#allocation41_spill] sm:$0xff] %v12589_v43  ;;  %9805 = vmatprep.subr.bf16.mxu1 %v12589_v43 }
 0x233   : > { %9790 = vmatmul.mubr.msk.bf16.gmra.mrb[60].mxu0 %vm1566_vm0, %v12529_v8  ;;  %9806 = vmatpush3.bf16.msra.mxu1 %v12589_v43 }
 0x234   : > { %9873 = vmatprep.mubr.msk.bf16.mxu0 %vm1566_vm0, %v12523_v61  ;;  %v9715_v39 = vpop.f32.mrb[32].mxu1  ;;  %9807 = vmatprep.subr.bf16.mxu1 %v12586_v22 }
 0x235   : > { %v1439_v28 = vpop.f32.mrb[33].mxu1 }
 0x236   : > { %v9716_v56 = vpop.f32.mrb[34].mxu1 }
 0x237   : > { %v12598_v30 = vpack.c.bf16 %v9716_v56, %v9715_v39  ;;  %v1442_v19 = vpop.f32.mrb[35].mxu1  ;;  %9808 = vmatpush3.bf16.msra.mxu1 %v12586_v22  ;;  %v1563_v22 = vld [vmem:[%s17884_s1 + $0x68] sm:$0xff] }
 0x238   : > { %v12601_v2 = vpack.c.bf16 %v1442_v19, %v1439_v28 }
 0x239   : > { %18282 = vst [vmem:[#allocation42_spill] sm:$0xff] %v12598_v30 }
 0x23a   : > { %18283 = vst [vmem:[#allocation43_spill] sm:$0xff] %v12601_v2  ;;  %9825 = vmatprep.subr.bf16.mxu1 %v12601_v2 }
 0x23c   : > { %v9719_v6 = vpop.f32.mrb[36].mxu1 }
 0x23d   : > { %v1455_v46 = vpop.f32.mrb[37].mxu1 }
 0x23e   : > { %v9720_v18 = vpop.f32.mrb[38].mxu1 }
 0x23f   : > { %v12604_v57 = vpack.c.bf16 %v9720_v18, %v9719_v6  ;;  %v1458_v61 = vpop.f32.mrb[39].mxu1 }
 0x240   : > { %v12606_v20 = vpack.c.bf16 %v1458_v61, %v1455_v46 }
 0x241   : > { %18284 = vst [vmem:[#allocation44_spill] sm:$0xff] %v12604_v57 }
 0x242   : > { %18285 = vst [vmem:[#allocation45_spill] sm:$0xff] %v12606_v20 }
 0x244   : > { %v9723_v12 = vpop.f32.mrb[40].mxu1 }
 0x245   : > { %v1471_v38 = vpop.f32.mrb[41].mxu1 }
 0x246   : > { %v9724_v51 = vpop.f32.mrb[42].mxu1 }
 0x247   : > { %v12608_v48 = vpack.c.bf16 %v9724_v51, %v9723_v12  ;;  %v1474_v15 = vpop.f32.mrb[43].mxu1 }
 0x248   : > { %v12610_v23 = vpack.c.bf16 %v1474_v15, %v1471_v38 }
 0x249   : > { %18286 = vst [vmem:[#allocation46_spill] sm:$0xff] %v12608_v48 }
 0x24a   : > { %18287 = vst [vmem:[#allocation47_spill] sm:$0xff] %v12610_v23 }
 0x24c   : > { %v9727_v32 = vpop.f32.mrb[44].mxu1 }
 0x24d   : > { %v1487_v11 = vpop.f32.mrb[45].mxu1 }
 0x24e   : > { %v9728_v41 = vpop.f32.mrb[46].mxu1 }
 0x24f   : > { %v12612_v52 = vpack.c.bf16 %v9728_v41, %v9727_v32  ;;  %v1490_v63 = vpop.f32.mrb[47].mxu1 }
 0x250   : > { %v12614_v39 = vpack.c.bf16 %v1490_v63, %v1487_v11 }
 0x251   : > { %18288 = vst [vmem:[#allocation48_spill] sm:$0xff] %v12612_v52 }
 0x252   : > { %18289 = vst [vmem:[#allocation49_spill] sm:$0xff] %v12614_v39 }
 0x26c   : > { %v12616_v28 = vpop.permute.xlu0 %2604 }
 0x26d   : > { %18290 = vst [vmem:[#allocation50_spill] sm:$0xff] %v12616_v28 }
 0x270   : > { %v2382_v56 = vpop.permute.xlu0 %2381 }
 0x274   : > { %v2408_v19 = vpop.permute.xlu0 %2407  ;;  %v12618_v6 = vpop.permute.xlu1 %2606 }
 0x275   : > { %18291 = vst [vmem:[#allocation51_spill] sm:$0xff] %v12618_v6  ;;  %10323 = vmatprep.subr.msk.bf16.mxu0 %vm1566_vm0, %v2408_v19  ;;  %v2450_v46 = vsel %vm1566_vm0, %v2408_v19, 0 }
 0x276   : > { %9862 = vmatpush3.bf16.xpose.msra.mxu0 %v2450_v46 }
 0x278   : > { %v2386_v18 = vpop.permute.xlu0 %2385  ;;  %v2384_v61 = vpop.permute.xlu1 %2383 }
 0x27c   : > { %v2410_v12 = vpop.permute.xlu0 %2409  ;;  %v2412_v51 = vpop.permute.xlu1 %2411 }
 0x27d   : > { %10324 = vmatprep.subr.msk.bf16.mxu0 %vm1566_vm0, %v2410_v12  ;;  %v2453_v38 = vsel %vm1566_vm0, %v2410_v12, 0  ;;  %v2456_v15 = vsel %vm1566_vm0, %v2412_v51, 0  ;;  %v12637_v12 = vld [vmem:[%s17884_s1 + $0x10] sm:$0xff] }
 0x27e   : > { %9864 = vmatpush3.bf16.xpose.msra.mxu0 %v2453_v38  ;;  %18292 = vst [vmem:[#allocation52_spill] sm:$0xff] %v12637_v12 }
 0x27f   : > { %10325 = vmatprep.subr.msk.bf16.mxu0 %vm1566_vm0, %v2412_v51  ;;  %v12643_v51 = vld [vmem:[%s17884_s1 + $0x18] sm:$0xff] }
 0x280   : > { %v2414_v32 = vpop.permute.xlu0 %2413  ;;  %v2416_v41 = vpop.permute.xlu1 %2415  ;;  %18293 = vst [vmem:[#allocation53_spill] sm:$0xff] %v12643_v51 }
 0x281   : > { %v2459_v11 = vsel %vm1566_vm0, %v2414_v32, 0  ;;  %v2462_v63 = vsel %vm1566_vm0, %v2416_v41, 0 }
 0x284   : > { %v2418_v19 = vpop.permute.xlu0 %2417 }
 0x285   : > { %v2465_v46 = vsel %vm1566_vm0, %v2418_v19, 0 }
 0x286   : > { %9866 = vmatpush3.bf16.xpose.msra.mxu0 %v2456_v15 }
 0x287   : > { %10326 = vmatprep.subr.msk.bf16.mxu0 %vm1566_vm0, %v2414_v32 }
 0x28e   : > { %9868 = vmatpush3.bf16.xpose.msra.mxu0 %v2459_v11 }
 0x28f   : > { %10327 = vmatprep.subr.msk.bf16.mxu0 %vm1566_vm0, %v2416_v41  ;;  %v12660_v41 = vld [vmem:[%s17884_s1 + $0x8] sm:$0xff] }
 0x296   : > { %9870 = vmatpush3.bf16.xpose.msra.mxu0 %v2462_v63 }
 0x297   : > { %10328 = vmatprep.subr.msk.bf16.mxu0 %vm1566_vm0, %v2418_v19  ;;  %v12669_v19 = vld [vmem:[%s17884_s1 + $0x30] sm:$0xff] }
 0x298   : > { %18295 = vst [vmem:[#allocation55_spill] sm:$0xff] %v12669_v19 }
 0x29e   : > { %9872 = vmatpush3.bf16.xpose.msra.mxu0 %v2465_v46 }
 0x2a5   : > { %9874 = vmatmul.mubr.msk.bf16.vlgmr.msra.gmra.mrb[64].mxu0 %vm1566_vm0, %v2382_v56 }
 0x2a6   : > { %9877 = vmatprep.mubr.msk.bf16.mxu0 %vm1566_vm0, %v2384_v61  ;;  %v12651_v61 = vld [vmem:[%s17884_s1] sm:$0xff] }
 0x2a7   : > { %18294 = vst [vmem:[#allocation54_spill] sm:$0xff] %v12651_v61 }
 0x2ad   : > { %v9747_v38 = vpop.f32.mrb[48].mxu1  ;;  %9878 = vmatmul.mubr.msk.bf16.gmra.mrb[68].mxu0 %vm1566_vm0, %v2386_v18 }
 0x2ae   : > { %v1649_v15 = vpop.f32.mrb[49].mxu1  ;;  %v12646_v32 = vadd.f32 %v9747_v38, %v12637_v12 }
 0x2af   : > { %v9748_v56 = vpop.f32.mrb[50].mxu1  ;;  %v12664_v63 = vadd.f32 %v1649_v15, %v12651_v61 }
 0x2b0   : > { %1861 = vmax.xlane.f32.xlu0 %v12646_v32  ;;  %v1652_v11 = vpop.f32.mrb[51].mxu1  ;;  %v12655_v18 = vadd.f32 %v9748_v56, %v12643_v51  ;;  %v12678_v56 = vld [vmem:[%s17884_s1 + $0x38] sm:$0xff] }
 0x2b1   : > { %v12673_v46 = vadd.f32 %v1652_v11, %v12660_v41 }
 0x2b2   : > { %1863 = vmax.xlane.f32.xlu1 %v12655_v18 }
 0x2b4   : > { %1857 = vmax.xlane.f32.xlu0 %v12664_v63 }
 0x2b5   : > { %v9751_v38 = vpop.f32.mrb[52].mxu1 }
 0x2b6   : > { %v1665_v42 = vpop.f32.mrb[53].mxu1  ;;  %1859 = vmax.xlane.f32.xlu1 %v12673_v46  ;;  %v12682_v15 = vadd.f32 %v9751_v38, %v12669_v19 }
 0x2b7   : > { %v9752_v27 = vpop.f32.mrb[54].mxu1  ;;  %v12700_v38 = vadd.f32 %v1665_v42, %v12687_v9 }
 0x2b8   : > { %v1668_v11 = vpop.f32.mrb[55].mxu1  ;;  %1869 = vmax.xlane.f32.xlu0 %v12682_v15  ;;  %v12691_v49 = vadd.f32 %v9752_v27, %v12678_v56 }
 0x2b9   : > { %v12709_v27 = vadd.f32 %v1668_v11, %v12696_v59 }
 0x2ba   : > { %1871 = vmax.xlane.f32.xlu1 %v12691_v49 }
 0x2bc   : > { %1865 = vmax.xlane.f32.xlu0 %v12700_v38 }
 0x2bd   : > { %v9755_v55 = vpop.f32.mrb[56].mxu1 }
 0x2be   : > { %v1681_v13 = vpop.f32.mrb[57].mxu1  ;;  %1867 = vmax.xlane.f32.xlu1 %v12709_v27  ;;  %v12718_v42 = vadd.f32 %v9755_v55, %v12705_v33 }
 0x2bf   : > { %v9756_v7 = vpop.f32.mrb[58].mxu1  ;;  %v12736_v55 = vadd.f32 %v1681_v13, %v12723_v1  ;;  %v1562_v13 = vld [vmem:[%s17884_s1 + $0x60] sm:$0xff] }
 0x2c0   : > { %v1684_v11 = vpop.f32.mrb[59].mxu1  ;;  %1877 = vmax.xlane.f32.xlu0 %v12718_v42  ;;  %v12727_v3 = vadd.f32 %v9756_v7, %v12714_v45 }
 0x2c1   : > { %v12743_v37 = vadd.f32 %v1684_v11, %v12732_v40 }
 0x2c2   : > { %1879 = vmax.xlane.f32.xlu1 %v12727_v3 }
 0x2c4   : > { %1873 = vmax.xlane.f32.xlu0 %v12736_v55 }
 0x2c5   : > { %v9759_v7 = vpop.f32.mrb[60].mxu1 }
 0x2c6   : > { %v12748_v54 = vadd.f32 %v9759_v7, %v1564_v29  ;;  %v1697_v0 = vpop.f32.mrb[61].mxu1  ;;  %1875 = vmax.xlane.f32.xlu1 %v12743_v37 }
 0x2c7   : > { %v9760_v34 = vpop.f32.mrb[62].mxu1  ;;  %v12760_v44 = vadd.f32 %v1697_v0, %v1562_v13 }
 0x2c8   : > { %v1700_v43 = vpop.f32.mrb[63].mxu1  ;;  %1885 = vmax.xlane.f32.xlu0 %v12748_v54  ;;  %v12755_v11 = vadd.f32 %v9760_v34, %v1565_v50 }
 0x2c9   : > { %v12764_v7 = vadd.f32 %v1700_v43, %v1563_v22 }
 0x2ca   : > { %1887 = vmax.xlane.f32.xlu1 %v12755_v11 }
 0x2cc   : > { %1881 = vmax.xlane.f32.xlu0 %v12760_v44 }
 0x2ce   : > { %1883 = vmax.xlane.f32.xlu1 %v12764_v7 }
 0x2df   : > { %2389 = vrot.lane.b32.xlu1 %v12411_v58, %s11695_s15 }
 0x2ee   : > { %v9779_v5 = vpop.f32.mrb[48].mxu0 }
 0x2ef   : > { %v12770_v34 = vadd.f32 %v9779_v5, %v12637_v12  ;;  %v1794_v26 = vpop.f32.mrb[49].mxu0 }
 0x2f0   : > { %v9780_v31 = vpop.f32.mrb[50].mxu0  ;;  %v12774_v0 = vadd.f32 %v1794_v26, %v12651_v61 }
 0x2f1   : > { %v1797_v10 = vpop.f32.mrb[51].mxu0  ;;  %1893 = vmax.xlane.f32.xlu0 %v12770_v34  ;;  %v12778_v5 = vadd.f32 %v9780_v31, %v12643_v51 }
 0x2f2   : > { %v12782_v12 = vadd.f32 %v1797_v10, %v12660_v41 }
 0x2f5   : > { %1889 = vmax.xlane.f32.xlu0 %v12774_v0 }
 0x2f6   : > { %v9783_v43 = vpop.f32.mrb[52].mxu0 }
 0x2f7   : > { %v1810_v24 = vpop.f32.mrb[53].mxu0 }
 0x2f8   : > { %v9784_v6 = vpop.f32.mrb[54].mxu0 }
 0x2f9   : > { %v1813_v28 = vpop.f32.mrb[55].mxu0  ;;  %v12786_v4 = vadd.f32 %v9784_v6, %v12678_v56 }
 0x2fa   : > { %v12792_v31 = vadd.f32 %v1813_v28, %v12696_v59 }
 0x2fe   : > { %v9787_v60 = vpop.f32.mrb[56].mxu0 }
 0x2ff   : > { %v1826_v58 = vpop.f32.mrb[57].mxu0 }
 0x300   : > { %v9788_v36 = vpop.f32.mrb[58].mxu0 }
 0x301   : > { %v1829_v16 = vpop.f32.mrb[59].mxu0  ;;  %v12796_v10 = vadd.f32 %v9788_v36, %v12714_v45 }
 0x302   : > { %v12800_v51 = vadd.f32 %v1829_v16, %v12732_v40  ;;  %v12816_v16 = vadd.f32 %v9783_v43, %v12669_v19 }
 0x303   : > { %1895 = vmax.xlane.f32.xlu1 %v12778_v5 }
 0x306   : > { %v9791_v26 = vpop.f32.mrb[60].mxu0 }
 0x307   : > { %v1842_v61 = vpop.f32.mrb[61].mxu0  ;;  %1891 = vmax.xlane.f32.xlu1 %v12782_v12  ;;  %v12803_v6 = vadd.f32 %v9791_v26, %v1564_v29  ;;  %v12820_v29 = vadd.f32 %v1810_v24, %v12687_v9 }
 0x308   : > { %v9792_v47 = vpop.f32.mrb[62].mxu0 }
 0x309   : > { %v1845_v52 = vpop.f32.mrb[63].mxu0  ;;  %v12809_v28 = vadd.f32 %v9792_v47, %v1565_v50  ;;  %v12827_v50 = vpop.permute.xlu0 %2596  ;;  %v12830_v47 = vadd.f32 %v1826_v58, %v12723_v1 }
 0x30a   : > { %v12812_v36 = vadd.f32 %v1845_v52, %v1563_v22  ;;  %v12832_v22 = vpop.permute.xlu1 %2598 }
 0x30b   : > { %2387 = vrot.lane.b32.xlu0 %v12403_v53, %s11695_s15  ;;  %1903 = vmax.xlane.f32.xlu1 %v12786_v4  ;;  %v12806_v53 = vadd.f32 %v1842_v61, %v1562_v13  ;;  %v12824_v61 = vadd.f32 %v9787_v60, %v12705_v33  ;;  %18301 = vst [vmem:[#allocation61_spill] sm:$0xff] %v12832_v22 }
 0x30d   : > { %v12835_v52 = vpop.permute.xlu0 %2600 }
 0x30e   : > { %18302 = vst [vmem:[#allocation62_spill] sm:$0xff] %v12835_v52  ;;  %v12837_v24 = vpop.permute.xlu1 %2602 }
 0x30f   : > { %1899 = vmax.xlane.f32.xlu1 %v12792_v31  ;;  %18303 = vst [vmem:[#allocation63_spill] sm:$0xff] %v12837_v24 }
 0x313   : > { %1911 = vmax.xlane.f32.xlu1 %v12796_v10 }
 0x317   : > { %1907 = vmax.xlane.f32.xlu1 %v12800_v51 }
 0x31b   : > { %1917 = vmax.xlane.f32.xlu1 %v12803_v6 }
 0x31f   : > { %1913 = vmax.xlane.f32.xlu1 %v12806_v53 }
 0x323   : > { %1919 = vmax.xlane.f32.xlu1 %v12809_v28 }
 0x327   : > { %1915 = vmax.xlane.f32.xlu1 %v12812_v36 }
 0x32a   : > { %1901 = vmax.xlane.f32.xlu0 %v12816_v16 }
 0x32e   : > { %1897 = vmax.xlane.f32.xlu0 %v12820_v29 }
 0x332   : > { %1909 = vmax.xlane.f32.xlu0 %v12824_v61 }
 0x336   : > { %1905 = vmax.xlane.f32.xlu0 %v12830_v47 }
 0x33d   : > { %v1862_v13 = vpop.xlane.xlu0 %1861 }
 0x33e   : > { %v1923_v43 = vsub.f32 %v12646_v32, %v1862_v13 }
 0x33f   : > { %v1864_v60 = vpop.xlane.xlu1 %1863 }
 0x340   : > { %v1957_v26 = vmul.f32 1.442695, %v1923_v43  ;;  %v1924_v33 = vsub.f32 %v12655_v18, %v1864_v60 }
 0x341   : > { %v1858_v45 = vpop.xlane.xlu0 %1857 }
 0x342   : > { %10805 = vpow2.f32 %v1957_v26  ;;  %v1959_v40 = vmul.f32 1.442695, %v1924_v33  ;;  %v1921_v58 = vsub.f32 %v12664_v63, %v1858_v45 }
 0x343   : > { %v1860_v1 = vpop.xlane.xlu1 %1859 }
 0x344   : > { %10807 = vpow2.f32 %v1959_v40  ;;  %v1953_v19 = vmul.f32 1.442695, %v1921_v58  ;;  %v1922_v9 = vsub.f32 %v12673_v46, %v1860_v1 }
 0x345   : > { %v1870_v52 = vpop.xlane.xlu0 %1869 }
 0x346   : > { %10809 = vpow2.f32 %v1953_v19  ;;  %v1955_v24 = vmul.f32 1.442695, %v1922_v9  ;;  %v1927_v22 = vsub.f32 %v12682_v15, %v1870_v52 }
 0x347   : > { %v1872_v32 = vpop.xlane.xlu1 %1871 }
 0x348   : > { %10811 = vpow2.f32 %v1955_v24  ;;  %v1965_v13 = vmul.f32 1.442695, %v1927_v22  ;;  %v1928_v18 = vsub.f32 %v12691_v49, %v1872_v32 }
 0x349   : > { %v1866_v43 = vpop.xlane.xlu0 %1865 }
 0x34a   : > { %10813 = vpow2.f32 %v1965_v13  ;;  %v1925_v33 = vsub.f32 %v12700_v38, %v1866_v43  ;;  %v1967_v46 = vmul.f32 1.442695, %v1928_v18 }
 0x34b   : > { %v1868_v45 = vpop.xlane.xlu1 %1867 }
 0x34c   : > { %v12846_v63 = vpop.eup %10805  ;;  %v1961_v40 = vmul.f32 1.442695, %v1925_v33  ;;  %v1926_v1 = vsub.f32 %v12709_v27, %v1868_v45 }
 0x34d   : > { %2021 = vadd.xlane.f32.xlu0 %v12846_v63  ;;  %v1878_v9 = vpop.xlane.xlu0 %1877 }
 0x34e   : > { %v12850_v19 = vpop.eup %10807  ;;  %10815 = vpow2.f32 %v1961_v40  ;;  %v1963_v15 = vmul.f32 1.442695, %v1926_v1  ;;  %v1931_v22 = vsub.f32 %v12718_v42, %v1878_v9 }
 0x34f   : > { %2023 = vadd.xlane.f32.xlu1 %v12850_v19  ;;  %v1880_v49 = vpop.xlane.xlu1 %1879 }
 0x350   : > { %v12854_v38 = vpop.eup %10809  ;;  %10817 = vpow2.f32 %v1963_v15  ;;  %v1973_v52 = vmul.f32 1.442695, %v1931_v22  ;;  %v1932_v42 = vsub.f32 %v12727_v3, %v1880_v49 }
 0x351   : > { %2017 = vadd.xlane.f32.xlu0 %v12854_v38  ;;  %v1874_v27 = vpop.xlane.xlu0 %1873  ;;  %10819 = vpow2.f32 %v1967_v46 }
 0x352   : > { %v12857_v24 = vpop.eup %10811  ;;  %v1929_v60 = vsub.f32 %v12736_v55, %v1874_v27  ;;  %10821 = vpow2.f32 %v1973_v52  ;;  %v1975_v45 = vmul.f32 1.442695, %v1932_v42 }
 0x353   : > { %2019 = vadd.xlane.f32.xlu1 %v12857_v24  ;;  %v1876_v26 = vpop.xlane.xlu1 %1875 }
 0x354   : > { %v12861_v58 = vpop.eup %10813  ;;  %v1969_v32 = vmul.f32 1.442695, %v1929_v60  ;;  %v1930_v13 = vsub.f32 %v12743_v37, %v1876_v26 }
 0x355   : > { %2029 = vadd.xlane.f32.xlu0 %v12861_v58  ;;  %v1886_v43 = vpop.xlane.xlu0 %1885 }
 0x356   : > { %10823 = vpow2.f32 %v1969_v32  ;;  %v1971_v40 = vmul.f32 1.442695, %v1930_v13  ;;  %v1935_v9 = vsub.f32 %v12748_v54, %v1886_v43 }
 0x357   : > { %v1888_v18 = vpop.xlane.xlu1 %1887  ;;  %10825 = vpow2.f32 %v1975_v45 }
 0x358   : > { %v12866_v33 = vpop.eup %10815  ;;  %10827 = vpow2.f32 %v1971_v40  ;;  %v1981_v49 = vmul.f32 1.442695, %v1935_v9  ;;  %v1936_v54 = vsub.f32 %v12755_v11, %v1888_v18 }
 0x359   : > { %2025 = vadd.xlane.f32.xlu0 %v12866_v33  ;;  %v1882_v46 = vpop.xlane.xlu0 %1881 }
 0x35a   : > { %v12869_v55 = vpop.eup %10817  ;;  %v1933_v52 = vsub.f32 %v12760_v44, %v1882_v46  ;;  %v1983_v26 = vmul.f32 1.442695, %v1936_v54 }
 0x35b   : > { %2027 = vadd.xlane.f32.xlu1 %v12869_v55  ;;  %v1884_v1 = vpop.xlane.xlu1 %1883  ;;  %v12872_v3 = vpop.eup %10819 }
 0x35c   : > { %v1934_v37 = vsub.f32 %v12764_v7, %v1884_v1  ;;  %v12877_v15 = vpop.eup %10821  ;;  %v1977_v7 = vmul.f32 1.442695, %v1933_v52 }
 0x35d   : > { %2031 = vadd.xlane.f32.xlu0 %v12872_v3 }
 0x35e   : > { %v1979_v22 = vmul.f32 1.442695, %v1934_v37 }
 0x35f   : > { %2037 = vadd.xlane.f32.xlu1 %v12877_v15 }
 0x360   : > { %10829 = vpow2.f32 %v1979_v22  ;;  %v12881_v27 = vpop.eup %10823 }
 0x361   : > { %10831 = vpow2.f32 %v1981_v49  ;;  %v12885_v60 = vpop.eup %10825 }
 0x362   : > { %10833 = vpow2.f32 %v1977_v7  ;;  %v12888_v42 = vpop.eup %10827 }
 0x363   : > { %2033 = vadd.xlane.f32.xlu1 %v12881_v27  ;;  %10835 = vpow2.f32 %v1983_v26 }
 0x367   : > { %2039 = vadd.xlane.f32.xlu1 %v12885_v60 }
 0x36a   : > { %v12890_v32 = vpop.eup %10829 }
 0x36b   : > { %2035 = vadd.xlane.f32.xlu1 %v12888_v42  ;;  %2043 = vadd.xlane.f32.xlu0 %v12890_v32  ;;  %v12894_v44 = vpop.eup %10831 }
 0x36c   : > { %v12897_v11 = vpop.eup %10833 }
 0x36d   : > { %v12900_v13 = vpop.eup %10835 }
 0x36f   : > { %2045 = vadd.xlane.f32.xlu1 %v12894_v44 }
 0x373   : > { %2041 = vadd.xlane.f32.xlu1 %v12897_v11 }
 0x377   : > { %2047 = vadd.xlane.f32.xlu1 %v12900_v13 }
 0x378   : > { %v12903_v43 = vpop.f32.mrb[64].mxu0 }
 0x379   : > { %18304 = vst [vmem:[#allocation64_spill] sm:$0xff] %v12903_v43  ;;  %v12905_v18 = vpop.f32.mrb[65].mxu0  ;;  %v2390_v43 = vpop.permute.xlu1 %2389 }
 0x37a   : > { %18305 = vst [vmem:[#allocation65_spill] sm:$0xff] %v12905_v18  ;;  %v12907_v45 = vpop.f32.mrb[66].mxu0 }
 0x37b   : > { %18306 = vst [vmem:[#allocation66_spill] sm:$0xff] %v12907_v45  ;;  %v12909_v40 = vpop.f32.mrb[67].mxu0 }
 0x37e   : > { %v1894_v1 = vpop.xlane.xlu0 %1893 }
 0x37f   : > { %v1939_v9 = vsub.f32 %v12770_v34, %v1894_v1 }
 0x380   : > { %v12912_v37 = vpop.f32.mrb[68].mxu0 }
 0x381   : > { %18307 = vst [vmem:[#allocation67_spill] sm:$0xff] %v12912_v37  ;;  %v1989_v46 = vmul.f32 1.442695, %v1939_v9  ;;  %v12914_v22 = vpop.f32.mrb[69].mxu0 }
 0x382   : > { %18308 = vst [vmem:[#allocation68_spill] sm:$0xff] %v12914_v22  ;;  %v1890_v49 = vpop.xlane.xlu0 %1889  ;;  %v12916_v52 = vpop.f32.mrb[70].mxu0 }
 0x383   : > { %18309 = vst [vmem:[#allocation69_spill] sm:$0xff] %v12916_v52  ;;  %10837 = vpow2.f32 %v1989_v46  ;;  %v1937_v54 = vsub.f32 %v12774_v0, %v1890_v49  ;;  %v12919_v7 = vpop.f32.mrb[71].mxu0 }
 0x385   : > { %v1985_v26 = vmul.f32 1.442695, %v1937_v54 }
 0x386   : > { %v2388_v45 = vpop.permute.xlu0 %2387 }
 0x387   : > { %10839 = vpow2.f32 %v1985_v26  ;;  %9881 = vmatprep.mubr.msk.bf16.mxu0 %vm1566_vm0, %v2388_v45 }
 0x388   : > { %9882 = vmatmul.mubr.msk.bf16.gmra.mrb[72].mxu0 %vm1566_vm0, %v2390_v43 }
 0x38d   : > { %v12923_v34 = vpop.eup %10837 }
 0x38e   : > { %18310 = vst [vmem:[#allocation70_spill] sm:$0xff] %v12923_v34  ;;  %2053 = vadd.xlane.f32.xlu0 %v12923_v34 }
 0x390   : > { %v1896_v1 = vpop.xlane.xlu1 %1895 }
 0x391   : > { %v12926_v9 = vpop.eup %10839  ;;  %v1940_v46 = vsub.f32 %v12778_v5, %v1896_v1 }
 0x392   : > { %18311 = vst [vmem:[#allocation71_spill] sm:$0xff] %v12926_v9  ;;  %2049 = vadd.xlane.f32.xlu1 %v12926_v9 }
 0x393   : > { %v1991_v0 = vmul.f32 1.442695, %v1940_v46 }
 0x394   : > { %v1892_v49 = vpop.xlane.xlu1 %1891 }
 0x395   : > { %10841 = vpow2.f32 %v1991_v0  ;;  %v1938_v54 = vsub.f32 %v12782_v12, %v1892_v49 }
 0x397   : > { %v1987_v26 = vmul.f32 1.442695, %v1938_v54 }
 0x398   : > { %v1904_v43 = vpop.xlane.xlu1 %1903 }
 0x399   : > { %10843 = vpow2.f32 %v1987_v26  ;;  %v1944_v18 = vsub.f32 %v12786_v4, %v1904_v43 }
 0x39c   : > { %v1900_v5 = vpop.xlane.xlu1 %1899 }
 0x39d   : > { %v1942_v0 = vsub.f32 %v12792_v31, %v1900_v5 }
 0x39f   : > { %v12931_v45 = vpop.eup %10841  ;;  %v1995_v12 = vmul.f32 1.442695, %v1942_v0 }
 0x3a0   : > { %18312 = vst [vmem:[#allocation72_spill] sm:$0xff] %v12931_v45  ;;  %2055 = vadd.xlane.f32.xlu0 %v12931_v45  ;;  %v1912_v1 = vpop.xlane.xlu1 %1911  ;;  %v1999_v45 = vmul.f32 1.442695, %v1944_v18 }
 0x3a1   : > { %10845 = vpow2.f32 %v1995_v12  ;;  %v1948_v4 = vsub.f32 %v12796_v10, %v1912_v1 }
 0x3a3   : > { %v12934_v37 = vpop.eup %10843  ;;  %2391 = vrot.lane.b32.xlu1 %v12419_v17, %s11695_s15 }
 0x3a4   : > { %18313 = vst [vmem:[#allocation73_spill] sm:$0xff] %v12934_v37  ;;  %2051 = vadd.xlane.f32.xlu0 %v12934_v37  ;;  %v1908_v46 = vpop.xlane.xlu1 %1907 }
 0x3a5   : > { %v1946_v18 = vsub.f32 %v12800_v51, %v1908_v46 }
 0x3a7   : > { %v2003_v10 = vmul.f32 1.442695, %v1946_v18 }
 0x3a8   : > { %v12940_v49 = vpop.xlane.xlu1 %1917 }
 0x3ab   : > { %v12952_v43 = vpop.eup %10845 }
 0x3ac   : > { %v12945_v37 = vpop.xlane.xlu1 %1913 }
 0x3b0   : > { %v12948_v0 = vpop.xlane.xlu1 %1919 }
 0x3b7   : > { %v1902_v54 = vpop.xlane.xlu0 %1901 }
 0x3b8   : > { %v1943_v26 = vsub.f32 %v12816_v16, %v1902_v54 }
 0x3ba   : > { %v1997_v22 = vmul.f32 1.442695, %v1943_v26 }
 0x3bb   : > { %v1898_v34 = vpop.xlane.xlu0 %1897 }
 0x3bc   : > { %10847 = vpow2.f32 %v1997_v22  ;;  %v1941_v17 = vsub.f32 %v12820_v29, %v1898_v34 }
 0x3be   : > { %v1993_v9 = vmul.f32 1.442695, %v1941_v17 }
 0x3bf   : > { %v1910_v52 = vpop.xlane.xlu0 %1909 }
 0x3c0   : > { %10849 = vpow2.f32 %v1993_v9  ;;  %v1947_v31 = vsub.f32 %v12824_v61, %v1910_v52  ;;  %v2007_v61 = vmul.f32 1.442695, %v1948_v4  ;;  %v1916_v52 = vpop.xlane.xlu1 %1915 }
 0x3c1   : > { %10851 = vpow2.f32 %v1999_v45 }
 0x3c2   : > { %v2005_v5 = vmul.f32 1.442695, %v1947_v31 }
 0x3c3   : > { %v1906_v16 = vpop.xlane.xlu0 %1905 }
 0x3c4   : > { %10853 = vpow2.f32 %v2005_v5  ;;  %v1945_v22 = vsub.f32 %v12830_v47, %v1906_v16  ;;  %v1950_v47 = vsub.f32 %v12812_v36, %v1916_v52 }
 0x3c6   : > { %v12954_v29 = vpop.eup %10847  ;;  %v2001_v17 = vmul.f32 1.442695, %v1945_v22  ;;  %v2011_v51 = vmul.f32 1.442695, %v1950_v47 }
 0x3c7   : > { %2061 = vadd.xlane.f32.xlu0 %v12954_v29  ;;  %2059 = vadd.xlane.f32.xlu1 %v12952_v43 }
 0x3c8   : > { %10855 = vpow2.f32 %v2001_v17 }
 0x3c9   : > { %10857 = vpow2.f32 %v2007_v61 }
 0x3ca   : > { %v12959_v34 = vpop.eup %10849  ;;  %10859 = vpow2.f32 %v2003_v10 }
 0x3cb   : > { %2057 = vadd.xlane.f32.xlu0 %v12959_v34  ;;  %v12963_v9 = vpop.eup %10851  ;;  %10861 = vpow2.f32 %v2011_v51 }
 0x3ce   : > { %v12965_v45 = vpop.eup %10853 }
 0x3cf   : > { %2063 = vadd.xlane.f32.xlu0 %v12963_v9  ;;  %2069 = vadd.xlane.f32.xlu1 %v12965_v45 }
 0x3d2   : > { %v12969_v1 = vpop.eup %10855 }
 0x3d3   : > { %2065 = vadd.xlane.f32.xlu1 %v12969_v1  ;;  %v12972_v46 = vpop.eup %10857 }
 0x3d4   : > { %v12975_v36 = vpop.eup %10859 }
 0x3d5   : > { %v12978_v26 = vpop.eup %10861 }
 0x3d7   : > { %2071 = vadd.xlane.f32.xlu1 %v12972_v46 }
 0x3da   : > { %v2022_v12 = vpop.xlane.xlu0 %2021 }
 0x3db   : > { %2067 = vadd.xlane.f32.xlu1 %v12975_v36 }
 0x3dc   : > { %v2024_v54 = vpop.xlane.xlu1 %2023 }
 0x3dd   : > { %10863 = vrcp.f32 %v2024_v54 }
 0x3de   : > { %v2018_v31 = vpop.xlane.xlu0 %2017 }
 0x3df   : > { %10865 = vrcp.f32 %v2018_v31  ;;  %2075 = vadd.xlane.f32.xlu1 %v12978_v26 }
 0x3e0   : > { %10867 = vrcp.f32 %v2022_v12  ;;  %v2020_v5 = vpop.xlane.xlu1 %2019 }
 0x3e1   : > { %10869 = vrcp.f32 %v2020_v5  ;;  %v1951_v5 = vsub.f32 %v12803_v6, %v12940_v49 }
 0x3e2   : > { %v2030_v16 = vpop.xlane.xlu0 %2029 }
 0x3e5   : > { %2608 = vrot.lane.b32.xlu0 %v12513_v21, %s11695_s15 }
 0x3e6   : > { %v2026_v4 = vpop.xlane.xlu0 %2025 }
 0x3e7   : > { %10871 = vrcp.f32 %v2026_v4  ;;  %v10864_v22 = vpop.eup %10863 }
 0x3e8   : > { %10873 = vrcp.f32 %v2030_v16  ;;  %v2028_v17 = vpop.xlane.xlu1 %2027  ;;  %v2116_v47 = vmul.f32 %v10864_v22, %v12850_v19  ;;  %v2013_v22 = vmul.f32 1.442695, %v1951_v5 }
 0x3e9   : > { %v10866_v61 = vpop.eup %10865  ;;  %10875 = vrcp.f32 %v2028_v17 }
 0x3ea   : > { %v10868_v18 = vpop.eup %10867  ;;  %v2032_v52 = vpop.xlane.xlu0 %2031  ;;  %v2113_v12 = vmul.f32 %v10866_v61, %v12854_v38  ;;  %v1949_v61 = vsub.f32 %v12806_v53, %v12945_v37 }
 0x3eb   : > { %v10870_v10 = vpop.eup %10869  ;;  %10877 = vrcp.f32 %v2032_v52  ;;  %v2115_v31 = vmul.f32 %v10868_v18, %v12846_v63 }
 0x3ec   : > { %v2038_v51 = vpop.xlane.xlu1 %2037  ;;  %v2114_v54 = vmul.f32 %v10870_v10, %v12857_v24  ;;  %10879 = vpow2.f32 %v2013_v22 }
 0x3ed   : > { %v2146_v4 = vpack.c.bf16 %v2116_v47, %v2115_v31 }
 0x3ee   : > { %v2145_v16 = vpack.c.bf16 %v2114_v54, %v2113_v12 }
 0x3f0   : > { %2610 = vrot.lane.b32.xlu1 %v12531_v35, %s11695_s15  ;;  %9809 = vmatprep.mubr.bf16.mxu1 %v2145_v16  ;;  %v2034_v17 = vpop.xlane.xlu1 %2033 }
 0x3f1   : > { %v10872_v21 = vpop.eup %10871  ;;  %9810 = vmatmul.mubr.bf16.vlgmr.msra.gmra.mrb[64].mxu1 %v2146_v4 }
 0x3f2   : > { %v10874_v19 = vpop.eup %10873  ;;  %9826 = vmatpush3.bf16.msra.mxu1 %v12601_v2  ;;  %v2117_v63 = vmul.f32 %v10872_v21, %v12866_v33  ;;  %v1952_v21 = vsub.f32 %v12809_v28, %v12948_v0 }
 0x3f3   : > { %v10876_v38 = vpop.eup %10875  ;;  %9827 = vmatprep.subr.bf16.mxu1 %v12598_v30  ;;  %v2119_v52 = vmul.f32 %v10874_v19, %v12861_v58 }
 0x3f4   : > { %2574 = vrot.lane.b32.xlu1 %v12449_v25, %s11695_s15  ;;  %v2040_v6 = vpop.xlane.xlu1 %2039  ;;  %v2118_v24 = vmul.f32 %v10876_v38, %v12869_v55  ;;  %v2009_v55 = vmul.f32 1.442695, %v1949_v61  ;;  %v2015_v58 = vmul.f32 1.442695, %v1952_v21 }
 0x3f5   : > { %v10878_v49 = vpop.eup %10877  ;;  %10881 = vrcp.f32 %v2040_v6 }
 0x3f6   : > { %9828 = vmatpush3.bf16.msra.mxu1 %v12598_v30  ;;  %v2147_v18 = vpack.c.bf16 %v2118_v24, %v2117_v63  ;;  %v2120_v10 = vmul.f32 %v10878_v49, %v12872_v3  ;;  %10883 = vrcp.f32 %v2034_v17  ;;  %v13013_v37 = vpop.eup %10879 }
 0x3f7   : > { %9829 = vmatprep.subr.bf16.mxu1 %v12606_v20  ;;  %10885 = vrcp.f32 %v2038_v51 }
 0x3f8   : > { %2578 = vrot.lane.b32.xlu1 %v12473_v62, %s11695_s15  ;;  %9813 = vmatprep.mubr.bf16.mxu1 %v2147_v18  ;;  %v2036_v53 = vpop.xlane.xlu1 %2035  ;;  %v2148_v33 = vpack.c.bf16 %v2120_v10, %v2119_v52  ;;  %v2044_v3 = vpop.xlane.xlu0 %2043 }
 0x3f9   : > { %10887 = vrcp.f32 %v2036_v53 }
 0x3fa   : > { %9830 = vmatpush3.bf16.msra.mxu1 %v12606_v20  ;;  %10889 = vpow2.f32 %v2009_v55  ;;  %v18318_v55 = vld [vmem:[#allocation22_spill] sm:$0xff] }
 0x3fb   : > { %9814 = vmatmul.mubr.bf16.gmra.mrb[68].mxu1 %v2148_v33  ;;  %9831 = vmatprep.subr.bf16.mxu1 %v12604_v57  ;;  %10891 = vrcp.f32 %v2044_v3  ;;  %v18319_v3 = vld [vmem:[#allocation26_spill] sm:$0xff] }
 0x3fc   : > { %2582 = vrot.lane.b32.xlu1 %v12495_v14, %s11695_s15  ;;  %v2046_v28 = vpop.xlane.xlu1 %2045  ;;  %10893 = vpow2.f32 %v2015_v58 }
 0x3fe   : > { %9832 = vmatpush3.bf16.msra.mxu1 %v12604_v57 }
 0x3ff   : > { %9833 = vmatprep.subr.bf16.mxu1 %v12610_v23  ;;  %v10882_v47 = vpop.eup %10881 }
 0x400   : > { %2586 = vrot.lane.b32.xlu1 %v12529_v8, %s11695_s15  ;;  %v2042_v0 = vpop.xlane.xlu1 %2041  ;;  %v10884_v51 = vpop.eup %10883  ;;  %v2124_v5 = vmul.f32 %v10882_v47, %v12885_v60 }
 0x401   : > { %10895 = vrcp.f32 %v2042_v0  ;;  %v10886_v12 = vpop.eup %10885  ;;  %v2121_v16 = vmul.f32 %v10884_v51, %v12881_v27  ;;  %v18321_v51 = vld [vmem:[#allocation72_spill] sm:$0xff] }
 0x402   : > { %9834 = vmatpush3.bf16.msra.mxu1 %v12610_v23  ;;  %10897 = vrcp.f32 %v2046_v28  ;;  %v2123_v17 = vmul.f32 %v10886_v12, %v12877_v15 }
 0x403   : > { %9835 = vmatprep.subr.bf16.mxu1 %v12608_v48  ;;  %v10888_v54 = vpop.eup %10887 }
 0x404   : > { %2077 = vadd.xlane.f32.xlu0 %v13013_v37  ;;  %v2048_v31 = vpop.xlane.xlu1 %2047  ;;  %v2122_v4 = vmul.f32 %v10888_v54, %v12888_v42  ;;  %v13025_v19 = vpop.eup %10889  ;;  %v2150_v38 = vpack.c.bf16 %v2124_v5, %v2123_v17  ;;  %v18314_v42 = vld [vmem:[#allocation48_spill] sm:$0xff]  ;;  %v18322_v54 = vld [vmem:[#allocation71_spill] sm:$0xff]  ;;  %v18323_v5 = vld [vmem:[#allocation73_spill] sm:$0xff] }
 0x405   : > { %10899 = vrcp.f32 %v2048_v31  ;;  %v10892_v6 = vpop.eup %10891 }
 0x406   : > { %9836 = vmatpush3.bf16.msra.mxu1 %v12608_v48  ;;  %v2149_v22 = vpack.c.bf16 %v2122_v4, %v2121_v16  ;;  %v13029_v60 = vpop.eup %10893  ;;  %v2126_v63 = vmul.f32 %v10892_v6, %v12890_v32  ;;  %v18315_v32 = vld [vmem:[#allocation16_spill] sm:$0xff]  ;;  %v18324_v4 = vld [vmem:[#allocation70_spill] sm:$0xff]  ;;  %v2637_v6 = vsel %vm1566_vm0, %v12827_v50, 0 }
 0x407   : > { %9837 = vmatprep.subr.bf16.mxu1 %v12614_v39 }
 0x408   : > { %2073 = vadd.xlane.f32.xlu0 %v13025_v19  ;;  %9817 = vmatprep.mubr.bf16.mxu1 %v2149_v22 }
 0x409   : > { %9818 = vmatmul.mubr.bf16.gmra.mrb[72].mxu1 %v2150_v38 }
 0x40a   : > { %9838 = vmatpush3.bf16.msra.mxu1 %v12614_v39 }
 0x40b   : > { %v10896_v27 = vpop.eup %10895  ;;  %9839 = vmatprep.subr.bf16.mxu1 %v18314_v42 }
 0x40c   : > { %2079 = vadd.xlane.f32.xlu0 %v13029_v60  ;;  %v2125_v15 = vmul.f32 %v10896_v27, %v12897_v11  ;;  %v10898_v24 = vpop.eup %10897  ;;  %v13043_v11 = vadd.f32 %v12909_v40, %v12660_v41  ;;  %v18317_v41 = vld [vmem:[#allocation69_spill] sm:$0xff] }
 0x40d   : > { %v2127_v18 = vmul.f32 %v10898_v24, %v12894_v44  ;;  %v13051_v44 = vadd.f32 %v12919_v7, %v12696_v59  ;;  %v13058_v40 = vadd.f32 %v18317_v41, %v12678_v56  ;;  %v18320_v7 = vld [vmem:[#allocation30_spill] sm:$0xff]  ;;  %v18325_v27 = vld [vmem:[#allocation61_spill] sm:$0xff] }
 0x40e   : > { %v2151_v49 = vpack.c.bf16 %v2126_v63, %v2125_v15  ;;  %9840 = vmatpush3.bf16.msra.mxu1 %v18314_v42  ;;  %v2640_v15 = vsel %vm1566_vm0, %v18325_v27, 0  ;;  %v18326_v63 = vld [vmem:[#allocation62_spill] sm:$0xff]  ;;  %v18332_v41 = vld [vmem:[#allocation53_spill] sm:$0xff] }
 0x40f   : > { %v10900_v61 = vpop.eup %10899  ;;  %10329 = vmatprep.subr.msk.bf16.mxu1 %vm1566_vm0, %v12827_v50  ;;  %v18327_v24 = vld [vmem:[#allocation54_spill] sm:$0xff]  ;;  %v2643_v50 = vsel %vm1566_vm0, %v18326_v63, 0 }
 0x410   : > { %9821 = vmatprep.mubr.bf16.mxu1 %v2151_v49  ;;  %v2128_v52 = vmul.f32 %v10900_v61, %v12900_v13  ;;  %v18316_v13 = vld [vmem:[#allocation18_spill] sm:$0xff]  ;;  %v18328_v49 = vld [vmem:[#allocation65_spill] sm:$0xff] }
 0x411   : > { %v13081_v61 = vadd.f32 %v18328_v49, %v18327_v24 }
 0x412   : > { %v2152_v10 = vpack.c.bf16 %v2128_v52, %v2127_v18  ;;  %v18329_v18 = vld [vmem:[#allocation52_spill] sm:$0xff] }
 0x413   : > { %v18330_v52 = vld [vmem:[#allocation64_spill] sm:$0xff] }
 0x414   : > { %9822 = vmatmul.mubr.bf16.gmra.mrb[76].mxu1 %v2152_v10  ;;  %v13088_v10 = vadd.f32 %v18330_v52, %v18329_v18  ;;  %v18340_v18 = vld [vmem:[#allocation59_spill] sm:$0xff] }
 0x41b   : > { %v2054_v33 = vpop.xlane.xlu0 %2053 }
 0x41f   : > { %v2050_v21 = vpop.xlane.xlu1 %2049 }
 0x422   : > { %2393 = vrot.lane.b32.xlu0 %v18315_v32, %s11695_s15 }
 0x423   : > { %v2392_v53 = vpop.permute.xlu1 %2391 }
 0x424   : > { %2759 = vmax.xlane.f32.xlu1 %v13043_v11  ;;  %9885 = vmatprep.mubr.msk.bf16.mxu0 %vm1566_vm0, %v2392_v53  ;;  %v18331_v53 = vld [vmem:[#allocation63_spill] sm:$0xff] }
 0x426   : > { %2572 = vrot.lane.b32.xlu0 %v18316_v13, %s11695_s15 }
 0x428   : > { %2767 = vmax.xlane.f32.xlu1 %v13051_v44 }
 0x42a   : > { %2576 = vrot.lane.b32.xlu0 %v18318_v55, %s11695_s15 }
 0x42c   : > { %2771 = vmax.xlane.f32.xlu1 %v13058_v40 }
 0x42d   : > { %v2056_v58 = vpop.xlane.xlu0 %2055 }
 0x42e   : > { %2580 = vrot.lane.b32.xlu0 %v18319_v3, %s11695_s15  ;;  %10901 = vrcp.f32 %v2056_v58  ;;  %v18333_v58 = vld [vmem:[#allocation66_spill] sm:$0xff] }
 0x42f   : > { %10903 = vrcp.f32 %v2050_v21 }
 0x430   : > { %10905 = vrcp.f32 %v2054_v33 }
 0x431   : > { %v2052_v59 = vpop.xlane.xlu0 %2051 }
 0x432   : > { %10907 = vrcp.f32 %v2052_v59  ;;  %2584 = vrot.lane.b32.xlu0 %v18320_v7, %s11695_s15  ;;  %v13095_v59 = vadd.f32 %v18333_v58, %v18332_v41 }
 0x438   : > { %v10902_v28 = vpop.eup %10901 }
 0x439   : > { %v10904_v56 = vpop.eup %10903  ;;  %v2132_v12 = vmul.f32 %v10902_v28, %v18321_v51 }
 0x43a   : > { %v10906_v0 = vpop.eup %10905  ;;  %v2129_v31 = vmul.f32 %v10904_v56, %v18322_v54  ;;  %v2646_v56 = vsel %vm1566_vm0, %v18331_v53, 0 }
 0x43b   : > { %v2131_v17 = vmul.f32 %v10906_v0, %v18324_v4  ;;  %v18334_v0 = vld [vmem:[#allocation56_spill] sm:$0xff] }
 0x43c   : > { %v10908_v47 = vpop.eup %10907 }
 0x43d   : > { %v2130_v16 = vmul.f32 %v10908_v47, %v18323_v5  ;;  %v2154_v38 = vpack.c.bf16 %v2132_v12, %v2131_v17  ;;  %v18335_v47 = vld [vmem:[#allocation68_spill] sm:$0xff]  ;;  %v18336_v5 = vld [vmem:[#allocation50_spill] sm:$0xff] }
 0x43e   : > { %v13102_v51 = vadd.f32 %v18335_v47, %v18334_v0  ;;  %v2649_v49 = vsel %vm1566_vm0, %v18336_v5, 0 }
 0x43f   : > { %v2153_v22 = vpack.c.bf16 %v2130_v16, %v2129_v31 }
 0x441   : > { %9841 = vmatprep.mubr.bf16.mxu1 %v2153_v22  ;;  %v18337_v22 = vld [vmem:[#allocation55_spill] sm:$0xff] }
 0x442   : > { %9842 = vmatmul.mubr.bf16.vlgmr.msra.gmra.mrb[80].mxu1 %v2154_v38  ;;  %v18338_v38 = vld [vmem:[#allocation67_spill] sm:$0xff] }
 0x443   : > { %9890 = vmatpush3.bf16.xpose.msra.mxu1 %v2637_v6  ;;  %v13109_v6 = vadd.f32 %v18338_v38, %v18337_v22 }
 0x444   : > { %10330 = vmatprep.subr.msk.bf16.mxu1 %vm1566_vm0, %v18325_v27  ;;  %v18339_v27 = vld [vmem:[#allocation60_spill] sm:$0xff] }
 0x44b   : > { %9892 = vmatpush3.bf16.xpose.msra.mxu1 %v2640_v15 }
 0x44c   : > { %10331 = vmatprep.subr.msk.bf16.mxu1 %vm1566_vm0, %v18326_v63 }
 0x451   : > { %2757 = vmax.xlane.f32.xlu0 %v13081_v61 }
 0x453   : > { %9894 = vmatpush3.bf16.xpose.msra.mxu1 %v2643_v50 }
 0x454   : > { %v2062_v21 = vpop.xlane.xlu0 %2061  ;;  %10332 = vmatprep.subr.msk.bf16.mxu1 %vm1566_vm0, %v18331_v53  ;;  %v2060_v33 = vpop.xlane.xlu1 %2059 }
 0x455   : > { %2761 = vmax.xlane.f32.xlu0 %v13088_v10  ;;  %10909 = vrcp.f32 %v2060_v33  ;;  %v18342_v33 = vld [vmem:[#allocation51_spill] sm:$0xff] }
 0x458   : > { %v2058_v28 = vpop.xlane.xlu0 %2057 }
 0x459   : > { %10911 = vrcp.f32 %v2058_v28  ;;  %2763 = vmax.xlane.f32.xlu0 %v13095_v59 }
 0x45a   : > { %10913 = vrcp.f32 %v2062_v21  ;;  %v18341_v21 = vld [vmem:[#allocation58_spill] sm:$0xff] }
 0x45b   : > { %v9883_v12 = vpop.f32.mrb[72].mxu0  ;;  %9896 = vmatpush3.bf16.xpose.msra.mxu1 %v2646_v56 }
 0x45c   : > { %v2533_v54 = vpop.f32.mrb[73].mxu0  ;;  %v2064_v31 = vpop.xlane.xlu0 %2063  ;;  %10333 = vmatprep.subr.msk.bf16.mxu1 %vm1566_vm0, %v18336_v5 }
 0x45d   : > { %10915 = vrcp.f32 %v2064_v31  ;;  %v2070_v16 = vpop.xlane.xlu1 %2069  ;;  %v9884_v4 = vpop.f32.mrb[74].mxu0  ;;  %2765 = vmax.xlane.f32.xlu0 %v13102_v51  ;;  %v13119_v52 = vadd.f32 %v2533_v54, %v18340_v18  ;;  %v18343_v54 = vld [vmem:[#allocation57_spill] sm:$0xff] }
 0x45e   : > { %v2536_v17 = vpop.f32.mrb[75].mxu0  ;;  %v13122_v53 = vadd.f32 %v9884_v4, %v18341_v21  ;;  %v13131_v31 = vadd.f32 %v9883_v12, %v18343_v54  ;;  %v2652_v4 = vsel %vm1566_vm0, %v18342_v33, 0 }
 0x45f   : > { %v13112_v15 = vadd.f32 %v2536_v17, %v18339_v27  ;;  %v10910_v63 = vpop.eup %10909 }
 0x460   : > { %v2134_v58 = vmul.f32 %v10910_v63, %v12952_v43  ;;  %v2609_v22 = vpop.permute.xlu0 %2608 }
 0x461   : > { %v2066_v24 = vpop.xlane.xlu1 %2065  ;;  %2769 = vmax.xlane.f32.xlu0 %v13109_v6  ;;  %2775 = vmax.xlane.f32.xlu1 %v13112_v15 }
 0x463   : > { %v10912_v50 = vpop.eup %10911  ;;  %9898 = vmatpush3.bf16.xpose.msra.mxu1 %v2649_v49 }
 0x464   : > { %10334 = vmatprep.subr.msk.bf16.mxu1 %vm1566_vm0, %v18342_v33  ;;  %v2133_v41 = vmul.f32 %v10912_v50, %v12959_v34  ;;  %v10914_v28 = vpop.eup %10913 }
 0x465   : > { %v2072_v56 = vpop.xlane.xlu1 %2071  ;;  %2773 = vmax.xlane.f32.xlu0 %v13119_v52  ;;  %2779 = vmax.xlane.f32.xlu1 %v13122_v53  ;;  %v2135_v5 = vmul.f32 %v10914_v28, %v12954_v29  ;;  %v2655_v29 = vsel %vm1566_vm0, %v2609_v22, 0 }
 0x466   : > { %v2155_v0 = vpack.c.bf16 %v2134_v58, %v2133_v41  ;;  %10917 = vrcp.f32 %v2072_v56 }
 0x467   : > { %v10916_v47 = vpop.eup %10915  ;;  %10919 = vrcp.f32 %v2066_v24 }
 0x468   : > { %9845 = vmatprep.mubr.bf16.mxu1 %v2155_v0  ;;  %v2136_v34 = vmul.f32 %v10916_v47, %v12963_v9  ;;  %10921 = vrcp.f32 %v2070_v16 }
 0x469   : > { %v2068_v43 = vpop.xlane.xlu1 %2067  ;;  %2777 = vmax.xlane.f32.xlu0 %v13131_v31 }
 0x46a   : > { %10923 = vrcp.f32 %v2068_v43  ;;  %v2156_v17 = vpack.c.bf16 %v2136_v34, %v2135_v5 }
 0x46b   : > { %9900 = vmatpush3.bf16.xpose.msra.mxu1 %v2652_v4 }
 0x46c   : > { %9846 = vmatmul.mubr.bf16.gmra.mrb[84].mxu1 %v2156_v17  ;;  %10335 = vmatprep.subr.msk.bf16.mxu1 %vm1566_vm0, %v2609_v22 }
 0x46d   : > { %v2076_v12 = vpop.xlane.xlu1 %2075 }
 0x46e   : > { %10925 = vrcp.f32 %v2076_v12 }
 0x470   : > { %v10918_v38 = vpop.eup %10917 }
 0x471   : > { %v10920_v27 = vpop.eup %10919  ;;  %v2611_v16 = vpop.permute.xlu1 %2610  ;;  %v2140_v24 = vmul.f32 %v10918_v38, %v12972_v46 }
 0x472   : > { %v10922_v9 = vpop.eup %10921  ;;  %v2137_v49 = vmul.f32 %v10920_v27, %v12969_v1  ;;  %v2658_v41 = vsel %vm1566_vm0, %v2611_v16, 0 }
 0x473   : > { %9902 = vmatpush3.bf16.xpose.msra.mxu1 %v2655_v29  ;;  %v2139_v18 = vmul.f32 %v10922_v9, %v12965_v45 }
 0x474   : > { %v10924_v63 = vpop.eup %10923  ;;  %10336 = vmatprep.subr.msk.bf16.mxu1 %vm1566_vm0, %v2611_v16 }
 0x475   : > { %v2138_v50 = vmul.f32 %v10924_v63, %v12975_v36  ;;  %v2158_v33 = vpack.c.bf16 %v2140_v24, %v2139_v18  ;;  %v2575_v22 = vpop.permute.xlu1 %2574 }
 0x477   : > { %v2157_v21 = vpack.c.bf16 %v2138_v50, %v2137_v49 }
 0x478   : > { %v10926_v1 = vpop.eup %10925 }
 0x479   : > { %9849 = vmatprep.mubr.bf16.mxu1 %v2157_v21  ;;  %v2142_v0 = vmul.f32 %v10926_v1, %v12978_v26  ;;  %v2579_v26 = vpop.permute.xlu1 %2578 }
 0x47a   : > { %9850 = vmatmul.mubr.bf16.gmra.mrb[88].mxu1 %v2158_v33 }
 0x47b   : > { %9904 = vmatpush3.bf16.xpose.msra.mxu1 %v2658_v41 }
 0x491   : > { %v2078_v58 = vpop.xlane.xlu0 %2077 }
 0x495   : > { %v2074_v28 = vpop.xlane.xlu0 %2073 }
 0x496   : > { %10927 = vrcp.f32 %v2074_v28 }
 0x497   : > { %10929 = vrcp.f32 %v2078_v58 }
 0x499   : > { %v2080_v56 = vpop.xlane.xlu0 %2079 }
 0x49a   : > { %10931 = vrcp.f32 %v2080_v56 }
 0x49d   : > { %v2394_v46 = vpop.permute.xlu0 %2393 }
 0x49e   : > { %9886 = vmatmul.mubr.msk.bf16.gmra.mrb[76].mxu0 %vm1566_vm0, %v2394_v46 }
 0x4a0   : > { %v10928_v36 = vpop.eup %10927 }
 0x4a1   : > { %v2141_v45 = vmul.f32 %v10928_v36, %v13025_v19  ;;  %v10930_v47 = vpop.eup %10929  ;;  %v2573_v17 = vpop.permute.xlu0 %2572 }
 0x4a2   : > { %v2143_v34 = vmul.f32 %v10930_v47, %v13013_v37  ;;  %v2583_v37 = vpop.permute.xlu1 %2582 }
 0x4a3   : > { %v2159_v54 = vpack.c.bf16 %v2142_v0, %v2141_v45 }
 0x4a4   : > { %v10932_v5 = vpop.eup %10931 }
 0x4a5   : > { %9853 = vmatprep.mubr.bf16.mxu1 %v2159_v54  ;;  %v2144_v43 = vmul.f32 %v10932_v5, %v13029_v60  ;;  %v2577_v12 = vpop.permute.xlu0 %2576 }
 0x4a6   : > { %v2587_v16 = vpop.permute.xlu1 %2586 }
 0x4a7   : > { %v2160_v4 = vpack.c.bf16 %v2144_v43, %v2143_v34 }
 0x4a9   : > { %9854 = vmatmul.mubr.bf16.gmra.mrb[92].mxu1 %v2160_v4  ;;  %v2581_v19 = vpop.permute.xlu0 %2580 }
 0x4aa   : > { %9905 = vmatprep.mubr.msk.bf16.mxu1 %vm1566_vm0, %v2573_v17 }
 0x4ad   : > { %v2585_v38 = vpop.permute.xlu0 %2584 }
 0x4b1   : > { %9906 = vmatmul.mubr.msk.bf16.vlgmr.msra.gmra.mrb[96].mxu1 %vm1566_vm0, %v2575_v22 }
 0x4b2   : > { %9909 = vmatprep.mubr.msk.bf16.mxu1 %vm1566_vm0, %v2577_v12  ;;  %v2367_v12 = vld [vmem:[%s17884_s1 + $0x60] sm:$0xff] }
 0x4b9   : > { %9910 = vmatmul.mubr.msk.bf16.gmra.mrb[100].mxu1 %vm1566_vm0, %v2579_v26 }
 0x4ba   : > { %9913 = vmatprep.mubr.msk.bf16.mxu1 %vm1566_vm0, %v2581_v19 }
 0x4c1   : > { %9914 = vmatmul.mubr.msk.bf16.gmra.mrb[104].mxu1 %vm1566_vm0, %v2583_v37  ;;  %v2368_v37 = vld [vmem:[%s17884_s1 + $0x68] sm:$0xff] }
 0x4c2   : > { %9917 = vmatprep.mubr.msk.bf16.mxu1 %vm1566_vm0, %v2585_v38 }
 0x4c4   : > { %v13158_v60 = vpop.f32.mrb[64].mxu1 }
 0x4c5   : > { %18344 = vst [vmem:[#allocation69_spill] sm:$0xff] %v13158_v60  ;;  %v13160_v27 = vpop.f32.mrb[65].mxu1 }
 0x4c6   : > { %18345 = vst [vmem:[#allocation72_spill] sm:$0xff] %v13160_v27  ;;  %v13162_v29 = vpop.f32.mrb[66].mxu1 }
 0x4c7   : > { %18346 = vst [vmem:[#allocation71_spill] sm:$0xff] %v13162_v29  ;;  %v13164_v9 = vpop.f32.mrb[67].mxu1 }
 0x4c8   : > { %18347 = vst [vmem:[#allocation73_spill] sm:$0xff] %v13164_v9 }
 0x4c9   : > { %9918 = vmatmul.mubr.msk.bf16.gmra.mrb[108].mxu1 %vm1566_vm0, %v2587_v16 }
 0x4ce   : > { %v13167_v63 = vpop.f32.mrb[68].mxu1 }
 0x4cf   : > { %18348 = vst [vmem:[#allocation70_spill] sm:$0xff] %v13167_v63  ;;  %v13169_v24 = vpop.f32.mrb[69].mxu1  ;;  %v18382_v63 = vld [vmem:[#allocation40_spill] sm:$0xff] }
 0x4d0   : > { %18349 = vst [vmem:[#allocation61_spill] sm:$0xff] %v13169_v24  ;;  %v13171_v49 = vpop.f32.mrb[70].mxu1  ;;  %v18384_v24 = vld [vmem:[#allocation7_spill] sm:$0xff] }
 0x4d1   : > { %18350 = vst [vmem:[#allocation62_spill] sm:$0xff] %v13171_v49  ;;  %v13173_v50 = vpop.f32.mrb[71].mxu1  ;;  %v18383_v49 = vld [vmem:[#allocation41_spill] sm:$0xff] }
 0x4d2   : > { %18351 = vst [vmem:[#allocation54_spill] sm:$0xff] %v13173_v50 }
 0x4dc   : > { %v13175_v18 = vpop.f32.mrb[72].mxu1 }
 0x4dd   : > { %18352 = vst [vmem:[#allocation65_spill] sm:$0xff] %v13175_v18  ;;  %v13177_v21 = vpop.f32.mrb[73].mxu1 }
 0x4de   : > { %18353 = vst [vmem:[#allocation52_spill] sm:$0xff] %v13177_v21  ;;  %v13179_v33 = vpop.f32.mrb[74].mxu1  ;;  %v18381_v21 = vld [vmem:[#allocation39_spill] sm:$0xff] }
 0x4df   : > { %18354 = vst [vmem:[#allocation64_spill] sm:$0xff] %v13179_v33  ;;  %v13181_v41 = vpop.f32.mrb[75].mxu1 }
 0x4e0   : > { %18355 = vst [vmem:[#allocation63_spill] sm:$0xff] %v13181_v41 }
 0x4e7   : > { %v13183_v58 = vpop.f32.mrb[76].mxu1 }
 0x4e8   : > { %18356 = vst [vmem:[#allocation53_spill] sm:$0xff] %v13183_v58  ;;  %v13185_v28 = vpop.f32.mrb[77].mxu1  ;;  %v18380_v58 = vld [vmem:[#allocation38_spill] sm:$0xff] }
 0x4e9   : > { %18357 = vst [vmem:[#allocation66_spill] sm:$0xff] %v13185_v28  ;;  %v13187_v56 = vpop.f32.mrb[78].mxu1  ;;  %v18378_v28 = vld [vmem:[#allocation36_spill] sm:$0xff] }
 0x4ea   : > { %18358 = vst [vmem:[#allocation56_spill] sm:$0xff] %v13187_v56  ;;  %v13189_v46 = vpop.f32.mrb[79].mxu1 }
 0x4eb   : > { %18359 = vst [vmem:[#allocation68_spill] sm:$0xff] %v13189_v46  ;;  %v18379_v46 = vld [vmem:[#allocation37_spill] sm:$0xff] }
 0x515   : > { %v13191_v1 = vpop.f32.mrb[80].mxu1 }
 0x516   : > { %18360 = vst [vmem:[#allocation50_spill] sm:$0xff] %v13191_v1  ;;  %v13193_v36 = vpop.f32.mrb[81].mxu1  ;;  %v18376_v1 = vld [vmem:[#allocation34_spill] sm:$0xff] }
 0x517   : > { %18361 = vst [vmem:[#allocation55_spill] sm:$0xff] %v13193_v36  ;;  %v13195_v45 = vpop.f32.mrb[82].mxu1 }
 0x518   : > { %18362 = vst [vmem:[#allocation67_spill] sm:$0xff] %v13195_v45  ;;  %v13197_v0 = vpop.f32.mrb[83].mxu1 }
 0x519   : > { %18363 = vst [vmem:[#allocation60_spill] sm:$0xff] %v13197_v0 }
 0x53f   : > { %v13199_v47 = vpop.f32.mrb[84].mxu1 }
 0x540   : > { %18364 = vst [vmem:[#allocation59_spill] sm:$0xff] %v13199_v47  ;;  %v13201_v54 = vpop.f32.mrb[85].mxu1 }
 0x541   : > { %18365 = vst [vmem:[#allocation58_spill] sm:$0xff] %v13201_v54  ;;  %v13203_v5 = vpop.f32.mrb[86].mxu1 }
 0x542   : > { %18366 = vst [vmem:[#allocation51_spill] sm:$0xff] %v13203_v5  ;;  %v13205_v34 = vpop.f32.mrb[87].mxu1 }
 0x543   : > { %18367 = vst [vmem:[#allocation57_spill] sm:$0xff] %v13205_v34 }
 0x54d   : > { %v13207_v43 = vpop.f32.mrb[88].mxu1 }
 0x54e   : > { %18368 = vst [vmem:[#allocation74_spill] sm:$0xff] %v13207_v43  ;;  %v13209_v4 = vpop.f32.mrb[89].mxu1 }
 0x54f   : > { %18369 = vst [vmem:[#allocation75_spill] sm:$0xff] %v13209_v4  ;;  %v13211_v17 = vpop.f32.mrb[90].mxu1  ;;  %v2369_v4 = vld [vmem:[%s17884_s1 + $0x70] sm:$0xff] }
 0x550   : > { %18370 = vst [vmem:[#allocation76_spill] sm:$0xff] %v13211_v17  ;;  %v13213_v22 = vpop.f32.mrb[91].mxu1 }
 0x551   : > { %18371 = vst [vmem:[#allocation77_spill] sm:$0xff] %v13213_v22  ;;  %v2370_v22 = vld [vmem:[%s17884_s1 + $0x78] sm:$0xff] }
 0x571   : > { %v9887_v26 = vpop.f32.mrb[76].mxu0 }
 0x572   : > { %v2549_v19 = vpop.f32.mrb[77].mxu0  ;;  %v13232_v54 = vadd.f32 %v9887_v26, %v2369_v4 }
 0x573   : > { %v13221_v38 = vadd.f32 %v2549_v19, %v2367_v12  ;;  %v9888_v16 = vpop.f32.mrb[78].mxu0 }
 0x574   : > { %v2552_v43 = vpop.f32.mrb[79].mxu0  ;;  %v13235_v19 = vadd.f32 %v9888_v16, %v2370_v22 }
 0x575   : > { %v13226_v17 = vadd.f32 %v2552_v43, %v2368_v37  ;;  %2781 = vmax.xlane.f32.xlu0 %v13221_v38 }
 0x577   : > { %2783 = vmax.xlane.f32.xlu1 %v13226_v17 }
 0x579   : > { %2785 = vmax.xlane.f32.xlu0 %v13232_v54 }
 0x57b   : > { %2787 = vmax.xlane.f32.xlu1 %v13235_v19 }
 0x57c   : > { %v13239_v34 = vpop.f32.mrb[92].mxu1 }
 0x57d   : > { %18372 = vst [vmem:[#allocation78_spill] sm:$0xff] %v13239_v34  ;;  %v13241_v43 = vpop.f32.mrb[93].mxu1 }
 0x57e   : > { %18373 = vst [vmem:[#allocation79_spill] sm:$0xff] %v13241_v43  ;;  %v13243_v47 = vpop.f32.mrb[94].mxu1 }
 0x57f   : > { %18374 = vst [vmem:[#allocation80_spill] sm:$0xff] %v13243_v47  ;;  %v13245_v5 = vpop.f32.mrb[95].mxu1  ;;  %v18377_v47 = vld [vmem:[#allocation35_spill] sm:$0xff] }
 0x580   : > { %18375 = vst [vmem:[#allocation81_spill] sm:$0xff] %v13245_v5 }
 0x584   : > { %v13247_v36 = vpop.f32.mrb[96].mxu1 }
 0x585   : > { %v13249_v26 = vpop.f32.mrb[97].mxu1 }
 0x586   : > { %v13251_v0 = vpop.f32.mrb[98].mxu1 }
 0x587   : > { %v13253_v16 = vpop.f32.mrb[99].mxu1 }
 0x58c   : > { %3071 = vrot.lane.b32.xlu1 %v18376_v1, %s11695_s15  ;;  %v13257_v45 = vpop.f32.mrb[100].mxu1 }
 0x58d   : > { %v13259_v34 = vpop.f32.mrb[101].mxu1 }
 0x58e   : > { %v13261_v43 = vpop.f32.mrb[102].mxu1 }
 0x58f   : > { %3069 = vrot.lane.b32.xlu0 %v18377_v47, %s11695_s15  ;;  %v13265_v5 = vpop.f32.mrb[103].mxu1 }
 0x590   : > { %3075 = vrot.lane.b32.xlu1 %v18378_v28, %s11695_s15 }
 0x593   : > { %3073 = vrot.lane.b32.xlu0 %v18379_v46, %s11695_s15 }
 0x594   : > { %3079 = vrot.lane.b32.xlu1 %v18380_v58, %s11695_s15  ;;  %v13273_v56 = vpop.f32.mrb[104].mxu1  ;;  %v18385_v58 = vld [vmem:[#allocation3_spill] sm:$0xff] }
 0x595   : > { %v13275_v18 = vpop.f32.mrb[105].mxu1 }
 0x596   : > { %v13277_v33 = vpop.f32.mrb[106].mxu1 }
 0x597   : > { %3077 = vrot.lane.b32.xlu0 %v18381_v21, %s11695_s15  ;;  %v13281_v41 = vpop.f32.mrb[107].mxu1 }
 0x598   : > { %3083 = vrot.lane.b32.xlu1 %v18382_v63, %s11695_s15 }
 0x59b   : > { %3081 = vrot.lane.b32.xlu0 %v18383_v49, %s11695_s15 }
 0x59c   : > { %3355 = vrot.lane.b32.xlu1 %v18384_v24, %s11696_s20  ;;  %v9919_v50 = vpop.f32.mrb[108].mxu1  ;;  %v18386_v24 = vld [vmem:[#allocation5_spill] sm:$0xff] }
 0x59d   : > { %v13289_v60 = vadd.f32 %v9919_v50, %v2369_v4  ;;  %v2742_v29 = vpop.f32.mrb[109].mxu1  ;;  %v18390_v50 = vld [vmem:[#allocation4_spill] sm:$0xff]  ;;  %v18391_v4 = vld [vmem:[#allocation13_spill] sm:$0xff] }
 0x59e   : > { %v13291_v27 = vadd.f32 %v2742_v29, %v2367_v12  ;;  %v9920_v9 = vpop.f32.mrb[110].mxu1  ;;  %v18387_v29 = vld [vmem:[#allocation9_spill] sm:$0xff] }
 0x59f   : > { %v13293_v21 = vadd.f32 %v9920_v9, %v2370_v22  ;;  %3351 = vrot.lane.b32.xlu0 %v18385_v58, %s11696_s20  ;;  %v2745_v63 = vpop.f32.mrb[111].mxu1  ;;  %v18388_v9 = vld [vmem:[#allocation11_spill] sm:$0xff]  ;;  %v18392_v22 = vld [vmem:[#allocation21_spill] sm:$0xff] }
 0x5a0   : > { %v13297_v46 = vadd.f32 %v2745_v63, %v2368_v37  ;;  %3198 = vrot.lane.b32.xlu1 %v12601_v2, %s11695_s15  ;;  %v18389_v63 = vld [vmem:[#allocation15_spill] sm:$0xff]  ;;  %v18393_v12 = vld [vmem:[#allocation25_spill] sm:$0xff]  ;;  %v18394_v37 = vld [vmem:[#allocation6_spill] sm:$0xff] }
 0x5a3   : > { %3353 = vrot.lane.b32.xlu0 %v18386_v24, %s11696_s20 }
 0x5a4   : > { %3200 = vrot.lane.b32.xlu1 %v12598_v30, %s11695_s15 }
 0x5a7   : > { %3357 = vrot.lane.b32.xlu0 %v18387_v29, %s11696_s20 }
 0x5a8   : > { %3202 = vrot.lane.b32.xlu1 %v12606_v20, %s11695_s15 }
 0x5ab   : > { %3359 = vrot.lane.b32.xlu0 %v18388_v9, %s11696_s20  ;;  %v2760_v9 = vpop.xlane.xlu1 %2759 }
 0x5ac   : > { %3363 = vrot.lane.b32.xlu1 %v18389_v63, %s11696_s20 }
 0x5af   : > { %3204 = vrot.lane.b32.xlu0 %v12604_v57, %s11695_s15  ;;  %v18399_v57 = vld [vmem:[#allocation23_spill] sm:$0xff] }
 0x5b0   : > { %3337 = vrot.lane.b32.xlu1 %v18390_v50, %s11696_s20  ;;  %v2758_v50 = vpop.xlane.xlu0 %2757 }
 0x5b1   : > { %v2821_v63 = vsub.f32 %v13081_v61, %v2758_v50 }
 0x5b3   : > { %3361 = vrot.lane.b32.xlu0 %v18391_v4, %s11696_s20  ;;  %v18395_v4 = vld [vmem:[#allocation29_spill] sm:$0xff]  ;;  %v2853_v20 = vmul.f32 1.442695, %v2821_v63 }
 0x5b4   : > { %3530 = vrot.lane.b32.xlu1 %v18392_v22, %s11696_s20  ;;  %v18396_v22 = vld [vmem:[#allocation17_spill] sm:$0xff] }
 0x5b7   : > { %3206 = vrot.lane.b32.xlu0 %v12610_v23, %s11695_s15  ;;  %v18397_v23 = vld [vmem:[#allocation2_spill] sm:$0xff] }
 0x5b8   : > { %3534 = vrot.lane.b32.xlu1 %v18393_v12, %s11696_s20  ;;  %v2762_v12 = vpop.xlane.xlu0 %2761 }
 0x5bb   : > { %3208 = vrot.lane.b32.xlu0 %v12608_v48, %s11695_s15 }
 0x5bc   : > { %3339 = vrot.lane.b32.xlu1 %v18394_v37, %s11696_s20  ;;  %v2764_v48 = vpop.xlane.xlu0 %2763  ;;  %v18398_v37 = vld [vmem:[#allocation19_spill] sm:$0xff] }
 0x5bf   : > { %3210 = vrot.lane.b32.xlu0 %v12614_v39, %s11695_s15  ;;  %v2823_v39 = vsub.f32 %v13088_v10, %v2762_v12  ;;  %v2768_v10 = vpop.xlane.xlu1 %2767 }
 0x5c0   : > { %3538 = vrot.lane.b32.xlu1 %v18395_v4, %s11696_s20  ;;  %v2766_v4 = vpop.xlane.xlu0 %2765 }
 0x5c3   : > { %3212 = vrot.lane.b32.xlu0 %v18314_v42, %s11695_s15  ;;  %v2857_v42 = vmul.f32 1.442695, %v2823_v39  ;;  %v2825_v39 = vsub.f32 %v13102_v51, %v2766_v4  ;;  %v2772_v50 = vpop.xlane.xlu1 %2771  ;;  %v2826_v4 = vsub.f32 %v13051_v44, %v2768_v10 }
 0x5c4   : > { %v2770_v29 = vpop.xlane.xlu0 %2769 }
 0x5c5   : > { %10933 = vpow2.f32 %v2857_v42  ;;  %v2861_v42 = vmul.f32 1.442695, %v2825_v39 }
 0x5c6   : > { %10935 = vpow2.f32 %v2853_v20  ;;  %v2822_v20 = vsub.f32 %v13043_v11, %v2760_v9  ;;  %v2863_v11 = vmul.f32 1.442695, %v2826_v4 }
 0x5c7   : > { %3365 = vrot.lane.b32.xlu0 %v18396_v22, %s11696_s20  ;;  %v18400_v22 = vld [vmem:[#allocation27_spill] sm:$0xff]  ;;  %v2776_v51 = vpop.xlane.xlu1 %2775 }
 0x5cb   : > { %3335 = vrot.lane.b32.xlu0 %v18397_v23, %s11696_s20  ;;  %v2824_v23 = vsub.f32 %v13095_v59, %v2764_v48  ;;  %v2828_v48 = vsub.f32 %v13058_v40, %v2772_v50  ;;  %v2774_v59 = vpop.xlane.xlu0 %2773 }
 0x5cd   : > { %v2859_v12 = vmul.f32 1.442695, %v2824_v23  ;;  %v2867_v23 = vmul.f32 1.442695, %v2828_v48  ;;  %v2830_v48 = vsub.f32 %v13112_v15, %v2776_v51 }
 0x5cf   : > { %3528 = vrot.lane.b32.xlu0 %v18398_v37, %s11696_s20  ;;  %v18401_v37 = vld [vmem:[#allocation8_spill] sm:$0xff]  ;;  %10937 = vpow2.f32 %v2859_v12  ;;  %v13352_v30 = vpop.eup %10933  ;;  %v2778_v40 = vpop.xlane.xlu0 %2777 }
 0x5d0   : > { %v13356_v63 = vpop.eup %10935  ;;  %v2831_v9 = vsub.f32 %v13131_v31, %v2778_v40 }
 0x5d2   : > { %v2873_v10 = vmul.f32 1.442695, %v2831_v9 }
 0x5d3   : > { %3532 = vrot.lane.b32.xlu0 %v18399_v57, %s11696_s20  ;;  %v2827_v57 = vsub.f32 %v13109_v6, %v2770_v29  ;;  %v2855_v29 = vmul.f32 1.442695, %v2822_v20  ;;  %v2871_v20 = vmul.f32 1.442695, %v2830_v48 }
 0x5d5   : > { %v2865_v61 = vmul.f32 1.442695, %v2827_v57  ;;  %v2829_v57 = vsub.f32 %v13119_v52, %v2774_v59 }
 0x5d7   : > { %3536 = vrot.lane.b32.xlu0 %v18400_v22, %s11696_s20  ;;  %10939 = vpow2.f32 %v2865_v61  ;;  %v2869_v12 = vmul.f32 1.442695, %v2829_v57  ;;  %v2780_v61 = vpop.xlane.xlu1 %2779  ;;  %v18402_v22 = vld [vmem:[#allocation10_spill] sm:$0xff] }
 0x5d8   : > { %10941 = vpow2.f32 %v2861_v42  ;;  %v2832_v44 = vsub.f32 %v13122_v53, %v2780_v61 }
 0x5d9   : > { %v13361_v6 = vpop.eup %10937  ;;  %10943 = vpow2.f32 %v2867_v23 }
 0x5da   : > { %10945 = vpow2.f32 %v2855_v29  ;;  %v2875_v42 = vmul.f32 1.442695, %v2832_v44 }
 0x5db   : > { %3341 = vrot.lane.b32.xlu0 %v18401_v37, %s11696_s20  ;;  %10947 = vpow2.f32 %v2869_v12 }
 0x5dc   : > { %10949 = vpow2.f32 %v2863_v11 }
 0x5dd   : > { %10951 = vpow2.f32 %v2873_v10 }
 0x5de   : > { %10953 = vpow2.f32 %v2875_v42 }
 0x5df   : > { %10955 = vpow2.f32 %v2871_v20 }
 0x5e1   : > { %v13365_v39 = vpop.eup %10939 }
 0x5e2   : > { %v13369_v52 = vpop.eup %10941 }
 0x5e3   : > { %v13373_v50 = vpop.eup %10943 }
 0x5e4   : > { %2921 = vadd.xlane.f32.xlu1 %v13352_v30  ;;  %v13377_v31 = vpop.eup %10945 }
 0x5e5   : > { %v13380_v59 = vpop.eup %10947 }
 0x5e6   : > { %v13383_v53 = vpop.eup %10949 }
 0x5e7   : > { %v13386_v15 = vpop.eup %10951 }
 0x5e8   : > { %2917 = vadd.xlane.f32.xlu1 %v13356_v63  ;;  %v13389_v51 = vpop.eup %10953 }
 0x5e9   : > { %v13395_v61 = vpop.eup %10955 }
 0x5ec   : > { %2923 = vadd.xlane.f32.xlu1 %v13361_v6 }
 0x5f0   : > { %2929 = vadd.xlane.f32.xlu1 %v13365_v39 }
 0x5f4   : > { %2925 = vadd.xlane.f32.xlu1 %v13369_v52 }
 0x5f8   : > { %2931 = vadd.xlane.f32.xlu1 %v13373_v50 }
 0x5fa   : > { %2919 = vadd.xlane.f32.xlu0 %v13377_v31 }
 0x5fc   : > { %2933 = vadd.xlane.f32.xlu1 %v13380_v59 }
 0x5fe   : > { %2927 = vadd.xlane.f32.xlu0 %v13383_v53 }
 0x602   : > { %v2782_v23 = vpop.xlane.xlu0 %2781  ;;  %2937 = vadd.xlane.f32.xlu0 %v13386_v15 }
 0x603   : > { %v2833_v40 = vsub.f32 %v13221_v38, %v2782_v23 }
 0x604   : > { %v2784_v57 = vpop.xlane.xlu1 %2783 }
 0x605   : > { %v2834_v29 = vsub.f32 %v13226_v17, %v2784_v57  ;;  %v2877_v48 = vmul.f32 1.442695, %v2833_v40 }
 0x606   : > { %v2786_v4 = vpop.xlane.xlu0 %2785  ;;  %2939 = vadd.xlane.f32.xlu0 %v13389_v51 }
 0x607   : > { %v2879_v12 = vmul.f32 1.442695, %v2834_v29  ;;  %v2835_v11 = vsub.f32 %v13232_v54, %v2786_v4 }
 0x608   : > { %v2788_v9 = vpop.xlane.xlu1 %2787 }
 0x609   : > { %10957 = vpow2.f32 %v2879_v12  ;;  %v2881_v44 = vmul.f32 1.442695, %v2835_v11  ;;  %v2836_v17 = vsub.f32 %v13235_v19, %v2788_v9  ;;  %v11637_v19 = vld [vmem:[%s17884_s1 + $0x10] sm:$0xff] }
 0x60a   : > { %v3070_v10 = vpop.permute.xlu0 %3069  ;;  %2935 = vadd.xlane.f32.xlu0 %v13395_v61  ;;  %v13408_v40 = vadd.f32 %v11637_v19, %v13247_v36 }
 0x60b   : > { %10959 = vpow2.f32 %v2881_v44  ;;  %9921 = vmatprep.subr.bf16.mxu0 %v3070_v10  ;;  %v2883_v20 = vmul.f32 1.442695, %v2836_v17  ;;  %v11638_v44 = vld [vmem:[%s17884_s1] sm:$0xff] }
 0x60c   : > { %9922 = vmatpush3.bf16.msra.mxu0 %v3070_v10  ;;  %v3072_v42 = vpop.permute.xlu1 %3071  ;;  %10961 = vpow2.f32 %v2877_v48  ;;  %v13418_v10 = vadd.f32 %v11638_v44, %v13249_v26 }
 0x60d   : > { %9923 = vmatprep.subr.bf16.mxu0 %v3072_v42  ;;  %10963 = vpow2.f32 %v2883_v20  ;;  %v11640_v20 = vld [vmem:[%s17884_s1 + $0x18] sm:$0xff] }
 0x60e   : > { %v3074_v38 = vpop.permute.xlu0 %3073 }
 0x610   : > { %9924 = vmatpush3.bf16.msra.mxu0 %v3072_v42  ;;  %v3076_v54 = vpop.permute.xlu1 %3075  ;;  %v11639_v42 = vld [vmem:[%s17884_s1 + $0x20] sm:$0xff] }
 0x611   : > { %9925 = vmatprep.subr.bf16.mxu0 %v3074_v38 }
 0x612   : > { %v3078_v23 = vpop.permute.xlu0 %3077 }
 0x613   : > { %v13399_v57 = vpop.eup %10957 }
 0x614   : > { %2943 = vadd.xlane.f32.xlu0 %v13399_v57  ;;  %9926 = vmatpush3.bf16.msra.mxu0 %v3074_v38  ;;  %v3080_v29 = vpop.permute.xlu1 %3079  ;;  %v13432_v38 = vadd.f32 %v11639_v42, %v13259_v34  ;;  %v11641_v34 = vld [vmem:[%s17884_s1 + $0x50] sm:$0xff] }
 0x615   : > { %v13402_v4 = vpop.eup %10959  ;;  %9927 = vmatprep.subr.bf16.mxu0 %v3076_v54  ;;  %v13448_v19 = vadd.f32 %v11641_v34, %v13273_v56  ;;  %v11643_v56 = vld [vmem:[%s17884_s1 + $0x40] sm:$0xff] }
 0x616   : > { %v3082_v12 = vpop.permute.xlu0 %3081  ;;  %2945 = vadd.xlane.f32.xlu1 %v13402_v4  ;;  %v13412_v9 = vpop.eup %10961 }
 0x617   : > { %v13426_v17 = vpop.eup %10963 }
 0x618   : > { %2793 = vmax.xlane.f32.xlu0 %v13408_v40  ;;  %9928 = vmatpush3.bf16.msra.mxu0 %v3076_v54  ;;  %v3084_v11 = vpop.permute.xlu1 %3083  ;;  %v13441_v54 = vadd.f32 %v11640_v20, %v13251_v0  ;;  %v11642_v0 = vld [vmem:[%s17884_s1 + $0x8] sm:$0xff]  ;;  %v13464_v20 = vadd.f32 %v11643_v56, %v13275_v18  ;;  %v11645_v18 = vld [vmem:[%s17884_s1 + $0x58] sm:$0xff] }
 0x619   : > { %9929 = vmatprep.subr.bf16.mxu0 %v3078_v23 }
 0x61a   : > { %v13420_v48 = vpop.permute.xlu0 %3351  ;;  %2941 = vadd.xlane.f32.xlu1 %v13412_v9 }
 0x61c   : > { %2789 = vmax.xlane.f32.xlu0 %v13418_v10  ;;  %9930 = vmatpush3.bf16.msra.mxu0 %v3078_v23  ;;  %v13424_v36 = vpop.permute.xlu1 %3355 }
 0x61d   : > { %9931 = vmatprep.subr.bf16.mxu0 %v3080_v29 }
 0x61e   : > { %v13434_v26 = vpop.permute.xlu0 %3353  ;;  %2947 = vadd.xlane.f32.xlu1 %v13426_v17 }
 0x620   : > { %2797 = vmax.xlane.f32.xlu0 %v13432_v38  ;;  %9932 = vmatpush3.bf16.msra.mxu0 %v3080_v29  ;;  %v3199_v23 = vpop.permute.xlu1 %3198  ;;  %v13457_v29 = vadd.f32 %v11642_v0, %v13253_v16  ;;  %v11644_v16 = vld [vmem:[%s17884_s1 + $0x30] sm:$0xff]  ;;  %v13482_v0 = vadd.f32 %v11645_v18, %v13277_v33  ;;  %v11647_v33 = vld [vmem:[%s17884_s1 + $0x28] sm:$0xff] }
 0x621   : > { %9933 = vmatprep.subr.bf16.mxu0 %v3082_v12  ;;  %9953 = vmatprep.subr.bf16.mxu1 %v3199_v23 }
 0x622   : > { %v13450_v44 = vpop.permute.xlu0 %3357  ;;  %2795 = vmax.xlane.f32.xlu1 %v13441_v54  ;;  %9954 = vmatpush3.bf16.msra.mxu1 %v3199_v23 }
 0x624   : > { %2809 = vmax.xlane.f32.xlu0 %v13448_v19  ;;  %9934 = vmatpush3.bf16.msra.mxu0 %v3082_v12  ;;  %v3201_v42 = vpop.permute.xlu1 %3200  ;;  %v13473_v12 = vadd.f32 %v11644_v16, %v13257_v45  ;;  %v11646_v45 = vld [vmem:[%s17884_s1 + $0x38] sm:$0xff]  ;;  %v13499_v16 = vadd.f32 %v11647_v33, %v13265_v5  ;;  %v18403_v5 = vld [vmem:[#allocation12_spill] sm:$0xff] }
 0x625   : > { %9935 = vmatprep.subr.bf16.mxu0 %v3084_v11  ;;  %9955 = vmatprep.subr.bf16.mxu1 %v3201_v42 }
 0x626   : > { %v13466_v23 = vpop.permute.xlu0 %3359  ;;  %2791 = vmax.xlane.f32.xlu1 %v13457_v29  ;;  %9956 = vmatpush3.bf16.msra.mxu1 %v3201_v42 }
 0x628   : > { %2805 = vmax.xlane.f32.xlu0 %v13464_v20  ;;  %9936 = vmatpush3.bf16.msra.mxu0 %v3084_v11  ;;  %v3203_v34 = vpop.permute.xlu1 %3202  ;;  %v13489_v11 = vadd.f32 %v11646_v45, %v13261_v43 }
 0x629   : > { %9957 = vmatprep.subr.bf16.mxu1 %v3203_v34  ;;  %10337 = vmatprep.subr.msk.bf16.mxu0 %vm1566_vm0, %v13420_v48 }
 0x62a   : > { %v3205_v42 = vpop.permute.xlu0 %3204  ;;  %2801 = vmax.xlane.f32.xlu1 %v13473_v12  ;;  %9958 = vmatpush3.bf16.msra.mxu1 %v3203_v34 }
 0x62b   : > { %9959 = vmatprep.subr.bf16.mxu1 %v3205_v42 }
 0x62c   : > { %2811 = vmax.xlane.f32.xlu0 %v13482_v0 }
 0x62e   : > { %v13492_v56 = vpop.permute.xlu0 %3361  ;;  %2803 = vmax.xlane.f32.xlu1 %v13489_v11  ;;  %9960 = vmatpush3.bf16.msra.mxu1 %v3205_v42 }
 0x632   : > { %v3207_v34 = vpop.permute.xlu0 %3206  ;;  %2799 = vmax.xlane.f32.xlu1 %v13499_v16 }
 0x633   : > { %9961 = vmatprep.subr.bf16.mxu1 %v3207_v34 }
 0x634   : > { %9962 = vmatpush3.bf16.msra.mxu1 %v3207_v34 }
 0x636   : > { %v3209_v43 = vpop.permute.xlu0 %3208 }
 0x637   : > { %9963 = vmatprep.subr.bf16.mxu1 %v3209_v43 }
 0x638   : > { %9964 = vmatpush3.bf16.msra.mxu1 %v3209_v43  ;;  %v13514_v43 = vpop.permute.xlu1 %3363 }
 0x63a   : > { %v3211_v18 = vpop.permute.xlu0 %3210 }
 0x63b   : > { %9965 = vmatprep.subr.bf16.mxu1 %v3211_v18 }
 0x63c   : > { %9966 = vmatpush3.bf16.msra.mxu1 %v3211_v18  ;;  %v13516_v18 = vpop.permute.xlu1 %3337 }
 0x63e   : > { %v3213_v45 = vpop.permute.xlu0 %3212 }
 0x63f   : > { %9967 = vmatprep.subr.bf16.mxu1 %v3213_v45 }
 0x640   : > { %9968 = vmatpush3.bf16.msra.mxu1 %v3213_v45  ;;  %v13518_v45 = vpop.permute.xlu1 %3530 }
 0x641   : > { %18405 = vst [vmem:[#allocation83_spill] sm:$0xff] %v13518_v45 }
 0x642   : > { %v13502_v42 = vpop.permute.xlu0 %3365  ;;  %3343 = vrot.lane.b32.xlu0 %v18402_v22, %s11696_s20  ;;  %v11648_v22 = vld [vmem:[%s17884_s1 + $0x48] sm:$0xff] }
 0x643   : > { %3345 = vrot.lane.b32.xlu1 %v18403_v5, %s11696_s20  ;;  %v13526_v5 = vadd.f32 %v11648_v22, %v13281_v41 }
 0x644   : > { %v13520_v37 = vpop.permute.xlu1 %3534 }
 0x645   : > { %18406 = vst [vmem:[#allocation84_spill] sm:$0xff] %v13520_v37 }
 0x646   : > { %v13508_v33 = vpop.permute.xlu0 %3335 }
 0x648   : > { %v13528_v24 = vpop.permute.xlu1 %3339 }
 0x64a   : > { %v13510_v34 = vpop.permute.xlu0 %3528 }
 0x64b   : > { %18404 = vst [vmem:[#allocation82_spill] sm:$0xff] %v13510_v34  ;;  %10345 = vmatprep.subr.msk.bf16.mxu1 %vm1566_vm0, %v13510_v34 }
 0x64c   : > { %v13532_v2 = vpop.permute.xlu1 %3538 }
 0x64d   : > { %18407 = vst [vmem:[#allocation85_spill] sm:$0xff] %v13532_v2 }
 0x64e   : > { %v13536_v28 = vpop.permute.xlu0 %3532 }
 0x64f   : > { %18408 = vst [vmem:[#allocation86_spill] sm:$0xff] %v13536_v28 }
 0x652   : > { %v13539_v22 = vpop.permute.xlu0 %3536 }
 0x653   : > { %18409 = vst [vmem:[#allocation87_spill] sm:$0xff] %v13539_v22 }
 0x656   : > { %v13541_v1 = vpop.permute.xlu0 %3341 }
 0x667   : > { %2807 = vmax.xlane.f32.xlu1 %v13526_v5 }
 0x66b   : > { %2817 = vmax.xlane.f32.xlu1 %v13289_v60 }
 0x66f   : > { %2813 = vmax.xlane.f32.xlu1 %v13291_v27 }
 0x671   : > { %v2922_v58 = vpop.xlane.xlu1 %2921 }
 0x673   : > { %2819 = vmax.xlane.f32.xlu1 %v13293_v21 }
 0x675   : > { %v2918_v49 = vpop.xlane.xlu1 %2917 }
 0x677   : > { %2815 = vmax.xlane.f32.xlu1 %v13297_v46 }
 0x679   : > { %v2924_v41 = vpop.xlane.xlu1 %2923 }
 0x67a   : > { %10965 = vrcp.f32 %v2924_v41 }
 0x67b   : > { %10967 = vrcp.f32 %v2918_v49 }
 0x67c   : > { %10969 = vrcp.f32 %v2922_v58 }
 0x67d   : > { %v2930_v47 = vpop.xlane.xlu1 %2929 }
 0x681   : > { %v2926_v37 = vpop.xlane.xlu1 %2925 }
 0x684   : > { %v10966_v28 = vpop.eup %10965 }
 0x685   : > { %v2932_v45 = vpop.xlane.xlu1 %2931  ;;  %v10968_v14 = vpop.eup %10967  ;;  %v3016_v25 = vmul.f32 %v10966_v28, %v13361_v6 }
 0x686   : > { %v10970_v62 = vpop.eup %10969  ;;  %v3013_v49 = vmul.f32 %v10968_v14, %v13356_v63  ;;  %v3392_v14 = vsel %vm1566_vm0, %v13420_v48, 0 }
 0x687   : > { %v2920_v2 = vpop.xlane.xlu0 %2919 }
 0x688   : > { %10971 = vrcp.f32 %v2920_v2 }
 0x689   : > { %10973 = vrcp.f32 %v2926_v37  ;;  %v2934_v7 = vpop.xlane.xlu1 %2933  ;;  %v3015_v37 = vmul.f32 %v10970_v62, %v13352_v30 }
 0x68b   : > { %v2928_v34 = vpop.xlane.xlu0 %2927 }
 0x68c   : > { %10975 = vrcp.f32 %v2928_v34 }
 0x68d   : > { %10977 = vrcp.f32 %v2932_v45 }
 0x68e   : > { %10979 = vrcp.f32 %v2930_v47  ;;  %v3046_v47 = vpack.c.bf16 %v3016_v25, %v3015_v37 }
 0x68f   : > { %v2938_v8 = vpop.xlane.xlu0 %2937 }
 0x692   : > { %v10972_v22 = vpop.eup %10971 }
 0x693   : > { %v2940_v3 = vpop.xlane.xlu0 %2939  ;;  %v3014_v58 = vmul.f32 %v10972_v22, %v13377_v31  ;;  %v10974_v2 = vpop.eup %10973 }
 0x694   : > { %10981 = vrcp.f32 %v2940_v3  ;;  %v3017_v28 = vmul.f32 %v10974_v2, %v13369_v52 }
 0x695   : > { %v3045_v34 = vpack.c.bf16 %v3014_v58, %v3013_v49  ;;  %10983 = vrcp.f32 %v2934_v7 }
 0x696   : > { %v10976_v45 = vpop.eup %10975  ;;  %10985 = vrcp.f32 %v2938_v8 }
 0x697   : > { %v10978_v41 = vpop.eup %10977  ;;  %v2936_v55 = vpop.xlane.xlu0 %2935  ;;  %9937 = vmatprep.mubr.bf16.mxu0 %v3045_v34  ;;  %v3018_v6 = vmul.f32 %v10976_v45, %v13383_v53 }
 0x698   : > { %10987 = vrcp.f32 %v2936_v55  ;;  %9938 = vmatmul.mubr.bf16.vlgmr.msra.gmra.mrb[80].mxu0 %v3046_v47  ;;  %v10980_v63 = vpop.eup %10979  ;;  %v3020_v25 = vmul.f32 %v10978_v41, %v13373_v50  ;;  %v3395_v55 = vsel %vm1566_vm0, %v13434_v26, 0 }
 0x699   : > { %9986 = vmatpush3.bf16.xpose.msra.mxu0 %v3392_v14  ;;  %v3047_v62 = vpack.c.bf16 %v3018_v6, %v3017_v28  ;;  %v3019_v8 = vmul.f32 %v10980_v63, %v13365_v39 }
 0x69a   : > { %10338 = vmatprep.subr.msk.bf16.mxu0 %vm1566_vm0, %v13434_v26 }
 0x69b   : > { %9941 = vmatprep.mubr.bf16.mxu0 %v3047_v62  ;;  %v3048_v30 = vpack.c.bf16 %v3020_v25, %v3019_v8 }
 0x69e   : > { %v10982_v3 = vpop.eup %10981 }
 0x69f   : > { %v10984_v7 = vpop.eup %10983  ;;  %v3024_v48 = vmul.f32 %v10982_v3, %v13389_v51  ;;  %v3398_v51 = vsel %vm1566_vm0, %v13424_v36, 0 }
 0x6a0   : > { %9942 = vmatmul.mubr.bf16.gmra.mrb[84].mxu0 %v3048_v30  ;;  %v10986_v52 = vpop.eup %10985  ;;  %v3021_v22 = vmul.f32 %v10984_v7, %v13380_v59 }
 0x6a1   : > { %9988 = vmatpush3.bf16.xpose.msra.mxu0 %v3395_v55  ;;  %v2944_v31 = vpop.xlane.xlu0 %2943  ;;  %v3023_v49 = vmul.f32 %v10986_v52, %v13386_v15 }
 0x6a2   : > { %v10988_v53 = vpop.eup %10987  ;;  %10339 = vmatprep.subr.msk.bf16.mxu0 %vm1566_vm0, %v13424_v36  ;;  %10989 = vrcp.f32 %v2944_v31  ;;  %v3401_v36 = vsel %vm1566_vm0, %v13450_v44, 0 }
 0x6a3   : > { %v2946_v50 = vpop.xlane.xlu1 %2945  ;;  %v3022_v39 = vmul.f32 %v10988_v53, %v13395_v61  ;;  %v3050_v37 = vpack.c.bf16 %v3024_v48, %v3023_v49 }
 0x6a5   : > { %v2794_v58 = vpop.xlane.xlu0 %2793  ;;  %v3049_v2 = vpack.c.bf16 %v3022_v39, %v3021_v22  ;;  %v3407_v22 = vsel %vm1566_vm0, %v13492_v56, 0 }
 0x6a6   : > { %v2839_v26 = vsub.f32 %v13408_v40, %v2794_v58 }
 0x6a7   : > { %9945 = vmatprep.mubr.bf16.mxu0 %v3049_v2  ;;  %v2942_v34 = vpop.xlane.xlu1 %2941  ;;  %v3413_v2 = vsel %vm1566_vm0, %v13502_v42, 0 }
 0x6a8   : > { %v2889_v45 = vmul.f32 1.442695, %v2839_v26  ;;  %10991 = vrcp.f32 %v2942_v34  ;;  %9946 = vmatmul.mubr.bf16.gmra.mrb[88].mxu0 %v3050_v37  ;;  %v18410_v26 = vld [vmem:[#allocation14_spill] sm:$0xff] }
 0x6a9   : > { %10993 = vrcp.f32 %v2946_v50  ;;  %9990 = vmatpush3.bf16.xpose.msra.mxu0 %v3398_v51  ;;  %v2790_v59 = vpop.xlane.xlu0 %2789 }
 0x6aa   : > { %10995 = vpow2.f32 %v2889_v45  ;;  %v2837_v15 = vsub.f32 %v13418_v10, %v2790_v59  ;;  %10340 = vmatprep.subr.msk.bf16.mxu0 %vm1566_vm0, %v13450_v44 }
 0x6ab   : > { %v2948_v61 = vpop.xlane.xlu1 %2947 }
 0x6ac   : > { %v2885_v40 = vmul.f32 1.442695, %v2837_v15  ;;  %10997 = vrcp.f32 %v2948_v61  ;;  %v10990_v41 = vpop.eup %10989  ;;  %v18411_v15 = vld [vmem:[#allocation31_spill] sm:$0xff] }
 0x6ad   : > { %v3026_v25 = vmul.f32 %v10990_v41, %v13399_v57  ;;  %v2798_v30 = vpop.xlane.xlu0 %2797 }
 0x6ae   : > { %10999 = vpow2.f32 %v2885_v40  ;;  %v2841_v57 = vsub.f32 %v13432_v38, %v2798_v30 }
 0x6af   : > { %v2796_v47 = vpop.xlane.xlu1 %2795 }
 0x6b0   : > { %v2840_v28 = vsub.f32 %v13441_v54, %v2796_v47 }
 0x6b1   : > { %9992 = vmatpush3.bf16.xpose.msra.mxu0 %v3401_v36  ;;  %v2810_v58 = vpop.xlane.xlu0 %2809 }
 0x6b2   : > { %v10992_v6 = vpop.eup %10991  ;;  %v2891_v14 = vmul.f32 1.442695, %v2840_v28  ;;  %10341 = vmatprep.subr.msk.bf16.mxu0 %vm1566_vm0, %v13466_v23 }
 0x6b3   : > { %v10994_v10 = vpop.eup %10993  ;;  %v2792_v63 = vpop.xlane.xlu1 %2791  ;;  %v3025_v62 = vmul.f32 %v10992_v6, %v13412_v9 }
 0x6b4   : > { %v13576_v8 = vpop.eup %10995  ;;  %11001 = vpow2.f32 %v2891_v14  ;;  %v2838_v54 = vsub.f32 %v13457_v29, %v2792_v63  ;;  %v3027_v52 = vmul.f32 %v10994_v10, %v13402_v4  ;;  %v3404_v29 = vsel %vm1566_vm0, %v13466_v23, 0 }
 0x6b5   : > { %2953 = vadd.xlane.f32.xlu0 %v13576_v8  ;;  %v3051_v44 = vpack.c.bf16 %v3026_v25, %v3025_v62 }
 0x6b6   : > { %v10998_v3 = vpop.eup %10997  ;;  %v2887_v7 = vmul.f32 1.442695, %v2838_v54 }
 0x6b7   : > { %9949 = vmatprep.mubr.bf16.mxu0 %v3051_v44  ;;  %v2802_v55 = vpop.xlane.xlu1 %2801  ;;  %v3028_v31 = vmul.f32 %v10998_v3, %v13426_v17  ;;  %v2893_v17 = vmul.f32 1.442695, %v2841_v57  ;;  %v18414_v57 = vld [vmem:[#allocation30_spill] sm:$0xff] }
 0x6b8   : > { %v13582_v9 = vpop.eup %10999  ;;  %11003 = vpow2.f32 %v2887_v7  ;;  %v2843_v53 = vsub.f32 %v13473_v12, %v2802_v55 }
 0x6b9   : > { %9994 = vmatpush3.bf16.xpose.msra.mxu0 %v3404_v29  ;;  %2949 = vadd.xlane.f32.xlu1 %v13582_v9  ;;  %v3052_v48 = vpack.c.bf16 %v3028_v31, %v3027_v52  ;;  %v18412_v52 = vld [vmem:[#allocation22_spill] sm:$0xff]  ;;  %v18415_v29 = vld [vmem:[#allocation20_spill] sm:$0xff] }
 0x6ba   : > { %v2897_v50 = vmul.f32 1.442695, %v2843_v53  ;;  %10342 = vmatprep.subr.msk.bf16.mxu0 %vm1566_vm0, %v13492_v56  ;;  %v18413_v31 = vld [vmem:[#allocation26_spill] sm:$0xff] }
 0x6bb   : > { %9950 = vmatmul.mubr.bf16.gmra.mrb[92].mxu0 %v3052_v48  ;;  %v2804_v4 = vpop.xlane.xlu1 %2803 }
 0x6bc   : > { %11005 = vpow2.f32 %v2897_v50  ;;  %v2844_v38 = vsub.f32 %v13489_v11, %v2804_v4  ;;  %10001 = vmatprep.mubr.msk.bf16.mxu0 %vm1566_vm0, %v13508_v33  ;;  %v3410_v33 = vsel %vm1566_vm0, %v13514_v43, 0  ;;  %v18416_v4 = vld [vmem:[#allocation24_spill] sm:$0xff] }
 0x6bd   : > { %11007 = vpow2.f32 %v2893_v17 }
 0x6be   : > { %v13594_v12 = vpop.eup %11001  ;;  %v2899_v23 = vmul.f32 1.442695, %v2844_v38 }
 0x6bf   : > { %2955 = vadd.xlane.f32.xlu1 %v13594_v12  ;;  %v2800_v34 = vpop.xlane.xlu1 %2799 }
 0x6c0   : > { %11009 = vpow2.f32 %v2899_v23  ;;  %v2842_v51 = vsub.f32 %v13499_v16, %v2800_v34  ;;  %v18417_v23 = vld [vmem:[#allocation28_spill] sm:$0xff] }
 0x6c1   : > { %9996 = vmatpush3.bf16.xpose.msra.mxu0 %v3407_v22  ;;  %v18418_v22 = vld [vmem:[#allocation32_spill] sm:$0xff] }
 0x6c2   : > { %v13599_v39 = vpop.eup %11003  ;;  %10343 = vmatprep.subr.msk.bf16.mxu0 %vm1566_vm0, %v13514_v43  ;;  %v2806_v43 = vpop.xlane.xlu0 %2805  ;;  %v2895_v59 = vmul.f32 1.442695, %v2842_v51 }
 0x6c3   : > { %2951 = vadd.xlane.f32.xlu0 %v13599_v39  ;;  %v2845_v61 = vsub.f32 %v13464_v20, %v2806_v43 }
 0x6c4   : > { %11011 = vpow2.f32 %v2895_v59 }
 0x6c5   : > { %v2901_v40 = vmul.f32 1.442695, %v2845_v61  ;;  %v18420_v61 = vld [vmem:[#allocation83_spill] sm:$0xff] }
 0x6c6   : > { %v13604_v11 = vpop.eup %11005  ;;  %v2812_v37 = vpop.xlane.xlu0 %2811 }
 0x6c7   : > { %2961 = vadd.xlane.f32.xlu0 %v13604_v11  ;;  %v13609_v49 = vpop.eup %11007 }
 0x6c9   : > { %9998 = vmatpush3.bf16.xpose.msra.mxu0 %v3410_v33 }
 0x6ca   : > { %10344 = vmatprep.subr.msk.bf16.mxu0 %vm1566_vm0, %v13502_v42  ;;  %v13614_v56 = vpop.eup %11009  ;;  %v3344_v45 = vpop.permute.xlu0 %3343  ;;  %v2847_v42 = vsub.f32 %v13448_v19, %v2810_v58 }
 0x6cb   : > { %2957 = vadd.xlane.f32.xlu0 %v13609_v49 }
 0x6ce   : > { %v13635_v47 = vpop.eup %11011 }
 0x6cf   : > { %2963 = vadd.xlane.f32.xlu0 %v13614_v56 }
 0x6d0   : > { %3347 = vrot.lane.b32.xlu1 %v18410_v26, %s11696_s20 }
 0x6d1   : > { %10000 = vmatpush3.bf16.xpose.msra.mxu0 %v3413_v2 }
 0x6d8   : > { %10002 = vmatmul.mubr.msk.bf16.vlgmr.msra.gmra.mrb[96].mxu0 %vm1566_vm0, %v13516_v18  ;;  %v3346_v18 = vpop.permute.xlu1 %3345 }
 0x6d9   : > { %10005 = vmatprep.mubr.msk.bf16.mxu0 %vm1566_vm0, %v13528_v24  ;;  %v2905_v24 = vmul.f32 1.442695, %v2847_v42 }
 0x6db   : > { %11013 = vpow2.f32 %v2905_v24 }
 0x6dc   : > { %11015 = vpow2.f32 %v2901_v40 }
 0x6e0   : > { %10006 = vmatmul.mubr.msk.bf16.gmra.mrb[100].mxu0 %vm1566_vm0, %v13541_v1  ;;  %v2848_v1 = vsub.f32 %v13482_v0, %v2812_v37 }
 0x6e1   : > { %10009 = vmatprep.mubr.msk.bf16.mxu0 %vm1566_vm0, %v3344_v45 }
 0x6e2   : > { %v2907_v16 = vmul.f32 1.442695, %v2848_v1 }
 0x6e4   : > { %11017 = vpow2.f32 %v2907_v16 }
 0x6e5   : > { %3540 = vrot.lane.b32.xlu0 %v18411_v15, %s11696_s20  ;;  %v13639_v28 = vpop.eup %11013 }
 0x6e6   : > { %v13643_v0 = vpop.eup %11015 }
 0x6e8   : > { %10010 = vmatmul.mubr.msk.bf16.gmra.mrb[104].mxu0 %vm1566_vm0, %v3346_v18  ;;  %v18419_v18 = vld [vmem:[#allocation82_spill] sm:$0xff] }
 0x6e9   : > { %v3569_v24 = vsel %vm1566_vm0, %v18419_v18, 0 }
 0x6ee   : > { %v13647_v62 = vpop.eup %11017 }
 0x6f4   : > { %2959 = vadd.xlane.f32.xlu1 %v13635_v47  ;;  %v2808_v19 = vpop.xlane.xlu1 %2807 }
 0x6f5   : > { %v2846_v41 = vsub.f32 %v13526_v5, %v2808_v19 }
 0x6f7   : > { %v2903_v36 = vmul.f32 1.442695, %v2846_v41 }
 0x6f8   : > { %2969 = vadd.xlane.f32.xlu1 %v13639_v28  ;;  %v2818_v20 = vpop.xlane.xlu1 %2817 }
 0x6f9   : > { %11019 = vpow2.f32 %v2903_v36  ;;  %v2851_v6 = vsub.f32 %v13289_v60, %v2818_v20  ;;  %v18426_v20 = vld [vmem:[#allocation84_spill] sm:$0xff] }
 0x6fb   : > { %v2913_v14 = vmul.f32 1.442695, %v2851_v6 }
 0x6fc   : > { %2965 = vadd.xlane.f32.xlu1 %v13643_v0  ;;  %v2814_v10 = vpop.xlane.xlu1 %2813 }
 0x6fd   : > { %11021 = vpow2.f32 %v2913_v14  ;;  %v2849_v63 = vsub.f32 %v13291_v27, %v2814_v10 }
 0x6ff   : > { %v2909_v5 = vmul.f32 1.442695, %v2849_v63 }
 0x700   : > { %2971 = vadd.xlane.f32.xlu1 %v13647_v62  ;;  %v2820_v25 = vpop.xlane.xlu1 %2819 }
 0x701   : > { %11023 = vpow2.f32 %v2909_v5  ;;  %v2852_v54 = vsub.f32 %v13293_v21, %v2820_v25 }
 0x703   : > { %v13651_v30 = vpop.eup %11019  ;;  %v2915_v60 = vmul.f32 1.442695, %v2852_v54  ;;  %v13874_v54 = vld [vmem:[%s17884_s1 + $0x50] sm:$0xff] }
 0x704   : > { %2967 = vadd.xlane.f32.xlu1 %v13651_v30  ;;  %v2816_v21 = vpop.xlane.xlu1 %2815 }
 0x705   : > { %11025 = vpow2.f32 %v2915_v60  ;;  %v2850_v7 = vsub.f32 %v13297_v46, %v2816_v21  ;;  %v3578_v60 = vsel %vm1566_vm0, %v18426_v20, 0  ;;  %v18431_v21 = vld [vmem:[#allocation87_spill] sm:$0xff] }
 0x707   : > { %v13654_v44 = vpop.eup %11021  ;;  %v2911_v55 = vmul.f32 1.442695, %v2850_v7 }
 0x708   : > { %2977 = vadd.xlane.f32.xlu0 %v13654_v44 }
 0x709   : > { %11027 = vpow2.f32 %v2911_v55 }
 0x70b   : > { %v13657_v27 = vpop.eup %11023 }
 0x70c   : > { %2973 = vadd.xlane.f32.xlu0 %v13657_v27 }
 0x70f   : > { %v13660_v3 = vpop.eup %11025 }
 0x710   : > { %2979 = vadd.xlane.f32.xlu0 %v13660_v3 }
 0x713   : > { %v13676_v53 = vpop.eup %11027 }
 0x715   : > { %3542 = vrot.lane.b32.xlu1 %v12531_v35, %s11696_s20 }
 0x726   : > { %3349 = vrot.lane.b32.xlu0 %v18315_v32, %s11696_s20 }
 0x72a   : > { %3512 = vrot.lane.b32.xlu0 %v18316_v13, %s11696_s20 }
 0x72e   : > { %3516 = vrot.lane.b32.xlu0 %v18412_v52, %s11696_s20  ;;  %v18481_v52 = vld [vmem:[#allocation17_spill] sm:$0xff] }
 0x732   : > { %3520 = vrot.lane.b32.xlu0 %v18413_v31, %s11696_s20 }
 0x736   : > { %3524 = vrot.lane.b32.xlu0 %v18414_v57, %s11696_s20 }
 0x739   : > { %2975 = vadd.xlane.f32.xlu1 %v13676_v53 }
 0x742   : > { %v2954_v48 = vpop.xlane.xlu0 %2953 }
 0x746   : > { %v2950_v46 = vpop.xlane.xlu1 %2949 }
 0x74a   : > { %3514 = vrot.lane.b32.xlu1 %v18415_v29, %s11696_s20 }
 0x74c   : > { %v2956_v50 = vpop.xlane.xlu1 %2955 }
 0x74d   : > { %11029 = vrcp.f32 %v2956_v50  ;;  %v13865_v50 = vld [vmem:[%s17884_s1 + $0x58] sm:$0xff] }
 0x74e   : > { %3518 = vrot.lane.b32.xlu1 %v18416_v4, %s11696_s20  ;;  %11031 = vrcp.f32 %v2950_v46 }
 0x74f   : > { %11033 = vrcp.f32 %v2954_v48 }
 0x750   : > { %v2952_v17 = vpop.xlane.xlu0 %2951  ;;  %v3348_v38 = vpop.permute.xlu1 %3347 }
 0x751   : > { %11035 = vrcp.f32 %v2952_v17  ;;  %10013 = vmatprep.mubr.msk.bf16.mxu0 %vm1566_vm0, %v3348_v38 }
 0x752   : > { %3522 = vrot.lane.b32.xlu1 %v18417_v23, %s11696_s20 }
 0x754   : > { %v2962_v41 = vpop.xlane.xlu0 %2961 }
 0x756   : > { %3526 = vrot.lane.b32.xlu1 %v18418_v22, %s11696_s20 }
 0x757   : > { %v11030_v33 = vpop.eup %11029 }
 0x758   : > { %v11032_v58 = vpop.eup %11031  ;;  %v3032_v37 = vmul.f32 %v11030_v33, %v13594_v12  ;;  %v3572_v12 = vsel %vm1566_vm0, %v18420_v61, 0  ;;  %v2958_v25 = vpop.xlane.xlu0 %2957  ;;  %v3581_v33 = vsel %vm1566_vm0, %v18431_v21, 0 }
 0x759   : > { %v11034_v2 = vpop.eup %11033  ;;  %v3029_v34 = vmul.f32 %v11032_v58, %v13582_v9  ;;  %v18421_v9 = vld [vmem:[#allocation86_spill] sm:$0xff]  ;;  %11037 = vrcp.f32 %v2958_v25 }
 0x75a   : > { %v3031_v51 = vmul.f32 %v11034_v2, %v13576_v8  ;;  %v3575_v36 = vsel %vm1566_vm0, %v18421_v9, 0  ;;  %v18436_v2 = vld [vmem:[#allocation85_spill] sm:$0xff] }
 0x75b   : > { %v11036_v43 = vpop.eup %11035 }
 0x75c   : > { %v3030_v45 = vmul.f32 %v11036_v43, %v13599_v39  ;;  %v3054_v59 = vpack.c.bf16 %v3032_v37, %v3031_v51  ;;  %v2964_v46 = vpop.xlane.xlu0 %2963 }
 0x75d   : > { %11039 = vrcp.f32 %v2964_v46 }
 0x75e   : > { %v3053_v42 = vpack.c.bf16 %v3030_v45, %v3029_v34  ;;  %11041 = vrcp.f32 %v2962_v41  ;;  %v3584_v34 = vsel %vm1566_vm0, %v18436_v2, 0 }
 0x760   : > { %9969 = vmatprep.mubr.bf16.mxu1 %v3053_v42  ;;  %v3541_v42 = vpop.permute.xlu0 %3540 }
 0x761   : > { %9970 = vmatmul.mubr.bf16.vlgmr.msra.gmra.mrb[112].mxu1 %v3054_v59 }
 0x762   : > { %10018 = vmatpush3.bf16.xpose.msra.mxu1 %v3569_v24 }
 0x763   : > { %10346 = vmatprep.subr.msk.bf16.mxu1 %vm1566_vm0, %v18420_v61  ;;  %v11038_v37 = vpop.eup %11037 }
 0x764   : > { %v3033_v61 = vmul.f32 %v11038_v37, %v13609_v49 }
 0x767   : > { %v11040_v51 = vpop.eup %11039 }
 0x768   : > { %v11042_v59 = vpop.eup %11041 }
 0x769   : > { %v3035_v25 = vmul.f32 %v11042_v59, %v13604_v11 }
 0x76a   : > { %10020 = vmatpush3.bf16.xpose.msra.mxu1 %v3572_v12 }
 0x76b   : > { %10347 = vmatprep.subr.msk.bf16.mxu1 %vm1566_vm0, %v18421_v9  ;;  %v13700_v39 = vpop.f32.mrb[80].mxu0  ;;  %v3036_v9 = vmul.f32 %v11040_v51, %v13614_v56  ;;  %v3587_v56 = vsel %vm1566_vm0, %v3541_v42, 0 }
 0x76c   : > { %18422 = vst [vmem:[#allocation82_spill] sm:$0xff] %v13700_v39  ;;  %v13702_v8 = vpop.f32.mrb[81].mxu0  ;;  %v18475_v39 = vld [vmem:[#allocation4_spill] sm:$0xff] }
 0x76d   : > { %18423 = vst [vmem:[#allocation83_spill] sm:$0xff] %v13702_v8  ;;  %v13704_v40 = vpop.f32.mrb[82].mxu0  ;;  %v3056_v46 = vpack.c.bf16 %v3036_v9, %v3035_v25  ;;  %v13780_v25 = vld [vmem:[%s17884_s1] sm:$0xff]  ;;  %v18472_v8 = vld [vmem:[#allocation11_spill] sm:$0xff] }
 0x76e   : > { %18424 = vst [vmem:[#allocation86_spill] sm:$0xff] %v13704_v40  ;;  %v13708_v16 = vpop.f32.mrb[83].mxu0 }
 0x76f   : > { %18425 = vst [vmem:[#allocation88_spill] sm:$0xff] %v13708_v16 }
 0x772   : > { %10022 = vmatpush3.bf16.xpose.msra.mxu1 %v3575_v36 }
 0x773   : > { %10348 = vmatprep.subr.msk.bf16.mxu1 %vm1566_vm0, %v18426_v20  ;;  %v13716_v6 = vpop.f32.mrb[84].mxu0 }
 0x774   : > { %18427 = vst [vmem:[#allocation84_spill] sm:$0xff] %v13716_v6  ;;  %v13718_v14 = vpop.f32.mrb[85].mxu0  ;;  %v18467_v6 = vld [vmem:[#allocation9_spill] sm:$0xff] }
 0x775   : > { %18428 = vst [vmem:[#allocation89_spill] sm:$0xff] %v13718_v14  ;;  %v13720_v10 = vpop.f32.mrb[86].mxu0  ;;  %v18465_v14 = vld [vmem:[#allocation42_spill] sm:$0xff] }
 0x776   : > { %18429 = vst [vmem:[#allocation90_spill] sm:$0xff] %v13720_v10  ;;  %v13724_v5 = vpop.f32.mrb[87].mxu0 }
 0x777   : > { %18430 = vst [vmem:[#allocation91_spill] sm:$0xff] %v13724_v5 }
 0x77a   : > { %10024 = vmatpush3.bf16.xpose.msra.mxu1 %v3578_v60 }
 0x77b   : > { %10349 = vmatprep.subr.msk.bf16.mxu1 %vm1566_vm0, %v18431_v21  ;;  %v13732_v7 = vpop.f32.mrb[88].mxu0 }
 0x77c   : > { %18432 = vst [vmem:[#allocation87_spill] sm:$0xff] %v13732_v7  ;;  %v13734_v55 = vpop.f32.mrb[89].mxu0  ;;  %v18463_v7 = vld [vmem:[#allocation43_spill] sm:$0xff] }
 0x77d   : > { %18433 = vst [vmem:[#allocation92_spill] sm:$0xff] %v13734_v55  ;;  %v13736_v48 = vpop.f32.mrb[90].mxu0 }
 0x77e   : > { %18434 = vst [vmem:[#allocation93_spill] sm:$0xff] %v13736_v48  ;;  %v13740_v17 = vpop.f32.mrb[91].mxu0  ;;  %v18464_v48 = vld [vmem:[#allocation5_spill] sm:$0xff] }
 0x77f   : > { %18435 = vst [vmem:[#allocation94_spill] sm:$0xff] %v13740_v17  ;;  %v18462_v17 = vld [vmem:[#allocation3_spill] sm:$0xff] }
 0x781   : > { %v2960_v58 = vpop.xlane.xlu1 %2959 }
 0x782   : > { %10026 = vmatpush3.bf16.xpose.msra.mxu1 %v3581_v33  ;;  %11043 = vrcp.f32 %v2960_v58 }
 0x783   : > { %10350 = vmatprep.subr.msk.bf16.mxu1 %vm1566_vm0, %v18436_v2 }
 0x785   : > { %v2970_v43 = vpop.xlane.xlu1 %2969 }
 0x789   : > { %v2966_v45 = vpop.xlane.xlu1 %2965 }
 0x78a   : > { %10028 = vmatpush3.bf16.xpose.msra.mxu1 %v3584_v34 }
 0x78b   : > { %10351 = vmatprep.subr.msk.bf16.mxu1 %vm1566_vm0, %v3541_v42 }
 0x78c   : > { %v11044_v18 = vpop.eup %11043 }
 0x78d   : > { %v2972_v24 = vpop.xlane.xlu1 %2971  ;;  %v3034_v12 = vmul.f32 %v11044_v18, %v13635_v47 }
 0x78e   : > { %v13754_v41 = vpop.f32.mrb[92].mxu0  ;;  %11045 = vrcp.f32 %v2972_v24 }
 0x78f   : > { %18437 = vst [vmem:[#allocation85_spill] sm:$0xff] %v13754_v41  ;;  %v13756_v36 = vpop.f32.mrb[93].mxu0  ;;  %v3055_v20 = vpack.c.bf16 %v3034_v12, %v3033_v61  ;;  %11047 = vrcp.f32 %v2966_v45 }
 0x790   : > { %18438 = vst [vmem:[#allocation95_spill] sm:$0xff] %v13756_v36  ;;  %v13759_v60 = vpop.f32.mrb[94].mxu0  ;;  %11049 = vrcp.f32 %v2970_v43 }
 0x791   : > { %18439 = vst [vmem:[#allocation96_spill] sm:$0xff] %v13759_v60  ;;  %v13763_v49 = vpop.f32.mrb[95].mxu0  ;;  %9973 = vmatprep.mubr.bf16.mxu1 %v3055_v20  ;;  %v2968_v47 = vpop.xlane.xlu1 %2967 }
 0x792   : > { %18440 = vst [vmem:[#allocation97_spill] sm:$0xff] %v13763_v49  ;;  %10030 = vmatpush3.bf16.xpose.msra.mxu1 %v3587_v56  ;;  %11051 = vrcp.f32 %v2968_v47  ;;  %v13793_v47 = vld [vmem:[%s17884_s1 + $0x10] sm:$0xff] }
 0x793   : > { %9974 = vmatmul.mubr.bf16.gmra.mrb[116].mxu1 %v3056_v46 }
 0x795   : > { %v13768_v11 = vpop.xlane.xlu0 %2977  ;;  %v3543_v58 = vpop.permute.xlu1 %3542 }
 0x796   : > { %10352 = vmatprep.subr.msk.bf16.mxu1 %vm1566_vm0, %v3543_v58  ;;  %v3590_v37 = vsel %vm1566_vm0, %v3543_v58, 0 }
 0x798   : > { %v11046_v2 = vpop.eup %11045 }
 0x799   : > { %v2974_v43 = vpop.xlane.xlu0 %2973  ;;  %v11048_v34 = vpop.eup %11047  ;;  %v3040_v42 = vmul.f32 %v11046_v2, %v13647_v62 }
 0x79a   : > { %10032 = vmatpush3.bf16.xpose.msra.mxu1 %v3590_v37  ;;  %v11050_v45 = vpop.eup %11049  ;;  %v3037_v18 = vmul.f32 %v11048_v34, %v13643_v0  ;;  %v13785_v0 = vld [vmem:[%s17884_s1 + $0x8] sm:$0xff]  ;;  %v13806_v37 = vld [vmem:[%s17884_s1 + $0x18] sm:$0xff] }
 0x79b   : > { %v3039_v61 = vmul.f32 %v11050_v45, %v13639_v28 }
 0x79c   : > { %v11052_v51 = vpop.eup %11051 }
 0x79d   : > { %v2980_v59 = vpop.xlane.xlu0 %2979  ;;  %v3038_v24 = vmul.f32 %v11052_v51, %v13651_v30  ;;  %v3058_v9 = vpack.c.bf16 %v3040_v42, %v3039_v61  ;;  %v13812_v51 = vld [vmem:[%s17884_s1 + $0x28] sm:$0xff] }
 0x79e   : > { %11053 = vrcp.f32 %v2980_v59 }
 0x79f   : > { %v3057_v12 = vpack.c.bf16 %v3038_v24, %v3037_v18  ;;  %v13820_v24 = vld [vmem:[%s17884_s1 + $0x20] sm:$0xff]  ;;  %11055 = vrcp.f32 %v2974_v43 }
 0x7a0   : > { %11057 = vrcp.f32 %v13768_v11 }
 0x7a1   : > { %v3350_v20 = vpop.permute.xlu0 %3349  ;;  %9977 = vmatprep.mubr.bf16.mxu1 %v3057_v12 }
 0x7a2   : > { %9978 = vmatmul.mubr.bf16.gmra.mrb[120].mxu1 %v3058_v9  ;;  %10014 = vmatmul.mubr.msk.bf16.gmra.mrb[108].mxu0 %vm1566_vm0, %v3350_v20  ;;  %v13829_v9 = vld [vmem:[%s17884_s1 + $0x38] sm:$0xff] }
 0x7a5   : > { %v3513_v11 = vpop.permute.xlu0 %3512 }
 0x7a8   : > { %v11054_v1 = vpop.eup %11053 }
 0x7a9   : > { %v11056_v19 = vpop.eup %11055  ;;  %v3044_v49 = vmul.f32 %v11054_v1, %v13660_v3  ;;  %v3517_v55 = vpop.permute.xlu0 %3516 }
 0x7aa   : > { %v11058_v36 = vpop.eup %11057  ;;  %v3041_v59 = vmul.f32 %v11056_v19, %v13657_v27 }
 0x7ab   : > { %v10003_v62 = vpop.f32.mrb[96].mxu0 }
 0x7ac   : > { %v3449_v56 = vpop.f32.mrb[97].mxu0  ;;  %v13800_v2 = vadd.f32 %v10003_v62, %v13793_v47  ;;  %v13838_v62 = vld [vmem:[%s17884_s1 + $0x30] sm:$0xff] }
 0x7ad   : > { %v13788_v28 = vadd.f32 %v3449_v56, %v13780_v25  ;;  %v10004_v30 = vpop.f32.mrb[98].mxu0  ;;  %v3521_v1 = vpop.permute.xlu0 %3520 }
 0x7ae   : > { %v3452_v46 = vpop.f32.mrb[99].mxu0  ;;  %v13815_v42 = vadd.f32 %v10004_v30, %v13806_v37 }
 0x7af   : > { %v13796_v58 = vadd.f32 %v3452_v46, %v13785_v0  ;;  %3689 = vmax.xlane.f32.xlu0 %v13788_v28 }
 0x7b1   : > { %3691 = vmax.xlane.f32.xlu1 %v13796_v58  ;;  %v3525_v27 = vpop.permute.xlu0 %3524 }
 0x7b3   : > { %v10007_v34 = vpop.f32.mrb[100].mxu0  ;;  %3693 = vmax.xlane.f32.xlu0 %v13800_v2 }
 0x7b4   : > { %v3465_v45 = vpop.f32.mrb[101].mxu0 }
 0x7b5   : > { %v10008_v18 = vpop.f32.mrb[102].mxu0  ;;  %v13832_v20 = vadd.f32 %v3465_v45, %v13820_v24  ;;  %v13850_v45 = vadd.f32 %v10007_v34, %v13838_v62 }
 0x7b6   : > { %v3468_v61 = vpop.f32.mrb[103].mxu0  ;;  %v13841_v56 = vadd.f32 %v10008_v18, %v13829_v9  ;;  %v13856_v18 = vld [vmem:[%s17884_s1 + $0x40] sm:$0xff] }
 0x7b7   : > { %v13823_v12 = vadd.f32 %v3468_v61, %v13812_v51  ;;  %3695 = vmax.xlane.f32.xlu0 %v13815_v42  ;;  %v13847_v61 = vld [vmem:[%s17884_s1 + $0x48] sm:$0xff] }
 0x7b9   : > { %3699 = vmax.xlane.f32.xlu1 %v13823_v12 }
 0x7bb   : > { %v10011_v30 = vpop.f32.mrb[104].mxu0  ;;  %3697 = vmax.xlane.f32.xlu0 %v13832_v20 }
 0x7bc   : > { %v3481_v46 = vpop.f32.mrb[105].mxu0  ;;  %v13881_v63 = vadd.f32 %v10011_v30, %v13874_v54  ;;  %v3043_v30 = vmul.f32 %v11058_v36, %v13654_v44 }
 0x7bd   : > { %v10012_v33 = vpop.f32.mrb[106].mxu0  ;;  %3703 = vmax.xlane.f32.xlu1 %v13841_v56  ;;  %v13868_v34 = vadd.f32 %v3481_v46, %v13856_v18 }
 0x7be   : > { %v3484_v21 = vpop.f32.mrb[107].mxu0  ;;  %v3060_v60 = vpack.c.bf16 %v3044_v49, %v3043_v30  ;;  %v13934_v30 = vld [vmem:[%s17884_s1 + $0x68] sm:$0xff] }
 0x7bf   : > { %v13859_v38 = vadd.f32 %v3484_v21, %v13847_v61  ;;  %3701 = vmax.xlane.f32.xlu0 %v13850_v45  ;;  %v13877_v21 = vadd.f32 %v10012_v33, %v13865_v50 }
 0x7c1   : > { %3707 = vmax.xlane.f32.xlu1 %v13859_v38 }
 0x7c3   : > { %3705 = vmax.xlane.f32.xlu0 %v13868_v34 }
 0x7c5   : > { %3711 = vmax.xlane.f32.xlu1 %v13877_v21 }
 0x7c6   : > { %v2976_v46 = vpop.xlane.xlu1 %2975 }
 0x7c7   : > { %3709 = vmax.xlane.f32.xlu0 %v13881_v63  ;;  %11059 = vrcp.f32 %v2976_v46 }
 0x7ca   : > { %v3515_v46 = vpop.permute.xlu1 %3514 }
 0x7ce   : > { %v3519_v3 = vpop.permute.xlu1 %3518 }
 0x7d1   : > { %v11060_v33 = vpop.eup %11059 }
 0x7d2   : > { %v3042_v43 = vmul.f32 %v11060_v33, %v13676_v53  ;;  %v3523_v44 = vpop.permute.xlu1 %3522 }
 0x7d4   : > { %v3059_v41 = vpack.c.bf16 %v3042_v43, %v3041_v59 }
 0x7d6   : > { %9981 = vmatprep.mubr.bf16.mxu1 %v3059_v41  ;;  %v3527_v53 = vpop.permute.xlu1 %3526 }
 0x7d7   : > { %9982 = vmatmul.mubr.bf16.gmra.mrb[124].mxu1 %v3060_v60 }
 0x7d8   : > { %10033 = vmatprep.mubr.msk.bf16.mxu1 %vm1566_vm0, %v3513_v11 }
 0x7df   : > { %10034 = vmatmul.mubr.msk.bf16.vlgmr.msra.gmra.mrb[128].mxu1 %vm1566_vm0, %v3515_v46 }
 0x7e0   : > { %10037 = vmatprep.mubr.msk.bf16.mxu1 %vm1566_vm0, %v3517_v55 }
 0x7e7   : > { %10038 = vmatmul.mubr.msk.bf16.gmra.mrb[132].mxu1 %vm1566_vm0, %v3519_v3  ;;  %v13925_v3 = vld [vmem:[%s17884_s1 + $0x60] sm:$0xff] }
 0x7e8   : > { %10041 = vmatprep.mubr.msk.bf16.mxu1 %vm1566_vm0, %v3521_v1 }
 0x7ef   : > { %10042 = vmatmul.mubr.msk.bf16.gmra.mrb[136].mxu1 %vm1566_vm0, %v3523_v44 }
 0x7f0   : > { %10045 = vmatprep.mubr.msk.bf16.mxu1 %vm1566_vm0, %v3525_v27 }
 0x7f7   : > { %10046 = vmatmul.mubr.msk.bf16.gmra.mrb[140].mxu1 %vm1566_vm0, %v3527_v53 }
 0x834   : > { %v13898_v19 = vpop.f32.mrb[112].mxu1 }
 0x835   : > { %18441 = vst [vmem:[#allocation98_spill] sm:$0xff] %v13898_v19  ;;  %v13900_v41 = vpop.f32.mrb[113].mxu1 }
 0x836   : > { %18442 = vst [vmem:[#allocation99_spill] sm:$0xff] %v13900_v41  ;;  %v13902_v55 = vpop.f32.mrb[114].mxu1  ;;  %v18454_v41 = vld [vmem:[#allocation35_spill] sm:$0xff] }
 0x837   : > { %18443 = vst [vmem:[#allocation100_spill] sm:$0xff] %v13902_v55  ;;  %v13906_v60 = vpop.f32.mrb[115].mxu1  ;;  %v18461_v55 = vld [vmem:[#allocation7_spill] sm:$0xff] }
 0x838   : > { %18444 = vst [vmem:[#allocation101_spill] sm:$0xff] %v13906_v60  ;;  %v13959_v60 = vld [vmem:[%s17884_s1 + $0x78] sm:$0xff] }
 0x83e   : > { %v3692_v13 = vpop.xlane.xlu1 %3691 }
 0x866   : > { %v13910_v33 = vpop.f32.mrb[116].mxu1 }
 0x867   : > { %18445 = vst [vmem:[#allocation102_spill] sm:$0xff] %v13910_v33  ;;  %v13912_v59 = vpop.f32.mrb[117].mxu1 }
 0x868   : > { %18446 = vst [vmem:[#allocation103_spill] sm:$0xff] %v13912_v59  ;;  %v13914_v43 = vpop.f32.mrb[118].mxu1  ;;  %v13944_v59 = vld [vmem:[%s17884_s1 + $0x70] sm:$0xff] }
 0x869   : > { %18447 = vst [vmem:[#allocation104_spill] sm:$0xff] %v13914_v43  ;;  %v13918_v11 = vpop.f32.mrb[119].mxu1 }
 0x86a   : > { %18448 = vst [vmem:[#allocation105_spill] sm:$0xff] %v13918_v11 }
 0x875   : > { %v13927_v1 = vpop.f32.mrb[120].mxu1  ;;  %v10015_v44 = vpop.f32.mrb[108].mxu0 }
 0x876   : > { %18449 = vst [vmem:[#allocation106_spill] sm:$0xff] %v13927_v1  ;;  %v13929_v27 = vpop.f32.mrb[121].mxu1  ;;  %v3497_v53 = vpop.f32.mrb[109].mxu0  ;;  %v13962_v19 = vadd.f32 %v10015_v44, %v13944_v59  ;;  %v18456_v44 = vld [vmem:[#allocation37_spill] sm:$0xff]  ;;  %v18459_v1 = vld [vmem:[#allocation40_spill] sm:$0xff] }
 0x877   : > { %18450 = vst [vmem:[#allocation107_spill] sm:$0xff] %v13929_v27  ;;  %v13937_v49 = vadd.f32 %v3497_v53, %v13925_v3  ;;  %v13939_v46 = vpop.f32.mrb[122].mxu1  ;;  %v10016_v36 = vpop.f32.mrb[110].mxu0  ;;  %v18455_v27 = vld [vmem:[#allocation36_spill] sm:$0xff] }
 0x878   : > { %18451 = vst [vmem:[#allocation108_spill] sm:$0xff] %v13939_v46  ;;  %v13948_v33 = vpop.f32.mrb[123].mxu1  ;;  %v3500_v43 = vpop.f32.mrb[111].mxu0  ;;  %v13966_v11 = vadd.f32 %v10016_v36, %v13959_v60  ;;  %v18458_v36 = vld [vmem:[#allocation39_spill] sm:$0xff]  ;;  %v18460_v46 = vld [vmem:[#allocation41_spill] sm:$0xff] }
 0x879   : > { %18452 = vst [vmem:[#allocation109_spill] sm:$0xff] %v13948_v33  ;;  %v13953_v53 = vadd.f32 %v3500_v43, %v13934_v30  ;;  %3713 = vmax.xlane.f32.xlu0 %v13937_v49  ;;  %v18453_v43 = vld [vmem:[#allocation34_spill] sm:$0xff] }
 0x87a   : > { %v18457_v33 = vld [vmem:[#allocation38_spill] sm:$0xff] }
 0x87b   : > { %3715 = vmax.xlane.f32.xlu1 %v13953_v53 }
 0x87d   : > { %3717 = vmax.xlane.f32.xlu0 %v13962_v19 }
 0x87f   : > { %3719 = vmax.xlane.f32.xlu1 %v13966_v11 }
 0x890   : > { %3995 = vrot.lane.b32.xlu1 %v18453_v43, %s11696_s20 }
 0x893   : > { %3993 = vrot.lane.b32.xlu0 %v18454_v41, %s11696_s20  ;;  %v18480_v41 = vld [vmem:[#allocation48_spill] sm:$0xff] }
 0x894   : > { %3999 = vrot.lane.b32.xlu1 %v18455_v27, %s11696_s20 }
 0x897   : > { %3997 = vrot.lane.b32.xlu0 %v18456_v44, %s11696_s20 }
 0x898   : > { %4003 = vrot.lane.b32.xlu1 %v18457_v33, %s11696_s20 }
 0x89b   : > { %4001 = vrot.lane.b32.xlu0 %v18458_v36, %s11696_s20 }
 0x89c   : > { %4007 = vrot.lane.b32.xlu1 %v18459_v1, %s11696_s20 }
 0x89f   : > { %4005 = vrot.lane.b32.xlu0 %v18460_v46, %s11696_s20 }
 0x8a0   : > { %4271 = vrot.lane.b32.xlu1 %v18461_v55, %s11697_s22  ;;  %v18469_v55 = vld [vmem:[#allocation45_spill] sm:$0xff] }
 0x8a3   : > { %4267 = vrot.lane.b32.xlu0 %v18462_v17, %s11697_s22 }
 0x8a4   : > { %4114 = vrot.lane.b32.xlu1 %v18463_v7, %s11696_s20 }
 0x8a7   : > { %4269 = vrot.lane.b32.xlu0 %v18464_v48, %s11697_s22  ;;  %v3690_v48 = vpop.xlane.xlu0 %3689 }
 0x8a8   : > { %4116 = vrot.lane.b32.xlu1 %v18465_v14, %s11696_s20 }
 0x8aa   : > { %v13996_v5 = vpop.f32.mrb[124].mxu1 }
 0x8ab   : > { %18466 = vst [vmem:[#allocation7_spill] sm:$0xff] %v13996_v5  ;;  %4273 = vrot.lane.b32.xlu0 %v18467_v6, %s11697_s22  ;;  %v14000_v10 = vpop.f32.mrb[125].mxu1  ;;  %v18473_v6 = vld [vmem:[#allocation15_spill] sm:$0xff] }
 0x8ac   : > { %18468 = vst [vmem:[#allocation3_spill] sm:$0xff] %v14000_v10  ;;  %4118 = vrot.lane.b32.xlu1 %v18469_v55, %s11696_s20  ;;  %v14004_v17 = vpop.f32.mrb[126].mxu1  ;;  %v18474_v55 = vld [vmem:[#allocation44_spill] sm:$0xff] }
 0x8ad   : > { %18470 = vst [vmem:[#allocation5_spill] sm:$0xff] %v14004_v17  ;;  %v14008_v40 = vpop.f32.mrb[127].mxu1 }
 0x8ae   : > { %18471 = vst [vmem:[#allocation9_spill] sm:$0xff] %v14008_v40 }
 0x8af   : > { %4275 = vrot.lane.b32.xlu0 %v18472_v8, %s11697_s22  ;;  %v18476_v8 = vld [vmem:[#allocation13_spill] sm:$0xff] }
 0x8b0   : > { %4279 = vrot.lane.b32.xlu1 %v18473_v6, %s11697_s22  ;;  %v18477_v6 = vld [vmem:[#allocation47_spill] sm:$0xff] }
 0x8b2   : > { %v14016_v16 = vpop.f32.mrb[128].mxu1 }
 0x8b3   : > { %4120 = vrot.lane.b32.xlu0 %v18474_v55, %s11696_s20  ;;  %v14020_v7 = vpop.f32.mrb[129].mxu1  ;;  %v3694_v55 = vpop.xlane.xlu0 %3693 }
 0x8b4   : > { %4253 = vrot.lane.b32.xlu1 %v18475_v39, %s11697_s22  ;;  %v14024_v5 = vpop.f32.mrb[130].mxu1  ;;  %v18478_v39 = vld [vmem:[#allocation46_spill] sm:$0xff] }
 0x8b5   : > { %v14026_v17 = vpop.f32.mrb[131].mxu1 }
 0x8b7   : > { %4277 = vrot.lane.b32.xlu0 %v18476_v8, %s11697_s22  ;;  %v3696_v1 = vpop.xlane.xlu0 %3695  ;;  %v18479_v8 = vld [vmem:[#allocation49_spill] sm:$0xff] }
 0x8ba   : > { %v14030_v10 = vpop.f32.mrb[132].mxu1 }
 0x8bb   : > { %4122 = vrot.lane.b32.xlu0 %v18477_v6, %s11696_s20  ;;  %v14034_v40 = vpop.f32.mrb[133].mxu1  ;;  %v3755_v6 = vsub.f32 %v13800_v2, %v3694_v55  ;;  %v3698_v43 = vpop.xlane.xlu0 %3697  ;;  %v3756_v55 = vsub.f32 %v13815_v42, %v3696_v1 }
 0x8bc   : > { %v14036_v14 = vpop.f32.mrb[134].mxu1  ;;  %v3757_v4 = vsub.f32 %v13832_v20, %v3698_v43 }
 0x8bd   : > { %v14038_v46 = vpop.f32.mrb[135].mxu1  ;;  %v3789_v57 = vmul.f32 1.442695, %v3755_v6  ;;  %v3791_v6 = vmul.f32 1.442695, %v3756_v55 }
 0x8bf   : > { %4124 = vrot.lane.b32.xlu0 %v18478_v39, %s11696_s20  ;;  %v3753_v39 = vsub.f32 %v13788_v28, %v3690_v48  ;;  %11061 = vpow2.f32 %v3789_v57  ;;  %v18482_v28 = vld [vmem:[#allocation2_spill] sm:$0xff]  ;;  %v3700_v48 = vpop.xlane.xlu1 %3699  ;;  %v3793_v57 = vmul.f32 1.442695, %v3757_v4 }
 0x8c0   : > { %v3758_v4 = vsub.f32 %v13823_v12, %v3700_v48 }
 0x8c1   : > { %v3785_v2 = vmul.f32 1.442695, %v3753_v39 }
 0x8c2   : > { %v14042_v27 = vpop.f32.mrb[136].mxu1 }
 0x8c3   : > { %4126 = vrot.lane.b32.xlu0 %v18479_v8, %s11696_s20  ;;  %v14046_v33 = vpop.f32.mrb[137].mxu1  ;;  %11063 = vpow2.f32 %v3785_v2  ;;  %v3704_v35 = vpop.xlane.xlu1 %3703  ;;  %v3754_v2 = vsub.f32 %v13796_v58, %v3692_v13  ;;  %v3795_v13 = vmul.f32 1.442695, %v3758_v4 }
 0x8c4   : > { %v14048_v44 = vpop.f32.mrb[138].mxu1  ;;  %11065 = vpow2.f32 %v3791_v6  ;;  %v3760_v42 = vsub.f32 %v13841_v56, %v3704_v35 }
 0x8c5   : > { %v14051_v36 = vpop.f32.mrb[139].mxu1  ;;  %v3787_v55 = vmul.f32 1.442695, %v3754_v2 }
 0x8c7   : > { %4128 = vrot.lane.b32.xlu0 %v18480_v41, %s11696_s20  ;;  %v3702_v41 = vpop.xlane.xlu0 %3701 }
 0x8c9   : > { %v14071_v39 = vpop.eup %11061 }
 0x8ca   : > { %v14056_v31 = vpop.f32.mrb[140].mxu1 }
 0x8cb   : > { %4281 = vrot.lane.b32.xlu0 %v18481_v52, %s11697_s22  ;;  %v14060_v8 = vpop.f32.mrb[141].mxu1  ;;  %v3759_v52 = vsub.f32 %v13850_v45, %v3702_v41  ;;  %v3706_v1 = vpop.xlane.xlu0 %3705  ;;  %v3799_v45 = vmul.f32 1.442695, %v3760_v42 }
 0x8cc   : > { %v14062_v22 = vpop.f32.mrb[142].mxu1  ;;  %v3761_v20 = vsub.f32 %v13868_v34, %v3706_v1  ;;  %v3708_v41 = vpop.xlane.xlu1 %3707 }
 0x8cd   : > { %v14065_v23 = vpop.f32.mrb[143].mxu1  ;;  %v3797_v29 = vmul.f32 1.442695, %v3759_v52 }
 0x8ce   : > { %v3801_v35 = vmul.f32 1.442695, %v3761_v20 }
 0x8cf   : > { %4251 = vrot.lane.b32.xlu0 %v18482_v28, %s11697_s22  ;;  %11067 = vpow2.f32 %v3797_v29  ;;  %v14075_v28 = vpop.eup %11063  ;;  %v3710_v6 = vpop.xlane.xlu0 %3709 }
 0x8d0   : > { %11069 = vpow2.f32 %v3793_v57  ;;  %v14080_v43 = vpop.eup %11065  ;;  %v3763_v58 = vsub.f32 %v13881_v63, %v3710_v6  ;;  %v3712_v56 = vpop.xlane.xlu1 %3711  ;;  %v3762_v57 = vsub.f32 %v13859_v38, %v3708_v41 }
 0x8d1   : > { %11071 = vpow2.f32 %v3799_v45  ;;  %v3764_v12 = vsub.f32 %v13877_v21, %v3712_v56 }
 0x8d2   : > { %11073 = vpow2.f32 %v3787_v55  ;;  %v3805_v48 = vmul.f32 1.442695, %v3763_v58  ;;  %v3803_v2 = vmul.f32 1.442695, %v3762_v57 }
 0x8d3   : > { %11075 = vpow2.f32 %v3801_v35  ;;  %v3807_v42 = vmul.f32 1.442695, %v3764_v12 }
 0x8d4   : > { %11077 = vpow2.f32 %v3795_v13 }
 0x8d5   : > { %11079 = vpow2.f32 %v3805_v48 }
 0x8d6   : > { %11081 = vpow2.f32 %v3807_v42 }
 0x8d7   : > { %11083 = vpow2.f32 %v3803_v2 }
 0x8d8   : > { %3853 = vadd.xlane.f32.xlu1 %v14071_v39 }
 0x8d9   : > { %v14084_v29 = vpop.eup %11067 }
 0x8da   : > { %v14088_v34 = vpop.eup %11069 }
 0x8db   : > { %v14092_v52 = vpop.eup %11071 }
 0x8dc   : > { %3849 = vadd.xlane.f32.xlu1 %v14075_v28  ;;  %v14096_v63 = vpop.eup %11073 }
 0x8dd   : > { %v14099_v1 = vpop.eup %11075 }
 0x8de   : > { %v14102_v21 = vpop.eup %11077 }
 0x8df   : > { %v14105_v38 = vpop.eup %11079 }
 0x8e0   : > { %3855 = vadd.xlane.f32.xlu1 %v14080_v43  ;;  %v14108_v45 = vpop.eup %11081 }
 0x8e1   : > { %v14111_v20 = vpop.eup %11083 }
 0x8e4   : > { %3861 = vadd.xlane.f32.xlu1 %v14084_v29 }
 0x8e8   : > { %3857 = vadd.xlane.f32.xlu1 %v14088_v34 }
 0x8ec   : > { %3863 = vadd.xlane.f32.xlu1 %v14092_v52 }
 0x8ee   : > { %3851 = vadd.xlane.f32.xlu0 %v14096_v63 }
 0x8f0   : > { %3865 = vadd.xlane.f32.xlu1 %v14099_v1 }
 0x8f2   : > { %3859 = vadd.xlane.f32.xlu0 %v14102_v21 }
 0x8f6   : > { %3869 = vadd.xlane.f32.xlu0 %v14105_v38 }
 0x8fa   : > { %3871 = vadd.xlane.f32.xlu0 %v14108_v45 }
 0x8fe   : > { %3867 = vadd.xlane.f32.xlu0 %v14111_v20 }
 0x906   : > { %v3714_v41 = vpop.xlane.xlu0 %3713 }
 0x907   : > { %v3765_v35 = vsub.f32 %v13937_v49, %v3714_v41 }
 0x908   : > { %v3716_v55 = vpop.xlane.xlu1 %3715 }
 0x909   : > { %v3766_v4 = vsub.f32 %v13953_v53, %v3716_v55  ;;  %v3809_v57 = vmul.f32 1.442695, %v3765_v35 }
 0x90a   : > { %v3718_v6 = vpop.xlane.xlu0 %3717 }
 0x90b   : > { %v3811_v13 = vmul.f32 1.442695, %v3766_v4  ;;  %v3767_v58 = vsub.f32 %v13962_v19, %v3718_v6 }
 0x90c   : > { %v3720_v56 = vpop.xlane.xlu1 %3719 }
 0x90d   : > { %11085 = vpow2.f32 %v3811_v13  ;;  %v3813_v12 = vmul.f32 1.442695, %v3767_v58  ;;  %v3768_v42 = vsub.f32 %v13966_v11, %v3720_v56  ;;  %v14125_v11 = vadd.f32 %v14016_v16, %v13793_v47 }
 0x90e   : > { %v3994_v48 = vpop.permute.xlu0 %3993 }
 0x90f   : > { %11087 = vpow2.f32 %v3813_v12  ;;  %10049 = vmatprep.subr.bf16.mxu0 %v3994_v48  ;;  %v3815_v53 = vmul.f32 1.442695, %v3768_v42 }
 0x910   : > { %10050 = vmatpush3.bf16.msra.mxu0 %v3994_v48  ;;  %v3996_v2 = vpop.permute.xlu1 %3995  ;;  %11089 = vpow2.f32 %v3809_v57 }
 0x911   : > { %10051 = vmatprep.subr.bf16.mxu0 %v3996_v2  ;;  %11091 = vpow2.f32 %v3815_v53  ;;  %v18483_v53 = vld [vmem:[#allocation21_spill] sm:$0xff] }
 0x912   : > { %v3998_v15 = vpop.permute.xlu0 %3997 }
 0x914   : > { %10052 = vmatpush3.bf16.msra.mxu0 %v3996_v2  ;;  %v4000_v49 = vpop.permute.xlu1 %3999 }
 0x915   : > { %10053 = vmatprep.subr.bf16.mxu0 %v3998_v15 }
 0x916   : > { %v4002_v41 = vpop.permute.xlu0 %4001 }
 0x917   : > { %v14118_v19 = vpop.eup %11085 }
 0x918   : > { %3875 = vadd.xlane.f32.xlu0 %v14118_v19  ;;  %10054 = vmatpush3.bf16.msra.mxu0 %v3998_v15  ;;  %v4004_v55 = vpop.permute.xlu1 %4003  ;;  %v14133_v15 = vadd.f32 %v14020_v7, %v13780_v25 }
 0x919   : > { %v14121_v4 = vpop.eup %11087  ;;  %10055 = vmatprep.subr.bf16.mxu0 %v4000_v49 }
 0x91a   : > { %v4006_v6 = vpop.permute.xlu0 %4005  ;;  %3877 = vadd.xlane.f32.xlu1 %v14121_v4  ;;  %v14129_v13 = vpop.eup %11089 }
 0x91b   : > { %v14141_v47 = vpop.eup %11091 }
 0x91c   : > { %3725 = vmax.xlane.f32.xlu0 %v14125_v11  ;;  %10056 = vmatpush3.bf16.msra.mxu0 %v4000_v49  ;;  %v4008_v35 = vpop.permute.xlu1 %4007 }
 0x91d   : > { %10057 = vmatprep.subr.bf16.mxu0 %v4002_v41 }
 0x91e   : > { %v14135_v58 = vpop.permute.xlu0 %4267  ;;  %3873 = vadd.xlane.f32.xlu1 %v14129_v13 }
 0x920   : > { %3721 = vmax.xlane.f32.xlu0 %v14133_v15  ;;  %10058 = vmatpush3.bf16.msra.mxu0 %v4002_v41  ;;  %v14139_v16 = vpop.permute.xlu1 %4271  ;;  %v18484_v41 = vld [vmem:[#allocation19_spill] sm:$0xff] }
 0x921   : > { %10059 = vmatprep.subr.bf16.mxu0 %v4004_v55 }
 0x922   : > { %v14143_v56 = vpop.permute.xlu0 %4269  ;;  %3879 = vadd.xlane.f32.xlu1 %v14141_v47 }
 0x924   : > { %10060 = vmatpush3.bf16.msra.mxu0 %v4004_v55  ;;  %v4115_v12 = vpop.permute.xlu1 %4114 }
 0x925   : > { %10061 = vmatprep.subr.bf16.mxu0 %v4006_v6  ;;  %10081 = vmatprep.subr.bf16.mxu1 %v4115_v12 }
 0x926   : > { %v14146_v7 = vpop.permute.xlu0 %4273  ;;  %10082 = vmatpush3.bf16.msra.mxu1 %v4115_v12  ;;  %v14160_v12 = vadd.f32 %v14034_v40, %v13820_v24  ;;  %v14179_v40 = vadd.f32 %v14046_v33, %v13856_v18 }
 0x928   : > { %10062 = vmatpush3.bf16.msra.mxu0 %v4006_v6  ;;  %v4117_v25 = vpop.permute.xlu1 %4116 }
 0x929   : > { %10063 = vmatprep.subr.bf16.mxu0 %v4008_v35  ;;  %10083 = vmatprep.subr.bf16.mxu1 %v4117_v25 }
 0x92a   : > { %v14148_v48 = vpop.permute.xlu0 %4275  ;;  %10084 = vmatpush3.bf16.msra.mxu1 %v4117_v25  ;;  %v14164_v25 = vadd.f32 %v14024_v5, %v13806_v37  ;;  %v14196_v37 = vadd.f32 %v14036_v14, %v13829_v9  ;;  %v18485_v9 = vld [vmem:[#allocation6_spill] sm:$0xff] }
 0x92c   : > { %10064 = vmatpush3.bf16.msra.mxu0 %v4008_v35  ;;  %v4119_v57 = vpop.permute.xlu1 %4118 }
 0x92d   : > { %10085 = vmatprep.subr.bf16.mxu1 %v4119_v57  ;;  %10353 = vmatprep.subr.msk.bf16.mxu0 %vm1566_vm0, %v14135_v58 }
 0x92e   : > { %v4121_v42 = vpop.permute.xlu0 %4120  ;;  %10086 = vmatpush3.bf16.msra.mxu1 %v4119_v57  ;;  %v14169_v57 = vadd.f32 %v14042_v27, %v13874_v54  ;;  %v14186_v54 = vadd.f32 %v14030_v10, %v13838_v62  ;;  %v14204_v10 = vadd.f32 %v14038_v46, %v13812_v51  ;;  %v18487_v46 = vld [vmem:[#allocation23_spill] sm:$0xff] }
 0x92f   : > { %10087 = vmatprep.subr.bf16.mxu1 %v4121_v42 }
 0x930   : > { %v14181_v5 = vpop.permute.xlu1 %4279 }
 0x932   : > { %v14152_v2 = vpop.permute.xlu0 %4277  ;;  %10088 = vmatpush3.bf16.msra.mxu1 %v4121_v42  ;;  %v14174_v42 = vadd.f32 %v14026_v17, %v13785_v0  ;;  %v14191_v0 = vadd.f32 %v14048_v44, %v13865_v50  ;;  %v18486_v17 = vld [vmem:[#allocation8_spill] sm:$0xff] }
 0x933   : > { %4446 = vrot.lane.b32.xlu1 %v18483_v53, %s11697_s22 }
 0x934   : > { %v14198_v24 = vpop.permute.xlu1 %4253 }
 0x936   : > { %v4123_v49 = vpop.permute.xlu0 %4122  ;;  %4444 = vrot.lane.b32.xlu0 %v18484_v41, %s11697_s22  ;;  %v18488_v41 = vld [vmem:[#allocation25_spill] sm:$0xff] }
 0x937   : > { %10089 = vmatprep.subr.bf16.mxu1 %v4123_v49 }
 0x938   : > { %10090 = vmatpush3.bf16.msra.mxu1 %v4123_v49 }
 0x93a   : > { %v4125_v55 = vpop.permute.xlu0 %4124 }
 0x93b   : > { %10091 = vmatprep.subr.bf16.mxu1 %v4125_v55 }
 0x93c   : > { %10092 = vmatpush3.bf16.msra.mxu1 %v4125_v55 }
 0x93e   : > { %v4127_v6 = vpop.permute.xlu0 %4126 }
 0x93f   : > { %10093 = vmatprep.subr.bf16.mxu1 %v4127_v6 }
 0x940   : > { %10094 = vmatpush3.bf16.msra.mxu1 %v4127_v6 }
 0x942   : > { %v4129_v35 = vpop.permute.xlu0 %4128 }
 0x943   : > { %10095 = vmatprep.subr.bf16.mxu1 %v4129_v35 }
 0x944   : > { %10096 = vmatpush3.bf16.msra.mxu1 %v4129_v35 }
 0x946   : > { %v14207_v33 = vpop.permute.xlu0 %4281 }
 0x94a   : > { %v14209_v14 = vpop.permute.xlu0 %4251 }
 0x955   : > { %3729 = vmax.xlane.f32.xlu0 %v14160_v12 }
 0x957   : > { %3727 = vmax.xlane.f32.xlu1 %v14164_v25 }
 0x959   : > { %3741 = vmax.xlane.f32.xlu0 %v14169_v57 }
 0x95b   : > { %3723 = vmax.xlane.f32.xlu1 %v14174_v42 }
 0x95d   : > { %3737 = vmax.xlane.f32.xlu0 %v14179_v40 }
 0x95f   : > { %3733 = vmax.xlane.f32.xlu1 %v14186_v54 }
 0x961   : > { %3743 = vmax.xlane.f32.xlu0 %v14191_v0 }
 0x963   : > { %3735 = vmax.xlane.f32.xlu1 %v14196_v37 }
 0x965   : > { %v3854_v62 = vpop.xlane.xlu1 %3853 }
 0x967   : > { %3731 = vmax.xlane.f32.xlu1 %v14204_v10 }
 0x969   : > { %v3850_v50 = vpop.xlane.xlu1 %3849 }
 0x96d   : > { %v3856_v18 = vpop.xlane.xlu1 %3855 }
 0x96e   : > { %11093 = vrcp.f32 %v3856_v18 }
 0x96f   : > { %11095 = vrcp.f32 %v3850_v50 }
 0x970   : > { %11097 = vrcp.f32 %v3854_v62 }
 0x971   : > { %v3862_v27 = vpop.xlane.xlu1 %3861 }
 0x975   : > { %v3858_v44 = vpop.xlane.xlu1 %3857 }
 0x977   : > { %4255 = vrot.lane.b32.xlu0 %v18485_v9, %s11697_s22 }
 0x978   : > { %4257 = vrot.lane.b32.xlu1 %v18486_v17, %s11697_s22  ;;  %v11094_v55 = vpop.eup %11093 }
 0x979   : > { %v3864_v53 = vpop.xlane.xlu1 %3863  ;;  %v11096_v35 = vpop.eup %11095  ;;  %v3948_v62 = vmul.f32 %v11094_v55, %v14080_v43 }
 0x97a   : > { %v11098_v18 = vpop.eup %11097 }
 0x97b   : > { %v3852_v51 = vpop.xlane.xlu0 %3851 }
 0x97c   : > { %11099 = vrcp.f32 %v3852_v51  ;;  %4448 = vrot.lane.b32.xlu1 %v18487_v46, %s11697_s22  ;;  %v3945_v51 = vmul.f32 %v11096_v35, %v14075_v28  ;;  %v4308_v28 = vsel %vm1566_vm0, %v14135_v58, 0 }
 0x97d   : > { %11101 = vrcp.f32 %v3858_v44  ;;  %v3866_v9 = vpop.xlane.xlu1 %3865 }
 0x97f   : > { %v3860_v49 = vpop.xlane.xlu0 %3859 }
 0x980   : > { %11103 = vrcp.f32 %v3860_v49  ;;  %4450 = vrot.lane.b32.xlu1 %v18488_v41, %s11697_s22  ;;  %v3947_v49 = vmul.f32 %v11098_v18, %v14071_v39 }
 0x981   : > { %11105 = vrcp.f32 %v3864_v53 }
 0x982   : > { %11107 = vrcp.f32 %v3862_v27  ;;  %v3978_v27 = vpack.c.bf16 %v3948_v62, %v3947_v49 }
 0x983   : > { %v3870_v6 = vpop.xlane.xlu0 %3869 }
 0x986   : > { %v11100_v50 = vpop.eup %11099 }
 0x987   : > { %v3872_v17 = vpop.xlane.xlu0 %3871  ;;  %v3946_v44 = vmul.f32 %v11100_v50, %v14096_v63  ;;  %v11102_v46 = vpop.eup %11101 }
 0x988   : > { %11109 = vrcp.f32 %v3872_v17  ;;  %v3949_v43 = vmul.f32 %v11102_v46, %v14088_v34  ;;  %v14267_v46 = vadd.f32 %v14062_v22, %v13959_v60  ;;  %v4323_v60 = vsel %vm1566_vm0, %v14152_v2, 0 }
 0x989   : > { %v3977_v41 = vpack.c.bf16 %v3946_v44, %v3945_v51  ;;  %11111 = vrcp.f32 %v3866_v9 }
 0x98a   : > { %v11104_v53 = vpop.eup %11103  ;;  %11113 = vrcp.f32 %v3870_v6 }
 0x98b   : > { %v11106_v32 = vpop.eup %11105  ;;  %v3868_v26 = vpop.xlane.xlu0 %3867  ;;  %10065 = vmatprep.mubr.bf16.mxu0 %v3977_v41  ;;  %v3950_v55 = vmul.f32 %v11104_v53, %v14102_v21 }
 0x98c   : > { %11115 = vrcp.f32 %v3868_v26  ;;  %10066 = vmatmul.mubr.bf16.vlgmr.msra.gmra.mrb[112].mxu0 %v3978_v27  ;;  %v11108_v63 = vpop.eup %11107  ;;  %v3952_v35 = vmul.f32 %v11106_v32, %v14092_v52  ;;  %v4311_v26 = vsel %vm1566_vm0, %v14143_v56, 0 }
 0x98d   : > { %10114 = vmatpush3.bf16.xpose.msra.mxu0 %v4308_v28  ;;  %v3979_v39 = vpack.c.bf16 %v3950_v55, %v3949_v43  ;;  %v3951_v6 = vmul.f32 %v11108_v63, %v14084_v29  ;;  %v4326_v63 = vsel %vm1566_vm0, %v14181_v5, 0 }
 0x98e   : > { %10354 = vmatprep.subr.msk.bf16.mxu0 %vm1566_vm0, %v14143_v56  ;;  %v4314_v56 = vsel %vm1566_vm0, %v14139_v16, 0 }
 0x98f   : > { %10069 = vmatprep.mubr.bf16.mxu0 %v3979_v39  ;;  %v3980_v18 = vpack.c.bf16 %v3952_v35, %v3951_v6 }
 0x992   : > { %v11110_v34 = vpop.eup %11109 }
 0x993   : > { %v11112_v50 = vpop.eup %11111  ;;  %v3956_v62 = vmul.f32 %v11110_v34, %v14108_v45  ;;  %v14245_v45 = vadd.f32 %v14051_v36, %v13847_v61  ;;  %v14259_v61 = vadd.f32 %v14060_v8, %v13925_v3 }
 0x994   : > { %10070 = vmatmul.mubr.bf16.gmra.mrb[116].mxu0 %v3980_v18  ;;  %v11114_v21 = vpop.eup %11113  ;;  %v3953_v32 = vmul.f32 %v11112_v50, %v14099_v1  ;;  %v4317_v1 = vsel %vm1566_vm0, %v14146_v7, 0 }
 0x995   : > { %10116 = vmatpush3.bf16.xpose.msra.mxu0 %v4311_v26  ;;  %v3955_v29 = vmul.f32 %v11114_v21, %v14105_v38 }
 0x996   : > { %v11116_v58 = vpop.eup %11115  ;;  %10355 = vmatprep.subr.msk.bf16.mxu0 %vm1566_vm0, %v14139_v16 }
 0x997   : > { %v3954_v52 = vmul.f32 %v11116_v58, %v14111_v20  ;;  %v3982_v17 = vpack.c.bf16 %v3956_v62, %v3955_v29  ;;  %v14252_v20 = vadd.f32 %v14056_v31, %v13944_v59  ;;  %v4320_v31 = vsel %vm1566_vm0, %v14148_v48, 0 }
 0x999   : > { %v3981_v9 = vpack.c.bf16 %v3954_v52, %v3953_v32 }
 0x99b   : > { %10073 = vmatprep.mubr.bf16.mxu0 %v3981_v9 }
 0x99c   : > { %10074 = vmatmul.mubr.bf16.gmra.mrb[120].mxu0 %v3982_v17 }
 0x99d   : > { %10118 = vmatpush3.bf16.xpose.msra.mxu0 %v4314_v56 }
 0x99e   : > { %10356 = vmatprep.subr.msk.bf16.mxu0 %vm1566_vm0, %v14146_v7 }
 0x9a4   : > { %3739 = vmax.xlane.f32.xlu1 %v14245_v45 }
 0x9a5   : > { %10120 = vmatpush3.bf16.xpose.msra.mxu0 %v4317_v1  ;;  %v3876_v38 = vpop.xlane.xlu0 %3875 }
 0x9a6   : > { %10357 = vmatprep.subr.msk.bf16.mxu0 %vm1566_vm0, %v14148_v48  ;;  %11117 = vrcp.f32 %v3876_v38  ;;  %v14277_v48 = vadd.f32 %v14065_v23, %v13934_v30 }
 0x9a7   : > { %v3878_v16 = vpop.xlane.xlu1 %3877 }
 0x9a8   : > { %3749 = vmax.xlane.f32.xlu1 %v14252_v20 }
 0x9a9   : > { %v3726_v51 = vpop.xlane.xlu0 %3725 }
 0x9aa   : > { %v3771_v36 = vsub.f32 %v14125_v11, %v3726_v51 }
 0x9ab   : > { %v3874_v7 = vpop.xlane.xlu1 %3873 }
 0x9ac   : > { %v3821_v44 = vmul.f32 1.442695, %v3771_v36  ;;  %11119 = vrcp.f32 %v3874_v7  ;;  %3745 = vmax.xlane.f32.xlu1 %v14259_v61 }
 0x9ad   : > { %11121 = vrcp.f32 %v3878_v16  ;;  %10122 = vmatpush3.bf16.xpose.msra.mxu0 %v4320_v31  ;;  %v3722_v59 = vpop.xlane.xlu0 %3721 }
 0x9ae   : > { %11123 = vpow2.f32 %v3821_v44  ;;  %v3769_v3 = vsub.f32 %v14133_v15, %v3722_v59  ;;  %10358 = vmatprep.subr.msk.bf16.mxu0 %vm1566_vm0, %v14152_v2 }
 0x9af   : > { %v3880_v8 = vpop.xlane.xlu1 %3879 }
 0x9b0   : > { %v3817_v11 = vmul.f32 1.442695, %v3769_v3  ;;  %11125 = vrcp.f32 %v3880_v8  ;;  %3751 = vmax.xlane.f32.xlu1 %v14267_v46  ;;  %v11118_v22 = vpop.eup %11117 }
 0x9b1   : > { %v14273_v49 = vpop.permute.xlu0 %4444  ;;  %v3958_v23 = vmul.f32 %v11118_v22, %v14118_v19 }
 0x9b2   : > { %11127 = vpow2.f32 %v3817_v11  ;;  %10361 = vmatprep.subr.msk.bf16.mxu1 %vm1566_vm0, %v14273_v49 }
 0x9b4   : > { %3747 = vmax.xlane.f32.xlu1 %v14277_v48 }
 0x9b5   : > { %10124 = vmatpush3.bf16.xpose.msra.mxu0 %v4323_v60 }
 0x9b6   : > { %v11120_v15 = vpop.eup %11119  ;;  %10359 = vmatprep.subr.msk.bf16.mxu0 %vm1566_vm0, %v14181_v5 }
 0x9b7   : > { %v11122_v41 = vpop.eup %11121  ;;  %v3957_v53 = vmul.f32 %v11120_v15, %v14129_v13  ;;  %v14306_v13 = vpop.permute.xlu1 %4446 }
 0x9b8   : > { %v14288_v30 = vpop.eup %11123  ;;  %v3959_v55 = vmul.f32 %v11122_v41, %v14121_v4  ;;  %v4329_v4 = vsel %vm1566_vm0, %v14207_v33, 0 }
 0x9b9   : > { %3885 = vadd.xlane.f32.xlu0 %v14288_v30  ;;  %v3983_v27 = vpack.c.bf16 %v3958_v23, %v3957_v53 }
 0x9ba   : > { %v11126_v43 = vpop.eup %11125 }
 0x9bb   : > { %10077 = vmatprep.mubr.bf16.mxu0 %v3983_v27  ;;  %v3960_v2 = vmul.f32 %v11126_v43, %v14141_v47 }
 0x9bc   : > { %v14293_v28 = vpop.eup %11127 }
 0x9bd   : > { %10126 = vmatpush3.bf16.xpose.msra.mxu0 %v4326_v63  ;;  %3881 = vadd.xlane.f32.xlu1 %v14293_v28  ;;  %v3984_v19 = vpack.c.bf16 %v3960_v2, %v3959_v55  ;;  %v18490_v63 = vld [vmem:[#allocation27_spill] sm:$0xff] }
 0x9be   : > { %10360 = vmatprep.subr.msk.bf16.mxu0 %vm1566_vm0, %v14207_v33 }
 0x9bf   : > { %10078 = vmatmul.mubr.bf16.gmra.mrb[124].mxu0 %v3984_v19 }
 0x9c0   : > { %10129 = vmatprep.mubr.msk.bf16.mxu0 %vm1566_vm0, %v14209_v14 }
 0x9c5   : > { %10128 = vmatpush3.bf16.xpose.msra.mxu0 %v4329_v4 }
 0x9cc   : > { %10130 = vmatmul.mubr.msk.bf16.vlgmr.msra.gmra.mrb[128].mxu0 %vm1566_vm0, %v14198_v24 }
 0x9e2   : > { %v3730_v47 = vpop.xlane.xlu0 %3729 }
 0x9e3   : > { %v3773_v33 = vsub.f32 %v14160_v12, %v3730_v47  ;;  %v18491_v47 = vld [vmem:[#allocation29_spill] sm:$0xff] }
 0x9e4   : > { %v3728_v5 = vpop.xlane.xlu1 %3727 }
 0x9e5   : > { %v3772_v39 = vsub.f32 %v14164_v25, %v3728_v5  ;;  %v3825_v32 = vmul.f32 1.442695, %v3773_v33 }
 0x9e6   : > { %v3742_v35 = vpop.xlane.xlu0 %3741 }
 0x9e7   : > { %v3823_v6 = vmul.f32 1.442695, %v3772_v39  ;;  %v3779_v12 = vsub.f32 %v14169_v57, %v3742_v35  ;;  %v18493_v35 = vld [vmem:[#allocation16_spill] sm:$0xff] }
 0x9e8   : > { %v3724_v18 = vpop.xlane.xlu1 %3723 }
 0x9e9   : > { %11129 = vpow2.f32 %v3823_v6  ;;  %v3770_v34 = vsub.f32 %v14174_v42, %v3724_v18  ;;  %v3837_v56 = vmul.f32 1.442695, %v3779_v12  ;;  %v18494_v6 = vld [vmem:[#allocation31_spill] sm:$0xff] }
 0x9ea   : > { %v3738_v14 = vpop.xlane.xlu0 %3737 }
 0x9eb   : > { %v3819_v50 = vmul.f32 1.442695, %v3770_v34  ;;  %v3777_v44 = vsub.f32 %v14179_v40, %v3738_v14  ;;  %v18495_v34 = vld [vmem:[#allocation33_spill] sm:$0xff]  ;;  %v18496_v14 = vld [vmem:[#allocation20_spill] sm:$0xff] }
 0x9ec   : > { %v3734_v26 = vpop.xlane.xlu1 %3733 }
 0x9ed   : > { %11131 = vpow2.f32 %v3819_v50  ;;  %v3775_v24 = vsub.f32 %v14186_v54, %v3734_v26  ;;  %v3833_v59 = vmul.f32 1.442695, %v3777_v44  ;;  %v18497_v50 = vld [vmem:[#allocation24_spill] sm:$0xff] }
 0x9ee   : > { %v3744_v21 = vpop.xlane.xlu0 %3743  ;;  %v18498_v26 = vld [vmem:[#allocation28_spill] sm:$0xff] }
 0x9ef   : > { %v3829_v58 = vmul.f32 1.442695, %v3775_v24 }
 0x9f0   : > { %v3736_v62 = vpop.xlane.xlu1 %3735 }
 0x9f1   : > { %11133 = vpow2.f32 %v3829_v58  ;;  %v3776_v25 = vsub.f32 %v14196_v37, %v3736_v62  ;;  %v3780_v37 = vsub.f32 %v14191_v0, %v3744_v21  ;;  %v18489_v0 = vld [vmem:[#allocation10_spill] sm:$0xff]  ;;  %v4250_v58 = vld [vmem:[%s17884_s1 + $0x78] sm:$0xff] }
 0x9f2   : > { %v4256_v52 = vpop.permute.xlu0 %4255  ;;  %11135 = vpow2.f32 %v3825_v32  ;;  %v18499_v32 = vld [vmem:[#allocation32_spill] sm:$0xff] }
 0x9f3   : > { %v14313_v29 = vpop.eup %11129  ;;  %10133 = vmatprep.mubr.msk.bf16.mxu0 %vm1566_vm0, %v4256_v52  ;;  %v3831_v9 = vmul.f32 1.442695, %v3776_v25  ;;  %v3839_v38 = vmul.f32 1.442695, %v3780_v37 }
 0x9f4   : > { %3887 = vadd.xlane.f32.xlu1 %v14313_v29  ;;  %v3732_v42 = vpop.xlane.xlu1 %3731 }
 0x9f5   : > { %11137 = vpow2.f32 %v3831_v9  ;;  %v3774_v7 = vsub.f32 %v14204_v10, %v3732_v42  ;;  %v18501_v42 = vld [vmem:[#allocation12_spill] sm:$0xff] }
 0x9f6   : > { %11139 = vpow2.f32 %v3837_v56 }
 0x9f7   : > { %v14318_v54 = vpop.eup %11131  ;;  %11141 = vpow2.f32 %v3839_v38  ;;  %v3827_v31 = vmul.f32 1.442695, %v3774_v7  ;;  %v18504_v38 = vld [vmem:[#allocation18_spill] sm:$0xff] }
 0x9f8   : > { %3883 = vadd.xlane.f32.xlu0 %v14318_v54  ;;  %v4258_v17 = vpop.permute.xlu1 %4257  ;;  %v18506_v7 = vld [vmem:[#allocation22_spill] sm:$0xff] }
 0x9f9   : > { %10134 = vmatmul.mubr.msk.bf16.gmra.mrb[132].mxu0 %vm1566_vm0, %v4258_v17  ;;  %11143 = vpow2.f32 %v3827_v31 }
 0x9fa   : > { %11145 = vpow2.f32 %v3833_v59  ;;  %v4249_v59 = vld [vmem:[%s17884_s1 + $0x70] sm:$0xff] }
 0x9fb   : > { %v14323_v1 = vpop.eup %11133 }
 0x9fc   : > { %3893 = vadd.xlane.f32.xlu0 %v14323_v1  ;;  %v14326_v16 = vpop.eup %11135  ;;  %v14342_v3 = vpop.permute.xlu1 %4448 }
 0x9ff   : > { %v14329_v57 = vpop.eup %11137 }
 0xa00   : > { %3889 = vadd.xlane.f32.xlu0 %v14326_v16  ;;  %v14334_v51 = vpop.eup %11139  ;;  %v14349_v22 = vpop.permute.xlu1 %4450 }
 0xa01   : > { %v14337_v36 = vpop.eup %11141 }
 0xa03   : > { %v14344_v8 = vpop.eup %11143 }
 0xa04   : > { %3895 = vadd.xlane.f32.xlu0 %v14329_v57  ;;  %v14347_v11 = vpop.eup %11145 }
 0xa05   : > { %4259 = vrot.lane.b32.xlu1 %v18489_v0, %s11697_s22 }
 0xa08   : > { %3901 = vadd.xlane.f32.xlu0 %v14334_v51 }
 0xa0c   : > { %3903 = vadd.xlane.f32.xlu0 %v14337_v36 }
 0xa29   : > { %3891 = vadd.xlane.f32.xlu1 %v14344_v8 }
 0xa2d   : > { %3897 = vadd.xlane.f32.xlu1 %v14347_v11 }
 0xa31   : > { %v3740_v60 = vpop.xlane.xlu1 %3739 }
 0xa32   : > { %v3778_v10 = vsub.f32 %v14245_v45, %v3740_v60 }
 0xa34   : > { %v3835_v40 = vmul.f32 1.442695, %v3778_v10 }
 0xa35   : > { %v3750_v15 = vpop.xlane.xlu1 %3749 }
 0xa36   : > { %11147 = vpow2.f32 %v3835_v40  ;;  %v3783_v41 = vsub.f32 %v14252_v20, %v3750_v15  ;;  %v18510_v40 = vld [vmem:[#allocation26_spill] sm:$0xff] }
 0xa37   : > { %v18511_v15 = vld [vmem:[#allocation30_spill] sm:$0xff] }
 0xa38   : > { %v3845_v53 = vmul.f32 1.442695, %v3783_v41 }
 0xa39   : > { %v3746_v23 = vpop.xlane.xlu1 %3745 }
 0xa3a   : > { %11149 = vpow2.f32 %v3845_v53  ;;  %v3781_v27 = vsub.f32 %v14259_v61, %v3746_v23 }
 0xa3c   : > { %v3841_v43 = vmul.f32 1.442695, %v3781_v27 }
 0xa3d   : > { %v3752_v55 = vpop.xlane.xlu1 %3751 }
 0xa3e   : > { %11151 = vpow2.f32 %v3841_v43  ;;  %v3784_v2 = vsub.f32 %v14267_v46, %v3752_v55  ;;  %4452 = vrot.lane.b32.xlu1 %v18490_v63, %s11697_s22  ;;  %v18492_v46 = vld [vmem:[#allocation14_spill] sm:$0xff] }
 0xa40   : > { %v14358_v19 = vpop.eup %11147  ;;  %v3847_v45 = vmul.f32 1.442695, %v3784_v2 }
 0xa41   : > { %3899 = vadd.xlane.f32.xlu0 %v14358_v19  ;;  %v3748_v4 = vpop.xlane.xlu1 %3747 }
 0xa42   : > { %11153 = vpow2.f32 %v3847_v45  ;;  %v3782_v20 = vsub.f32 %v14277_v48, %v3748_v4  ;;  %4454 = vrot.lane.b32.xlu1 %v18491_v47, %s11697_s22 }
 0xa44   : > { %v14364_v61 = vpop.eup %11149  ;;  %v3843_v5 = vmul.f32 1.442695, %v3782_v20 }
 0xa45   : > { %3909 = vadd.xlane.f32.xlu0 %v14364_v61 }
 0xa46   : > { %11155 = vpow2.f32 %v3843_v5  ;;  %4263 = vrot.lane.b32.xlu1 %v18492_v46, %s11697_s22  ;;  %v3886_v53 = vpop.xlane.xlu0 %3885 }
 0xa48   : > { %v14369_v39 = vpop.eup %11151 }
 0xa49   : > { %3905 = vadd.xlane.f32.xlu0 %v14369_v39 }
 0xa4a   : > { %4265 = vrot.lane.b32.xlu1 %v18493_v35, %s11697_s22  ;;  %v3882_v41 = vpop.xlane.xlu1 %3881 }
 0xa4c   : > { %v14374_v48 = vpop.eup %11153 }
 0xa4d   : > { %3911 = vadd.xlane.f32.xlu0 %v14374_v48 }
 0xa4e   : > { %4456 = vrot.lane.b32.xlu1 %v18494_v6, %s11697_s22 }
 0xa50   : > { %v14379_v18 = vpop.eup %11155 }
 0xa51   : > { %3907 = vadd.xlane.f32.xlu0 %v14379_v18 }
 0xa52   : > { %4458 = vrot.lane.b32.xlu1 %v18495_v34, %s11697_s22 }
 0xa56   : > { %4430 = vrot.lane.b32.xlu1 %v18496_v14, %s11697_s22 }
 0xa5a   : > { %4434 = vrot.lane.b32.xlu1 %v18497_v50, %s11697_s22 }
 0xa5e   : > { %4438 = vrot.lane.b32.xlu1 %v18498_v26, %s11697_s22 }
 0xa5f   : > { %v14390_v33 = vpop.f32.mrb[112].mxu0 }
 0xa60   : > { %v14392_v24 = vpop.f32.mrb[113].mxu0 }
 0xa61   : > { %v14394_v21 = vpop.f32.mrb[114].mxu0 }
 0xa62   : > { %v14398_v62 = vpop.f32.mrb[115].mxu0  ;;  %4442 = vrot.lane.b32.xlu1 %v18499_v32, %s11697_s22 }
 0xa67   : > { %v14404_v52 = vpop.f32.mrb[116].mxu0  ;;  %4261 = vrot.lane.b32.xlu0 %v18501_v42, %s11697_s22 }
 0xa68   : > { %18500 = vst [vmem:[#allocation11_spill] sm:$0xff] %v14404_v52  ;;  %v14408_v12 = vpop.f32.mrb[117].mxu0 }
 0xa69   : > { %18502 = vst [vmem:[#allocation15_spill] sm:$0xff] %v14408_v12  ;;  %v14410_v9 = vpop.f32.mrb[118].mxu0 }
 0xa6a   : > { %v14414_v56 = vpop.f32.mrb[119].mxu0 }
 0xa6b   : > { %18503 = vst [vmem:[#allocation4_spill] sm:$0xff] %v14414_v56  ;;  %4428 = vrot.lane.b32.xlu0 %v18504_v38, %s11697_s22 }
 0xa6f   : > { %v14420_v0 = vpop.f32.mrb[120].mxu0  ;;  %4432 = vrot.lane.b32.xlu0 %v18506_v7, %s11697_s22  ;;  %v14479_v7 = vld [vmem:[%s17884_s1 + $0x10] sm:$0xff] }
 0xa70   : > { %18505 = vst [vmem:[#allocation13_spill] sm:$0xff] %v14420_v0  ;;  %v14424_v44 = vpop.f32.mrb[121].mxu0 }
 0xa71   : > { %18507 = vst [vmem:[#allocation17_spill] sm:$0xff] %v14424_v44  ;;  %v14426_v31 = vpop.f32.mrb[122].mxu0 }
 0xa72   : > { %18508 = vst [vmem:[#allocation2_spill] sm:$0xff] %v14426_v31  ;;  %v14430_v60 = vpop.f32.mrb[123].mxu0 }
 0xa73   : > { %18509 = vst [vmem:[#allocation21_spill] sm:$0xff] %v14430_v60  ;;  %4436 = vrot.lane.b32.xlu0 %v18510_v40, %s11697_s22 }
 0xa77   : > { %4440 = vrot.lane.b32.xlu0 %v18511_v15, %s11697_s22 }
 0xa81   : > { %v3888_v23 = vpop.xlane.xlu1 %3887 }
 0xa82   : > { %11157 = vrcp.f32 %v3888_v23  ;;  %v14492_v23 = vld [vmem:[%s17884_s1 + $0x18] sm:$0xff] }
 0xa83   : > { %11159 = vrcp.f32 %v3882_v41 }
 0xa84   : > { %11161 = vrcp.f32 %v3886_v53 }
 0xa85   : > { %v3884_v27 = vpop.xlane.xlu0 %3883  ;;  %v4260_v43 = vpop.permute.xlu1 %4259 }
 0xa86   : > { %11163 = vrcp.f32 %v3884_v27  ;;  %10137 = vmatprep.mubr.msk.bf16.mxu0 %vm1566_vm0, %v4260_v43  ;;  %v4491_v27 = vsel %vm1566_vm0, %v14342_v3, 0 }
 0xa89   : > { %v3894_v41 = vpop.xlane.xlu0 %3893 }
 0xa8c   : > { %v11158_v55 = vpop.eup %11157 }
 0xa8d   : > { %v11160_v2 = vpop.eup %11159  ;;  %v3964_v4 = vmul.f32 %v11158_v55, %v14313_v29  ;;  %v4488_v29 = vsel %vm1566_vm0, %v14306_v13, 0  ;;  %v3890_v55 = vpop.xlane.xlu0 %3889 }
 0xa8e   : > { %v11162_v63 = vpop.eup %11161  ;;  %v3961_v20 = vmul.f32 %v11160_v2, %v14293_v28  ;;  %v4494_v2 = vsel %vm1566_vm0, %v14349_v22, 0 }
 0xa8f   : > { %v3963_v5 = vmul.f32 %v11162_v63, %v14288_v30  ;;  %v4485_v30 = vsel %vm1566_vm0, %v14273_v49, 0  ;;  %v14471_v49 = vld [vmem:[%s17884_s1 + $0x8] sm:$0xff] }
 0xa90   : > { %v11164_v45 = vpop.eup %11163 }
 0xa91   : > { %v3962_v47 = vmul.f32 %v11164_v45, %v14318_v54  ;;  %v3986_v14 = vpack.c.bf16 %v3964_v4, %v3963_v5  ;;  %v14464_v54 = vld [vmem:[%s17884_s1] sm:$0xff]  ;;  %v3896_v63 = vpop.xlane.xlu0 %3895 }
 0xa92   : > { %v14443_v46 = vpop.f32.mrb[124].mxu0  ;;  %11165 = vrcp.f32 %v3896_v63 }
 0xa93   : > { %18512 = vst [vmem:[#allocation19_spill] sm:$0xff] %v14443_v46  ;;  %v14445_v35 = vpop.f32.mrb[125].mxu0  ;;  %v3985_v6 = vpack.c.bf16 %v3962_v47, %v3961_v20  ;;  %11167 = vrcp.f32 %v3890_v55 }
 0xa94   : > { %18513 = vst [vmem:[#allocation6_spill] sm:$0xff] %v14445_v35  ;;  %v14447_v34 = vpop.f32.mrb[126].mxu0  ;;  %11169 = vrcp.f32 %v3894_v41  ;;  %v18534_v35 = vld [vmem:[#allocation39_spill] sm:$0xff] }
 0xa95   : > { %18514 = vst [vmem:[#allocation8_spill] sm:$0xff] %v14447_v34  ;;  %v14451_v26 = vpop.f32.mrb[127].mxu0  ;;  %10097 = vmatprep.mubr.bf16.mxu1 %v3985_v6 }
 0xa96   : > { %18515 = vst [vmem:[#allocation23_spill] sm:$0xff] %v14451_v26  ;;  %10098 = vmatmul.mubr.bf16.vlgmr.msra.gmra.mrb[144].mxu1 %v3986_v14 }
 0xa97   : > { %10146 = vmatpush3.bf16.xpose.msra.mxu1 %v4485_v30 }
 0xa98   : > { %10362 = vmatprep.subr.msk.bf16.mxu1 %vm1566_vm0, %v14306_v13 }
 0xa9c   : > { %v11166_v4 = vpop.eup %11165 }
 0xa9d   : > { %v11168_v47 = vpop.eup %11167 }
 0xa9e   : > { %v11170_v6 = vpop.eup %11169 }
 0xa9f   : > { %v10131_v32 = vpop.f32.mrb[128].mxu0  ;;  %10148 = vmatpush3.bf16.xpose.msra.mxu1 %v4488_v29  ;;  %v3965_v29 = vmul.f32 %v11168_v47, %v14326_v16  ;;  %v14516_v16 = vld [vmem:[%s17884_s1 + $0x20] sm:$0xff]  ;;  %v14529_v47 = vld [vmem:[%s17884_s1 + $0x30] sm:$0xff] }
 0xaa0   : > { %v4365_v42 = vpop.f32.mrb[129].mxu0  ;;  %10363 = vmatprep.subr.msk.bf16.mxu1 %vm1566_vm0, %v14342_v3  ;;  %v14486_v53 = vadd.f32 %v10131_v32, %v14479_v7 }
 0xaa1   : > { %v14474_v38 = vadd.f32 %v4365_v42, %v14464_v54  ;;  %v10132_v13 = vpop.f32.mrb[130].mxu0  ;;  %v3902_v42 = vpop.xlane.xlu0 %3901 }
 0xaa2   : > { %v4368_v40 = vpop.f32.mrb[131].mxu0  ;;  %v14500_v43 = vadd.f32 %v10132_v13, %v14492_v23  ;;  %v3967_v13 = vmul.f32 %v11170_v6, %v14323_v1  ;;  %v14521_v1 = vld [vmem:[%s17884_s1 + $0x28] sm:$0xff] }
 0xaa3   : > { %v14482_v15 = vadd.f32 %v4368_v40, %v14471_v49  ;;  %4605 = vmax.xlane.f32.xlu0 %v14474_v38 }
 0xaa5   : > { %4607 = vmax.xlane.f32.xlu1 %v14482_v15 }
 0xaa7   : > { %4609 = vmax.xlane.f32.xlu0 %v14486_v53  ;;  %10150 = vmatpush3.bf16.xpose.msra.mxu1 %v4491_v27 }
 0xaa8   : > { %10364 = vmatprep.subr.msk.bf16.mxu1 %vm1566_vm0, %v14349_v22  ;;  %v3968_v22 = vmul.f32 %v11166_v4, %v14329_v57 }
 0xaaa   : > { %v3988_v41 = vpack.c.bf16 %v3968_v22, %v3967_v13  ;;  %v14540_v22 = vld [vmem:[%s17884_s1 + $0x38] sm:$0xff] }
 0xaab   : > { %4611 = vmax.xlane.f32.xlu0 %v14500_v43 }
 0xaaf   : > { %10152 = vmatpush3.bf16.xpose.msra.mxu1 %v4494_v2  ;;  %v3904_v2 = vpop.xlane.xlu0 %3903 }
 0xab6   : > { %v3892_v3 = vpop.xlane.xlu1 %3891 }
 0xab7   : > { %11171 = vrcp.f32 %v3892_v3 }
 0xab8   : > { %11173 = vrcp.f32 %v3904_v2 }
 0xaba   : > { %v3898_v45 = vpop.xlane.xlu1 %3897 }
 0xabb   : > { %11175 = vrcp.f32 %v3898_v45 }
 0xabc   : > { %11177 = vrcp.f32 %v3902_v42 }
 0xabe   : > { %v4453_v20 = vpop.permute.xlu1 %4452 }
 0xabf   : > { %10365 = vmatprep.subr.msk.bf16.mxu1 %vm1566_vm0, %v4453_v20  ;;  %v4497_v5 = vsel %vm1566_vm0, %v4453_v20, 0 }
 0xac0   : > { %10154 = vmatpush3.bf16.xpose.msra.mxu1 %v4497_v5 }
 0xac1   : > { %v11172_v14 = vpop.eup %11171 }
 0xac2   : > { %v4455_v30 = vpop.permute.xlu1 %4454  ;;  %v3966_v32 = vmul.f32 %v11172_v14, %v14344_v8  ;;  %v11174_v13 = vpop.eup %11173 }
 0xac3   : > { %10366 = vmatprep.subr.msk.bf16.mxu1 %vm1566_vm0, %v4455_v30  ;;  %v4500_v55 = vsel %vm1566_vm0, %v4455_v30, 0 }
 0xac4   : > { %v3987_v40 = vpack.c.bf16 %v3966_v32, %v3965_v29 }
 0xac6   : > { %10101 = vmatprep.mubr.bf16.mxu1 %v3987_v40  ;;  %v4264_v27 = vpop.permute.xlu1 %4263 }
 0xac7   : > { %10102 = vmatmul.mubr.bf16.gmra.mrb[148].mxu1 %v3988_v41  ;;  %v11176_v41 = vpop.eup %11175 }
 0xac8   : > { %10156 = vmatpush3.bf16.xpose.msra.mxu1 %v4500_v55  ;;  %v11178_v55 = vpop.eup %11177 }
 0xaca   : > { %v4266_v57 = vpop.permute.xlu1 %4265 }
 0xacc   : > { %v10135_v8 = vpop.f32.mrb[132].mxu0 }
 0xacd   : > { %v4381_v63 = vpop.f32.mrb[133].mxu0  ;;  %v14543_v30 = vadd.f32 %v10135_v8, %v14529_v47 }
 0xace   : > { %v14524_v3 = vadd.f32 %v4381_v63, %v14516_v16  ;;  %v10136_v4 = vpop.f32.mrb[134].mxu0  ;;  %v3900_v20 = vpop.xlane.xlu0 %3899  ;;  %v3972_v63 = vmul.f32 %v11174_v13, %v14337_v36 }
 0xacf   : > { %11179 = vrcp.f32 %v3900_v20  ;;  %v4457_v5 = vpop.permute.xlu1 %4456  ;;  %v4384_v45 = vpop.f32.mrb[135].mxu0  ;;  %v14547_v42 = vadd.f32 %v10136_v4, %v14540_v22  ;;  %v3969_v4 = vmul.f32 %v11176_v41, %v14347_v11 }
 0xad0   : > { %v14532_v6 = vadd.f32 %v4384_v45, %v14521_v1  ;;  %10367 = vmatprep.subr.msk.bf16.mxu1 %vm1566_vm0, %v4457_v5  ;;  %4613 = vmax.xlane.f32.xlu0 %v14524_v3  ;;  %v4503_v14 = vsel %vm1566_vm0, %v4457_v5, 0  ;;  %v3971_v45 = vmul.f32 %v11178_v55, %v14334_v51 }
 0xad1   : > { %10158 = vmatpush3.bf16.xpose.msra.mxu1 %v4503_v14 }
 0xad2   : > { %4615 = vmax.xlane.f32.xlu1 %v14532_v6  ;;  %v3910_v29 = vpop.xlane.xlu0 %3909  ;;  %v3990_v28 = vpack.c.bf16 %v3972_v63, %v3971_v45 }
 0xad3   : > { %v4459_v32 = vpop.permute.xlu1 %4458 }
 0xad4   : > { %10368 = vmatprep.subr.msk.bf16.mxu1 %vm1566_vm0, %v4459_v32  ;;  %4617 = vmax.xlane.f32.xlu0 %v14543_v30  ;;  %v4506_v2 = vsel %vm1566_vm0, %v4459_v32, 0 }
 0xad6   : > { %4619 = vmax.xlane.f32.xlu1 %v14547_v42  ;;  %v3906_v40 = vpop.xlane.xlu0 %3905 }
 0xad9   : > { %v11180_v8 = vpop.eup %11179  ;;  %10160 = vmatpush3.bf16.xpose.msra.mxu1 %v4506_v2 }
 0xada   : > { %v3912_v20 = vpop.xlane.xlu0 %3911  ;;  %v3970_v5 = vmul.f32 %v11180_v8, %v14358_v19 }
 0xadb   : > { %11181 = vrcp.f32 %v3912_v20 }
 0xadc   : > { %v3989_v14 = vpack.c.bf16 %v3970_v5, %v3969_v4  ;;  %11183 = vrcp.f32 %v3906_v40  ;;  %v4248_v4 = vld [vmem:[%s17884_s1 + $0x68] sm:$0xff] }
 0xadd   : > { %11185 = vrcp.f32 %v3910_v29 }
 0xade   : > { %v3908_v50 = vpop.xlane.xlu0 %3907  ;;  %10105 = vmatprep.mubr.bf16.mxu1 %v3989_v14 }
 0xadf   : > { %11187 = vrcp.f32 %v3908_v50  ;;  %10106 = vmatmul.mubr.bf16.gmra.mrb[152].mxu1 %v3990_v28 }
 0xae2   : > { %v4262_v32 = vpop.permute.xlu0 %4261 }
 0xae3   : > { %10138 = vmatmul.mubr.msk.bf16.gmra.mrb[136].mxu0 %vm1566_vm0, %v4262_v32 }
 0xae4   : > { %10141 = vmatprep.mubr.msk.bf16.mxu0 %vm1566_vm0, %v4264_v27  ;;  %v4431_v27 = vpop.permute.xlu1 %4430 }
 0xae5   : > { %v11182_v36 = vpop.eup %11181 }
 0xae6   : > { %v11184_v11 = vpop.eup %11183  ;;  %v3976_v51 = vmul.f32 %v11182_v36, %v14374_v48  ;;  %v4429_v55 = vpop.permute.xlu0 %4428 }
 0xae7   : > { %v11186_v13 = vpop.eup %11185  ;;  %v3973_v41 = vmul.f32 %v11184_v11, %v14369_v39 }
 0xae8   : > { %v3975_v50 = vmul.f32 %v11186_v13, %v14364_v61  ;;  %v4435_v39 = vpop.permute.xlu1 %4434 }
 0xae9   : > { %v11188_v19 = vpop.eup %11187 }
 0xaea   : > { %v3974_v40 = vmul.f32 %v11188_v19, %v14379_v18  ;;  %v3992_v29 = vpack.c.bf16 %v3976_v51, %v3975_v50  ;;  %v4433_v2 = vpop.permute.xlu0 %4432 }
 0xaeb   : > { %10142 = vmatmul.mubr.msk.bf16.gmra.mrb[140].mxu0 %vm1566_vm0, %v4266_v57 }
 0xaec   : > { %v3991_v28 = vpack.c.bf16 %v3974_v40, %v3973_v41  ;;  %v4439_v61 = vpop.permute.xlu1 %4438 }
 0xaee   : > { %10109 = vmatprep.mubr.bf16.mxu1 %v3991_v28  ;;  %v4437_v48 = vpop.permute.xlu0 %4436 }
 0xaef   : > { %10110 = vmatmul.mubr.bf16.gmra.mrb[156].mxu1 %v3992_v29  ;;  %v4243_v29 = vld [vmem:[%s17884_s1 + $0x40] sm:$0xff] }
 0xaf0   : > { %10161 = vmatprep.mubr.msk.bf16.mxu1 %vm1566_vm0, %v4429_v55  ;;  %v4443_v57 = vpop.permute.xlu1 %4442  ;;  %v4246_v55 = vld [vmem:[%s17884_s1 + $0x58] sm:$0xff] }
 0xaf2   : > { %v4441_v18 = vpop.permute.xlu0 %4440 }
 0xaf7   : > { %10162 = vmatmul.mubr.msk.bf16.vlgmr.msra.gmra.mrb[160].mxu1 %vm1566_vm0, %v4431_v27 }
 0xaf8   : > { %10165 = vmatprep.mubr.msk.bf16.mxu1 %vm1566_vm0, %v4433_v2 }
 0xaff   : > { %10166 = vmatmul.mubr.msk.bf16.gmra.mrb[164].mxu1 %vm1566_vm0, %v4435_v39  ;;  %v4244_v39 = vld [vmem:[%s17884_s1 + $0x48] sm:$0xff] }
 0xb00   : > { %10169 = vmatprep.mubr.msk.bf16.mxu1 %vm1566_vm0, %v4437_v48 }
 0xb07   : > { %10170 = vmatmul.mubr.msk.bf16.gmra.mrb[168].mxu1 %vm1566_vm0, %v4439_v61 }
 0xb08   : > { %10173 = vmatprep.mubr.msk.bf16.mxu1 %vm1566_vm0, %v4441_v18  ;;  %v4245_v18 = vld [vmem:[%s17884_s1 + $0x50] sm:$0xff] }
 0xb0f   : > { %10174 = vmatmul.mubr.msk.bf16.gmra.mrb[172].mxu1 %vm1566_vm0, %v4443_v57 }
 0xb30   : > { %v4606_v34 = vpop.xlane.xlu0 %4605 }
 0xb69   : > { %v14572_v8 = vpop.f32.mrb[144].mxu1 }
 0xb6a   : > { %18516 = vst [vmem:[#allocation25_spill] sm:$0xff] %v14572_v8  ;;  %v14574_v63 = vpop.f32.mrb[145].mxu1 }
 0xb6b   : > { %18517 = vst [vmem:[#allocation10_spill] sm:$0xff] %v14574_v63  ;;  %v14576_v20 = vpop.f32.mrb[146].mxu1 }
 0xb6c   : > { %18518 = vst [vmem:[#allocation27_spill] sm:$0xff] %v14576_v20  ;;  %v14580_v5 = vpop.f32.mrb[147].mxu1 }
 0xb6d   : > { %18519 = vst [vmem:[#allocation29_spill] sm:$0xff] %v14580_v5  ;;  %v18533_v5 = vld [vmem:[#allocation35_spill] sm:$0xff] }
 0xb9a   : > { %v14584_v14 = vpop.f32.mrb[148].mxu1 }
 0xb9b   : > { %18520 = vst [vmem:[#allocation14_spill] sm:$0xff] %v14584_v14  ;;  %v14586_v32 = vpop.f32.mrb[149].mxu1 }
 0xb9c   : > { %18521 = vst [vmem:[#allocation16_spill] sm:$0xff] %v14586_v32  ;;  %v14588_v36 = vpop.f32.mrb[150].mxu1 }
 0xb9d   : > { %18522 = vst [vmem:[#allocation31_spill] sm:$0xff] %v14588_v36  ;;  %v14592_v13 = vpop.f32.mrb[151].mxu1 }
 0xb9e   : > { %18523 = vst [vmem:[#allocation33_spill] sm:$0xff] %v14592_v13 }
 0xbb2   : > { %v14596_v51 = vpop.f32.mrb[152].mxu1 }
 0xbb3   : > { %18524 = vst [vmem:[#allocation20_spill] sm:$0xff] %v14596_v51  ;;  %v14598_v41 = vpop.f32.mrb[153].mxu1 }
 0xbb4   : > { %18525 = vst [vmem:[#allocation24_spill] sm:$0xff] %v14598_v41  ;;  %v14600_v40 = vpop.f32.mrb[154].mxu1 }
 0xbb5   : > { %18526 = vst [vmem:[#allocation28_spill] sm:$0xff] %v14600_v40  ;;  %v14604_v28 = vpop.f32.mrb[155].mxu1  ;;  %v18532_v40 = vld [vmem:[#allocation34_spill] sm:$0xff] }
 0xbb6   : > { %18527 = vst [vmem:[#allocation32_spill] sm:$0xff] %v14604_v28  ;;  %v10139_v27 = vpop.f32.mrb[136].mxu0 }
 0xbb7   : > { %v4397_v2 = vpop.f32.mrb[137].mxu0  ;;  %v14625_v19 = vadd.f32 %v10139_v27, %v4245_v18 }
 0xbb8   : > { %v14614_v48 = vadd.f32 %v4397_v2, %v4243_v29  ;;  %v10140_v61 = vpop.f32.mrb[138].mxu0  ;;  %v4247_v2 = vld [vmem:[%s17884_s1 + $0x60] sm:$0xff] }
 0xbb9   : > { %v4400_v57 = vpop.f32.mrb[139].mxu0  ;;  %v14631_v11 = vadd.f32 %v10140_v61, %v4246_v55 }
 0xbba   : > { %v14619_v50 = vadd.f32 %v4400_v57, %v4244_v39  ;;  %4621 = vmax.xlane.f32.xlu0 %v14614_v48 }
 0xbbc   : > { %4623 = vmax.xlane.f32.xlu1 %v14619_v50 }
 0xbbe   : > { %4625 = vmax.xlane.f32.xlu0 %v14625_v19  ;;  %v10143_v57 = vpop.f32.mrb[140].mxu0 }
 0xbbf   : > { %v4413_v45 = vpop.f32.mrb[141].mxu0  ;;  %v14653_v25 = vadd.f32 %v10143_v57, %v4249_v59 }
 0xbc0   : > { %v14637_v10 = vadd.f32 %v4413_v45, %v4247_v2  ;;  %4627 = vmax.xlane.f32.xlu1 %v14631_v11  ;;  %v10144_v27 = vpop.f32.mrb[142].mxu0 }
 0xbc1   : > { %v4416_v37 = vpop.f32.mrb[143].mxu0  ;;  %v14662_v51 = vadd.f32 %v10144_v27, %v4250_v58 }
 0xbc2   : > { %v14643_v61 = vadd.f32 %v4416_v37, %v4248_v4  ;;  %v14645_v17 = vpop.f32.mrb[156].mxu1  ;;  %4629 = vmax.xlane.f32.xlu0 %v14637_v10 }
 0xbc3   : > { %18528 = vst [vmem:[#allocation12_spill] sm:$0xff] %v14645_v17  ;;  %v14651_v45 = vpop.f32.mrb[157].mxu1 }
 0xbc4   : > { %18529 = vst [vmem:[#allocation18_spill] sm:$0xff] %v14651_v45  ;;  %v14655_v41 = vpop.f32.mrb[158].mxu1  ;;  %4631 = vmax.xlane.f32.xlu1 %v14643_v61 }
 0xbc5   : > { %18530 = vst [vmem:[#allocation22_spill] sm:$0xff] %v14655_v41  ;;  %v14660_v28 = vpop.f32.mrb[159].mxu1 }
 0xbc6   : > { %18531 = vst [vmem:[#allocation26_spill] sm:$0xff] %v14660_v28  ;;  %4633 = vmax.xlane.f32.xlu0 %v14653_v25 }
 0xbc8   : > { %4635 = vmax.xlane.f32.xlu1 %v14662_v51 }
 0xbca   : > { %v14668_v57 = vpop.f32.mrb[160].mxu1 }
 0xbcb   : > { %v14670_v32 = vpop.f32.mrb[161].mxu1 }
 0xbcc   : > { %v14672_v13 = vpop.f32.mrb[162].mxu1 }
 0xbcd   : > { %v14674_v14 = vpop.f32.mrb[163].mxu1 }
 0xbd2   : > { %v14676_v37 = vpop.f32.mrb[164].mxu1 }
 0xbd3   : > { %v14678_v17 = vpop.f32.mrb[165].mxu1 }
 0xbd4   : > { %v14680_v27 = vpop.f32.mrb[166].mxu1 }
 0xbd5   : > { %v14682_v41 = vpop.f32.mrb[167].mxu1 }
 0xbd9   : > { %4911 = vrot.lane.b32.xlu1 %v18532_v40, %s11697_s22  ;;  %v18535_v40 = vld [vmem:[#allocation37_spill] sm:$0xff] }
 0xbda   : > { %v10171_v45 = vpop.f32.mrb[168].mxu1 }
 0xbdb   : > { %v14686_v28 = vadd.f32 %v10171_v45, %v4245_v18  ;;  %v4574_v36 = vpop.f32.mrb[169].mxu1  ;;  %v18536_v18 = vld [vmem:[#allocation38_spill] sm:$0xff] }
 0xbdc   : > { %v14688_v63 = vadd.f32 %v4574_v36, %v4243_v29  ;;  %4909 = vrot.lane.b32.xlu0 %v18533_v5, %s11697_s22  ;;  %v10172_v8 = vpop.f32.mrb[170].mxu1 }
 0xbdd   : > { %v14692_v20 = vadd.f32 %v10172_v8, %v4246_v55  ;;  %4917 = vrot.lane.b32.xlu1 %v18534_v35, %s11697_s22  ;;  %v4577_v26 = vpop.f32.mrb[171].mxu1  ;;  %v18537_v8 = vld [vmem:[#allocation36_spill] sm:$0xff]  ;;  %v4610_v55 = vpop.xlane.xlu0 %4609 }
 0xbde   : > { %v14696_v46 = vadd.f32 %v4577_v26, %v4244_v39  ;;  %v18538_v39 = vld [vmem:[#allocation40_spill] sm:$0xff]  ;;  %v4671_v0 = vsub.f32 %v14486_v53, %v4610_v55 }
 0xbe0   : > { %4913 = vrot.lane.b32.xlu0 %v18535_v40, %s11697_s22  ;;  %v4705_v12 = vmul.f32 1.442695, %v4671_v0 }
 0xbe1   : > { %4919 = vrot.lane.b32.xlu1 %v18536_v18, %s11697_s22  ;;  %v18539_v18 = vld [vmem:[#allocation41_spill] sm:$0xff] }
 0xbe2   : > { %v10175_v36 = vpop.f32.mrb[172].mxu1 }
 0xbe3   : > { %v14702_v29 = vadd.f32 %v10175_v36, %v4249_v59  ;;  %v4590_v5 = vpop.f32.mrb[173].mxu1  ;;  %v18540_v59 = vld [vmem:[#allocation42_spill] sm:$0xff]  ;;  %v18541_v36 = vld [vmem:[#allocation43_spill] sm:$0xff] }
 0xbe4   : > { %v14704_v45 = vadd.f32 %v4590_v5, %v4247_v2  ;;  %4915 = vrot.lane.b32.xlu0 %v18537_v8, %s11697_s22  ;;  %v10176_v35 = vpop.f32.mrb[174].mxu1  ;;  %v4612_v2 = vpop.xlane.xlu0 %4611  ;;  %v18542_v5 = vld [vmem:[#allocation45_spill] sm:$0xff] }
 0xbe5   : > { %v14708_v26 = vadd.f32 %v10176_v35, %v4250_v58  ;;  %4923 = vrot.lane.b32.xlu1 %v18538_v39, %s11697_s22  ;;  %v4593_v40 = vpop.f32.mrb[175].mxu1  ;;  %v4608_v58 = vpop.xlane.xlu1 %4607  ;;  %v4672_v52 = vsub.f32 %v14500_v43, %v4612_v2 }
 0xbe6   : > { %v14712_v44 = vadd.f32 %v4593_v40, %v4248_v4 }
 0xbe7   : > { %v4707_v53 = vmul.f32 1.442695, %v4672_v52 }
 0xbe8   : > { %4921 = vrot.lane.b32.xlu0 %v18539_v18, %s11697_s22  ;;  %v4614_v8 = vpop.xlane.xlu0 %4613 }
 0xbe9   : > { %5032 = vrot.lane.b32.xlu1 %v18540_v59, %s11697_s22  ;;  %v4616_v35 = vpop.xlane.xlu1 %4615  ;;  %v4673_v0 = vsub.f32 %v14524_v3, %v4614_v8 }
 0xbea   : > { %v4674_v59 = vsub.f32 %v14532_v6, %v4616_v35 }
 0xbec   : > { %5030 = vrot.lane.b32.xlu0 %v18541_v36, %s11697_s22  ;;  %v4618_v39 = vpop.xlane.xlu0 %4617  ;;  %v4669_v36 = vsub.f32 %v14474_v38, %v4606_v34 }
 0xbed   : > { %5034 = vrot.lane.b32.xlu1 %v18542_v5, %s11697_s22  ;;  %v4675_v4 = vsub.f32 %v14543_v30, %v4618_v39  ;;  %v4620_v40 = vpop.xlane.xlu1 %4619  ;;  %v4711_v5 = vmul.f32 1.442695, %v4674_v59 }
 0xbee   : > { %v4676_v18 = vsub.f32 %v14547_v42, %v4620_v40  ;;  %v4701_v56 = vmul.f32 1.442695, %v4669_v36  ;;  %v4670_v42 = vsub.f32 %v14482_v15, %v4608_v58 }
 0xbef   : > { %v4713_v60 = vmul.f32 1.442695, %v4675_v4 }
 0xbf0   : > { %v4715_v31 = vmul.f32 1.442695, %v4676_v18  ;;  %v4703_v6 = vmul.f32 1.442695, %v4670_v42 }
 0xbf1   : > { %11189 = vpow2.f32 %v4713_v60 }
 0xbf2   : > { %11191 = vpow2.f32 %v4715_v31 }
 0xbf3   : > { %11193 = vpow2.f32 %v4705_v12 }
 0xbf4   : > { %11195 = vpow2.f32 %v4711_v5 }
 0xbf5   : > { %11197 = vpow2.f32 %v4701_v56  ;;  %v4709_v56 = vmul.f32 1.442695, %v4673_v0 }
 0xbf6   : > { %11199 = vpow2.f32 %v4707_v53 }
 0xbf7   : > { %11201 = vpow2.f32 %v4703_v6 }
 0xbf8   : > { %11203 = vpow2.f32 %v4709_v56 }
 0xbfb   : > { %v14728_v30 = vpop.eup %11189 }
 0xbfc   : > { %v14732_v60 = vpop.eup %11191 }
 0xbfd   : > { %v14736_v12 = vpop.eup %11193 }
 0xbfe   : > { %v14739_v31 = vpop.eup %11195 }
 0xbff   : > { %v14742_v52 = vpop.eup %11197 }
 0xc00   : > { %v14745_v34 = vpop.eup %11199 }
 0xc01   : > { %v14748_v38 = vpop.eup %11201 }
 0xc02   : > { %v14751_v15 = vpop.eup %11203 }
 0xc0b   : > { %4777 = vadd.xlane.f32.xlu0 %v14728_v30 }
 0xc0f   : > { %4779 = vadd.xlane.f32.xlu0 %v14732_v60 }
 0xc11   : > { %4769 = vadd.xlane.f32.xlu1 %v14736_v12 }
 0xc13   : > { %4775 = vadd.xlane.f32.xlu0 %v14739_v31 }
 0xc15   : > { %4765 = vadd.xlane.f32.xlu1 %v14742_v52 }
 0xc19   : > { %4771 = vadd.xlane.f32.xlu1 %v14745_v34 }
 0xc1d   : > { %4767 = vadd.xlane.f32.xlu1 %v14748_v38 }
 0xc21   : > { %4773 = vadd.xlane.f32.xlu1 %v14751_v15 }
 0xc47   : > { %v4622_v43 = vpop.xlane.xlu0 %4621 }
 0xc48   : > { %v4677_v55 = vsub.f32 %v14614_v48, %v4622_v43 }
 0xc49   : > { %v4624_v3 = vpop.xlane.xlu1 %4623 }
 0xc4a   : > { %v4717_v39 = vmul.f32 1.442695, %v4677_v55  ;;  %v4678_v42 = vsub.f32 %v14619_v50, %v4624_v3 }
 0xc4b   : > { %v4626_v2 = vpop.xlane.xlu0 %4625 }
 0xc4c   : > { %v4679_v58 = vsub.f32 %v14625_v19, %v4626_v2  ;;  %v4719_v19 = vmul.f32 1.442695, %v4678_v42  ;;  %v14821_v42 = vadd.f32 %v14676_v37, %v14529_v47  ;;  %v18544_v47 = vld [vmem:[#allocation46_spill] sm:$0xff] }
 0xc4d   : > { %v4628_v8 = vpop.xlane.xlu1 %4627 }
 0xc4e   : > { %v4721_v35 = vmul.f32 1.442695, %v4679_v58  ;;  %v4680_v40 = vsub.f32 %v14631_v11, %v4628_v8 }
 0xc4f   : > { %v4630_v4 = vpop.xlane.xlu0 %4629 }
 0xc50   : > { %11205 = vpow2.f32 %v4721_v35  ;;  %v4681_v18 = vsub.f32 %v14637_v10, %v4630_v4  ;;  %v4723_v53 = vmul.f32 1.442695, %v4680_v40  ;;  %v14773_v35 = vadd.f32 %v14672_v13, %v14492_v23 }
 0xc51   : > { %v4632_v59 = vpop.xlane.xlu1 %4631  ;;  %11207 = vpow2.f32 %v4717_v39 }
 0xc52   : > { %v4725_v36 = vmul.f32 1.442695, %v4681_v18  ;;  %v4682_v58 = vsub.f32 %v14643_v61, %v4632_v59  ;;  %v14781_v61 = vadd.f32 %v14674_v14, %v14471_v49  ;;  %v14789_v59 = vadd.f32 %v14680_v27, %v14540_v22 }
 0xc53   : > { %v4634_v5 = vpop.xlane.xlu0 %4633 }
 0xc54   : > { %11209 = vpow2.f32 %v4725_v36  ;;  %v4683_v0 = vsub.f32 %v14653_v25, %v4634_v5  ;;  %v4727_v40 = vmul.f32 1.442695, %v4682_v58  ;;  %v14797_v36 = vadd.f32 %v14682_v41, %v14521_v1 }
 0xc55   : > { %v4636_v48 = vpop.xlane.xlu1 %4635  ;;  %11211 = vpow2.f32 %v4723_v53  ;;  %v14809_v1 = vadd.f32 %v14668_v57, %v14479_v7  ;;  %v14815_v41 = vadd.f32 %v14670_v32, %v14464_v54  ;;  %v14826_v7 = vadd.f32 %v14678_v17, %v14516_v16  ;;  %v18543_v54 = vld [vmem:[#allocation47_spill] sm:$0xff] }
 0xc56   : > { %11213 = vpow2.f32 %v4719_v19  ;;  %v4729_v43 = vmul.f32 1.442695, %v4683_v0  ;;  %v4684_v50 = vsub.f32 %v14662_v51, %v4636_v48 }
 0xc57   : > { %v4910_v6 = vpop.permute.xlu0 %4909 }
 0xc58   : > { %10177 = vmatprep.subr.bf16.mxu0 %v4910_v6  ;;  %11215 = vpow2.f32 %v4729_v43  ;;  %v4731_v8 = vmul.f32 1.442695, %v4684_v50 }
 0xc59   : > { %10178 = vmatpush3.bf16.msra.mxu0 %v4910_v6  ;;  %v4912_v56 = vpop.permute.xlu1 %4911  ;;  %v18545_v6 = vld [vmem:[#allocation44_spill] sm:$0xff] }
 0xc5a   : > { %v14760_v11 = vpop.eup %11205  ;;  %10179 = vmatprep.subr.bf16.mxu0 %v4912_v56  ;;  %11217 = vpow2.f32 %v4731_v8 }
 0xc5b   : > { %v4914_v10 = vpop.permute.xlu0 %4913  ;;  %4785 = vadd.xlane.f32.xlu0 %v14760_v11  ;;  %v14764_v3 = vpop.eup %11207  ;;  %11219 = vpow2.f32 %v4727_v40 }
 0xc5d   : > { %10180 = vmatpush3.bf16.msra.mxu0 %v4912_v56  ;;  %v4918_v55 = vpop.permute.xlu1 %4917 }
 0xc5e   : > { %v14766_v2 = vpop.eup %11209  ;;  %10181 = vmatprep.subr.bf16.mxu0 %v4914_v10 }
 0xc5f   : > { %v4916_v25 = vpop.permute.xlu0 %4915  ;;  %4789 = vadd.xlane.f32.xlu1 %v14766_v2  ;;  %4781 = vadd.xlane.f32.xlu0 %v14764_v3  ;;  %v14775_v39 = vpop.eup %11211 }
 0xc60   : > { %v14783_v23 = vpop.eup %11213 }
 0xc61   : > { %10182 = vmatpush3.bf16.msra.mxu0 %v4914_v10  ;;  %v4920_v51 = vpop.permute.xlu1 %4919 }
 0xc62   : > { %10183 = vmatprep.subr.bf16.mxu0 %v4916_v25  ;;  %v14791_v14 = vpop.eup %11215 }
 0xc63   : > { %v4922_v4 = vpop.permute.xlu0 %4921  ;;  %4643 = vmax.xlane.f32.xlu1 %v14773_v35  ;;  %4787 = vadd.xlane.f32.xlu0 %v14775_v39 }
 0xc64   : > { %v14799_v22 = vpop.eup %11217 }
 0xc65   : > { %10184 = vmatpush3.bf16.msra.mxu0 %v4916_v25  ;;  %v4924_v18 = vpop.permute.xlu1 %4923  ;;  %v14803_v27 = vpop.eup %11219 }
 0xc66   : > { %10185 = vmatprep.subr.bf16.mxu0 %v4918_v55 }
 0xc67   : > { %v5031_v13 = vpop.permute.xlu0 %5030  ;;  %4639 = vmax.xlane.f32.xlu1 %v14781_v61  ;;  %4783 = vadd.xlane.f32.xlu0 %v14783_v23 }
 0xc68   : > { %10209 = vmatprep.subr.bf16.mxu1 %v5031_v13 }
 0xc69   : > { %10186 = vmatpush3.bf16.msra.mxu0 %v4918_v55  ;;  %10210 = vmatpush3.bf16.msra.mxu1 %v5031_v13  ;;  %v5033_v49 = vpop.permute.xlu1 %5032 }
 0xc6a   : > { %10187 = vmatprep.subr.bf16.mxu0 %v4920_v51  ;;  %10211 = vmatprep.subr.bf16.mxu1 %v5033_v49 }
 0xc6b   : > { %4651 = vmax.xlane.f32.xlu1 %v14789_v59  ;;  %4793 = vadd.xlane.f32.xlu0 %v14791_v14 }
 0xc6d   : > { %10188 = vmatpush3.bf16.msra.mxu0 %v4920_v51  ;;  %10212 = vmatpush3.bf16.msra.mxu1 %v5033_v49  ;;  %v5035_v5 = vpop.permute.xlu1 %5034 }
 0xc6e   : > { %10189 = vmatprep.subr.bf16.mxu0 %v4922_v4  ;;  %10213 = vmatprep.subr.bf16.mxu1 %v5035_v5 }
 0xc6f   : > { %4647 = vmax.xlane.f32.xlu1 %v14797_v36  ;;  %4795 = vadd.xlane.f32.xlu0 %v14799_v22 }
 0xc71   : > { %10190 = vmatpush3.bf16.msra.mxu0 %v4922_v4  ;;  %10214 = vmatpush3.bf16.msra.mxu1 %v5035_v5 }
 0xc72   : > { %10191 = vmatprep.subr.bf16.mxu0 %v4924_v18 }
 0xc73   : > { %4655 = vmax.xlane.f32.xlu1 %v14696_v46  ;;  %4791 = vadd.xlane.f32.xlu0 %v14803_v27 }
 0xc75   : > { %10192 = vmatpush3.bf16.msra.mxu0 %v4924_v18 }
 0xc77   : > { %4665 = vmax.xlane.f32.xlu1 %v14702_v29  ;;  %4641 = vmax.xlane.f32.xlu0 %v14809_v1 }
 0xc7b   : > { %4661 = vmax.xlane.f32.xlu1 %v14704_v45  ;;  %4637 = vmax.xlane.f32.xlu0 %v14815_v41 }
 0xc7f   : > { %4649 = vmax.xlane.f32.xlu0 %v14821_v42 }
 0xc83   : > { %4645 = vmax.xlane.f32.xlu0 %v14826_v7 }
 0xc87   : > { %4657 = vmax.xlane.f32.xlu0 %v14686_v28 }
 0xc8b   : > { %4653 = vmax.xlane.f32.xlu0 %v14688_v63 }
 0xc8c   : > { %5038 = vrot.lane.b32.xlu1 %v18543_v54, %s11697_s22 }
 0xc8f   : > { %4659 = vmax.xlane.f32.xlu0 %v14692_v20 }
 0xc90   : > { %5040 = vrot.lane.b32.xlu1 %v18544_v47, %s11697_s22 }
 0xc93   : > { %4667 = vmax.xlane.f32.xlu0 %v14708_v26 }
 0xc97   : > { %4663 = vmax.xlane.f32.xlu0 %v14712_v44 }
 0xc98   : > { %v4778_v17 = vpop.xlane.xlu0 %4777 }
 0xc9c   : > { %v4780_v37 = vpop.xlane.xlu0 %4779 }
 0xc9e   : > { %v4770_v16 = vpop.xlane.xlu1 %4769 }
 0xca0   : > { %v4776_v53 = vpop.xlane.xlu0 %4775 }
 0xca2   : > { %v4766_v32 = vpop.xlane.xlu1 %4765 }
 0xca6   : > { %v4772_v57 = vpop.xlane.xlu1 %4771 }
 0xca7   : > { %11221 = vrcp.f32 %v4772_v57 }
 0xca8   : > { %11223 = vrcp.f32 %v4766_v32 }
 0xca9   : > { %11225 = vrcp.f32 %v4770_v16 }
 0xcaa   : > { %v4768_v48 = vpop.xlane.xlu1 %4767 }
 0xcab   : > { %11227 = vrcp.f32 %v4768_v48 }
 0xcac   : > { %11229 = vrcp.f32 %v4776_v53 }
 0xcad   : > { %5036 = vrot.lane.b32.xlu0 %v18545_v6, %s11697_s22 }
 0xcae   : > { %v4774_v19 = vpop.xlane.xlu1 %4773 }
 0xcaf   : > { %11231 = vrcp.f32 %v4774_v19 }
 0xcb0   : > { %11233 = vrcp.f32 %v4780_v37 }
 0xcb1   : > { %v11222_v0 = vpop.eup %11221  ;;  %11235 = vrcp.f32 %v4778_v17 }
 0xcb2   : > { %v11224_v56 = vpop.eup %11223  ;;  %v4864_v50 = vmul.f32 %v11222_v0, %v14745_v34 }
 0xcb3   : > { %v11226_v10 = vpop.eup %11225  ;;  %v4861_v55 = vmul.f32 %v11224_v56, %v14742_v52 }
 0xcb4   : > { %v4863_v8 = vmul.f32 %v11226_v10, %v14736_v12 }
 0xcb5   : > { %v11228_v43 = vpop.eup %11227 }
 0xcb6   : > { %v4862_v25 = vmul.f32 %v11228_v43, %v14748_v38  ;;  %v11230_v58 = vpop.eup %11229  ;;  %v4894_v40 = vpack.c.bf16 %v4864_v50, %v4863_v8 }
 0xcb7   : > { %v4866_v49 = vmul.f32 %v11230_v58, %v14739_v31 }
 0xcb8   : > { %v4893_v51 = vpack.c.bf16 %v4862_v25, %v4861_v55 }
 0xcb9   : > { %v11232_v4 = vpop.eup %11231 }
 0xcba   : > { %v11234_v18 = vpop.eup %11233  ;;  %10193 = vmatprep.mubr.bf16.mxu0 %v4893_v51  ;;  %v4865_v13 = vmul.f32 %v11232_v4, %v14751_v15 }
 0xcbb   : > { %10194 = vmatmul.mubr.bf16.vlgmr.msra.gmra.mrb[144].mxu0 %v4894_v40  ;;  %v11236_v5 = vpop.eup %11235  ;;  %v4868_v34 = vmul.f32 %v11234_v18, %v14732_v60 }
 0xcbc   : > { %v4895_v54 = vpack.c.bf16 %v4866_v49, %v4865_v13  ;;  %v4867_v52 = vmul.f32 %v11236_v5, %v14728_v30 }
 0xcbe   : > { %10197 = vmatprep.mubr.bf16.mxu0 %v4895_v54  ;;  %v4896_v38 = vpack.c.bf16 %v4868_v34, %v4867_v52 }
 0xcc3   : > { %10198 = vmatmul.mubr.bf16.gmra.mrb[148].mxu0 %v4896_v38 }
 0xce8   : > { %v4786_v12 = vpop.xlane.xlu0 %4785 }
 0xcec   : > { %v4782_v47 = vpop.xlane.xlu0 %4781  ;;  %v4790_v17 = vpop.xlane.xlu1 %4789 }
 0xcf0   : > { %v4788_v16 = vpop.xlane.xlu0 %4787  ;;  %v4644_v32 = vpop.xlane.xlu1 %4643 }
 0xcf1   : > { %11237 = vrcp.f32 %v4788_v16 }
 0xcf2   : > { %11239 = vrcp.f32 %v4782_v47 }
 0xcf3   : > { %11241 = vrcp.f32 %v4786_v12 }
 0xcf4   : > { %v4784_v15 = vpop.xlane.xlu0 %4783  ;;  %v4640_v37 = vpop.xlane.xlu1 %4639 }
 0xcf5   : > { %v4686_v31 = vsub.f32 %v14781_v61, %v4640_v37  ;;  %11243 = vrcp.f32 %v4784_v15 }
 0xcf7   : > { %v4735_v57 = vmul.f32 1.442695, %v4686_v31 }
 0xcf8   : > { %v4794_v60 = vpop.xlane.xlu0 %4793  ;;  %v14849_v53 = vpop.xlane.xlu1 %4651 }
 0xcf9   : > { %11245 = vpow2.f32 %v4735_v57 }
 0xcfa   : > { %11247 = vrcp.f32 %v4790_v17 }
 0xcfb   : > { %v11238_v6 = vpop.eup %11237 }
 0xcfc   : > { %v4796_v30 = vpop.xlane.xlu0 %4795  ;;  %v4648_v48 = vpop.xlane.xlu1 %4647  ;;  %v4872_v61 = vmul.f32 %v11238_v6, %v14775_v39 }
 0xcfd   : > { %v4690_v19 = vsub.f32 %v14797_v36, %v4648_v48  ;;  %v11240_v0 = vpop.eup %11239  ;;  %11249 = vrcp.f32 %v4796_v30 }
 0xcfe   : > { %v11242_v56 = vpop.eup %11241  ;;  %11251 = vrcp.f32 %v4794_v60  ;;  %v4869_v55 = vmul.f32 %v11240_v0, %v14764_v3  ;;  %v4688_v3 = vsub.f32 %v14773_v35, %v4644_v32 }
 0xcff   : > { %v4743_v10 = vmul.f32 1.442695, %v4690_v19  ;;  %v11244_v43 = vpop.eup %11243  ;;  %v4871_v58 = vmul.f32 %v11242_v56, %v14760_v11  ;;  %v18546_v19 = vld [vmem:[#allocation49_spill] sm:$0xff] }
 0xd00   : > { %v4792_v50 = vpop.xlane.xlu0 %4791  ;;  %v4870_v25 = vmul.f32 %v11244_v43, %v14783_v23  ;;  %v4739_v52 = vmul.f32 1.442695, %v4688_v3 }
 0xd01   : > { %11253 = vpow2.f32 %v4743_v10  ;;  %v4898_v4 = vpack.c.bf16 %v4872_v61, %v4871_v58 }
 0xd02   : > { %11255 = vrcp.f32 %v4792_v50  ;;  %v4897_v36 = vpack.c.bf16 %v4870_v25, %v4869_v55 }
 0xd03   : > { %v14856_v8 = vpop.eup %11245 }
 0xd04   : > { %v4642_v51 = vpop.xlane.xlu0 %4641  ;;  %4799 = vadd.xlane.f32.xlu0 %v14856_v8  ;;  %10201 = vmatprep.mubr.bf16.mxu0 %v4897_v36  ;;  %v11248_v18 = vpop.eup %11247 }
 0xd05   : > { %v4687_v40 = vsub.f32 %v14809_v1, %v4642_v51  ;;  %10202 = vmatmul.mubr.bf16.gmra.mrb[152].mxu0 %v4898_v4  ;;  %v4873_v35 = vmul.f32 %v11248_v18, %v14766_v2  ;;  %v4692_v2 = vsub.f32 %v14789_v59, %v14849_v53  ;;  %v18547_v4 = vld [vmem:[#allocation48_spill] sm:$0xff] }
 0xd07   : > { %v4737_v39 = vmul.f32 1.442695, %v4687_v40  ;;  %v11250_v23 = vpop.eup %11249  ;;  %v4747_v60 = vmul.f32 1.442695, %v4692_v2  ;;  %v10658_v2 = vld [vmem:[%s17888_s5 + $0x28] sm:$0xff]  }
 0xd08   : > { %v4638_v13 = vpop.xlane.xlu0 %4637  ;;  %v11252_v49 = vpop.eup %11251  ;;  %v4876_v1 = vmul.f32 %v11250_v23, %v14799_v22 }
 0xd09   : > { %11257 = vpow2.f32 %v4737_v39  ;;  %v4685_v11 = vsub.f32 %v14815_v41, %v4638_v13  ;;  %v4875_v41 = vmul.f32 %v11252_v49, %v14791_v14  ;;  %v4656_v14 = vpop.xlane.xlu1 %4655 }
 0xd0a   : > { %v4694_v61 = vsub.f32 %v14696_v46, %v4656_v14  ;;  %v10659_v14 = vld [vmem:[%s17888_s5 + $0x30] sm:$0xff]  }
 0xd0b   : > { %v14862_v5 = vpop.eup %11253  ;;  %v4733_v54 = vmul.f32 1.442695, %v4685_v11  ;;  %v4900_v32 = vpack.c.bf16 %v4876_v1, %v4875_v41  ;;  %v18549_v1 = vld [vmem:[#allocation83_spill] sm:$0xff]  ;;  %v10655_v41 = vld [vmem:[%s17888_s5 + $0x10] sm:$0xff]  }
 0xd0c   : > { %v11256_v34 = vpop.eup %11255  ;;  %v4650_v38 = vpop.xlane.xlu0 %4649  ;;  %4807 = vadd.xlane.f32.xlu0 %v14862_v5  ;;  %v4751_v25 = vmul.f32 1.442695, %v4694_v61  ;;  %v18559_v61 = vld [vmem:[#allocation91_spill] sm:$0xff] }
 0xd0d   : > { %11259 = vpow2.f32 %v4733_v54  ;;  %v4691_v12 = vsub.f32 %v14821_v42, %v4650_v38  ;;  %v4874_v47 = vmul.f32 %v11256_v34, %v14803_v27  ;;  %v4666_v30 = vpop.xlane.xlu1 %4665 }
 0xd0e   : > { %11261 = vpow2.f32 %v4739_v52  ;;  %v4699_v40 = vsub.f32 %v14702_v29, %v4666_v30 }
 0xd0f   : > { %v4899_v17 = vpack.c.bf16 %v4874_v47, %v4873_v35  ;;  %v4745_v15 = vmul.f32 1.442695, %v4691_v12  ;;  %v10653_v35 = vld [vmem:[%s17888_s5] sm:$0xff]   ;;  %v10654_v47 = vld [vmem:[%s17888_s5 + $0x8] sm:$0xff]  }
 0xd10   : > { %v4646_v16 = vpop.xlane.xlu0 %4645  ;;  %v4761_v18 = vmul.f32 1.442695, %v4699_v40  ;;  %10241 = vmatprep.subr.bf16.mxu0 %v10653_v35  ;;  %v18562_v40 = vld [vmem:[#allocation11_spill] sm:$0xff] }
 0xd11   : > { %v4689_v37 = vsub.f32 %v14826_v7, %v4646_v16  ;;  %10205 = vmatprep.mubr.bf16.mxu0 %v4899_v17  ;;  %11263 = vpow2.f32 %v4745_v15  ;;  %v4662_v53 = vpop.xlane.xlu1 %4661  ;;  %10242 = vmatpush3.bf16.msra.mxu0 %v10653_v35  ;;  %v10656_v17 = vld [vmem:[%s17888_s5 + $0x18] sm:$0xff]   ;;  %v18551_v16 = vld [vmem:[#allocation86_spill] sm:$0xff] }
 0xd12   : > { %10206 = vmatmul.mubr.bf16.gmra.mrb[156].mxu0 %v4900_v32  ;;  %v4697_v36 = vsub.f32 %v14704_v45, %v4662_v53  ;;  %10243 = vmatprep.subr.bf16.mxu0 %v10654_v47  ;;  %v18552_v32 = vld [vmem:[#allocation82_spill] sm:$0xff]  ;;  %v18574_v35 = vld [vmem:[#allocation13_spill] sm:$0xff] }
 0xd13   : > { %v14871_v31 = vpop.eup %11257  ;;  %v4741_v27 = vmul.f32 1.442695, %v4689_v37  ;;  %v18553_v15 = vpack.i.bf16 %v18551_v16, %v18552_v32  ;;  %v10657_v37 = vld [vmem:[%s17888_s5 + $0x20] sm:$0xff]  }
 0xd14   : > { %4801 = vadd.xlane.f32.xlu1 %v14871_v31  ;;  %v4658_v22 = vpop.xlane.xlu0 %4657  ;;  %v4757_v39 = vmul.f32 1.442695, %v4697_v36 }
 0xd15   : > { %11265 = vpow2.f32 %v4741_v27  ;;  %v5039_v43 = vpop.permute.xlu1 %5038  ;;  %v4695_v58 = vsub.f32 %v14686_v28, %v4658_v22  ;;  %10244 = vmatpush3.bf16.msra.mxu0 %v10654_v47  ;;  %v18554_v22 = vpack.i.bf16 %v14398_v62, %v14392_v24  ;;  %v18555_v27 = vpack.i.bf16 %v14394_v21, %v14390_v33  ;;  %v10660_v24 = vld [vmem:[%s17888_s5 + $0x38] sm:$0xff]  }
 0xd16   : > { %11267 = vpow2.f32 %v4747_v60  ;;  %10245 = vmatprep.subr.bf16.mxu0 %v10655_v41 }
 0xd17   : > { %v14876_v42 = vpop.eup %11259  ;;  %11269 = vpow2.f32 %v4751_v25  ;;  %v4753_v51 = vmul.f32 1.442695, %v4695_v58 }
 0xd18   : > { %4797 = vadd.xlane.f32.xlu1 %v14876_v42  ;;  %v4654_v57 = vpop.xlane.xlu0 %4653  ;;  %v14879_v7 = vpop.eup %11261 }
 0xd19   : > { %v5041_v55 = vpop.permute.xlu1 %5040  ;;  %11271 = vpow2.f32 %v4753_v51  ;;  %v4693_v3 = vsub.f32 %v14688_v63, %v4654_v57  ;;  %10246 = vmatpush3.bf16.msra.mxu0 %v10655_v41  ;;  %v18576_v41 = vld [vmem:[#allocation21_spill] sm:$0xff] }
 0xd1a   : > { %11273 = vpow2.f32 %v4757_v39  ;;  %10247 = vmatprep.subr.bf16.mxu0 %v10656_v17  ;;  %v18563_v39 = vpack.i.bf16 %v14410_v9, %v18562_v40  ;;  %v18570_v9 = vld [vmem:[#allocation94_spill] sm:$0xff] }
 0xd1b   : > { %v14882_v6 = vpop.eup %11263  ;;  %11275 = vpow2.f32 %v4761_v18  ;;  %v4749_v13 = vmul.f32 1.442695, %v4693_v3  ;;  %v18564_v18 = vld [vmem:[#allocation4_spill] sm:$0xff]  ;;  %v18565_v3 = vld [vmem:[#allocation15_spill] sm:$0xff] }
 0xd1c   : > { %v4660_v48 = vpop.xlane.xlu0 %4659  ;;  %4803 = vadd.xlane.f32.xlu1 %v14879_v7 }
 0xd1d   : > { %v4696_v23 = vsub.f32 %v14692_v20, %v4660_v48  ;;  %11277 = vpow2.f32 %v4749_v13  ;;  %v18548_v20 = vld [vmem:[#allocation88_spill] sm:$0xff]  ;;  %10248 = vmatpush3.bf16.msra.mxu0 %v10656_v17  ;;  %v18566_v13 = vpack.i.bf16 %v18564_v18, %v18565_v3  ;;  %v18577_v17 = vld [vmem:[#allocation17_spill] sm:$0xff] }
 0xd1e   : > { %v18550_v12 = vpack.i.bf16 %v18548_v20, %v18549_v1  ;;  %10249 = vmatprep.subr.bf16.mxu0 %v10657_v37  ;;  %v18578_v16 = vpack.i.bf16 %v18576_v41, %v18577_v17  ;;  %v18591_v41 = vld [vmem:[#allocation100_spill] sm:$0xff]  ;;  %v18592_v17 = vld [vmem:[#allocation98_spill] sm:$0xff] }
 0xd1f   : > { %v14887_v0 = vpop.eup %11265  ;;  %v4755_v11 = vmul.f32 1.442695, %v4696_v23 }
 0xd20   : > { %v4668_v59 = vpop.xlane.xlu0 %4667  ;;  %4809 = vadd.xlane.f32.xlu1 %v14882_v6  ;;  %v14890_v10 = vpop.eup %11267 }
 0xd21   : > { %v14899_v46 = vpop.eup %11269  ;;  %11279 = vpow2.f32 %v4755_v11  ;;  %v4700_v54 = vsub.f32 %v14708_v26, %v4668_v59  ;;  %10250 = vmatpush3.bf16.msra.mxu0 %v10657_v37 }
 0xd22   : > { %5042 = vrot.lane.b32.xlu0 %v18546_v19, %s11697_s22  ;;  %10251 = vmatprep.subr.bf16.mxu0 %v10658_v2  ;;  %v18556_v19 = vld [vmem:[#allocation90_spill] sm:$0xff] }
 0xd23   : > { %v14902_v28 = vpop.eup %11271  ;;  %v4763_v52 = vmul.f32 1.442695, %v4700_v54  ;;  %v18568_v54 = vld [vmem:[#allocation87_spill] sm:$0xff] }
 0xd24   : > { %v4664_v56 = vpop.xlane.xlu0 %4663  ;;  %4805 = vadd.xlane.f32.xlu1 %v14887_v0  ;;  %v14905_v45 = vpop.eup %11273 }
 0xd25   : > { %v14909_v29 = vpop.eup %11275  ;;  %v4698_v49 = vsub.f32 %v14712_v44, %v4664_v56  ;;  %10252 = vmatpush3.bf16.msra.mxu0 %v10658_v2  ;;  %v18557_v56 = vld [vmem:[#allocation84_spill] sm:$0xff] }
 0xd26   : > { %10253 = vmatprep.subr.bf16.mxu0 %v10659_v14 }
 0xd27   : > { %v4759_v34 = vmul.f32 1.442695, %v4698_v49  ;;  %v14915_v38 = vpop.eup %11277  ;;  %v18567_v49 = vld [vmem:[#allocation93_spill] sm:$0xff] }
 0xd28   : > { %v5037_v50 = vpop.permute.xlu0 %5036  ;;  %4811 = vadd.xlane.f32.xlu1 %v14890_v10 }
 0xd29   : > { %10215 = vmatprep.subr.bf16.mxu1 %v5037_v50  ;;  %11281 = vpow2.f32 %v4759_v34  ;;  %10254 = vmatpush3.bf16.msra.mxu0 %v10659_v14  ;;  %v18569_v34 = vpack.i.bf16 %v18567_v49, %v18568_v54 }
 0xd2a   : > { %10216 = vmatpush3.bf16.msra.mxu1 %v5037_v50  ;;  %11283 = vpow2.f32 %v4763_v52  ;;  %10255 = vmatprep.subr.bf16.mxu0 %v10660_v24  ;;  %v18571_v52 = vld [vmem:[#allocation92_spill] sm:$0xff] }
 0xd2b   : > { %10217 = vmatprep.subr.bf16.mxu1 %v5039_v43  ;;  %v14918_v63 = vpop.eup %11279  ;;  %v18572_v20 = vpack.i.bf16 %v18570_v9, %v18571_v52  ;;  %v18589_v9 = vld [vmem:[#allocation6_spill] sm:$0xff] }
 0xd2d   : > { %10256 = vmatpush3.bf16.msra.mxu0 %v10660_v24 }
 0xd2e   : > { %10218 = vmatpush3.bf16.msra.mxu1 %v5039_v43  ;;  %v18558_v43 = vpack.i.bf16 %v18556_v19, %v18557_v56 }
 0xd2f   : > { %10219 = vmatprep.subr.bf16.mxu1 %v5041_v55 }
 0xd32   : > { %10220 = vmatpush3.bf16.msra.mxu1 %v5041_v55  ;;  %v18560_v55 = vld [vmem:[#allocation89_spill] sm:$0xff] }
 0xd33   : > { %v14925_v44 = vpop.eup %11281  ;;  %v18561_v25 = vpack.i.bf16 %v18559_v61, %v18560_v55 }
 0xd34   : > { %v14928_v26 = vpop.eup %11283 }
 0xd39   : > { %5044 = vrot.lane.b32.xlu1 %v18547_v4, %s11697_s22 }
 0xd41   : > { %4815 = vadd.xlane.f32.xlu0 %v14899_v46 }
 0xd45   : > { %4817 = vadd.xlane.f32.xlu0 %v14902_v28 }
 0xd49   : > { %4821 = vadd.xlane.f32.xlu0 %v14905_v45 }
 0xd4d   : > { %4825 = vadd.xlane.f32.xlu0 %v14909_v29 }
 0xd5d   : > { %4813 = vadd.xlane.f32.xlu1 %v14915_v38 }
 0xd61   : > { %4819 = vadd.xlane.f32.xlu1 %v14918_v63 }
 0xd63   : > { %10382 = vrot.lane.b32.xlu0 %v18550_v12, %s11697_s22  ;;  %v18573_v12 = vld [vmem:[#allocation2_spill] sm:$0xff] }
 0xd64   : > { %v18575_v47 = vpack.i.bf16 %v18573_v12, %v18574_v35 }
 0xd65   : > { %4823 = vadd.xlane.f32.xlu1 %v14925_v44 }
 0xd69   : > { %4827 = vadd.xlane.f32.xlu1 %v14928_v26 }
 0xd7a   : > { %10387 = vrot.lane.b32.xlu1 %v18553_v15, %s11697_s22 }
 0xd7e   : > { %10392 = vrot.lane.b32.xlu1 %v18554_v22, %s11696_s20 }
 0xd82   : > { %10397 = vrot.lane.b32.xlu1 %v18555_v27, %s11696_s20 }
 0xd8e   : > { %v10195_v62 = vpop.f32.mrb[144].mxu0 }
 0xd8f   : > { %v4967_v57 = vpop.f32.mrb[145].mxu0 }
 0xd90   : > { %v10196_v60 = vpop.f32.mrb[146].mxu0 }
 0xd91   : > { %v10406_v30 = vpack.i.bf16 %v10196_v60, %v10195_v62  ;;  %v4970_v48 = vpop.f32.mrb[147].mxu0  ;;  %v4800_v21 = vpop.xlane.xlu0 %4799 }
 0xd92   : > { %v10401_v33 = vpack.i.bf16 %v4970_v48, %v4967_v57  ;;  %11285 = vrcp.f32 %v4800_v21 }
 0xd93   : > { %10407 = vrot.lane.b32.xlu1 %v10406_v30, %s11695_s15 }
 0xd94   : > { %10402 = vrot.lane.b32.xlu0 %v10401_v33, %s11695_s15 }
 0xd96   : > { %v10199_v59 = vpop.f32.mrb[148].mxu0 }
 0xd97   : > { %v4983_v53 = vpop.f32.mrb[149].mxu0  ;;  %10417 = vrot.lane.b32.xlu1 %v18558_v43, %s11697_s22 }
 0xd98   : > { %v10200_v50 = vpop.f32.mrb[150].mxu0  ;;  %10412 = vrot.lane.b32.xlu0 %v18561_v25, %s11697_s22 }
 0xd99   : > { %v10436_v58 = vpack.i.bf16 %v10200_v50, %v10199_v59  ;;  %v4986_v36 = vpop.f32.mrb[151].mxu0  ;;  %v4808_v51 = vpop.xlane.xlu0 %4807 }
 0xd9a   : > { %v10431_v4 = vpack.i.bf16 %v4986_v36, %v4983_v53 }
 0xd9b   : > { %10427 = vrot.lane.b32.xlu1 %v18563_v39, %s11696_s20 }
 0xd9c   : > { %10422 = vrot.lane.b32.xlu0 %v18566_v13, %s11696_s20  ;;  %v11286_v37 = vpop.eup %11285 }
 0xd9d   : > { %v5043_v23 = vpop.permute.xlu0 %5042  ;;  %v4878_v14 = vmul.f32 %v11286_v37, %v14856_v8  ;;  %v18595_v37 = vld [vmem:[#allocation99_spill] sm:$0xff] }
 0xd9e   : > { %10221 = vmatprep.subr.bf16.mxu1 %v5043_v23 }
 0xd9f   : > { %10437 = vrot.lane.b32.xlu1 %v10436_v58, %s11695_s15  ;;  %10222 = vmatpush3.bf16.msra.mxu1 %v5043_v23  ;;  %v18585_v23 = vld [vmem:[#allocation8_spill] sm:$0xff] }
 0xda0   : > { %10432 = vrot.lane.b32.xlu0 %v10431_v4, %s11695_s15  ;;  %v18580_v4 = vld [vmem:[#allocation85_spill] sm:$0xff] }
 0xda1   : > { %v4802_v11 = vpop.xlane.xlu1 %4801 }
 0xda3   : > { %10447 = vrot.lane.b32.xlu1 %v18569_v34, %s11697_s22  ;;  %v18588_v34 = vld [vmem:[#allocation23_spill] sm:$0xff] }
 0xda4   : > { %10442 = vrot.lane.b32.xlu0 %v18572_v20, %s11697_s22  ;;  %v18590_v52 = vpack.i.bf16 %v18588_v34, %v18589_v9  ;;  %v18606_v34 = vld [vmem:[#allocation69_spill] sm:$0xff] }
 0xda5   : > { %v4798_v1 = vpop.xlane.xlu1 %4797 }
 0xda6   : > { %11287 = vrcp.f32 %v4798_v1 }
 0xda7   : > { %10457 = vrot.lane.b32.xlu1 %v18575_v47, %s11696_s20 }
 0xda8   : > { %10452 = vrot.lane.b32.xlu0 %v18578_v16, %s11696_s20  ;;  %v18593_v16 = vpack.i.bf16 %v18591_v41, %v18592_v17 }
 0xda9   : > { %v4804_v32 = vpop.xlane.xlu1 %4803 }
 0xdaa   : > { %11289 = vrcp.f32 %v4804_v32 }
 0xdab   : > { %11291 = vrcp.f32 %v4802_v11  ;;  %v18586_v11 = vld [vmem:[#allocation19_spill] sm:$0xff] }
 0xdac   : > { %11293 = vrcp.f32 %v4808_v51  ;;  %v18587_v49 = vpack.i.bf16 %v18585_v23, %v18586_v11  ;;  %v18604_v23 = vld [vmem:[#allocation72_spill] sm:$0xff] }
 0xdad   : > { %v4810_v15 = vpop.xlane.xlu1 %4809 }
 0xdb0   : > { %v11288_v22 = vpop.eup %11287 }
 0xdb1   : > { %v4806_v2 = vpop.xlane.xlu1 %4805  ;;  %v4877_v27 = vmul.f32 %v11288_v22, %v14876_v42 }
 0xdb2   : > { %11295 = vrcp.f32 %v4806_v2 }
 0xdb3   : > { %v4901_v24 = vpack.c.bf16 %v4878_v14, %v4877_v27  ;;  %11297 = vrcp.f32 %v4810_v15  ;;  %v18594_v15 = vld [vmem:[#allocation101_spill] sm:$0xff]  ;;  %v18597_v27 = vld [vmem:[#allocation27_spill] sm:$0xff] }
 0xdb4   : > { %v11290_v62 = vpop.eup %11289  ;;  %v18596_v22 = vpack.i.bf16 %v18594_v15, %v18595_v37  ;;  %v18598_v14 = vld [vmem:[#allocation25_spill] sm:$0xff] }
 0xdb5   : > { %10225 = vmatprep.mubr.bf16.mxu1 %v4901_v24  ;;  %v4812_v57 = vpop.xlane.xlu1 %4811  ;;  %v11292_v60 = vpop.eup %11291  ;;  %v4880_v30 = vmul.f32 %v11290_v62, %v14879_v7  ;;  %v18599_v24 = vpack.i.bf16 %v18597_v27, %v18598_v14 }
 0xdb6   : > { %11299 = vrcp.f32 %v4812_v57  ;;  %v11294_v33 = vpop.eup %11293  ;;  %v4879_v21 = vmul.f32 %v11292_v60, %v14871_v31  ;;  %v18600_v60 = vld [vmem:[#allocation29_spill] sm:$0xff] }
 0xdb7   : > { %v4882_v53 = vmul.f32 %v11294_v33, %v14862_v5 }
 0xdb8   : > { %v4902_v42 = vpack.c.bf16 %v4880_v30, %v4879_v21  ;;  %v18601_v30 = vld [vmem:[#allocation10_spill] sm:$0xff] }
 0xdb9   : > { %v5045_v48 = vpop.permute.xlu1 %5044 }
 0xdba   : > { %10223 = vmatprep.subr.bf16.mxu1 %v5045_v48 }
 0xdbb   : > { %10224 = vmatpush3.bf16.msra.mxu1 %v5045_v48  ;;  %v18602_v48 = vpack.i.bf16 %v18600_v60, %v18601_v30 }
 0xdbc   : > { %v11296_v59 = vpop.eup %11295 }
 0xdbd   : > { %v4881_v8 = vmul.f32 %v11296_v59, %v14887_v0  ;;  %v11298_v19 = vpop.eup %11297  ;;  %v18579_v0 = vld [vmem:[#allocation96_spill] sm:$0xff] }
 0xdbe   : > { %10226 = vmatmul.mubr.bf16.vlgmr.msra.gmra.mrb[176].mxu1 %v4902_v42  ;;  %v4883_v50 = vmul.f32 %v11298_v19, %v14882_v6  ;;  %v18581_v40 = vpack.i.bf16 %v18579_v0, %v18580_v4  ;;  %v18582_v6 = vld [vmem:[#allocation97_spill] sm:$0xff] }
 0xdbf   : > { %v4903_v56 = vpack.c.bf16 %v4882_v53, %v4881_v8 }
 0xdc0   : > { %v11300_v43 = vpop.eup %11299 }
 0xdc1   : > { %10229 = vmatprep.mubr.bf16.mxu1 %v4903_v56  ;;  %v4884_v7 = vmul.f32 %v11300_v43, %v14890_v10  ;;  %v18583_v10 = vld [vmem:[#allocation95_spill] sm:$0xff] }
 0xdc2   : > { %v18584_v39 = vpack.i.bf16 %v18582_v6, %v18583_v10 }
 0xdc3   : > { %v4904_v61 = vpack.c.bf16 %v4884_v7, %v4883_v50 }
 0xdc6   : > { %10230 = vmatmul.mubr.bf16.gmra.mrb[180].mxu1 %v4904_v61 }
 0xdce   : > { %v4816_v5 = vpop.xlane.xlu0 %4815 }
 0xdcf   : > { %11301 = vrcp.f32 %v4816_v5 }
 0xdd2   : > { %v4818_v3 = vpop.xlane.xlu0 %4817 }
 0xdd6   : > { %v4822_v47 = vpop.xlane.xlu0 %4821 }
 0xdd8   : > { %v10203_v31 = vpop.f32.mrb[152].mxu0 }
 0xdd9   : > { %v4999_v55 = vpop.f32.mrb[153].mxu0  ;;  %v11302_v57 = vpop.eup %11301 }
 0xdda   : > { %v10204_v25 = vpop.f32.mrb[154].mxu0  ;;  %v4826_v2 = vpop.xlane.xlu0 %4825  ;;  %v4886_v42 = vmul.f32 %v11302_v57, %v14899_v46 }
 0xddb   : > { %v10466_v58 = vpack.i.bf16 %v10204_v25, %v10203_v31  ;;  %v5002_v36 = vpop.f32.mrb[155].mxu0 }
 0xddc   : > { %v10461_v51 = vpack.i.bf16 %v5002_v36, %v4999_v55 }
 0xddd   : > { %10467 = vrot.lane.b32.xlu1 %v10466_v58, %s11695_s15 }
 0xdde   : > { %10462 = vrot.lane.b32.xlu0 %v10461_v51, %s11695_s15  ;;  %v10383_v55 = vpop.permute.xlu0 %10382 }
 0xddf   : > { %v10385_v5 = vunpack.i.h.bf16 %v10383_v55  ;;  %v10384_v0 = vunpack.i.l.bf16 %v10383_v55 }
 0xde1   : > { %10477 = vrot.lane.b32.xlu1 %v18581_v40, %s11697_s22  ;;  %v5535_v11 = vsel %vm1566_vm0, %v18604_v23, %v10384_v0 }
 0xde2   : > { %10472 = vrot.lane.b32.xlu0 %v18584_v39, %s11697_s22 }
 0xde5   : > { %v10207_v18 = vpop.f32.mrb[156].mxu0  ;;  %10487 = vrot.lane.b32.xlu1 %v18587_v49, %s11696_s20  ;;  %v18605_v49 = vld [vmem:[#allocation71_spill] sm:$0xff] }
 0xde6   : > { %v5015_v13 = vpop.f32.mrb[157].mxu0  ;;  %10482 = vrot.lane.b32.xlu0 %v18590_v52, %s11696_s20 }
 0xde7   : > { %v10208_v54 = vpop.f32.mrb[158].mxu0 }
 0xde8   : > { %v10496_v20 = vpack.i.bf16 %v10208_v54, %v10207_v18  ;;  %v5018_v1 = vpop.f32.mrb[159].mxu0 }
 0xde9   : > { %v10491_v12 = vpack.i.bf16 %v5018_v1, %v5015_v13 }
 0xdea   : > { %10497 = vrot.lane.b32.xlu1 %v10496_v20, %s11695_s15  ;;  %v4814_v35 = vpop.xlane.xlu1 %4813 }
 0xdeb   : > { %10492 = vrot.lane.b32.xlu0 %v10491_v12, %s11695_s15  ;;  %11303 = vrcp.f32 %v4814_v35  ;;  %v18607_v35 = vmov 0  }
 0xdec   : > { %11305 = vrcp.f32 %v4818_v3 }
 0xdee   : > { %10507 = vrot.lane.b32.xlu1 %v18593_v16, %s11697_s22  ;;  %v4820_v32 = vpop.xlane.xlu1 %4819 }
 0xdef   : > { %10502 = vrot.lane.b32.xlu0 %v18596_v22, %s11697_s22  ;;  %11307 = vrcp.f32 %v4820_v32 }
 0xdf0   : > { %11309 = vrcp.f32 %v4822_v47 }
 0xdf2   : > { %10517 = vrot.lane.b32.xlu1 %v18599_v24, %s11696_s20  ;;  %v4824_v62 = vpop.xlane.xlu1 %4823 }
 0xdf3   : > { %10512 = vrot.lane.b32.xlu0 %v18602_v48, %s11696_s20  ;;  %11311 = vrcp.f32 %v4824_v62 }
 0xdf4   : > { %11313 = vrcp.f32 %v4826_v2 }
 0xdf5   : > { %v11304_v33 = vpop.eup %11303 }
 0xdf6   : > { %v4828_v21 = vpop.xlane.xlu1 %4827  ;;  %v4885_v59 = vmul.f32 %v11304_v33, %v14915_v38  ;;  %v11306_v8 = vpop.eup %11305 }
 0xdf7   : > { %11315 = vrcp.f32 %v4828_v21  ;;  %v4887_v43 = vmul.f32 %v11306_v8, %v14902_v28 }
 0xdf8   : > { %v4905_v53 = vpack.c.bf16 %v4886_v42, %v4885_v59 }
 0xdf9   : > { %v11308_v19 = vpop.eup %11307 }
 0xdfa   : > { %10233 = vmatprep.mubr.bf16.mxu1 %v4905_v53  ;;  %v10388_v56 = vpop.permute.xlu1 %10387  ;;  %v4888_v50 = vmul.f32 %v11308_v19, %v14918_v63  ;;  %v11310_v7 = vpop.eup %11309  ;;  %v18608_v53 = vld [vmem:[#allocation54_spill] sm:$0xff] }
 0xdfb   : > { %v4889_v38 = vmul.f32 %v11310_v7, %v14905_v45  ;;  %v10390_v4 = vunpack.i.h.bf16 %v10388_v56  ;;  %v10389_v40 = vunpack.i.l.bf16 %v10388_v56  ;;  %v18609_v56 = vld [vmem:[#allocation61_spill] sm:$0xff] }
 0xdfc   : > { %v4906_v61 = vpack.c.bf16 %v4888_v50, %v4887_v43  ;;  %v18610_v50 = vld [vmem:[#allocation62_spill] sm:$0xff] }
 0xdfd   : > { %v11312_v31 = vpop.eup %11311  ;;  %v5538_v54 = vsel %vm1566_vm0, %v18605_v49, %v10390_v4 }
 0xdfe   : > { %10234 = vmatmul.mubr.bf16.gmra.mrb[184].mxu1 %v4906_v61  ;;  %v10393_v25 = vpop.permute.xlu1 %10392  ;;  %v4890_v46 = vmul.f32 %v11312_v31, %v14925_v44  ;;  %v11314_v58 = vpop.eup %11313  ;;  %v18603_v44 = vld [vmem:[#allocation73_spill] sm:$0xff]  ;;  %v18611_v61 = vld [vmem:[#allocation70_spill] sm:$0xff] }
 0xdff   : > { %v4891_v63 = vmul.f32 %v11314_v58, %v14909_v29  ;;  %v10395_v10 = vunpack.i.h.bf16 %v10393_v25  ;;  %v10394_v39 = vunpack.i.l.bf16 %v10393_v25  ;;  %v5536_v13 = vsel %vm1566_vm0, %v18603_v44, %v10385_v5 }
 0xe00   : > { %v4907_v36 = vpack.c.bf16 %v4890_v46, %v4889_v38  ;;  %v5537_v29 = vsel %vm1566_vm0, %v18606_v34, %v10389_v40 }
 0xe01   : > { %v11316_v51 = vpop.eup %11315  ;;  %v5568_v17 = vsel %vm5567_vm1, %v5535_v11, %v10394_v39  ;;  %v5569_v16 = vsel %vm5567_vm1, %v5536_v13, %v10395_v10 }
 0xe02   : > { %10237 = vmatprep.mubr.bf16.mxu1 %v4907_v36  ;;  %v10398_v28 = vpop.permute.xlu1 %10397  ;;  %v4892_v6 = vmul.f32 %v11316_v51, %v14928_v26 }
 0xe03   : > { %v10400_v18 = vunpack.i.h.bf16 %v10398_v28  ;;  %v10399_v3 = vunpack.i.l.bf16 %v10398_v28 }
 0xe04   : > { %v4908_v45 = vpack.c.bf16 %v4892_v6, %v4891_v63 }
 0xe05   : > { %v5570_v47 = vsel %vm5567_vm1, %v5537_v29, %v10399_v3  ;;  %v5571_v41 = vsel %vm5567_vm1, %v5538_v54, %v10400_v18 }
 0xe06   : > { %v10403_v26 = vpop.permute.xlu0 %10402  ;;  %10238 = vmatmul.mubr.bf16.gmra.mrb[188].mxu1 %v4908_v45  ;;  %v10408_v9 = vpop.permute.xlu1 %10407 }
 0xe07   : > { %v10405_v52 = vunpack.i.h.bf16 %v10403_v26  ;;  %v10404_v20 = vunpack.i.l.bf16 %v10403_v26  ;;  %v10410_v1 = vunpack.i.h.bf16 %v10408_v9  ;;  %v10409_v12 = vunpack.i.l.bf16 %v10408_v9  ;;  %6701 = vmatprep.mubr.bf16.mxu1 %v18607_v35  ;;  %v18612_v9 = vld [vmem:[#allocation63_spill] sm:$0xff] }
 0xe09   : > { %v5603_v32 = vsel %vm5600_vm2, %v5570_v47, %v10409_v12  ;;  %v5604_v15 = vsel %vm5600_vm2, %v5571_v41, %v10410_v1  ;;  %v5601_v37 = vsel %vm5600_vm2, %v5568_v17, %v10404_v20  ;;  %v5602_v22 = vsel %vm5600_vm2, %v5569_v16, %v10405_v52  ;;  %v18613_v20 = vld [vmem:[#allocation52_spill] sm:$0xff]  ;;  %v18615_v17 = vld [vmem:[#allocation65_spill] sm:$0xff] }
 0xe0a   : > { %v5634_v2 = vpack.c.bf16 %v5604_v15, %v5603_v32  ;;  %v10413_v27 = vpop.permute.xlu0 %10412  ;;  %v10418_v14 = vpop.permute.xlu1 %10417  ;;  %v5633_v24 = vpack.c.bf16 %v5602_v22, %v5601_v37  ;;  %v18614_v47 = vld [vmem:[#allocation64_spill] sm:$0xff] }
 0xe0b   : > { %v10415_v62 = vunpack.i.h.bf16 %v10413_v27  ;;  %v10414_v57 = vunpack.i.l.bf16 %v10413_v27  ;;  %v10420_v60 = vunpack.i.h.bf16 %v10418_v14  ;;  %v10419_v30 = vunpack.i.l.bf16 %v10418_v14 }
 0xe0c   : > { %10257 = vmatprep.mubr.bf16.mxu0 %v5633_v24 }
 0xe0d   : > { %10258 = vmatmul.mubr.bf16.vlgmr.msra.gmra.mrb[160].mxu0 %v5634_v2  ;;  %v5540_v19 = vsel %vm1566_vm0, %v18608_v53, %v10415_v62  ;;  %v5539_v43 = vsel %vm1566_vm0, %v18609_v56, %v10414_v57  ;;  %v5542_v7 = vsel %vm1566_vm0, %v18610_v50, %v10420_v60  ;;  %v5541_v31 = vsel %vm1566_vm0, %v18611_v61, %v10419_v30 }
 0xe0e   : > { %v10423_v48 = vpop.permute.xlu0 %10422  ;;  %v10428_v33 = vpop.permute.xlu1 %10427 }
 0xe0f   : > { %v10425_v21 = vunpack.i.h.bf16 %v10423_v48  ;;  %v10424_v59 = vunpack.i.l.bf16 %v10423_v48  ;;  %v10430_v42 = vunpack.i.h.bf16 %v10428_v33  ;;  %v10429_v8 = vunpack.i.l.bf16 %v10428_v33 }
 0xe11   : > { %v5572_v51 = vsel %vm5567_vm1, %v5539_v43, %v10424_v59  ;;  %v5573_v5 = vsel %vm5567_vm1, %v5540_v19, %v10425_v21  ;;  %v5574_v0 = vsel %vm5567_vm1, %v5541_v31, %v10429_v8  ;;  %v5575_v4 = vsel %vm5567_vm1, %v5542_v7, %v10430_v42 }
 0xe12   : > { %v10433_v55 = vpop.permute.xlu0 %10432  ;;  %v10438_v25 = vpop.permute.xlu1 %10437 }
 0xe13   : > { %v10435_v38 = vunpack.i.h.bf16 %v10433_v55  ;;  %v10434_v46 = vunpack.i.l.bf16 %v10433_v55  ;;  %v10440_v58 = vunpack.i.h.bf16 %v10438_v25  ;;  %v10439_v36 = vunpack.i.l.bf16 %v10438_v25  ;;  %v18616_v25 = vld [vmem:[#allocation56_spill] sm:$0xff] }
 0xe15   : > { %v5605_v40 = vsel %vm5600_vm2, %v5572_v51, %v10434_v46  ;;  %v5606_v28 = vsel %vm5600_vm2, %v5573_v5, %v10435_v38  ;;  %v5607_v63 = vsel %vm5600_vm2, %v5574_v0, %v10439_v36  ;;  %v5608_v6 = vsel %vm5600_vm2, %v5575_v4, %v10440_v58  ;;  %v18617_v46 = vld [vmem:[#allocation53_spill] sm:$0xff]  ;;  %v18618_v51 = vld [vmem:[#allocation68_spill] sm:$0xff]  ;;  %v18619_v0 = vld [vmem:[#allocation66_spill] sm:$0xff] }
 0xe16   : > { %v5635_v10 = vpack.c.bf16 %v5606_v28, %v5605_v40  ;;  %v5636_v39 = vpack.c.bf16 %v5608_v6, %v5607_v63  ;;  %v10448_v18 = vpop.permute.xlu1 %10447  ;;  %v10443_v3 = vpop.permute.xlu0 %10442 }
 0xe17   : > { %v10445_v44 = vunpack.i.h.bf16 %v10443_v3  ;;  %v10444_v13 = vunpack.i.l.bf16 %v10443_v3  ;;  %v10450_v11 = vunpack.i.h.bf16 %v10448_v18  ;;  %v10449_v49 = vunpack.i.l.bf16 %v10448_v18 }
 0xe18   : > { %10261 = vmatprep.mubr.bf16.mxu0 %v5635_v10 }
 0xe19   : > { %10262 = vmatmul.mubr.bf16.gmra.mrb[164].mxu0 %v5636_v39  ;;  %v5544_v52 = vsel %vm1566_vm0, %v18612_v9, %v10445_v44  ;;  %v5543_v1 = vsel %vm1566_vm0, %v18613_v20, %v10444_v13  ;;  %v5546_v41 = vsel %vm1566_vm0, %v18614_v47, %v10450_v11  ;;  %v5545_v16 = vsel %vm1566_vm0, %v18615_v17, %v10449_v49  ;;  %v18621_v47 = vld [vmem:[#allocation102_spill] sm:$0xff] }
 0xe1a   : > { %v10458_v45 = vpop.permute.xlu1 %10457  ;;  %v10453_v23 = vpop.permute.xlu0 %10452 }
 0xe1b   : > { %v10460_v54 = vunpack.i.h.bf16 %v10458_v45  ;;  %v10459_v34 = vunpack.i.l.bf16 %v10458_v45  ;;  %v10455_v29 = vunpack.i.h.bf16 %v10453_v23  ;;  %v10454_v26 = vunpack.i.l.bf16 %v10453_v23 }
 0xe1d   : > { %v5578_v22 = vsel %vm5567_vm1, %v5545_v16, %v10459_v34  ;;  %v5579_v2 = vsel %vm5567_vm1, %v5546_v41, %v10460_v54  ;;  %v5576_v24 = vsel %vm5567_vm1, %v5543_v1, %v10454_v26  ;;  %v5577_v62 = vsel %vm5567_vm1, %v5544_v52, %v10455_v29  ;;  %v18623_v16 = vld [vmem:[#allocation105_spill] sm:$0xff] }
 0xe4f   : > { %v10468_v12 = vpop.permute.xlu1 %10467 }
 0xe50   : > { %v10470_v32 = vunpack.i.h.bf16 %v10468_v12  ;;  %v10469_v15 = vunpack.i.l.bf16 %v10468_v12  ;;  %v10463_v37 = vpop.permute.xlu0 %10462  ;;  %v18620_v12 = vld [vmem:[#allocation104_spill] sm:$0xff] }
 0xe51   : > { %v10465_v27 = vunpack.i.h.bf16 %v10463_v37  ;;  %v10464_v14 = vunpack.i.l.bf16 %v10463_v37  ;;  %v18622_v41 = vpack.i.bf16 %v18620_v12, %v18621_v47  ;;  %v11649_v12 = vld [vmem:[%s11784_s14] sm:$0xff] }
 0xe52   : > { %v5611_v57 = vsel %vm5600_vm2, %v5578_v22, %v10469_v15  ;;  %v5612_v60 = vsel %vm5600_vm2, %v5579_v2, %v10470_v32  ;;  %v18624_v32 = vld [vmem:[#allocation103_spill] sm:$0xff] }
 0xe53   : > { %v10478_v30 = vpop.permute.xlu1 %10477  ;;  %v5609_v48 = vsel %vm5600_vm2, %v5576_v24, %v10464_v14  ;;  %v5610_v33 = vsel %vm5600_vm2, %v5577_v62, %v10465_v27  ;;  %v5638_v21 = vpack.c.bf16 %v5612_v60, %v5611_v57  ;;  %v18625_v15 = vpack.i.bf16 %v18623_v16, %v18624_v32  ;;  %v18626_v14 = vld [vmem:[#allocation31_spill] sm:$0xff]  ;;  %v18627_v24 = vld [vmem:[#allocation14_spill] sm:$0xff]  ;;  %v18629_v57 = vld [vmem:[#allocation33_spill] sm:$0xff] }
 0xe54   : > { %v10473_v59 = vpop.permute.xlu0 %10472  ;;  %v5637_v42 = vpack.c.bf16 %v5610_v33, %v5609_v48  ;;  %v10480_v8 = vunpack.i.h.bf16 %v10478_v30  ;;  %v10479_v53 = vunpack.i.l.bf16 %v10478_v30  ;;  %v18628_v62 = vpack.i.bf16 %v18626_v14, %v18627_v24  ;;  %v18630_v60 = vld [vmem:[#allocation16_spill] sm:$0xff]  ;;  %v18633_v33 = vld [vmem:[#allocation106_spill] sm:$0xff]  ;;  %v11650_v16 = vld [vmem:[%s11784_s14 + $0x8] sm:$0xff] }
 0xe55   : > { %v10475_v56 = vunpack.i.h.bf16 %v10473_v59  ;;  %v10474_v43 = vunpack.i.l.bf16 %v10473_v59  ;;  %v18631_v30 = vpack.i.bf16 %v18629_v57, %v18630_v60  ;;  %v18632_v48 = vld [vmem:[#allocation108_spill] sm:$0xff]  ;;  %v18635_v59 = vld [vmem:[#allocation109_spill] sm:$0xff] }
 0xe56   : > { %10265 = vmatprep.mubr.bf16.mxu0 %v5637_v42  ;;  %v5550_v38 = vsel %vm1566_vm0, %v18616_v25, %v10480_v8  ;;  %v5549_v58 = vsel %vm1566_vm0, %v18617_v46, %v10479_v53  ;;  %v18636_v42 = vld [vmem:[#allocation107_spill] sm:$0xff]  ;;  %v18638_v53 = vld [vmem:[#allocation28_spill] sm:$0xff] }
 0xe57   : > { %v10488_v19 = vpop.permute.xlu1 %10487  ;;  %10266 = vmatmul.mubr.bf16.gmra.mrb[168].mxu0 %v5638_v21  ;;  %v5548_v5 = vsel %vm1566_vm0, %v18618_v51, %v10475_v56  ;;  %v5547_v4 = vsel %vm1566_vm0, %v18619_v0, %v10474_v43  ;;  %v18634_v21 = vpack.i.bf16 %v18632_v48, %v18633_v33  ;;  %v18637_v8 = vpack.i.bf16 %v18635_v59, %v18636_v42  ;;  %v18641_v43 = vld [vmem:[#allocation32_spill] sm:$0xff]  ;;  %v18645_v51 = vld [vmem:[#allocation7_spill] sm:$0xff] }
 0xe58   : > { %v10483_v50 = vpop.permute.xlu0 %10482  ;;  %v10490_v7 = vunpack.i.h.bf16 %v10488_v19  ;;  %v10489_v61 = vunpack.i.l.bf16 %v10488_v19  ;;  %v18639_v19 = vld [vmem:[#allocation20_spill] sm:$0xff] }
 0xe59   : > { %v10485_v31 = vunpack.i.h.bf16 %v10483_v50  ;;  %v10484_v55 = vunpack.i.l.bf16 %v10483_v50  ;;  %v18640_v56 = vpack.i.bf16 %v18638_v53, %v18639_v19  ;;  %v18642_v50 = vld [vmem:[#allocation24_spill] sm:$0xff]  ;;  %v18659_v19 = vld [vmem:[#allocation50_spill] sm:$0xff] }
 0xe5a   : > { %v5582_v6 = vsel %vm5567_vm1, %v5549_v58, %v10489_v61  ;;  %v5583_v10 = vsel %vm5567_vm1, %v5550_v38, %v10490_v7  ;;  %v18643_v7 = vpack.i.bf16 %v18641_v43, %v18642_v50  ;;  %v11652_v59 = vld [vmem:[%s11784_s14 + $0x10] sm:$0xff] }
 0xe5b   : > { %v5580_v3 = vsel %vm5567_vm1, %v5547_v4, %v10484_v55  ;;  %v5581_v45 = vsel %vm5567_vm1, %v5548_v5, %v10485_v31  ;;  %v18647_v4 = vld [vmem:[#allocation9_spill] sm:$0xff]  ;;  %v18660_v43 = vld [vmem:[#allocation60_spill] sm:$0xff] }
 0xe5c   : > { %v10498_v36 = vpop.permute.xlu1 %10497 }
 0xe5d   : > { %v10500_v40 = vunpack.i.h.bf16 %v10498_v36  ;;  %v10499_v28 = vunpack.i.l.bf16 %v10498_v36  ;;  %v10493_v63 = vpop.permute.xlu0 %10492  ;;  %v18644_v36 = vld [vmem:[#allocation5_spill] sm:$0xff] }
 0xe5e   : > { %v10495_v39 = vunpack.i.h.bf16 %v10493_v63  ;;  %v10494_v18 = vunpack.i.l.bf16 %v10493_v63  ;;  %v18646_v5 = vpack.i.bf16 %v18644_v36, %v18645_v51 }
 0xe5f   : > { %v5615_v44 = vsel %vm5600_vm2, %v5582_v6, %v10499_v28  ;;  %v5616_v13 = vsel %vm5600_vm2, %v5583_v10, %v10500_v40  ;;  %v18648_v40 = vld [vmem:[#allocation3_spill] sm:$0xff] }
 0xe60   : > { %v5613_v23 = vsel %vm5600_vm2, %v5580_v3, %v10494_v18  ;;  %v5614_v11 = vsel %vm5600_vm2, %v5581_v45, %v10495_v39  ;;  %v5640_v49 = vpack.c.bf16 %v5616_v13, %v5615_v44  ;;  %v18649_v28 = vpack.i.bf16 %v18647_v4, %v18648_v40  ;;  %v18650_v18 = vld [vmem:[#allocation22_spill] sm:$0xff]  ;;  %v18651_v3 = vld [vmem:[#allocation12_spill] sm:$0xff] }
 0xe61   : > { %v5639_v54 = vpack.c.bf16 %v5614_v11, %v5613_v23  ;;  %v18652_v45 = vpack.i.bf16 %v18650_v18, %v18651_v3  ;;  %v18653_v44 = vld [vmem:[#allocation26_spill] sm:$0xff] }
 0xe62   : > { %v18654_v13 = vld [vmem:[#allocation18_spill] sm:$0xff] }
 0xe63   : > { %10269 = vmatprep.mubr.bf16.mxu0 %v5639_v54  ;;  %v18655_v23 = vpack.i.bf16 %v18653_v44, %v18654_v13 }
 0xe64   : > { %10270 = vmatmul.mubr.bf16.gmra.mrb[172].mxu0 %v5640_v49 }
 0xe91   : > { %v10227_v34 = vpop.f32.mrb[176].mxu1 }
 0xe92   : > { %v5088_v29 = vpop.f32.mrb[177].mxu1 }
 0xe93   : > { %v10228_v26 = vpop.f32.mrb[178].mxu1 }
 0xe94   : > { %v10526_v9 = vpack.i.bf16 %v10228_v26, %v10227_v34  ;;  %v5091_v52 = vpop.f32.mrb[179].mxu1 }
 0xe95   : > { %v10521_v20 = vpack.i.bf16 %v5091_v52, %v5088_v29 }
 0xe96   : > { %10527 = vrot.lane.b32.xlu1 %v10526_v9, %s11695_s15 }
 0xe97   : > { %10522 = vrot.lane.b32.xlu0 %v10521_v20, %s11695_s15  ;;  %v10508_v20 = vpop.permute.xlu1 %10507 }
 0xe99   : > { %v10231_v1 = vpop.f32.mrb[180].mxu1 }
 0xe9a   : > { %10537 = vrot.lane.b32.xlu1 %v18622_v41, %s11697_s22  ;;  %v5104_v17 = vpop.f32.mrb[181].mxu1  ;;  %v15184_v41 = vld [vmem:[%s17889_s6] ss:$0 sm:$0xff] }
 0xe9b   : > { %10532 = vrot.lane.b32.xlu0 %v18625_v15, %s11697_s22  ;;  %v10232_v37 = vpop.f32.mrb[182].mxu1  ;;  %v10518_v15 = vpop.permute.xlu1 %10517 }
 0xe9c   : > { %v10556_v22 = vpack.i.bf16 %v10232_v37, %v10231_v1  ;;  %v5107_v2 = vpop.f32.mrb[183].mxu1  ;;  %v10503_v1 = vpop.permute.xlu0 %10502  ;;  %v10519_v24 = vunpack.i.l.bf16 %v10518_v15  ;;  %v10520_v48 = vunpack.i.h.bf16 %v10518_v15  ;;  %v10663_v15 = vld [vmem:[%s17892_s9 + $0x4] ss:$16 sps:$4 sm:$0xff]  }
 0xe9d   : > { %v10551_v27 = vpack.i.bf16 %v5107_v2, %v5104_v17  ;;  %v10509_v2 = vunpack.i.l.bf16 %v10508_v20  ;;  %v10504_v14 = vunpack.i.l.bf16 %v10503_v1  ;;  %6669 = vmatprep.subr.bf16.mxu1 %v10663_v15  ;;  %v10685_v15 = vld [vmem:[%s17892_s9 + $0x80] ss:$16 sps:$4 sm:$0xff]  }
 0xe9e   : > { %10547 = vrot.lane.b32.xlu1 %v18628_v62, %s11696_s20  ;;  %v11651_v62 = vld [vmem:[%s11784_s14 + $0x18] sm:$0xff] }
 0xe9f   : > { %10542 = vrot.lane.b32.xlu0 %v18631_v30, %s11696_s20 }
 0xea0   : > { %v10513_v37 = vpop.permute.xlu0 %10512 }
 0xea1   : > { %v10514_v33 = vunpack.i.l.bf16 %v10513_v37 }
 0xea2   : > { %10557 = vrot.lane.b32.xlu1 %v10556_v22, %s11695_s15  ;;  %v10510_v22 = vunpack.i.h.bf16 %v10508_v20 }
 0xea3   : > { %10552 = vrot.lane.b32.xlu0 %v10551_v27, %s11695_s15  ;;  %v10505_v27 = vunpack.i.h.bf16 %v10503_v1 }
 0xea5   : > { %v5552_v50 = vsel %vm1566_vm0, %v18660_v43, %v10505_v27  ;;  %v10661_v27 = vld [vmem:[%s17892_s9] ss:$16 sps:$4 sm:$0xff]  }
 0xea6   : > { %10567 = vrot.lane.b32.xlu1 %v18634_v21, %s11697_s22  ;;  %v10515_v21 = vunpack.i.h.bf16 %v10513_v37  ;;  %6670 = vmatpush1.bf16.msra.mxu1 %v10661_v27  ;;  %v10694_v27 = vld [vmem:[%s17892_s9 + $0xa8] ss:$16 sps:$4 sm:$0xff]  }
 0xea7   : > { %10562 = vrot.lane.b32.xlu0 %v18637_v8, %s11697_s22  ;;  %v18658_v8 = vld [vmem:[#allocation67_spill] sm:$0xff] }
 0xea8   : > { %v5554_v53 = vsel %vm1566_vm0, %v18658_v8, %v10510_v22  ;;  %v18668_v8 = vld [vmem:[#allocation59_spill] sm:$0xff] }
 0xeaa   : > { %10577 = vrot.lane.b32.xlu1 %v18640_v56, %s11696_s20  ;;  %v5553_v56 = vsel %vm1566_vm0, %v18659_v19, %v10509_v2  ;;  %v18669_v19 = vld [vmem:[#allocation57_spill] sm:$0xff] }
 0xeab   : > { %10572 = vrot.lane.b32.xlu0 %v18643_v7, %s11696_s20  ;;  %v18661_v7 = vld [vmem:[#allocation55_spill] sm:$0xff] }
 0xed1   : > { %v10235_v61 = vpop.f32.mrb[184].mxu1 }
 0xed2   : > { %v5120_v31 = vpop.f32.mrb[185].mxu1 }
 0xed3   : > { %v10236_v55 = vpop.f32.mrb[186].mxu1 }
 0xed4   : > { %v10586_v25 = vpack.i.bf16 %v10236_v55, %v10235_v61  ;;  %v5123_v38 = vpop.f32.mrb[187].mxu1  ;;  %v5551_v61 = vsel %vm1566_vm0, %v18661_v7, %v10504_v14  ;;  %v10664_v14 = vld [vmem:[%s17892_s9 + $0x8] ss:$16 sps:$4 sm:$0xff]   ;;  %v10672_v7 = vld [vmem:[%s17892_s9 + $0x2c] ss:$16 sps:$4 sm:$0xff]  }
 0xed5   : > { %v10581_v46 = vpack.i.bf16 %v5123_v38, %v5120_v31  ;;  %v5586_v31 = vsel %vm5567_vm1, %v5553_v56, %v10519_v24  ;;  %v11656_v24 = vld [vmem:[%s11784_s14 + $0x30] sm:$0xff] }
 0xed6   : > { %10587 = vrot.lane.b32.xlu1 %v10586_v25, %s11695_s15 }
 0xed7   : > { %10582 = vrot.lane.b32.xlu0 %v10581_v46, %s11695_s15  ;;  %v5587_v46 = vsel %vm5567_vm1, %v5554_v53, %v10520_v48 }
 0xed9   : > { %v10239_v58 = vpop.f32.mrb[188].mxu1 }
 0xeda   : > { %10597 = vrot.lane.b32.xlu1 %v18646_v5, %s11697_s22  ;;  %v5136_v0 = vpop.f32.mrb[189].mxu1 }
 0xedb   : > { %10592 = vrot.lane.b32.xlu0 %v18649_v28, %s11697_s22  ;;  %v10240_v63 = vpop.f32.mrb[190].mxu1  ;;  %s17548_s22 = scalar_lea.vmem %s17896_s13, %s8982_s28 }
 0xedc   : > { %v10616_v6 = vpack.i.bf16 %v10240_v63, %v10239_v58  ;;  %v5139_v10 = vpop.f32.mrb[191].mxu1  ;;  %v5584_v58 = vsel %vm5567_vm1, %v5551_v61, %v10514_v33  ;;  %v11653_v63 = vld [vmem:[%s11784_s14 + $0x20] sm:$0xff] }
 0xedd   : > { %v10611_v39 = vpack.i.bf16 %v5139_v10, %v5136_v0  ;;  %v5585_v0 = vsel %vm5567_vm1, %v5552_v50, %v10515_v21  ;;  %v11654_v10 = vld [vmem:[%s11784_s14 + $0x28] sm:$0xff]  ;;  %v10669_v50 = vld [vmem:[%s17892_s9 + $0x24] ss:$16 sps:$4 sm:$0xff]  }
 0xede   : > { %10607 = vrot.lane.b32.xlu1 %v18652_v45, %s11696_s20  ;;  %v18670_v61 = vld [vmem:[#allocation58_spill] sm:$0xff]  ;;  %6671 = vmatprep.subr.bf16.mxu1 %v10669_v50  ;;  %v11658_v50 = vld [vmem:[%s11784_s14 + $0x48] sm:$0xff] }
 0xedf   : > { %10602 = vrot.lane.b32.xlu0 %v18655_v23, %s11696_s20 }
 0xee0   : > { %v10259_v11 = vpop.f32.mrb[160].mxu0 }
 0xee1   : > { %v5747_v49 = vpop.f32.mrb[161].mxu0  ;;  %v5876_v42 = vadd.f32 %v11652_v59, %v10259_v11 }
 0xee2   : > { %10617 = vrot.lane.b32.xlu1 %v10616_v6, %s11695_s15  ;;  %v10260_v54 = vpop.f32.mrb[162].mxu0  ;;  %v5874_v47 = vadd.f32 %v11649_v12, %v5747_v49 }
 0xee3   : > { %10612 = vrot.lane.b32.xlu0 %v10611_v39, %s11695_s15  ;;  %v5750_v34 = vpop.f32.mrb[163].mxu0  ;;  %v5877_v57 = vadd.f32 %v11651_v62, %v10260_v54  ;;  %v15217_v4 = vadd.f32 %v15184_v41, %v5876_v42  ;;  %v18667_v42 = vld [vmem:[#allocation51_spill] sm:$0xff] }
 0xee4   : > { %v15187_v17 = vadd.f32 %v15184_v41, %v5874_v47  ;;  %v5875_v32 = vadd.f32 %v11650_v16, %v5750_v34 }
 0xee5   : > { %v15209_v55 = vadd.f32 %v15184_v41, %v5877_v57  ;;  %18663 = vst [vmem:[#allocation39_spill] sm:$0xff] %v15217_v4 }
 0xee6   : > { %18656 = vst [vmem:[#allocation30_spill] sm:$0xff] %v15187_v17  ;;  %v15193_v60 = vadd.f32 %v15184_v41, %v5875_v32  ;;  %v6043_v30 = vmul.f32 %v15187_v17, %v15187_v17  ;;  %v6045_v32 = vmul.f32 %v15217_v4, %v15217_v4 }
 0xee7   : > { %18662 = vst [vmem:[#allocation35_spill] sm:$0xff] %v15209_v55  ;;  %v6046_v44 = vmul.f32 %v15209_v55, %v15209_v55 }
 0xee8   : > { %18657 = vst [vmem:[#allocation34_spill] sm:$0xff] %v15193_v60  ;;  %v6044_v38 = vmul.f32 %v15193_v60, %v15193_v60 }
 0xeec   : > { %v15176_v29 = vpop.f32.mrb[164].mxu0 }
 0xeed   : > { %v5763_v26 = vpop.f32.mrb[165].mxu0  ;;  %v5880_v62 = vadd.f32 %v11656_v24, %v15176_v29  ;;  %v10702_v24 = vld [vmem:[%s17892_s9 + $0xcc] ss:$16 sps:$4 sm:$0xff]  }
 0xeee   : > { %v15178_v9 = vpop.f32.mrb[166].mxu0  ;;  %v5878_v6 = vadd.f32 %v11653_v63, %v5763_v26  ;;  %v11655_v26 = vld [vmem:[%s11784_s14 + $0x38] sm:$0xff] }
 0xeef   : > { %v5766_v52 = vpop.f32.mrb[167].mxu0 }
 0xef0   : > { %v5879_v39 = vadd.f32 %v11654_v10, %v5766_v52  ;;  %v15230_v34 = vadd.f32 %v15184_v41, %v5878_v6  ;;  %v5881_v52 = vadd.f32 %v11655_v26, %v15178_v9  ;;  %v10666_v9 = vld [vmem:[%s17892_s9 + $0xc] ss:$16 sps:$4 sm:$0xff]   ;;  %v10681_v26 = vld [vmem:[%s17892_s9 + $0x64] ss:$16 sps:$4 sm:$0xff]  }
 0xef1   : > { %6862 = vmatprep.subr.bf16.mxu0 %v10666_v9  ;;  %v10688_v9 = vld [vmem:[%s17892_s9 + $0x88] ss:$16 sps:$4 sm:$0xff]  }
 0xef2   : > { %18664 = vst [vmem:[#allocation37_spill] sm:$0xff] %v15230_v34  ;;  %v15235_v20 = vadd.f32 %v15184_v41, %v5879_v39  ;;  %v15255_v48 = vadd.f32 %v15184_v41, %v5881_v52  ;;  %v6047_v59 = vmul.f32 %v15230_v34, %v15230_v34  ;;  %6863 = vmatpush1.bf16.msra.mxu0 %v10664_v14  ;;  %v10684_v52 = vld [vmem:[%s17892_s9 + $0x6c] ss:$16 sps:$4 sm:$0xff]   ;;  %v10699_v14 = vld [vmem:[%s17892_s9 + $0xc4] ss:$16 sps:$4 sm:$0xff]  }
 0xef3   : > { %6864 = vmatprep.subr.bf16.mxu0 %v10672_v7 }
 0xef4   : > { %18665 = vst [vmem:[#allocation38_spill] sm:$0xff] %v15235_v20  ;;  %18666 = vst [vmem:[#allocation36_spill] sm:$0xff] %v15255_v48  ;;  %v6048_v21 = vmul.f32 %v15235_v20, %v15235_v20 }
 0xf02   : > { %5947 = vadd.xlane.f32.xlu0 %v15187_v17 }
 0xf06   : > { %6075 = vadd.xlane.f32.xlu0 %v6043_v30  ;;  %5949 = vadd.xlane.f32.xlu1 %v15193_v60 }
 0xf08   : > { %v10528_v25 = vpop.permute.xlu1 %10527 }
 0xf09   : > { %v10530_v36 = vunpack.i.h.bf16 %v10528_v25  ;;  %v10529_v51 = vunpack.i.l.bf16 %v10528_v25  ;;  %v10523_v5 = vpop.permute.xlu0 %10522 }
 0xf0a   : > { %v10525_v40 = vunpack.i.h.bf16 %v10523_v5  ;;  %v10524_v28 = vunpack.i.l.bf16 %v10523_v5  ;;  %5953 = vadd.xlane.f32.xlu1 %v15209_v55  ;;  %6077 = vadd.xlane.f32.xlu0 %v6044_v38 }
 0xf0b   : > { %v5619_v18 = vsel %vm5600_vm2, %v5586_v31, %v10529_v51  ;;  %v5620_v3 = vsel %vm5600_vm2, %v5587_v46, %v10530_v36  ;;  %v10667_v36 = vld [vmem:[%s17892_s9 + $0x20] ss:$16 sps:$4 sm:$0xff]   ;;  %v10670_v51 = vld [vmem:[%s17892_s9 + $0x28] ss:$16 sps:$4 sm:$0xff]  }
 0xf0c   : > { %v10538_v45 = vpop.permute.xlu1 %10537  ;;  %v5617_v13 = vsel %vm5600_vm2, %v5584_v58, %v10524_v28  ;;  %v5618_v23 = vsel %vm5600_vm2, %v5585_v0, %v10525_v40  ;;  %v5642_v11 = vpack.c.bf16 %v5620_v3, %v5619_v18  ;;  %6672 = vmatpush1.bf16.msra.mxu1 %v10667_v36  ;;  %6865 = vmatpush1.bf16.msra.mxu0 %v10670_v51 }
 0xf0d   : > { %v10533_v49 = vpop.permute.xlu0 %10532  ;;  %v5641_v54 = vpack.c.bf16 %v5618_v23, %v5617_v13  ;;  %v10540_v1 = vunpack.i.h.bf16 %v10538_v45  ;;  %v10539_v12 = vunpack.i.l.bf16 %v10538_v45  ;;  %v10675_v45 = vld [vmem:[%s17892_s9 + $0x44] ss:$16 sps:$4 sm:$0xff]   ;;  %v10673_v23 = vld [vmem:[%s17892_s9 + $0x40] ss:$16 sps:$4 sm:$0xff]  }
 0xf0e   : > { %6081 = vadd.xlane.f32.xlu1 %v6046_v44  ;;  %5951 = vadd.xlane.f32.xlu0 %v15217_v4  ;;  %v10535_v47 = vunpack.i.h.bf16 %v10533_v49  ;;  %v10534_v37 = vunpack.i.l.bf16 %v10533_v49  ;;  %v10678_v44 = vld [vmem:[%s17892_s9 + $0x4c] ss:$16 sps:$4 sm:$0xff]   ;;  %v15304_v49 = vadd.f32 %v15184_v41, %v5880_v62  ;;  %v10697_v62 = vld [vmem:[%s17892_s9 + $0xc0] ss:$16 sps:$4 sm:$0xff]  }
 0xf0f   : > { %10273 = vmatprep.mubr.bf16.mxu0 %v5641_v54  ;;  %v5558_v29 = vsel %vm1566_vm0, %v18667_v42, %v10540_v1  ;;  %v5557_v53 = vsel %vm1566_vm0, %v18668_v8, %v10539_v12  ;;  %6673 = vmatprep.subr.bf16.mxu1 %v10675_v45  ;;  %v6050_v54 = vmul.f32 %v15255_v48, %v15255_v48  ;;  %v10679_v1 = vld [vmem:[%s17892_s9 + $0x60] ss:$16 sps:$4 sm:$0xff]   ;;  %v10682_v12 = vld [vmem:[%s17892_s9 + $0x68] ss:$16 sps:$4 sm:$0xff]  }
 0xf10   : > { %v10548_v16 = vpop.permute.xlu1 %10547  ;;  %10274 = vmatmul.mubr.bf16.gmra.mrb[176].mxu0 %v5642_v11  ;;  %v5556_v56 = vsel %vm1566_vm0, %v18669_v19, %v10535_v47  ;;  %v5555_v31 = vsel %vm1566_vm0, %v18670_v61, %v10534_v37  ;;  %v10676_v11 = vld [vmem:[%s17892_s9 + $0x48] ss:$16 sps:$4 sm:$0xff]   ;;  %18671 = vst [vmem:[#allocation40_spill] sm:$0xff] %v15304_v49  ;;  %6866 = vmatprep.subr.bf16.mxu0 %v10678_v44  ;;  %v10693_v37 = vld [vmem:[%s17892_s9 + $0xa4] ss:$16 sps:$4 sm:$0xff]  }
 0xf11   : > { %v10549_v22 = vunpack.i.l.bf16 %v10548_v16  ;;  %v10543_v2 = vpop.permute.xlu0 %10542  ;;  %v10550_v57 = vunpack.i.h.bf16 %v10548_v16  ;;  %6674 = vmatpush1.bf16.msra.mxu1 %v10673_v23  ;;  %6867 = vmatpush1.bf16.msra.mxu0 %v10676_v11  ;;  %v6049_v47 = vmul.f32 %v15304_v49, %v15304_v49  ;;  %v10687_v16 = vld [vmem:[%s17892_s9 + $0x84] ss:$16 sps:$4 sm:$0xff]   ;;  %v11662_v45 = vld [vmem:[%s11784_s14 + $0x68] sm:$0xff] }
 0xf12   : > { %v10544_v30 = vunpack.i.l.bf16 %v10543_v2  ;;  %6079 = vadd.xlane.f32.xlu0 %v6045_v32  ;;  %5957 = vadd.xlane.f32.xlu1 %v15235_v20  ;;  %v10545_v33 = vunpack.i.h.bf16 %v10543_v2  ;;  %v10690_v32 = vld [vmem:[%s17892_s9 + $0x8c] ss:$16 sps:$4 sm:$0xff]   ;;  %v10691_v2 = vld [vmem:[%s17892_s9 + $0xa0] ss:$16 sps:$4 sm:$0xff]  }
 0xf13   : > { %v5590_v25 = vsel %vm5567_vm1, %v5557_v53, %v10549_v22  ;;  %v5591_v5 = vsel %vm5567_vm1, %v5558_v29, %v10550_v57  ;;  %6675 = vmatprep.subr.bf16.mxu1 %v10681_v26  ;;  %6868 = vmatprep.subr.bf16.mxu0 %v10684_v52  ;;  %v10696_v22 = vld [vmem:[%s17892_s9 + $0xac] ss:$16 sps:$4 sm:$0xff]   ;;  %v10700_v57 = vld [vmem:[%s17892_s9 + $0xc8] ss:$16 sps:$4 sm:$0xff]   ;;  %v11657_v42 = vld [vmem:[%s11784_s14 + $0x40] sm:$0xff] }
 0xf14   : > { %v10558_v43 = vpop.permute.xlu1 %10557  ;;  %v5588_v0 = vsel %vm5567_vm1, %v5555_v31, %v10544_v30  ;;  %v5589_v63 = vsel %vm5567_vm1, %v5556_v56, %v10545_v33  ;;  %v10703_v53 = vld [vmem:[%s17892_s9 + $0xe0] ss:$16 sps:$4 sm:$0xff]   ;;  %v10706_v56 = vld [vmem:[%s17892_s9 + $0xe8] ss:$16 sps:$4 sm:$0xff]  }
 0xf15   : > { %v10560_v38 = vunpack.i.h.bf16 %v10558_v43  ;;  %v10559_v46 = vunpack.i.l.bf16 %v10558_v43  ;;  %v10553_v58 = vpop.permute.xlu0 %10552  ;;  %6676 = vmatpush1.bf16.msra.mxu1 %v10679_v1  ;;  %6869 = vmatpush1.bf16.msra.mxu0 %v10682_v12  ;;  %v11659_v31 = vld [vmem:[%s11784_s14 + $0x50] sm:$0xff] }
 0xf16   : > { %v10555_v40 = vunpack.i.h.bf16 %v10553_v58  ;;  %v10554_v28 = vunpack.i.l.bf16 %v10553_v58  ;;  %5955 = vadd.xlane.f32.xlu0 %v15230_v34  ;;  %6085 = vadd.xlane.f32.xlu1 %v6048_v21  ;;  %v10705_v21 = vld [vmem:[%s17892_s9 + $0xe4] ss:$16 sps:$4 sm:$0xff]  }
 0xf17   : > { %v5623_v6 = vsel %vm5600_vm2, %v5590_v25, %v10559_v46  ;;  %v5624_v10 = vsel %vm5600_vm2, %v5591_v5, %v10560_v38  ;;  %6677 = vmatprep.subr.bf16.mxu1 %v10687_v16  ;;  %6870 = vmatprep.subr.bf16.mxu0 %v10690_v32  ;;  %v11660_v46 = vld [vmem:[%s11784_s14 + $0x58] sm:$0xff]  ;;  %v11663_v52 = vld [vmem:[%s11784_s14 + $0x70] sm:$0xff] }
 0xf18   : > { %v5621_v39 = vsel %vm5600_vm2, %v5588_v0, %v10554_v28  ;;  %v5622_v18 = vsel %vm5600_vm2, %v5589_v63, %v10555_v40  ;;  %v5644_v3 = vpack.c.bf16 %v5624_v10, %v5623_v6  ;;  %v11661_v6 = vld [vmem:[%s11784_s14 + $0x60] sm:$0xff] }
 0xf19   : > { %v5643_v13 = vpack.c.bf16 %v5622_v18, %v5621_v39  ;;  %6678 = vmatpush1.bf16.msra.mxu1 %v10685_v15  ;;  %6871 = vmatpush1.bf16.msra.mxu0 %v10688_v9  ;;  %v10568_v18 = vpop.permute.xlu1 %10567 }
 0xf1a   : > { %6083 = vadd.xlane.f32.xlu0 %v6047_v59  ;;  %5961 = vadd.xlane.f32.xlu1 %v15255_v48  ;;  %v10708_v59 = vld [vmem:[%s17892_s9 + $0xec] ss:$16 sps:$4 sm:$0xff]   ;;  %v10569_v16 = vunpack.i.l.bf16 %v10568_v18 }
 0xf1b   : > { %10277 = vmatprep.mubr.bf16.mxu0 %v5643_v13  ;;  %6679 = vmatprep.subr.bf16.mxu1 %v10693_v37  ;;  %v11664_v37 = vld [vmem:[%s11784_s14 + $0x78] sm:$0xff] }
 0xf1c   : > { %10278 = vmatmul.mubr.bf16.gmra.mrb[180].mxu0 %v5644_v3  ;;  %6872 = vmatprep.subr.bf16.mxu0 %v10696_v22  ;;  %v10563_v3 = vpop.permute.xlu0 %10562 }
 0xf1d   : > { %6680 = vmatpush1.bf16.msra.mxu1 %v10691_v2  ;;  %6873 = vmatpush1.bf16.msra.mxu0 %v10694_v27  ;;  %v10565_v32 = vunpack.i.h.bf16 %v10563_v3  ;;  %v10564_v15 = vunpack.i.l.bf16 %v10563_v3 }
 0xf1e   : > { %5959 = vadd.xlane.f32.xlu0 %v15304_v49  ;;  %6089 = vadd.xlane.f32.xlu1 %v6050_v54  ;;  %v10578_v54 = vpop.permute.xlu1 %10577 }
 0xf1f   : > { %6681 = vmatprep.subr.bf16.mxu1 %v10699_v14  ;;  %6874 = vmatprep.subr.bf16.mxu0 %v10702_v24  ;;  %v10579_v9 = vunpack.i.l.bf16 %v10578_v54  ;;  %v10580_v27 = vunpack.i.h.bf16 %v10578_v54 }
 0xf20   : > { %v10573_v26 = vpop.permute.xlu0 %10572 }
 0xf21   : > { %6682 = vmatpush1.bf16.msra.mxu1 %v10697_v62  ;;  %6875 = vmatpush1.bf16.msra.mxu0 %v10700_v57  ;;  %v10574_v14 = vunpack.i.l.bf16 %v10573_v26  ;;  %v10575_v24 = vunpack.i.h.bf16 %v10573_v26  ;;  %v18679_v57 = vld [vmem:[#allocation76_spill] sm:$0xff] }
 0xf22   : > { %6087 = vadd.xlane.f32.xlu0 %v6049_v47  ;;  %6683 = vmatprep.subr.bf16.mxu1 %v10705_v21  ;;  %v10570_v47 = vunpack.i.h.bf16 %v10568_v18 }
 0xf23   : > { %6876 = vmatprep.subr.bf16.mxu0 %v10708_v59  ;;  %v18681_v59 = vld [vmem:[#allocation77_spill] sm:$0xff] }
 0xf25   : > { %6684 = vmatpush1.bf16.msra.mxu1 %v10703_v53  ;;  %6877 = vmatpush1.bf16.msra.mxu0 %v10706_v56 }
 0xf2a   : > { %v10267_v30 = vpop.f32.mrb[168].mxu0 }
 0xf2b   : > { %v5779_v33 = vpop.f32.mrb[169].mxu0  ;;  %v5884_v25 = vadd.f32 %v11659_v31, %v10267_v30  ;;  %v5562_v30 = vsel %vm1566_vm0, %v18679_v57, %v10570_v47 }
 0xf2c   : > { %v5882_v29 = vadd.f32 %v11657_v42, %v5779_v33  ;;  %v10268_v8 = vpop.f32.mrb[170].mxu0  ;;  %v18680_v33 = vld [vmem:[#allocation74_spill] sm:$0xff]  ;;  %v5560_v42 = vsel %vm1566_vm0, %v18681_v59, %v10565_v32  ;;  %v18684_v32 = vld [vmem:[#allocation80_spill] sm:$0xff] }
 0xf2d   : > { %v5782_v19 = vpop.f32.mrb[171].mxu0  ;;  %v5885_v58 = vadd.f32 %v11660_v46, %v10268_v8  ;;  %v15388_v51 = vadd.f32 %v15184_v41, %v5884_v25  ;;  %v5561_v21 = vsel %vm1566_vm0, %v18680_v33, %v10569_v16  ;;  %v5595_v25 = vsel %vm5567_vm1, %v5562_v30, %v10580_v27 }
 0xf2e   : > { %v15373_v43 = vadd.f32 %v15184_v41, %v5882_v29  ;;  %v5883_v7 = vadd.f32 %v11658_v50, %v5782_v19  ;;  %v18682_v29 = vld [vmem:[#allocation75_spill] sm:$0xff]  ;;  %v5594_v19 = vsel %vm5567_vm1, %v5561_v21, %v10579_v9  ;;  %v18685_v9 = vld [vmem:[#allocation78_spill] sm:$0xff] }
 0xf2f   : > { %18674 = vst [vmem:[#allocation43_spill] sm:$0xff] %v15388_v51  ;;  %v15391_v40 = vadd.f32 %v15184_v41, %v5885_v58  ;;  %v6053_v39 = vmul.f32 %v15388_v51, %v15388_v51  ;;  %v5559_v8 = vsel %vm1566_vm0, %v18682_v29, %v10564_v15 }
 0xf30   : > { %18672 = vst [vmem:[#allocation41_spill] sm:$0xff] %v15373_v43  ;;  %v15377_v61 = vadd.f32 %v15184_v41, %v5883_v7  ;;  %5963 = vadd.xlane.f32.xlu0 %v15373_v43  ;;  %v6051_v38 = vmul.f32 %v15373_v43, %v15373_v43 }
 0xf31   : > { %18675 = vst [vmem:[#allocation45_spill] sm:$0xff] %v15391_v40  ;;  %v6054_v13 = vmul.f32 %v15391_v40, %v15391_v40 }
 0xf32   : > { %18673 = vst [vmem:[#allocation42_spill] sm:$0xff] %v15377_v61  ;;  %5965 = vadd.xlane.f32.xlu1 %v15377_v61  ;;  %v6052_v36 = vmul.f32 %v15377_v61, %v15377_v61 }
 0xf34   : > { %6091 = vadd.xlane.f32.xlu0 %v6051_v38  ;;  %v5592_v38 = vsel %vm5567_vm1, %v5559_v8, %v10574_v14  ;;  %v18687_v14 = vld [vmem:[#allocation79_spill] sm:$0xff] }
 0xf36   : > { %6093 = vadd.xlane.f32.xlu1 %v6052_v36  ;;  %v5593_v36 = vsel %vm5567_vm1, %v5560_v42, %v10575_v24 }
 0xf37   : > { %v10271_v5 = vpop.f32.mrb[172].mxu0 }
 0xf38   : > { %v5795_v0 = vpop.f32.mrb[173].mxu0  ;;  %5967 = vadd.xlane.f32.xlu0 %v15388_v51  ;;  %v5888_v1 = vadd.f32 %v11663_v52, %v10271_v5 }
 0xf39   : > { %v10272_v28 = vpop.f32.mrb[174].mxu0  ;;  %v5886_v10 = vadd.f32 %v11661_v6, %v5795_v0 }
 0xf3a   : > { %v5798_v63 = vpop.f32.mrb[175].mxu0  ;;  %5969 = vadd.xlane.f32.xlu1 %v15391_v40  ;;  %v5889_v22 = vadd.f32 %v11664_v37, %v10272_v28  ;;  %v15416_v62 = vadd.f32 %v15184_v41, %v5888_v1 }
 0xf3b   : > { %v5887_v44 = vadd.f32 %v11662_v45, %v5798_v63  ;;  %v15402_v23 = vadd.f32 %v15184_v41, %v5886_v10 }
 0xf3c   : > { %6095 = vadd.xlane.f32.xlu0 %v6053_v39  ;;  %18678 = vst [vmem:[#allocation44_spill] sm:$0xff] %v15416_v62  ;;  %v15428_v56 = vadd.f32 %v15184_v41, %v5889_v22  ;;  %v6057_v5 = vmul.f32 %v15416_v62, %v15416_v62 }
 0xf3d   : > { %18676 = vst [vmem:[#allocation47_spill] sm:$0xff] %v15402_v23  ;;  %v15405_v11 = vadd.f32 %v15184_v41, %v5887_v44  ;;  %v6055_v12 = vmul.f32 %v15402_v23, %v15402_v23 }
 0xf3e   : > { %6097 = vadd.xlane.f32.xlu1 %v6054_v13  ;;  %18683 = vst [vmem:[#allocation49_spill] sm:$0xff] %v15428_v56  ;;  %v6058_v18 = vmul.f32 %v15428_v56, %v15428_v56 }
 0xf3f   : > { %18677 = vst [vmem:[#allocation46_spill] sm:$0xff] %v15405_v11  ;;  %v6056_v2 = vmul.f32 %v15405_v11, %v15405_v11 }
 0xf40   : > { %5971 = vadd.xlane.f32.xlu0 %v15402_v23 }
 0xf42   : > { %5973 = vadd.xlane.f32.xlu1 %v15405_v11 }
 0xf44   : > { %6099 = vadd.xlane.f32.xlu0 %v6055_v12 }
 0xf46   : > { %6101 = vadd.xlane.f32.xlu1 %v6056_v2  ;;  %v18686_v2 = vld [vmem:[#allocation81_spill] sm:$0xff] }
 0xf48   : > { %v10588_v53 = vpop.permute.xlu1 %10587  ;;  %5975 = vadd.xlane.f32.xlu0 %v15416_v62 }
 0xf49   : > { %v10590_v50 = vunpack.i.h.bf16 %v10588_v53  ;;  %v10589_v7 = vunpack.i.l.bf16 %v10588_v53  ;;  %v10583_v31 = vpop.permute.xlu0 %10582 }
 0xf4a   : > { %v10585_v46 = vunpack.i.h.bf16 %v10583_v31  ;;  %v10584_v58 = vunpack.i.l.bf16 %v10583_v31  ;;  %5977 = vadd.xlane.f32.xlu1 %v15428_v56 }
 0xf4b   : > { %v5627_v41 = vsel %vm5600_vm2, %v5594_v19, %v10589_v7  ;;  %v5628_v0 = vsel %vm5600_vm2, %v5595_v25, %v10590_v50 }
 0xf4c   : > { %v10598_v28 = vpop.permute.xlu1 %10597  ;;  %v5625_v63 = vsel %vm5600_vm2, %v5592_v38, %v10584_v58  ;;  %v5626_v6 = vsel %vm5600_vm2, %v5593_v36, %v10585_v46  ;;  %v5646_v10 = vpack.c.bf16 %v5628_v0, %v5627_v41  ;;  %6103 = vadd.xlane.f32.xlu0 %v6057_v5 }
 0xf4d   : > { %v10593_v39 = vpop.permute.xlu0 %10592  ;;  %v5645_v3 = vpack.c.bf16 %v5626_v6, %v5625_v63  ;;  %v10600_v45 = vunpack.i.h.bf16 %v10598_v28  ;;  %v10599_v44 = vunpack.i.l.bf16 %v10598_v28 }
 0xf4e   : > { %6105 = vadd.xlane.f32.xlu1 %v6058_v18  ;;  %v10595_v54 = vunpack.i.h.bf16 %v10593_v39  ;;  %v10594_v26 = vunpack.i.l.bf16 %v10593_v39 }
 0xf4f   : > { %10281 = vmatprep.mubr.bf16.mxu0 %v5645_v3  ;;  %v5566_v15 = vsel %vm1566_vm0, %v18684_v32, %v10600_v45  ;;  %v5565_v37 = vsel %vm1566_vm0, %v18685_v9, %v10599_v44 }
 0xf50   : > { %v10608_v13 = vpop.permute.xlu1 %10607  ;;  %10282 = vmatmul.mubr.bf16.gmra.mrb[184].mxu0 %v5646_v10  ;;  %v5564_v27 = vsel %vm1566_vm0, %v18686_v2, %v10595_v54  ;;  %v5563_v24 = vsel %vm1566_vm0, %v18687_v14, %v10594_v26 }
 0xf51   : > { %v10603_v52 = vpop.permute.xlu0 %10602  ;;  %v10610_v1 = vunpack.i.h.bf16 %v10608_v13  ;;  %v10609_v12 = vunpack.i.l.bf16 %v10608_v13 }
 0xf52   : > { %v10605_v47 = vunpack.i.h.bf16 %v10603_v52  ;;  %v10604_v16 = vunpack.i.l.bf16 %v10603_v52 }
 0xf53   : > { %v5598_v21 = vsel %vm5567_vm1, %v5565_v37, %v10609_v12  ;;  %v5599_v59 = vsel %vm5567_vm1, %v5566_v15, %v10610_v1 }
 0xf54   : > { %v10618_v22 = vpop.permute.xlu1 %10617  ;;  %v5596_v8 = vsel %vm5567_vm1, %v5563_v24, %v10604_v16  ;;  %v5597_v53 = vsel %vm5567_vm1, %v5564_v27, %v10605_v47 }
 0xf55   : > { %v10620_v57 = vunpack.i.h.bf16 %v10618_v22  ;;  %v10619_v30 = vunpack.i.l.bf16 %v10618_v22  ;;  %v10613_v33 = vpop.permute.xlu0 %10612 }
 0xf56   : > { %v10615_v42 = vunpack.i.h.bf16 %v10613_v33  ;;  %v10614_v29 = vunpack.i.l.bf16 %v10613_v33 }
 0xf57   : > { %v5631_v19 = vsel %vm5600_vm2, %v5598_v21, %v10619_v30  ;;  %v5632_v50 = vsel %vm5600_vm2, %v5599_v59, %v10620_v57 }
 0xf58   : > { %v5629_v7 = vsel %vm5600_vm2, %v5596_v8, %v10614_v29  ;;  %v5630_v31 = vsel %vm5600_vm2, %v5597_v53, %v10615_v42  ;;  %v5648_v25 = vpack.c.bf16 %v5632_v50, %v5631_v19  ;;  %v15468_v8 = vld [vmem:[%s17890_s7] ss:$0 sm:$0xff] }
 0xf59   : > { %v5647_v38 = vpack.c.bf16 %v5630_v31, %v5629_v7 }
 0xf5b   : > { %10285 = vmatprep.mubr.bf16.mxu0 %v5647_v38 }
 0xf5c   : > { %10286 = vmatmul.mubr.bf16.gmra.mrb[188].mxu0 %v5648_v25 }
 0xf5d   : > { %6894 = vmatprep.mubr.bf16.mxu0 %v18607_v35 }
 0xf8f   : > { %v5948_v46 = vpop.xlane.xlu0 %5947 }
 0xf90   : > { %v6011_v58 = vmul.f32 0.0078125, %v5948_v46 }
 0xf92   : > { %v6171_v41 = vmul.f32 %v6011_v58, %v6011_v58  ;;  %v6235_v27 = vsub.f32 %v15187_v17, %v6011_v58 }
 0xf93   : > { %v6076_v36 = vpop.xlane.xlu0 %6075  ;;  %v5950_v5 = vpop.xlane.xlu1 %5949 }
 0xf94   : > { %v6139_v0 = vmul.f32 0.0078125, %v6076_v36  ;;  %v6012_v28 = vmul.f32 0.0078125, %v5950_v5 }
 0xf96   : > { %v6203_v63 = vsub.f32 %v6139_v0, %v6171_v41  ;;  %v6172_v18 = vmul.f32 %v6012_v28, %v6012_v28  ;;  %v6236_v53 = vsub.f32 %v15193_v60, %v6012_v28  ;;  %v15475_v41 = vld [vmem:[%s17891_s8] ss:$0 sm:$0xff] }
 0xf97   : > { %v5954_v6 = vpop.xlane.xlu1 %5953  ;;  %v6078_v10 = vpop.xlane.xlu0 %6077 }
 0xf98   : > { %v6267_v39 = vadd.f32 1e-05, %v6203_v63  ;;  %v6014_v3 = vmul.f32 0.0078125, %v5954_v6  ;;  %v6140_v45 = vmul.f32 0.0078125, %v6078_v10 }
 0xf9a   : > { %11317 = vrsqrt.f32 %v6267_v39  ;;  %v6204_v44 = vsub.f32 %v6140_v45, %v6172_v18  ;;  %v6174_v26 = vmul.f32 %v6014_v3, %v6014_v3  ;;  %v6238_v0 = vsub.f32 %v15209_v55, %v6014_v3 }
 0xf9b   : > { %v6082_v13 = vpop.xlane.xlu1 %6081  ;;  %v5952_v54 = vpop.xlane.xlu0 %5951 }
 0xf9c   : > { %v6268_v52 = vadd.f32 1e-05, %v6204_v44  ;;  %v6142_v1 = vmul.f32 0.0078125, %v6082_v13  ;;  %v6013_v12 = vmul.f32 0.0078125, %v5952_v54 }
 0xf9e   : > { %11319 = vrsqrt.f32 %v6268_v52  ;;  %v6206_v47 = vsub.f32 %v6142_v1, %v6174_v26  ;;  %v6173_v9 = vmul.f32 %v6013_v12, %v6013_v12  ;;  %v6237_v1 = vsub.f32 %v15217_v4, %v6013_v12 }
 0xf9f   : > { %v6080_v16 = vpop.xlane.xlu0 %6079  ;;  %v5958_v32 = vpop.xlane.xlu1 %5957 }
 0xfa0   : > { %v6270_v15 = vadd.f32 1e-05, %v6206_v47  ;;  %v6141_v37 = vmul.f32 0.0078125, %v6080_v16  ;;  %v15460_v22 = vmul.f32 0.0078125, %v5958_v32 }
 0xfa2   : > { %11321 = vrsqrt.f32 %v6270_v15  ;;  %v6205_v2 = vsub.f32 %v6141_v37, %v6173_v9  ;;  %v6176_v33 = vmul.f32 %v15460_v22, %v15460_v22  ;;  %v6240_v12 = vsub.f32 %v15235_v20, %v15460_v22 }
 0xfa3   : > { %v5956_v14 = vpop.xlane.xlu0 %5955  ;;  %v6086_v24 = vpop.xlane.xlu1 %6085 }
 0xfa4   : > { %v11318_v57 = vpop.eup %11317  ;;  %v6269_v30 = vadd.f32 1e-05, %v6205_v2  ;;  %v6015_v21 = vmul.f32 0.0078125, %v5956_v14  ;;  %v6144_v59 = vmul.f32 0.0078125, %v6086_v24 }
 0xfa5   : > { %v6331_v42 = vmul.f32 %v11318_v57, %v6235_v27 }
 0xfa6   : > { %11323 = vrsqrt.f32 %v6269_v30  ;;  %v6208_v29 = vsub.f32 %v6144_v59, %v6176_v33  ;;  %v6175_v31 = vmul.f32 %v6015_v21, %v6015_v21 }
 0xfa7   : > { %v6084_v19 = vpop.xlane.xlu0 %6083  ;;  %v5962_v50 = vpop.xlane.xlu1 %5961  ;;  %v6369_v36 = vmul.f32 %v15468_v8, %v6331_v42  ;;  %v6239_v42 = vsub.f32 %v15230_v34, %v6015_v21 }
 0xfa8   : > { %v11320_v7 = vpop.eup %11319  ;;  %v6272_v25 = vadd.f32 1e-05, %v6208_v29  ;;  %v6143_v38 = vmul.f32 0.0078125, %v6084_v19  ;;  %v6018_v46 = vmul.f32 0.0078125, %v5962_v50 }
 0xfa9   : > { %v6332_v58 = vmul.f32 %v11320_v7, %v6236_v53  ;;  %v6407_v13 = vadd.f32 %v15475_v41, %v6369_v36 }
 0xfaa   : > { %11325 = vrsqrt.f32 %v6272_v25  ;;  %v6207_v5 = vsub.f32 %v6143_v38, %v6175_v31  ;;  %v6178_v18 = vmul.f32 %v6018_v46, %v6018_v46  ;;  %v6242_v22 = vsub.f32 %v15255_v48, %v6018_v46 }
 0xfab   : > { %v5960_v28 = vpop.xlane.xlu0 %5959  ;;  %v6090_v63 = vpop.xlane.xlu1 %6089  ;;  %v6370_v6 = vmul.f32 %v15468_v8, %v6332_v58 }
 0xfac   : > { %v11322_v10 = vpop.eup %11321  ;;  %v6271_v39 = vadd.f32 1e-05, %v6207_v5  ;;  %v6017_v45 = vmul.f32 0.0078125, %v5960_v28  ;;  %v6146_v44 = vmul.f32 0.0078125, %v6090_v63 }
 0xfad   : > { %v6408_v54 = vadd.f32 %v15475_v41, %v6370_v6  ;;  %v6334_v26 = vmul.f32 %v11322_v10, %v6238_v0 }
 0xfae   : > { %11327 = vrsqrt.f32 %v6271_v39  ;;  %v6210_v52 = vsub.f32 %v6146_v44, %v6178_v18  ;;  %v6177_v32 = vmul.f32 %v6017_v45, %v6017_v45  ;;  %v6241_v36 = vsub.f32 %v15304_v49, %v6017_v45 }
 0xfaf   : > { %v6088_v47 = vpop.xlane.xlu0 %6087  ;;  %v6439_v3 = vpack.c.bf16 %v6408_v54, %v6407_v13  ;;  %v6372_v2 = vmul.f32 %v15468_v8, %v6334_v26 }
 0xfb0   : > { %v11324_v16 = vpop.eup %11323  ;;  %v6274_v15 = vadd.f32 1e-05, %v6210_v52  ;;  %v6145_v9 = vmul.f32 0.0078125, %v6088_v47 }
 0xfb1   : > { %6702 = vmatmul.mubr.bf16.vlgmr.msra.gmra.mrb[192].mxu1 %v6439_v3  ;;  %6895 = vmatmul.mubr.bf16.vlgmr.msra.gmra.mrb[192].mxu0 %v6439_v3  ;;  %v6333_v37 = vmul.f32 %v11324_v16, %v6237_v1  ;;  %v6410_v33 = vadd.f32 %v15475_v41, %v6372_v2 }
 0xfb2   : > { %11329 = vrsqrt.f32 %v6274_v15  ;;  %v6209_v27 = vsub.f32 %v6145_v9, %v6177_v32  ;;  %6711 = vmatprep.mubr.bf16.mxu1 %v18607_v35  ;;  %6904 = vmatprep.mubr.bf16.mxu0 %v18607_v35 }
 0xfb3   : > { %v6371_v14 = vmul.f32 %v15468_v8, %v6333_v37 }
 0xfb4   : > { %v11326_v24 = vpop.eup %11325  ;;  %v6273_v57 = vadd.f32 1e-05, %v6209_v27 }
 0xfb5   : > { %v6409_v30 = vadd.f32 %v15475_v41, %v6371_v14  ;;  %v6336_v59 = vmul.f32 %v11326_v24, %v6240_v12 }
 0xfb6   : > { %11331 = vrsqrt.f32 %v6273_v57 }
 0xfb7   : > { %v6440_v29 = vpack.c.bf16 %v6410_v33, %v6409_v30  ;;  %v6374_v50 = vmul.f32 %v15468_v8, %v6336_v59 }
 0xfb8   : > { %v11328_v53 = vpop.eup %11327 }
 0xfb9   : > { %6712 = vmatmul.mubr.bf16.gmra.mrb[196].mxu1 %v6440_v29  ;;  %6905 = vmatmul.mubr.bf16.gmra.mrb[196].mxu0 %v6440_v29  ;;  %v6335_v19 = vmul.f32 %v11328_v53, %v6239_v42  ;;  %v6412_v21 = vadd.f32 %v15475_v41, %v6374_v50 }
 0xfba   : > { %6721 = vmatprep.mubr.bf16.mxu1 %v18607_v35  ;;  %6914 = vmatprep.mubr.bf16.mxu0 %v18607_v35 }
 0xfbb   : > { %v6373_v7 = vmul.f32 %v15468_v8, %v6335_v19 }
 0xfbc   : > { %v11330_v31 = vpop.eup %11329 }
 0xfbd   : > { %v6411_v25 = vadd.f32 %v15475_v41, %v6373_v7  ;;  %v6338_v38 = vmul.f32 %v11330_v31, %v6242_v22  ;;  %v5964_v58 = vpop.xlane.xlu0 %5963 }
 0xfbe   : > { %v6019_v5 = vmul.f32 0.0078125, %v5964_v58 }
 0xfbf   : > { %v6441_v0 = vpack.c.bf16 %v6412_v21, %v6411_v25  ;;  %v5966_v63 = vpop.xlane.xlu1 %5965  ;;  %v6376_v6 = vmul.f32 %v15468_v8, %v6338_v38 }
 0xfc0   : > { %v11332_v28 = vpop.eup %11331  ;;  %v6020_v10 = vmul.f32 0.0078125, %v5966_v63  ;;  %v6179_v18 = vmul.f32 %v6019_v5, %v6019_v5  ;;  %v6243_v7 = vsub.f32 %v15373_v43, %v6019_v5 }
 0xfc1   : > { %6722 = vmatmul.mubr.bf16.gmra.mrb[200].mxu1 %v6441_v0  ;;  %6915 = vmatmul.mubr.bf16.gmra.mrb[200].mxu0 %v6441_v0  ;;  %v6337_v46 = vmul.f32 %v11332_v28, %v6241_v36  ;;  %v6092_v39 = vpop.xlane.xlu0 %6091  ;;  %v6414_v54 = vadd.f32 %v15475_v41, %v6376_v6 }
 0xfc2   : > { %6731 = vmatprep.mubr.bf16.mxu1 %v18607_v35  ;;  %6924 = vmatprep.mubr.bf16.mxu0 %v18607_v35  ;;  %v6147_v44 = vmul.f32 0.0078125, %v6092_v39  ;;  %v6180_v26 = vmul.f32 %v6020_v10, %v6020_v10  ;;  %v6244_v36 = vsub.f32 %v15377_v61, %v6020_v10 }
 0xfc3   : > { %v6375_v13 = vmul.f32 %v15468_v8, %v6337_v46  ;;  %v6094_v45 = vpop.xlane.xlu1 %6093 }
 0xfc4   : > { %v6211_v52 = vsub.f32 %v6147_v44, %v6179_v18  ;;  %v6148_v1 = vmul.f32 0.0078125, %v6094_v45 }
 0xfc5   : > { %v6413_v47 = vadd.f32 %v15475_v41, %v6375_v13  ;;  %v5968_v3 = vpop.xlane.xlu0 %5967 }
 0xfc6   : > { %v6275_v16 = vadd.f32 1e-05, %v6211_v52  ;;  %v6212_v32 = vsub.f32 %v6148_v1, %v6180_v26  ;;  %v6021_v15 = vmul.f32 0.0078125, %v5968_v3 }
 0xfc7   : > { %v6442_v9 = vpack.c.bf16 %v6414_v54, %v6413_v47  ;;  %v5970_v37 = vpop.xlane.xlu1 %5969 }
 0xfc8   : > { %11333 = vrsqrt.f32 %v6275_v16  ;;  %v6276_v2 = vadd.f32 1e-05, %v6212_v32  ;;  %v6022_v27 = vmul.f32 0.0078125, %v5970_v37  ;;  %v6181_v14 = vmul.f32 %v6021_v15, %v6021_v15 }
 0xfc9   : > { %6732 = vmatmul.mubr.bf16.gmra.mrb[204].mxu1 %v6442_v9  ;;  %6925 = vmatmul.mubr.bf16.gmra.mrb[204].mxu0 %v6442_v9  ;;  %v6096_v12 = vpop.xlane.xlu0 %6095  ;;  %v6245_v1 = vsub.f32 %v15388_v51, %v6021_v15 }
 0xfca   : > { %6741 = vmatprep.mubr.bf16.mxu1 %v18607_v35  ;;  %6934 = vmatprep.mubr.bf16.mxu0 %v18607_v35  ;;  %11335 = vrsqrt.f32 %v6276_v2  ;;  %v6149_v24 = vmul.f32 0.0078125, %v6096_v12  ;;  %v6182_v30 = vmul.f32 %v6022_v27, %v6022_v27  ;;  %v6246_v12 = vsub.f32 %v15391_v40, %v6022_v27 }
 0xfcb   : > { %v6098_v57 = vpop.xlane.xlu1 %6097 }
 0xfcc   : > { %v6213_v33 = vsub.f32 %v6149_v24, %v6181_v14  ;;  %v6150_v59 = vmul.f32 0.0078125, %v6098_v57 }
 0xfcd   : > { %v5972_v42 = vpop.xlane.xlu0 %5971 }
 0xfce   : > { %v6277_v29 = vadd.f32 1e-05, %v6213_v33  ;;  %v6214_v53 = vsub.f32 %v6150_v59, %v6182_v30  ;;  %v15507_v19 = vmul.f32 0.0078125, %v5972_v42 }
 0xfcf   : > { %v5974_v50 = vpop.xlane.xlu1 %5973 }
 0xfd0   : > { %11337 = vrsqrt.f32 %v6277_v29  ;;  %v6278_v22 = vadd.f32 1e-05, %v6214_v53  ;;  %v15510_v31 = vmul.f32 0.0078125, %v5974_v50  ;;  %v6183_v38 = vmul.f32 %v15507_v19, %v15507_v19 }
 0xfd1   : > { %v6100_v25 = vpop.xlane.xlu0 %6099 }
 0xfd2   : > { %v11334_v21 = vpop.eup %11333  ;;  %11339 = vrsqrt.f32 %v6278_v22  ;;  %v6151_v58 = vmul.f32 0.0078125, %v6100_v25  ;;  %v6184_v6 = vmul.f32 %v15510_v31, %v15510_v31 }
 0xfd3   : > { %v6102_v0 = vpop.xlane.xlu1 %6101  ;;  %v6339_v28 = vmul.f32 %v11334_v21, %v6243_v7  ;;  %v6247_v7 = vsub.f32 %v15402_v23, %v15507_v19 }
 0xfd4   : > { %v11336_v63 = vpop.eup %11335  ;;  %v6215_v46 = vsub.f32 %v6151_v58, %v6183_v38  ;;  %v6152_v39 = vmul.f32 0.0078125, %v6102_v0 }
 0xfd5   : > { %v5976_v5 = vpop.xlane.xlu0 %5975  ;;  %v6340_v18 = vmul.f32 %v11336_v63, %v6244_v36  ;;  %v6377_v44 = vmul.f32 %v15468_v8, %v6339_v28  ;;  %v6248_v36 = vsub.f32 %v15405_v11, %v15510_v31  ;;  %v11667_v31 = vld [vmem:[%s11784_s14 + $0x88] sm:$0xff] }
 0xfd6   : > { %v6279_v13 = vadd.f32 1e-05, %v6215_v46  ;;  %v6216_v45 = vsub.f32 %v6152_v39, %v6184_v6  ;;  %v15518_v54 = vmul.f32 0.0078125, %v5976_v5  ;;  %v11665_v46 = vld [vmem:[%s11784_s14 + $0x80] sm:$0xff] }
 0xfd7   : > { %v5978_v26 = vpop.xlane.xlu1 %5977  ;;  %v6378_v52 = vmul.f32 %v15468_v8, %v6340_v18  ;;  %v6415_v16 = vadd.f32 %v15475_v41, %v6377_v44  ;;  %v15545_v44 = vld [vmem:[%s17889_s6] ss:$0 sm:$0xff] }
 0xfd8   : > { %11341 = vrsqrt.f32 %v6279_v13  ;;  %v6280_v10 = vadd.f32 1e-05, %v6216_v45  ;;  %v15522_v47 = vmul.f32 0.0078125, %v5978_v26  ;;  %v6185_v37 = vmul.f32 %v15518_v54, %v15518_v54 }
 0xfd9   : > { %v6104_v3 = vpop.xlane.xlu0 %6103  ;;  %v6416_v32 = vadd.f32 %v15475_v41, %v6378_v52 }
 0xfda   : > { %v11338_v9 = vpop.eup %11337  ;;  %11343 = vrsqrt.f32 %v6280_v10  ;;  %v6153_v2 = vmul.f32 0.0078125, %v6104_v3  ;;  %v6186_v15 = vmul.f32 %v15522_v47, %v15522_v47 }
 0xfdb   : > { %v6106_v14 = vpop.xlane.xlu1 %6105  ;;  %v6443_v24 = vpack.c.bf16 %v6416_v32, %v6415_v16  ;;  %v6341_v57 = vmul.f32 %v11338_v9, %v6245_v1  ;;  %v6249_v1 = vsub.f32 %v15416_v62, %v15518_v54  ;;  %v11668_v9 = vld [vmem:[%s11784_s14 + $0x90] sm:$0xff] }
 0xfdc   : > { %v11340_v30 = vpop.eup %11339  ;;  %v6217_v33 = vsub.f32 %v6153_v2, %v6185_v37  ;;  %v6154_v59 = vmul.f32 0.0078125, %v6106_v14 }
 0xfdd   : > { %6742 = vmatmul.mubr.bf16.gmra.mrb[208].mxu1 %v6443_v24  ;;  %6935 = vmatmul.mubr.bf16.gmra.mrb[208].mxu0 %v6443_v24  ;;  %v6342_v42 = vmul.f32 %v11340_v30, %v6246_v12  ;;  %v6379_v29 = vmul.f32 %v15468_v8, %v6341_v57  ;;  %v6250_v12 = vsub.f32 %v15428_v56, %v15522_v47  ;;  %v11669_v30 = vld [vmem:[%s11784_s14 + $0x98] sm:$0xff] }
 0xfde   : > { %v6281_v53 = vadd.f32 1e-05, %v6217_v33  ;;  %v6218_v50 = vsub.f32 %v6154_v59, %v6186_v15  ;;  %6751 = vmatprep.mubr.bf16.mxu1 %v18607_v35  ;;  %6944 = vmatprep.mubr.bf16.mxu0 %v18607_v35 }
 0xfdf   : > { %v6380_v27 = vmul.f32 %v15468_v8, %v6342_v42  ;;  %v6417_v25 = vadd.f32 %v15475_v41, %v6379_v29 }
 0xfe0   : > { %11345 = vrsqrt.f32 %v6281_v53  ;;  %v6282_v22 = vadd.f32 1e-05, %v6218_v50 }
 0xfe1   : > { %v6418_v21 = vadd.f32 %v15475_v41, %v6380_v27 }
 0xfe2   : > { %v11342_v38 = vpop.eup %11341  ;;  %11347 = vrsqrt.f32 %v6282_v22 }
 0xfe3   : > { %v10275_v58 = vpop.f32.mrb[176].mxu0  ;;  %v6444_v28 = vpack.c.bf16 %v6418_v21, %v6417_v25  ;;  %v6343_v63 = vmul.f32 %v11342_v38, %v6247_v7  ;;  %v11670_v21 = vld [vmem:[%s11784_s14 + $0xa0] sm:$0xff] }
 0xfe4   : > { %v5811_v0 = vpop.f32.mrb[177].mxu0  ;;  %v11344_v6 = vpop.eup %11343  ;;  %v5892_v37 = vadd.f32 %v11668_v9, %v10275_v58 }
 0xfe5   : > { %v5890_v39 = vadd.f32 %v11665_v46, %v5811_v0  ;;  %v10276_v5 = vpop.f32.mrb[178].mxu0  ;;  %6752 = vmatmul.mubr.bf16.gmra.mrb[212].mxu1 %v6444_v28  ;;  %6945 = vmatmul.mubr.bf16.gmra.mrb[212].mxu0 %v6444_v28  ;;  %v6344_v18 = vmul.f32 %v11344_v6, %v6248_v36  ;;  %v6381_v26 = vmul.f32 %v15468_v8, %v6343_v63  ;;  %v11671_v36 = vld [vmem:[%s11784_s14 + $0xa8] sm:$0xff]  ;;  %v11672_v6 = vld [vmem:[%s11784_s14 + $0xb0] sm:$0xff] }
 0xfe6   : > { %v5814_v19 = vpop.f32.mrb[179].mxu0  ;;  %6761 = vmatprep.mubr.bf16.mxu1 %v18607_v35  ;;  %6954 = vmatprep.mubr.bf16.mxu0 %v18607_v35  ;;  %v5893_v54 = vadd.f32 %v11669_v30, %v10276_v5  ;;  %v15574_v42 = vadd.f32 %v15545_v44, %v5892_v37  ;;  %v11673_v5 = vld [vmem:[%s11784_s14 + $0xb8] sm:$0xff] }
 0xfe7   : > { %v15548_v13 = vadd.f32 %v15545_v44, %v5890_v39  ;;  %v5891_v45 = vadd.f32 %v11667_v31, %v5814_v19  ;;  %v6382_v52 = vmul.f32 %v15468_v8, %v6344_v18  ;;  %v6419_v3 = vadd.f32 %v15475_v41, %v6381_v26 }
 0xfe8   : > { %18690 = vst [vmem:[#allocation83_spill] sm:$0xff] %v15574_v42  ;;  %v15580_v50 = vadd.f32 %v15545_v44, %v5893_v54  ;;  %v6061_v58 = vmul.f32 %v15574_v42, %v15574_v42 }
 0xfe9   : > { %18688 = vst [vmem:[#allocation48_spill] sm:$0xff] %v15548_v13  ;;  %v15556_v10 = vadd.f32 %v15545_v44, %v5891_v45  ;;  %5979 = vadd.xlane.f32.xlu0 %v15548_v13  ;;  %v6420_v16 = vadd.f32 %v15475_v41, %v6382_v52  ;;  %v6059_v2 = vmul.f32 %v15548_v13, %v15548_v13 }
 0xfea   : > { %v11346_v32 = vpop.eup %11345  ;;  %18691 = vst [vmem:[#allocation86_spill] sm:$0xff] %v15580_v50  ;;  %v6062_v28 = vmul.f32 %v15580_v50, %v15580_v50 }
 0xfeb   : > { %18689 = vst [vmem:[#allocation88_spill] sm:$0xff] %v15556_v10  ;;  %5981 = vadd.xlane.f32.xlu1 %v15556_v10  ;;  %v6445_v14 = vpack.c.bf16 %v6420_v16, %v6419_v3  ;;  %v6345_v24 = vmul.f32 %v11346_v32, %v6249_v1  ;;  %v6060_v15 = vmul.f32 %v15556_v10, %v15556_v10  ;;  %v11674_v16 = vld [vmem:[%s11784_s14 + $0xc0] sm:$0xff] }
 0xfec   : > { %v11348_v57 = vpop.eup %11347 }
 0xfed   : > { %6107 = vadd.xlane.f32.xlu0 %v6059_v2  ;;  %6762 = vmatmul.mubr.bf16.gmra.mrb[216].mxu1 %v6445_v14  ;;  %v6346_v33 = vmul.f32 %v11348_v57, %v6250_v12  ;;  %v6383_v59 = vmul.f32 %v15468_v8, %v6345_v24  ;;  %v11675_v12 = vld [vmem:[%s11784_s14 + $0xc8] sm:$0xff]  ;;  %v11676_v57 = vld [vmem:[%s11784_s14 + $0xd0] sm:$0xff] }
 0xfee   : > { %6955 = vmatmul.mubr.bf16.gmra.mrb[216].mxu0 %v6445_v14  ;;  %6771 = vmatprep.mubr.bf16.mxu1 %v18607_v35 }
 0xfef   : > { %6109 = vadd.xlane.f32.xlu1 %v6060_v15  ;;  %v10279_v47 = vpop.f32.mrb[180].mxu0  ;;  %6964 = vmatprep.mubr.bf16.mxu0 %v18607_v35  ;;  %v6384_v53 = vmul.f32 %v15468_v8, %v6346_v33  ;;  %v6421_v7 = vadd.f32 %v15475_v41, %v6383_v59  ;;  %v11677_v15 = vld [vmem:[%s11784_s14 + $0xd8] sm:$0xff] }
 0xff0   : > { %v5827_v29 = vpop.f32.mrb[181].mxu0  ;;  %v5896_v46 = vadd.f32 %v11672_v6, %v10279_v47  ;;  %v11680_v6 = vld [vmem:[%s11784_s14 + $0xf0] sm:$0xff] }
 0xff1   : > { %5983 = vadd.xlane.f32.xlu0 %v15574_v42  ;;  %v10280_v27 = vpop.f32.mrb[182].mxu0  ;;  %v6422_v25 = vadd.f32 %v15475_v41, %v6384_v53  ;;  %v5894_v38 = vadd.f32 %v11670_v21, %v5827_v29 }
 0xff2   : > { %v5830_v22 = vpop.f32.mrb[183].mxu0  ;;  %v5897_v19 = vadd.f32 %v11673_v5, %v10280_v27  ;;  %v15609_v31 = vadd.f32 %v15545_v44, %v5896_v46  ;;  %v11681_v5 = vld [vmem:[%s11784_s14 + $0xf8] sm:$0xff] }
 0xff3   : > { %5985 = vadd.xlane.f32.xlu1 %v15580_v50  ;;  %v6446_v8 = vpack.c.bf16 %v6422_v25, %v6421_v7  ;;  %v5895_v0 = vadd.f32 %v11671_v36, %v5830_v22  ;;  %v15593_v41 = vadd.f32 %v15545_v44, %v5894_v38  ;;  %v11678_v25 = vld [vmem:[%s11784_s14 + $0xe0] sm:$0xff] }
 0xff4   : > { %18694 = vst [vmem:[#allocation84_spill] sm:$0xff] %v15609_v31  ;;  %v15612_v45 = vadd.f32 %v15545_v44, %v5897_v19  ;;  %v6065_v26 = vmul.f32 %v15609_v31, %v15609_v31 }
 0xff5   : > { %6111 = vadd.xlane.f32.xlu0 %v6061_v58  ;;  %6772 = vmatmul.mubr.bf16.gmra.mrb[220].mxu1 %v6446_v8  ;;  %18692 = vst [vmem:[#allocation82_spill] sm:$0xff] %v15593_v41  ;;  %v15598_v63 = vadd.f32 %v15545_v44, %v5895_v0  ;;  %v6063_v39 = vmul.f32 %v15593_v41, %v15593_v41  ;;  %v11679_v58 = vld [vmem:[%s11784_s14 + $0xe8] sm:$0xff] }
 0xff6   : > { %6965 = vmatmul.mubr.bf16.gmra.mrb[220].mxu0 %v6446_v8  ;;  %6781 = vmatprep.mubr.bf16.mxu1 %v18607_v35  ;;  %18695 = vst [vmem:[#allocation91_spill] sm:$0xff] %v15612_v45  ;;  %v6066_v52 = vmul.f32 %v15612_v45, %v15612_v45 }
 0xff7   : > { %6113 = vadd.xlane.f32.xlu1 %v6062_v28  ;;  %6974 = vmatprep.mubr.bf16.mxu0 %v18607_v35  ;;  %18693 = vst [vmem:[#allocation90_spill] sm:$0xff] %v15598_v63  ;;  %v6064_v18 = vmul.f32 %v15598_v63, %v15598_v63 }
 0xff9   : > { %5987 = vadd.xlane.f32.xlu0 %v15593_v41 }
 0xffb   : > { %5989 = vadd.xlane.f32.xlu1 %v15598_v63 }
 0xffd   : > { %6115 = vadd.xlane.f32.xlu0 %v6063_v39 }
 0xfff   : > { %6117 = vadd.xlane.f32.xlu1 %v6064_v18 }
0x1001   : > { %5991 = vadd.xlane.f32.xlu0 %v15609_v31 }
0x1003   : > { %5993 = vadd.xlane.f32.xlu1 %v15612_v45 }
0x1005   : > { %6119 = vadd.xlane.f32.xlu0 %v6065_v26 }
0x1007   : > { %6121 = vadd.xlane.f32.xlu1 %v6066_v52 }
0x1023   : > { %v10283_v1 = vpop.f32.mrb[184].mxu0 }
0x1024   : > { %v5843_v3 = vpop.f32.mrb[185].mxu0  ;;  %v5900_v30 = vadd.f32 %v11676_v57, %v10283_v1 }
0x1025   : > { %v5898_v32 = vadd.f32 %v11674_v16, %v5843_v3  ;;  %v10284_v9 = vpop.f32.mrb[186].mxu0  ;;  %v6489_v16 = vlaneseq }
0x1026   : > { %v5846_v37 = vpop.f32.mrb[187].mxu0  ;;  %v5901_v33 = vadd.f32 %v11677_v15, %v10284_v9  ;;  %v15637_v47 = vadd.f32 %v15545_v44, %v5900_v30 }
0x1027   : > { %v15622_v2 = vadd.f32 %v15545_v44, %v5898_v32  ;;  %v5899_v14 = vadd.f32 %v11675_v12, %v5846_v37  ;;  %v6490_v37 = vshrl.u32 %v6489_v16, 7 }
0x1028   : > { %18698 = vst [vmem:[#allocation4_spill] sm:$0xff] %v15637_v47  ;;  %v15640_v27 = vadd.f32 %v15545_v44, %v5901_v33  ;;  %v6069_v38 = vmul.f32 %v15637_v47, %v15637_v47  ;;  %v6487_v33 = vld [vmem:[%s17893_s10] sm:$0xf] }
0x1029   : > { %18696 = vst [vmem:[#allocation89_spill] sm:$0xff] %v15622_v2  ;;  %v15626_v24 = vadd.f32 %v15545_v44, %v5899_v14  ;;  %5995 = vadd.xlane.f32.xlu0 %v15622_v2  ;;  %v6067_v54 = vmul.f32 %v15622_v2, %v15622_v2 }
0x102a   : > { %18699 = vst [vmem:[#allocation15_spill] sm:$0xff] %v15640_v27  ;;  %v6070_v36 = vmul.f32 %v15640_v27, %v15640_v27 }
0x102b   : > { %18697 = vst [vmem:[#allocation11_spill] sm:$0xff] %v15626_v24  ;;  %5997 = vadd.xlane.f32.xlu1 %v15626_v24  ;;  %v6068_v59 = vmul.f32 %v15626_v24, %v15626_v24 }
0x102d   : > { %6123 = vadd.xlane.f32.xlu0 %v6067_v54  ;;  %v6491_v54 = vsub.s32 0, %v6490_v37 }
0x102f   : > { %6125 = vadd.xlane.f32.xlu1 %v6068_v59  ;;  %v10287_v29 = vpop.f32.mrb[188].mxu0  ;;  %v6499_v59 = vsub.s32 2, %v6490_v37 }
0x1030   : > { %v5859_v53 = vpop.f32.mrb[189].mxu0  ;;  %v5904_v46 = vadd.f32 %v11680_v6, %v10287_v29  ;;  %v6495_v29 = vsub.s32 1, %v6490_v37 }
0x1031   : > { %5999 = vadd.xlane.f32.xlu0 %v15637_v47  ;;  %v10288_v22 = vpop.f32.mrb[190].mxu0  ;;  %v5902_v21 = vadd.f32 %v11678_v25, %v5859_v53  ;;  %v15693_v6 = vrot.slane %v6487_v33, %v6499_v59 }
0x1032   : > { %v5862_v7 = vpop.f32.mrb[191].mxu0  ;;  %v5905_v19 = vadd.f32 %v11681_v5, %v10288_v22  ;;  %v15665_v26 = vadd.f32 %v15545_v44, %v5904_v46  ;;  %v15695_v46 = vrot.slane %v6487_v33, %v6495_v29 }
0x1033   : > { %6001 = vadd.xlane.f32.xlu1 %v15640_v27  ;;  %v5903_v8 = vadd.f32 %v11679_v58, %v5862_v7  ;;  %v15651_v0 = vadd.f32 %v15545_v44, %v5902_v21  ;;  %v15689_v58 = vrot.slane %v6487_v33, %v6491_v54  ;;  %18706 = vst [vmem:[#allocation21_spill] sm:$0xff] %v15693_v6 }
0x1034   : > { %18702 = vst [vmem:[#allocation94_spill] sm:$0xff] %v15665_v26  ;;  %v15668_v52 = vadd.f32 %v15545_v44, %v5905_v19  ;;  %v6073_v1 = vmul.f32 %v15665_v26, %v15665_v26  ;;  %18707 = vst [vmem:[#allocation17_spill] sm:$0xff] %v15695_v46 }
0x1035   : > { %6127 = vadd.xlane.f32.xlu0 %v6069_v38  ;;  %18700 = vst [vmem:[#allocation93_spill] sm:$0xff] %v15651_v0  ;;  %v15654_v28 = vadd.f32 %v15545_v44, %v5903_v8  ;;  %v6071_v39 = vmul.f32 %v15651_v0, %v15651_v0  ;;  %18704 = vst [vmem:[#allocation2_spill] sm:$0xff] %v15689_v58 }
0x1036   : > { %18703 = vst [vmem:[#allocation92_spill] sm:$0xff] %v15668_v52  ;;  %v6074_v3 = vmul.f32 %v15668_v52, %v15668_v52 }
0x1037   : > { %6129 = vadd.xlane.f32.xlu1 %v6070_v36  ;;  %18701 = vst [vmem:[#allocation87_spill] sm:$0xff] %v15654_v28  ;;  %v6072_v18 = vmul.f32 %v15654_v28, %v15654_v28 }
0x1039   : > { %6003 = vadd.xlane.f32.xlu0 %v15651_v0 }
0x103b   : > { %6005 = vadd.xlane.f32.xlu1 %v15654_v28 }
0x103d   : > { %6131 = vadd.xlane.f32.xlu0 %v6071_v39  ;;  %v6503_v39 = vsub.s32 3, %v6490_v37 }
0x103f   : > { %6133 = vadd.xlane.f32.xlu1 %v6072_v18  ;;  %v15706_v59 = vrot.slane %v6487_v33, %v6503_v39 }
0x1041   : > { %6007 = vadd.xlane.f32.xlu0 %v15665_v26 }
0x1043   : > { %6009 = vadd.xlane.f32.xlu1 %v15668_v52 }
0x1045   : > { %6135 = vadd.xlane.f32.xlu0 %v6073_v1 }
0x1047   : > { %6137 = vadd.xlane.f32.xlu1 %v6074_v3 }
0x1076   : > { %v5980_v32 = vpop.xlane.xlu0 %5979 }
0x1077   : > { %v15676_v14 = vmul.f32 0.0078125, %v5980_v32 }
0x1078   : > { %v5982_v9 = vpop.xlane.xlu1 %5981 }
0x1079   : > { %v15678_v57 = vmul.f32 0.0078125, %v5982_v9  ;;  %v6187_v53 = vmul.f32 %v15676_v14, %v15676_v14 }
0x107a   : > { %v6108_v12 = vpop.xlane.xlu0 %6107 }
0x107b   : > { %v6155_v30 = vmul.f32 0.0078125, %v6108_v12  ;;  %v6188_v21 = vmul.f32 %v15678_v57, %v15678_v57 }
0x107c   : > { %v6110_v44 = vpop.xlane.xlu1 %6109 }
0x107d   : > { %v6156_v22 = vmul.f32 0.0078125, %v6110_v44  ;;  %v6219_v38 = vsub.f32 %v6155_v30, %v6187_v53 }
0x107e   : > { %v5984_v15 = vpop.xlane.xlu0 %5983 }
0x107f   : > { %v15685_v7 = vmul.f32 0.0078125, %v5984_v15  ;;  %v6220_v5 = vsub.f32 %v6156_v22, %v6188_v21  ;;  %v6283_v16 = vadd.f32 1e-05, %v6219_v38 }
0x1080   : > { %v5986_v25 = vpop.xlane.xlu1 %5985 }
0x1081   : > { %v15691_v8 = vmul.f32 0.0078125, %v5986_v25  ;;  %v6189_v19 = vmul.f32 %v15685_v7, %v15685_v7  ;;  %v6284_v22 = vadd.f32 1e-05, %v6220_v5  ;;  %11349 = vrsqrt.f32 %v6283_v16 }
0x1082   : > { %v6112_v36 = vpop.xlane.xlu0 %6111 }
0x1083   : > { %18705 = vst [vmem:[#allocation13_spill] sm:$0xff] %v15691_v8  ;;  %v6157_v18 = vmul.f32 0.0078125, %v6112_v36  ;;  %v6190_v54 = vmul.f32 %v15691_v8, %v15691_v8  ;;  %11351 = vrsqrt.f32 %v6284_v22 }
0x1084   : > { %v6703_v1 = vpop.f32.mrb[192].mxu1  ;;  %v6114_v3 = vpop.xlane.xlu1 %6113 }
0x1085   : > { %v6221_v32 = vsub.f32 %v6157_v18, %v6189_v19  ;;  %v6704_v9 = vadd.f32 %v6703_v1, %v15689_v58  ;;  %v6158_v12 = vmul.f32 0.0078125, %v6114_v3  ;;  %v6896_v44 = vpop.f32.mrb[192].mxu0  ;;  %v6705_v30 = vpop.f32.mrb[193].mxu1 }
0x1086   : > { %v6897_v15 = vadd.f32 %v6896_v44, %v15693_v6  ;;  %v15704_v37 = vadd.f32 %v6705_v30, %v15695_v46  ;;  %v6898_v29 = vpop.f32.mrb[193].mxu0  ;;  %v6707_v53 = vpop.f32.mrb[194].mxu1 }
0x1087   : > { %v7183_v25 = vmul.f32 0.044715, %v6704_v9  ;;  %v6900_v21 = vpop.f32.mrb[194].mxu0  ;;  %v6222_v19 = vsub.f32 %v6158_v12, %v6190_v54  ;;  %v6709_v1 = vpop.f32.mrb[195].mxu1  ;;  %v6285_v3 = vadd.f32 1e-05, %v6221_v32  ;;  %v6708_v33 = vadd.f32 %v6707_v53, %v15689_v58 }
0x1088   : > { %18708 = vst [vmem:[#allocation96_spill] sm:$0xff] %v15704_v37  ;;  %v7185_v18 = vmul.f32 0.044715, %v6897_v15  ;;  %v5988_v39 = vpop.xlane.xlu0 %5987  ;;  %v6902_v30 = vpop.f32.mrb[195].mxu0  ;;  %v7184_v62 = vmul.f32 0.044715, %v15704_v37  ;;  %v15717_v38 = vadd.f32 %v6898_v29, %v15706_v59  ;;  %v15726_v29 = vadd.f32 %v6900_v21, %v15693_v6 }
0x1089   : > { %v7311_v44 = vmul.f32 %v7183_v25, %v6704_v9  ;;  %v7187_v32 = vmul.f32 0.044715, %v6708_v33  ;;  %v15721_v54 = vmul.f32 0.5, %v6704_v9  ;;  %v6286_v53 = vadd.f32 1e-05, %v6222_v19  ;;  %v5990_v11 = vpop.xlane.xlu1 %5989 }
0x108a   : > { %v7313_v56 = vmul.f32 %v7185_v18, %v6897_v15  ;;  %18709 = vst [vmem:[#allocation85_spill] sm:$0xff] %v15717_v38  ;;  %v15723_v25 = vmul.f32 0.5, %v6897_v15  ;;  %11353 = vrsqrt.f32 %v6285_v3  ;;  %v7186_v12 = vmul.f32 0.044715, %v15717_v38 }
0x108b   : > { %v7439_v16 = vmul.f32 %v7311_v44, %v6704_v9  ;;  %v7315_v23 = vmul.f32 %v7187_v32, %v6708_v33  ;;  %v7312_v44 = vmul.f32 %v7184_v62, %v15704_v37  ;;  %v15730_v61 = vmul.f32 0.0078125, %v5988_v39 }
0x108c   : > { %v7441_v36 = vmul.f32 %v7313_v56, %v6897_v15  ;;  %v6713_v5 = vpop.f32.mrb[196].mxu1  ;;  %v6906_v22 = vpop.f32.mrb[196].mxu0  ;;  %v7189_v3 = vmul.f32 0.044715, %v15726_v29  ;;  %11355 = vrsqrt.f32 %v6286_v53  ;;  %v15741_v62 = vadd.f32 %v6902_v30, %v15706_v59 }
0x108d   : > { %v7567_v18 = vadd.f32 %v7439_v16, %v6704_v9  ;;  %v6715_v40 = vpop.f32.mrb[197].mxu1  ;;  %18710 = vst [vmem:[#allocation97_spill] sm:$0xff] %v15730_v61  ;;  %v6908_v19 = vpop.f32.mrb[197].mxu0  ;;  %v7443_v48 = vmul.f32 %v7315_v23, %v6708_v33  ;;  %v15734_v9 = vadd.f32 %v6709_v1, %v15695_v46  ;;  %v6714_v23 = vadd.f32 %v6713_v5, %v15689_v58 }
0x108e   : > { %v7569_v51 = vadd.f32 %v7441_v36, %v6897_v15  ;;  %v6717_v43 = vpop.f32.mrb[198].mxu1  ;;  %v6116_v21 = vpop.xlane.xlu0 %6115  ;;  %v15738_v36 = vmul.f32 0.5, %v6708_v33  ;;  %18712 = vst [vmem:[#allocation8_spill] sm:$0xff] %v15741_v62  ;;  %v7317_v32 = vmul.f32 %v7189_v3, %v15726_v29  ;;  %v15750_v49 = vmul.f32 %v7312_v44, %v15704_v37 }
0x108f   : > { %v7695_v56 = vmul.f32 0.7978846, %v7567_v18  ;;  %18711 = vst [vmem:[#allocation95_spill] sm:$0xff] %v15734_v9  ;;  %v15736_v16 = vpop.f32.mrb[198].mxu0  ;;  %v7571_v39 = vadd.f32 %v7443_v48, %v6708_v33  ;;  %v15745_v18 = vpop.f32.mrb[199].mxu1  ;;  %v15754_v53 = vmul.f32 0.0078125, %v5990_v11  ;;  %v7314_v48 = vmul.f32 %v7186_v12, %v15717_v38 }
0x1090   : > { %v7697_v15 = vmul.f32 0.7978846, %v7569_v51  ;;  %v15747_v1 = vpop.f32.mrb[199].mxu0  ;;  %18713 = vst [vmem:[#allocation19_spill] sm:$0xff] %v15750_v49  ;;  %v6191_v51 = vmul.f32 %v15730_v61, %v15730_v61  ;;  %v6159_v30 = vmul.f32 0.0078125, %v6116_v21  ;;  %v6118_v20 = vpop.xlane.xlu1 %6117  ;;  %v7445_v5 = vmul.f32 %v7317_v32, %v15726_v29 }
0x1091   : > { %11357 = vtanh.f32 %v7695_v56  ;;  %18714 = vst [vmem:[#allocation23_spill] sm:$0xff] %v15754_v53  ;;  %v15756_v56 = vpop.eup %11349  ;;  %v7699_v33 = vmul.f32 0.7978846, %v7571_v39  ;;  %v7188_v3 = vmul.f32 0.044715, %v15734_v9  ;;  %v6160_v39 = vmul.f32 0.0078125, %v6118_v20 }
0x1092   : > { %11359 = vtanh.f32 %v7697_v15  ;;  %v7190_v34 = vmul.f32 0.044715, %v15741_v62  ;;  %v6223_v55 = vsub.f32 %v6159_v30, %v6191_v51  ;;  %v15766_v21 = vpop.eup %11351  ;;  %v7573_v4 = vadd.f32 %v7445_v5, %v15726_v29 }
0x1093   : > { %11361 = vtanh.f32 %v7699_v33  ;;  %v7191_v12 = vmul.f32 0.044715, %v6714_v23  ;;  %v6192_v15 = vmul.f32 %v15754_v53, %v15754_v53  ;;  %v6907_v44 = vadd.f32 %v6906_v22, %v15693_v6  ;;  %v10712_v53 = vld [vmem:[%s17894_s11 + $0x80] sm:$0xff]  }
0x1094   : > { %v15764_v11 = vpop.f32.mrb[200].mxu1  ;;  %v15769_v60 = vpop.f32.mrb[200].mxu0  ;;  %v15777_v51 = vadd.f32 %v6715_v40, %v15695_v46  ;;  %v15780_v30 = vadd.f32 %v6908_v19, %v15706_v59  ;;  %v7701_v17 = vmul.f32 0.7978846, %v7573_v4  ;;  %v7316_v49 = vmul.f32 %v7188_v3, %v15734_v9 }
0x1095   : > { %v15771_v32 = vpop.f32.mrb[201].mxu1  ;;  %v15782_v33 = vpop.f32.mrb[201].mxu0  ;;  %v7319_v37 = vmul.f32 %v7191_v12, %v6714_v23  ;;  %v15790_v52 = vadd.f32 %v6717_v43, %v15689_v58  ;;  %v15797_v19 = vmul.f32 %v7314_v48, %v15717_v38  ;;  %v7318_v26 = vmul.f32 %v7190_v34, %v15741_v62 }
0x1096   : > { %18715 = vst [vmem:[#allocation6_spill] sm:$0xff] %v15777_v51  ;;  %18716 = vst [vmem:[#allocation100_spill] sm:$0xff] %v15780_v30  ;;  %v15784_v5 = vpop.f32.mrb[202].mxu1  ;;  %v15786_v20 = vpop.eup %11353  ;;  %v6224_v28 = vsub.f32 %v6160_v39, %v6192_v15  ;;  %v7193_v0 = vmul.f32 0.044715, %v6907_v44  ;;  %11363 = vtanh.f32 %v7701_v17  ;;  %v15806_v47 = vmul.f32 0.5, %v15726_v29 }
0x1097   : > { %v15792_v22 = vpop.f32.mrb[202].mxu0  ;;  %v15794_v40 = vpop.f32.mrb[203].mxu1  ;;  %18717 = vst [vmem:[#allocation98_spill] sm:$0xff] %v15797_v19  ;;  %v6287_v4 = vadd.f32 1e-05, %v6223_v55  ;;  %v7447_v3 = vmul.f32 %v7319_v37, %v6714_v23  ;;  %v15811_v39 = vmul.f32 %v7316_v49, %v15734_v9  ;;  %v15815_v55 = vmul.f32 0.5, %v6714_v23 }
0x1098   : > { %v15800_v27 = vpop.f32.mrb[203].mxu0  ;;  %v7192_v12 = vmul.f32 0.044715, %v15777_v51  ;;  %v15803_v43 = vpop.eup %11355  ;;  %v7321_v24 = vmul.f32 %v7193_v0, %v6907_v44  ;;  %v7194_v48 = vmul.f32 0.044715, %v15780_v30  ;;  %v10709_v0 = vld [vmem:[%s17894_s11 + $0x40] sm:$0xff]   ;;  %v15826_v49 = vmul.f32 %v7318_v26, %v15741_v62 }
0x1099   : > { %18718 = vst [vmem:[#allocation101_spill] sm:$0xff] %v15803_v43  ;;  %v7195_v19 = vmul.f32 0.044715, %v15790_v52  ;;  %18719 = vst [vmem:[#allocation99_spill] sm:$0xff] %v15811_v39  ;;  %v7575_v37 = vadd.f32 %v7447_v3, %v6714_v23  ;;  %v5992_v15 = vpop.xlane.xlu0 %5991  ;;  %v15817_v38 = vpop.xlane.xlu1 %5993  ;;  %v10710_v29 = vld [vmem:[%s17894_s11 + $0xc0] sm:$0xff]   ;;  %11365 = vrsqrt.f32 %v6287_v4  ;;  %v15839_v26 = vmul.f32 0.5, %v6907_v44  ;;  %9457 = vmatprep.subr.bf16.mxu1 %v10709_v0 }
0x109a   : > { %18720 = vst [vmem:[#allocation27_spill] sm:$0xff] %v15826_v49  ;;  %v6288_v39 = vadd.f32 1e-05, %v6224_v28  ;;  %v7449_v9 = vmul.f32 %v7321_v24, %v6907_v44  ;;  %v10711_v3 = vld [vmem:[%s17894_s11] sm:$0xff]   ;;  %v7320_v24 = vmul.f32 %v7192_v12, %v15777_v51  ;;  %9569 = vmatprep.subr.bf16.mxu0 %v10710_v29  ;;  %v7322_v61 = vmul.f32 %v7194_v48, %v15780_v30 }
0x109b   : > { %v11358_v34 = vpop.eup %11357  ;;  %v7323_v17 = vmul.f32 %v7195_v19, %v15790_v52  ;;  %v7703_v63 = vmul.f32 0.7978846, %v7575_v37  ;;  %v15848_v43 = vmul.f32 0.0078125, %v5992_v15  ;;  %9458 = vmatpush3.bf16.msra.mxu1 %v10711_v3  ;;  %v15856_v0 = vadd.f32 %v15736_v16, %v15693_v6  ;;  %9570 = vmatpush3.bf16.msra.mxu0 %v10712_v53  ;;  %v10713_v15 = vld [vmem:[%s17894_s11 + $0x48] sm:$0xff]  }
0x109c   : > { %v15829_v2 = vpop.f32.mrb[204].mxu1  ;;  %v15831_v23 = vpop.f32.mrb[204].mxu0  ;;  %v7951_v62 = vadd.f32 1.0, %v11358_v34  ;;  %v7577_v8 = vadd.f32 %v7449_v9, %v6907_v44  ;;  %v15860_v34 = vadd.f32 %v15745_v18, %v15695_v46  ;;  %v15873_v16 = vmul.f32 0.5, %v15790_v52  ;;  %v10715_v44 = vld [vmem:[%s17894_s11 + $0x8] sm:$0xff]   ;;  %9459 = vmatprep.subr.bf16.mxu1 %v10713_v15 }
0x109d   : > { %v15842_v28 = vpop.f32.mrb[205].mxu1  ;;  %v15844_v19 = vpop.f32.mrb[205].mxu0  ;;  %v7451_v41 = vmul.f32 %v7323_v17, %v15790_v52  ;;  %11367 = vtanh.f32 %v7703_v63  ;;  %v10714_v63 = vld [vmem:[%s17894_s11 + $0xc8] sm:$0xff]   ;;  %v15883_v3 = vmul.f32 %v7320_v24, %v15777_v51 }
0x109e   : > { %v11360_v49 = vpop.eup %11359  ;;  %v15850_v4 = vpop.f32.mrb[206].mxu1  ;;  %18721 = vst [vmem:[#allocation25_spill] sm:$0xff] %v15860_v34  ;;  %11369 = vrsqrt.f32 %v6288_v39  ;;  %v10716_v53 = vld [vmem:[%s17894_s11 + $0x88] sm:$0xff]   ;;  %v15888_v39 = vadd.f32 %v15747_v1, %v15706_v59  ;;  %9571 = vmatprep.subr.bf16.mxu0 %v10714_v63  ;;  %v7705_v51 = vmul.f32 0.7978846, %v7577_v8  ;;  %v6193_v1 = vmul.f32 %v15848_v43, %v15848_v43  ;;  %v10722_v8 = vld [vmem:[%s17894_s11 + $0xd8] sm:$0xff]  }
0x109f   : > { %v15852_v37 = vpop.f32.mrb[206].mxu0  ;;  %v11362_v12 = vpop.eup %11361  ;;  %v7579_v18 = vadd.f32 %v7451_v41, %v15790_v52  ;;  %v7953_v29 = vadd.f32 1.0, %v11360_v49  ;;  %18723 = vst [vmem:[#allocation10_spill] sm:$0xff] %v15883_v3  ;;  %v15891_v41 = vmul.f32 %v7951_v62, %v15721_v54  ;;  %9460 = vmatpush3.bf16.msra.mxu1 %v10715_v44  ;;  %v7196_v63 = vmul.f32 0.044715, %v15860_v34  ;;  %9572 = vmatpush3.bf16.msra.mxu0 %v10716_v53  ;;  %v10720_v44 = vld [vmem:[%s17894_s11 + $0x90] sm:$0xff]  }
0x10a0   : > { %v15862_v48 = vpop.f32.mrb[207].mxu1  ;;  %v15864_v17 = vpop.f32.mrb[207].mxu0  ;;  %v7955_v9 = vadd.f32 1.0, %v11362_v12  ;;  %v7197_v12 = vmul.f32 0.044715, %v15856_v0  ;;  %18724 = vst [vmem:[#allocation73_spill] sm:$0xff] %v15888_v39 }
0x10a1   : > { %18722 = vst [vmem:[#allocation29_spill] sm:$0xff] %v15864_v17  ;;  %18725 = vst [vmem:[#allocation72_spill] sm:$0xff] %v15891_v41  ;;  %v15897_v17 = vmul.f32 %v7322_v61, %v15780_v30  ;;  %v7707_v49 = vmul.f32 0.7978846, %v7579_v18  ;;  %v6120_v24 = vpop.xlane.xlu0 %6119  ;;  %v11364_v3 = vpop.eup %11363  ;;  %v10718_v61 = vld [vmem:[%s17894_s11 + $0xd0] sm:$0xff]   ;;  %v10721_v53 = vld [vmem:[%s17894_s11 + $0x58] sm:$0xff]   ;;  %v15931_v41 = vmul.f32 %v7953_v29, %v15723_v25  ;;  %v7324_v25 = vmul.f32 %v7196_v63, %v15860_v34 }
0x10a2   : > { %v15894_v52 = vmul.f32 %v7955_v9, %v15738_v36  ;;  %v7325_v15 = vmul.f32 %v7197_v12, %v15856_v0  ;;  %v6122_v54 = vpop.xlane.xlu1 %6121  ;;  %v10717_v36 = vld [vmem:[%s17894_s11 + $0x50] sm:$0xff]   ;;  %v7957_v62 = vadd.f32 1.0, %v11364_v3  ;;  %v15912_v9 = vmul.f32 0.0078125, %v15817_v38  ;;  %9573 = vmatprep.subr.bf16.mxu0 %v10718_v61 }
0x10a3   : > { %18727 = vst [vmem:[#allocation69_spill] sm:$0xff] %v15897_v17  ;;  %11371 = vtanh.f32 %v7707_v49  ;;  %v10719_v18 = vld [vmem:[%s17894_s11 + $0x10] sm:$0xff]   ;;  %v7198_v3 = vmul.f32 0.044715, %v15888_v39  ;;  %v6161_v49 = vmul.f32 0.0078125, %v6120_v24  ;;  %v6724_v38 = vadd.f32 %v15764_v11, %v15689_v58  ;;  %9461 = vmatprep.subr.bf16.mxu1 %v10717_v36  ;;  %18728 = vst [vmem:[#allocation54_spill] sm:$0xff] %v15931_v41  ;;  %v15941_v24 = vpop.eup %11365  ;;  %9574 = vmatpush3.bf16.msra.mxu0 %v10720_v44 }
0x10a4   : > { %18726 = vst [vmem:[#allocation71_spill] sm:$0xff] %v15894_v52  ;;  %v7453_v12 = vmul.f32 %v7325_v15, %v15856_v0  ;;  %v15934_v52 = vmul.f32 %v7957_v62, %v15806_v47  ;;  %v6162_v17 = vmul.f32 0.0078125, %v6122_v54  ;;  %v6917_v15 = vadd.f32 %v15769_v60, %v15693_v6  ;;  %9462 = vmatpush3.bf16.msra.mxu1 %v10719_v18  ;;  %v10723_v11 = vld [vmem:[%s17894_s11 + $0x18] sm:$0xff]  }
0x10a5   : > { %11373 = vtanh.f32 %v7705_v51  ;;  %v7199_v29 = vmul.f32 0.044715, %v6724_v38  ;;  %9463 = vmatprep.subr.bf16.mxu1 %v10721_v53  ;;  %v10724_v47 = vld [vmem:[%s17894_s11 + $0x98] sm:$0xff]   ;;  %v6194_v54 = vmul.f32 %v15912_v9, %v15912_v9  ;;  %v6225_v61 = vsub.f32 %v6161_v49, %v6193_v1  ;;  %9575 = vmatprep.subr.bf16.mxu0 %v10722_v8 }
0x10a6   : > { %18729 = vst [vmem:[#allocation61_spill] sm:$0xff] %v15934_v52  ;;  %v7581_v36 = vadd.f32 %v7453_v12, %v15856_v0  ;;  %v7201_v62 = vmul.f32 0.044715, %v6917_v15  ;;  %v7326_v44 = vmul.f32 %v7198_v3, %v15888_v39  ;;  %v15958_v30 = vmul.f32 0.5, %v15856_v0  ;;  %v10725_v0 = vld [vmem:[%s17894_s11 + $0x60] sm:$0xff]  }
0x10a7   : > { %v11368_v51 = vpop.eup %11367  ;;  %v7327_v53 = vmul.f32 %v7199_v29, %v6724_v38  ;;  %v6226_v60 = vsub.f32 %v6162_v17, %v6194_v54  ;;  %v15962_v1 = vadd.f32 %v15771_v32, %v15695_v46  ;;  %9576 = vmatpush3.bf16.msra.mxu0 %v10724_v47  ;;  %v10726_v17 = vld [vmem:[%s17894_s11 + $0xe0] sm:$0xff]   ;;  %v15978_v3 = vmul.f32 %v7324_v25, %v15860_v34  ;;  %v10729_v54 = vld [vmem:[%s17894_s11 + $0x68] sm:$0xff]  }
0x10a8   : > { %v7709_v18 = vmul.f32 0.7978846, %v7581_v36  ;;  %v15955_v12 = vpop.eup %11369  ;;  %v7329_v41 = vmul.f32 %v7201_v62, %v6917_v15  ;;  %9464 = vmatpush3.bf16.msra.mxu1 %v10723_v11  ;;  %v7959_v8 = vadd.f32 1.0, %v11368_v51  ;;  %v15966_v36 = vadd.f32 %v15784_v5, %v15689_v58  ;;  %v10727_v32 = vld [vmem:[%s17894_s11 + $0x20] sm:$0xff]   ;;  %v10730_v62 = vld [vmem:[%s17894_s11 + $0xe8] sm:$0xff]   ;;  %9577 = vmatprep.subr.bf16.mxu0 %v10726_v17 }
0x10a9   : > { %18730 = vst [vmem:[#allocation62_spill] sm:$0xff] %v15962_v1  ;;  %v7455_v49 = vmul.f32 %v7327_v53, %v6724_v38  ;;  %18731 = vst [vmem:[#allocation70_spill] sm:$0xff] %v15978_v3  ;;  %v6289_v11 = vadd.f32 1e-05, %v6225_v61  ;;  %v10728_v47 = vld [vmem:[%s17894_s11 + $0xa0] sm:$0xff]   ;;  %v15992_v25 = vmul.f32 %v7326_v44, %v15888_v39  ;;  %v15994_v51 = vmul.f32 0.5, %v6724_v38  ;;  %9465 = vmatprep.subr.bf16.mxu1 %v10725_v0 }
0x10aa   : > { %11375 = vtanh.f32 %v7709_v18  ;;  %v7457_v29 = vmul.f32 %v7329_v41, %v6917_v15  ;;  %v15996_v61 = vmul.f32 0.5, %v6917_v15  ;;  %v6290_v53 = vadd.f32 1e-05, %v6226_v60  ;;  %v10731_v44 = vld [vmem:[%s17894_s11 + $0x28] sm:$0xff]  }
0x10ab   : > { %18732 = vst [vmem:[#allocation63_spill] sm:$0xff] %v15992_v25  ;;  %v7583_v18 = vadd.f32 %v7455_v49, %v6724_v38  ;;  %v16000_v63 = vadd.f32 %v15782_v33, %v15706_v59  ;;  %v7203_v52 = vmul.f32 0.044715, %v15966_v36  ;;  %v16007_v38 = vmul.f32 %v7959_v8, %v15815_v55  ;;  %9578 = vmatpush3.bf16.msra.mxu0 %v10728_v47  ;;  %v10732_v33 = vld [vmem:[%s17894_s11 + $0xa8] sm:$0xff]  }
0x10ac   : > { %v7585_v5 = vadd.f32 %v7457_v29, %v6917_v15  ;;  %9466 = vmatpush3.bf16.msra.mxu1 %v10727_v32  ;;  %v7200_v17 = vmul.f32 0.044715, %v15962_v1  ;;  %11377 = vrsqrt.f32 %v6289_v11  ;;  %v18735_v32 = vsub.f32 %v15548_v13, %v15676_v14  ;;  %9579 = vmatprep.subr.bf16.mxu0 %v10730_v62  ;;  %v10736_v13 = vld [vmem:[%s17894_s11 + $0xb0] sm:$0xff]  }
0x10ad   : > { %v11372_v41 = vpop.eup %11371  ;;  %18733 = vst [vmem:[#allocation52_spill] sm:$0xff] %v16000_v63  ;;  %18734 = vst [vmem:[#allocation64_spill] sm:$0xff] %v16007_v38  ;;  %v7711_v0 = vmul.f32 0.7978846, %v7583_v18  ;;  %9467 = vmatprep.subr.bf16.mxu1 %v10729_v54  ;;  %v7331_v60 = vmul.f32 %v7203_v52, %v15966_v36  ;;  %v18737_v47 = vsub.f32 %v15556_v10, %v15678_v57  ;;  %v10737_v38 = vld [vmem:[%s17894_s11 + $0x78] sm:$0xff]  }
0x10ae   : > { %v7963_v49 = vadd.f32 1.0, %v11372_v41  ;;  %v7713_v15 = vmul.f32 0.7978846, %v7585_v5  ;;  %v6347_v55 = vmul.f32 %v15756_v56, %v18735_v32  ;;  %v16027_v5 = vadd.f32 %v15792_v22, %v15693_v6 }
0x10af   : > { %v11374_v8 = vpop.eup %11373  ;;  %11379 = vtanh.f32 %v7711_v0  ;;  %v6348_v54 = vmul.f32 %v15766_v21, %v18737_v47  ;;  %v7202_v56 = vmul.f32 0.044715, %v16000_v63  ;;  %v7459_v11 = vmul.f32 %v7331_v60, %v15966_v36  ;;  %9580 = vmatpush3.bf16.msra.mxu0 %v10732_v33  ;;  %v10734_v33 = vld [vmem:[%s17894_s11 + $0xf0] sm:$0xff]  }
0x10b0   : > { %v16019_v29 = vmul.f32 %v7963_v49, %v15873_v16  ;;  %v16029_v52 = vpop.f32.mrb[208].mxu1  ;;  %v16031_v14 = vpop.f32.mrb[208].mxu0  ;;  %v16038_v16 = vld [vmem:[%s17890_s7] ss:$0 sm:$0xff]  ;;  %v16043_v21 = vadd.f32 %v15794_v40, %v15695_v46  ;;  %9468 = vmatpush3.bf16.msra.mxu1 %v10731_v44  ;;  %11381 = vtanh.f32 %v7713_v15  ;;  %v7205_v49 = vmul.f32 0.044715, %v16027_v5  ;;  %9581 = vmatprep.subr.bf16.mxu0 %v10734_v33 }
0x10b1   : > { %v6385_v57 = vmul.f32 %v16038_v16, %v6347_v55  ;;  %v16045_v22 = vpop.f32.mrb[209].mxu1  ;;  %v16047_v62 = vpop.f32.mrb[209].mxu0  ;;  %v6386_v41 = vmul.f32 %v16038_v16, %v6348_v54  ;;  %v10733_v40 = vld [vmem:[%s17894_s11 + $0x70] sm:$0xff]   ;;  %v7961_v32 = vadd.f32 1.0, %v11374_v8  ;;  %11383 = vrsqrt.f32 %v6290_v53  ;;  %v16064_v15 = vld [vmem:[%s17891_s8] ss:$0 sm:$0xff] }
0x10b2   : > { %18736 = vst [vmem:[#allocation65_spill] sm:$0xff] %v16019_v29  ;;  %18738 = vst [vmem:[#allocation56_spill] sm:$0xff] %v16043_v21  ;;  %v16053_v0 = vpop.f32.mrb[210].mxu1  ;;  %v16055_v60 = vpop.f32.mrb[210].mxu0  ;;  %v7587_v44 = vadd.f32 %v7459_v11, %v15966_v36  ;;  %v10735_v53 = vld [vmem:[%s17894_s11 + $0x30] sm:$0xff]   ;;  %v7333_v18 = vmul.f32 %v7205_v49, %v16027_v5  ;;  %v16085_v10 = vadd.f32 %v15831_v23, %v15693_v6  ;;  %9469 = vmatprep.subr.bf16.mxu1 %v10733_v40 }
0x10b3   : > { %v6423_v55 = vadd.f32 %v16064_v15, %v6385_v57  ;;  %v16067_v47 = vpop.f32.mrb[211].mxu1  ;;  %v16069_v54 = vpop.f32.mrb[211].mxu0  ;;  %v6424_v11 = vadd.f32 %v16064_v15, %v6386_v41  ;;  %v16081_v57 = vadd.f32 %v15829_v2, %v15689_v58  ;;  %v10738_v41 = vld [vmem:[%s17894_s11 + $0xf8] sm:$0xff]   ;;  %v7328_v2 = vmul.f32 %v7200_v17, %v15962_v1  ;;  %9582 = vmatpush3.bf16.msra.mxu0 %v10736_v13 }
0x10b4   : > { %v11376_v8 = vpop.eup %11375  ;;  %v7715_v29 = vmul.f32 0.7978846, %v7587_v44  ;;  %v7204_v23 = vmul.f32 0.044715, %v16043_v21  ;;  %9470 = vmatpush3.bf16.msra.mxu1 %v10735_v53  ;;  %v7330_v40 = vmul.f32 %v7202_v56, %v16000_v63  ;;  %v7461_v39 = vmul.f32 %v7333_v18, %v16027_v5  ;;  %9583 = vmatprep.subr.bf16.mxu0 %v10738_v41  ;;  %v10740_v13 = vld [vmem:[%s17894_s11 + $0xb8] sm:$0xff]  }
0x10b5   : > { %v7965_v49 = vadd.f32 1.0, %v11376_v8  ;;  %v6447_v25 = vpack.c.bf16 %v6424_v11, %v6423_v55  ;;  %v7207_v3 = vmul.f32 0.044715, %v16081_v57  ;;  %9471 = vmatprep.subr.bf16.mxu1 %v10737_v38  ;;  %v10739_v8 = vld [vmem:[%s17894_s11 + $0x38] sm:$0xff]   ;;  %v16105_v17 = vmul.f32 %v7961_v32, %v15839_v26 }
0x10b6   : > { %11385 = vtanh.f32 %v7715_v29  ;;  %v16112_v56 = vadd.f32 %v15800_v27, %v15706_v59  ;;  %v16118_v38 = vmul.f32 0.5, %v15966_v36  ;;  %v7589_v26 = vadd.f32 %v7461_v39, %v16027_v5  ;;  %v16127_v32 = vpop.eup %11377 }
0x10b7   : > { %18739 = vst [vmem:[#allocation53_spill] sm:$0xff] %v16105_v17  ;;  %v16108_v44 = vmul.f32 %v7965_v49, %v15958_v30  ;;  %6782 = vmatmul.mubr.bf16.gmra.mrb[224].mxu1 %v6447_v25  ;;  %6975 = vmatmul.mubr.bf16.gmra.mrb[224].mxu0 %v6447_v25  ;;  %v7335_v30 = vmul.f32 %v7207_v3, %v16081_v57  ;;  %v7209_v29 = vmul.f32 0.044715, %v16085_v10 }
0x10b8   : > { %v16123_v18 = vpop.f32.mrb[212].mxu1  ;;  %v16125_v27 = vpop.f32.mrb[212].mxu0  ;;  %v7332_v36 = vmul.f32 %v7204_v23, %v16043_v21  ;;  %v16134_v33 = vadd.f32 %v15842_v28, %v15695_v46  ;;  %6791 = vmatprep.mubr.bf16.mxu1 %v18607_v35  ;;  %v16139_v39 = vadd.f32 %v15844_v19, %v15706_v59  ;;  %v7717_v11 = vmul.f32 0.7978846, %v7589_v26  ;;  %6984 = vmatprep.mubr.bf16.mxu0 %v18607_v35 }
0x10b9   : > { %18740 = vst [vmem:[#allocation68_spill] sm:$0xff] %v16108_v44  ;;  %v16141_v3 = vpop.f32.mrb[213].mxu1  ;;  %v16143_v25 = vpop.f32.mrb[213].mxu0  ;;  %v7463_v41 = vmul.f32 %v7335_v30, %v16081_v57  ;;  %v7337_v49 = vmul.f32 %v7209_v29, %v16085_v10  ;;  %v16150_v28 = vadd.f32 %v15850_v4, %v15689_v58  ;;  %9472 = vmatpush3.bf16.msra.mxu1 %v10739_v8  ;;  %v7206_v26 = vmul.f32 0.044715, %v16112_v56 }
0x10ba   : > { %18741 = vst [vmem:[#allocation66_spill] sm:$0xff] %v16139_v39  ;;  %18742 = vst [vmem:[#allocation104_spill] sm:$0xff] %v16143_v25  ;;  %v11380_v53 = vpop.eup %11379  ;;  %v16152_v23 = vpop.f32.mrb[214].mxu1  ;;  %v16155_v19 = vmul.f32 %v7328_v2, %v15962_v1  ;;  %v16158_v55 = vmul.f32 %v7330_v40, %v16000_v63  ;;  %v18745_v30 = vsub.f32 %v15574_v42, %v15685_v7  ;;  %9584 = vmatpush3.bf16.msra.mxu0 %v10740_v13 }
0x10bb   : > { %v16165_v17 = vpop.f32.mrb[214].mxu0  ;;  %v11382_v4 = vpop.eup %11381  ;;  %v7967_v44 = vadd.f32 1.0, %v11380_v53  ;;  %11387 = vtanh.f32 %v7717_v11  ;;  %v7591_v8 = vadd.f32 %v7463_v41, %v16081_v57  ;;  %v7465_v2 = vmul.f32 %v7337_v49, %v16085_v10 }
0x10bc   : > { %18743 = vst [vmem:[#allocation102_spill] sm:$0xff] %v16155_v19  ;;  %18744 = vst [vmem:[#allocation105_spill] sm:$0xff] %v16158_v55  ;;  %v6349_v29 = vmul.f32 %v15786_v20, %v18745_v30  ;;  %v16169_v19 = vpop.f32.mrb[215].mxu1  ;;  %v16171_v40 = vpop.f32.mrb[215].mxu0  ;;  %v16176_v7 = vmul.f32 0.5, %v16027_v5  ;;  %v16179_v20 = vmul.f32 %v7332_v36, %v16043_v21  ;;  %v16182_v13 = vmul.f32 0.5, %v16081_v57 }
0x10bd   : > { %18746 = vst [vmem:[#allocation103_spill] sm:$0xff] %v16165_v17  ;;  %18747 = vst [vmem:[#allocation31_spill] sm:$0xff] %v16169_v19  ;;  %v16173_v55 = vpop.eup %11383  ;;  %v7208_v53 = vmul.f32 0.044715, %v16134_v33  ;;  %v7719_v11 = vmul.f32 0.7978846, %v7591_v8  ;;  %v7593_v41 = vadd.f32 %v7465_v2, %v16085_v10  ;;  %v16189_v63 = vmul.f32 %v7206_v26, %v16112_v56 }
0x10be   : > { %18748 = vst [vmem:[#allocation14_spill] sm:$0xff] %v16171_v40  ;;  %18749 = vst [vmem:[#allocation33_spill] sm:$0xff] %v16179_v20  ;;  %v7210_v49 = vmul.f32 0.044715, %v16139_v39  ;;  %v7211_v30 = vmul.f32 0.044715, %v16150_v28  ;;  %v6387_v57 = vmul.f32 %v16038_v16, %v6349_v29  ;;  %v16197_v1 = vmul.f32 %v7967_v44, %v15994_v51 }
0x10bf   : > { %v7969_v42 = vadd.f32 1.0, %v11382_v4  ;;  %v18750_v5 = vld [vmem:[#allocation13_spill] sm:$0xff]  ;;  %11389 = vtanh.f32 %v7719_v11  ;;  %v16202_v2 = vadd.f32 %v15852_v37, %v15693_v6  ;;  %v16211_v29 = vadd.f32 %v15862_v48, %v15695_v46  ;;  %v18766_v40 = vld [vmem:[#allocation90_spill] sm:$0xff] }
0x10c0   : > { %v18751_v36 = vsub.f32 %v15580_v50, %v18750_v5  ;;  %v18752_v20 = vld [vmem:[#allocation101_spill] sm:$0xff]  ;;  %18753 = vst [vmem:[#allocation16_spill] sm:$0xff] %v16197_v1  ;;  %v7339_v8 = vmul.f32 %v7211_v30, %v16150_v28  ;;  %v16204_v4 = vpop.f32.mrb[216].mxu1  ;;  %v11386_v34 = vpop.eup %11385  ;;  %v7721_v5 = vmul.f32 0.7978846, %v7593_v41  ;;  %v7338_v50 = vmul.f32 %v7210_v49, %v16139_v39 }
0x10c1   : > { %18754 = vst [vmem:[#allocation108_spill] sm:$0xff] %v16204_v4  ;;  %v16206_v26 = vpop.f32.mrb[216].mxu0  ;;  %18756 = vst [vmem:[#allocation109_spill] sm:$0xff] %v16211_v29  ;;  %v18757_v51 = vld [vmem:[#allocation29_spill] sm:$0xff]  ;;  %v16217_v11 = vpop.f32.mrb[217].mxu1  ;;  %v7971_v30 = vadd.f32 1.0, %v11386_v34  ;;  %v6425_v48 = vadd.f32 %v16064_v15, %v6387_v57 }
0x10c2   : > { %v6350_v21 = vmul.f32 %v18752_v20, %v18751_v36  ;;  %18755 = vst [vmem:[#allocation106_spill] sm:$0xff] %v16206_v26  ;;  %v16215_v44 = vadd.f32 %v18757_v51, %v15706_v59  ;;  %18759 = vst [vmem:[#allocation28_spill] sm:$0xff] %v16217_v11  ;;  %v16219_v37 = vpop.f32.mrb[217].mxu0  ;;  %v7336_v36 = vmul.f32 %v7208_v53, %v16134_v33  ;;  %v7213_v51 = vmul.f32 0.044715, %v16202_v2  ;;  %v18763_v53 = vld [vmem:[#allocation82_spill] sm:$0xff] }
0x10c3   : > { %18760 = vst [vmem:[#allocation20_spill] sm:$0xff] %v16219_v37  ;;  %v7467_v41 = vmul.f32 %v7339_v8, %v16150_v28  ;;  %v7212_v4 = vmul.f32 0.044715, %v16211_v29  ;;  %v16231_v11 = vmul.f32 %v7971_v30, %v16118_v38  ;;  %v18764_v37 = vld [vmem:[#allocation97_spill] sm:$0xff]  ;;  %11391 = vtanh.f32 %v7721_v5 }
0x10c4   : > { %v6388_v20 = vmul.f32 %v16038_v16, %v6350_v21  ;;  %18758 = vst [vmem:[#allocation107_spill] sm:$0xff] %v16215_v44  ;;  %v16224_v21 = vpop.f32.mrb[218].mxu1  ;;  %v18765_v49 = vsub.f32 %v18763_v53, %v18764_v37  ;;  %v7341_v38 = vmul.f32 %v7213_v51, %v16202_v2  ;;  %v7214_v30 = vmul.f32 0.044715, %v16215_v44 }
0x10c5   : > { %18761 = vst [vmem:[#allocation32_spill] sm:$0xff] %v16224_v21  ;;  %18762 = vst [vmem:[#allocation24_spill] sm:$0xff] %v16231_v11  ;;  %v7595_v34 = vadd.f32 %v7467_v41, %v16150_v28  ;;  %v18767_v21 = vld [vmem:[#allocation23_spill] sm:$0xff]  ;;  %v16244_v17 = vpop.f32.mrb[219].mxu1  ;;  %v11388_v37 = vpop.eup %11387 }
0x10c6   : > { %v6426_v26 = vadd.f32 %v16064_v15, %v6388_v20  ;;  %v6351_v8 = vmul.f32 %v15941_v24, %v18765_v49  ;;  %v18768_v19 = vsub.f32 %v18766_v40, %v18767_v21  ;;  %v16242_v20 = vpop.f32.mrb[218].mxu0  ;;  %v7973_v5 = vadd.f32 1.0, %v11388_v37 }
0x10c7   : > { %v16248_v41 = vpop.f32.mrb[219].mxu0  ;;  %v7723_v49 = vmul.f32 0.7978846, %v7595_v34  ;;  %v7085_v40 = vmul.f32 0.5, %v16202_v2 }
0x10c8   : > { %v6352_v57 = vmul.f32 %v15955_v12, %v18768_v19  ;;  %v6448_v25 = vpack.c.bf16 %v6426_v26, %v6425_v48  ;;  %v6389_v21 = vmul.f32 %v16038_v16, %v6351_v8  ;;  %v16255_v19 = vmul.f32 %v7969_v42, %v15996_v61  ;;  %v16267_v8 = vpop.f32.mrb[220].mxu1 }
0x10c9   : > { %v7469_v26 = vmul.f32 %v7341_v38, %v16202_v2  ;;  %v7340_v48 = vmul.f32 %v7212_v4, %v16211_v29  ;;  %11393 = vtanh.f32 %v7723_v49  ;;  %v18770_v42 = vsub.f32 %v15609_v31, %v15848_v43  ;;  %v16281_v43 = vpop.f32.mrb[221].mxu1 }
0x10ca   : > { %v6390_v12 = vmul.f32 %v16038_v16, %v6352_v57  ;;  %18769 = vst [vmem:[#allocation5_spill] sm:$0xff] %v16255_v19  ;;  %6792 = vmatmul.mubr.bf16.gmra.mrb[228].mxu1 %v6448_v25  ;;  %6985 = vmatmul.mubr.bf16.gmra.mrb[228].mxu0 %v6448_v25  ;;  %v6427_v51 = vadd.f32 %v16064_v15, %v6389_v21  ;;  %v16269_v57 = vpop.f32.mrb[220].mxu0  ;;  %v11390_v21 = vpop.eup %11389 }
0x10cb   : > { %6801 = vmatprep.mubr.bf16.mxu1 %v18607_v35  ;;  %6994 = vmatprep.mubr.bf16.mxu0 %v18607_v35  ;;  %v6353_v61 = vmul.f32 %v16127_v32, %v18770_v42  ;;  %v16272_v25 = vmul.f32 %v7973_v5, %v16176_v7  ;;  %v7597_v4 = vadd.f32 %v7469_v26, %v16202_v2  ;;  %v16283_v32 = vpop.f32.mrb[221].mxu0  ;;  %v16289_v42 = vpop.f32.mrb[222].mxu1 }
0x10cc   : > { %v6428_v34 = vadd.f32 %v16064_v15, %v6390_v12  ;;  %v18772_v38 = vsub.f32 %v15612_v45, %v15912_v9  ;;  %v6744_v49 = vadd.f32 %v16029_v52, %v15689_v58  ;;  %v7081_v12 = vmul.f32 0.5, %v16085_v10  ;;  %v16295_v24 = vpop.f32.mrb[222].mxu0  ;;  %v16297_v45 = vpop.f32.mrb[223].mxu1 }
0x10cd   : > { %18771 = vst [vmem:[#allocation7_spill] sm:$0xff] %v16272_v25  ;;  %v7342_v7 = vmul.f32 %v7214_v30, %v16215_v44  ;;  %v6937_v26 = vadd.f32 %v16031_v14, %v15693_v6  ;;  %v6391_v52 = vmul.f32 %v16038_v16, %v6353_v61  ;;  %v16301_v10 = vmul.f32 %v16189_v63, %v16112_v56 }
0x10ce   : > { %v6354_v37 = vmul.f32 %v16173_v55, %v18772_v38  ;;  %v6449_v5 = vpack.c.bf16 %v6428_v34, %v6427_v51  ;;  %v7725_v55 = vmul.f32 0.7978846, %v7597_v4  ;;  %v16304_v14 = vmul.f32 %v7336_v36, %v16134_v33  ;;  %v16307_v34 = vpop.f32.mrb[223].mxu0 }
0x10cf   : > { %v7083_v30 = vmul.f32 0.5, %v16150_v28  ;;  %v7215_v51 = vmul.f32 0.044715, %v6744_v49  ;;  %v7975_v4 = vadd.f32 1.0, %v11390_v21  ;;  %v16310_v61 = vmul.f32 %v7338_v50, %v16139_v39  ;;  %v11392_v28 = vpop.eup %11391 }
0x10d0   : > { %v6392_v38 = vmul.f32 %v16038_v16, %v6354_v37  ;;  %11395 = vtanh.f32 %v7725_v55  ;;  %v16313_v37 = vmul.f32 %v7340_v48, %v16211_v29  ;;  %v16316_v9 = vmul.f32 %v7342_v7, %v16215_v44 }
0x10d1   : > { %18773 = vst [vmem:[#allocation9_spill] sm:$0xff] %v16310_v61  ;;  %v7343_v63 = vmul.f32 %v7215_v51, %v6744_v49  ;;  %v7217_v31 = vmul.f32 0.044715, %v6937_v26  ;;  %v16320_v36 = vadd.f32 %v16045_v22, %v15695_v46  ;;  %v6429_v50 = vadd.f32 %v16064_v15, %v6391_v52 }
0x10d2   : > { %18774 = vst [vmem:[#allocation3_spill] sm:$0xff] %v16313_v37  ;;  %18775 = vst [vmem:[#allocation22_spill] sm:$0xff] %v16316_v9  ;;  %6802 = vmatmul.mubr.bf16.gmra.mrb[232].mxu1 %v6449_v5  ;;  %6995 = vmatmul.mubr.bf16.gmra.mrb[232].mxu0 %v6449_v5  ;;  %v6430_v21 = vadd.f32 %v16064_v15, %v6392_v38  ;;  %v6748_v48 = vadd.f32 %v16053_v0, %v15689_v58  ;;  %v16329_v7 = vmul.f32 0.5, %v6744_v49 }
0x10d3   : > { %18776 = vst [vmem:[#allocation12_spill] sm:$0xff] %v16320_v36  ;;  %6811 = vmatprep.mubr.bf16.mxu1 %v18607_v35  ;;  %7004 = vmatprep.mubr.bf16.mxu0 %v18607_v35  ;;  %v7471_v22 = vmul.f32 %v7343_v63, %v6744_v49  ;;  %v7345_v55 = vmul.f32 %v7217_v31, %v6937_v26  ;;  %v16338_v52 = vmul.f32 0.5, %v6937_v26  ;;  %v11394_v51 = vpop.eup %11393  ;;  %v7977_v53 = vadd.f32 1.0, %v11392_v28 }
0x10d4   : > { %v16333_v2 = vadd.f32 %v16047_v62, %v15706_v59  ;;  %v16336_v5 = vmul.f32 %v7975_v4, %v16182_v13  ;;  %v7219_v38 = vmul.f32 0.044715, %v6748_v48  ;;  %v6941_v0 = vadd.f32 %v16055_v60, %v15693_v6 }
0x10d5   : > { %v7599_v19 = vadd.f32 %v7471_v22, %v6744_v49  ;;  %v7473_v25 = vmul.f32 %v7345_v55, %v6937_v26  ;;  %v16344_v31 = vadd.f32 %v16067_v47, %v15695_v46  ;;  %v7979_v63 = vadd.f32 1.0, %v11394_v51  ;;  %v5996_v47 = vpop.xlane.xlu0 %5995 }
0x10d6   : > { %18777 = vst [vmem:[#allocation26_spill] sm:$0xff] %v16333_v2  ;;  %18778 = vst [vmem:[#allocation18_spill] sm:$0xff] %v16336_v5  ;;  %v6450_v62 = vpack.c.bf16 %v6430_v21, %v6429_v50  ;;  %v7347_v1 = vmul.f32 %v7219_v38, %v6748_v48  ;;  %v7221_v11 = vmul.f32 0.044715, %v6941_v0  ;;  %v7216_v9 = vmul.f32 0.044715, %v16320_v36 }
0x10d7   : > { %18779 = vst [vmem:[#allocation67_spill] sm:$0xff] %v16344_v31  ;;  %v7727_v13 = vmul.f32 0.7978846, %v7599_v19  ;;  %v7601_v4 = vadd.f32 %v7473_v25, %v6937_v26  ;;  %v7218_v44 = vmul.f32 0.044715, %v16333_v2  ;;  %v16348_v61 = vmul.f32 %v7979_v63, %v7083_v30 }
0x10d8   : > { %v7475_v60 = vmul.f32 %v7347_v1, %v6748_v48  ;;  %v7349_v28 = vmul.f32 %v7221_v11, %v6941_v0  ;;  %v16352_v49 = vadd.f32 %v16069_v54, %v15706_v59  ;;  %v16354_v22 = vmul.f32 %v7977_v53, %v7081_v12 }
0x10d9   : > { %18780 = vst [vmem:[#allocation50_spill] sm:$0xff] %v16348_v61  ;;  %11397 = vtanh.f32 %v7727_v13  ;;  %v7729_v50 = vmul.f32 0.7978846, %v7601_v4  ;;  %v7220_v19 = vmul.f32 0.044715, %v16344_v31  ;;  %v7344_v54 = vmul.f32 %v7216_v9, %v16320_v36 }
0x10da   : > { %18781 = vst [vmem:[#allocation60_spill] sm:$0xff] %v16352_v49  ;;  %18782 = vst [vmem:[#allocation55_spill] sm:$0xff] %v16354_v22  ;;  %v11396_v25 = vpop.eup %11395  ;;  %6812 = vmatmul.mubr.bf16.gmra.mrb[236].mxu1 %v6450_v62  ;;  %7005 = vmatmul.mubr.bf16.gmra.mrb[236].mxu0 %v6450_v62  ;;  %v7603_v30 = vadd.f32 %v7475_v60, %v6748_v48  ;;  %v7477_v1 = vmul.f32 %v7349_v28, %v6941_v0  ;;  %v7222_v11 = vmul.f32 0.044715, %v16352_v49  ;;  %v5998_v28 = vpop.xlane.xlu1 %5997 }
0x10db   : > { %v7981_v21 = vadd.f32 1.0, %v11396_v25  ;;  %11399 = vtanh.f32 %v7729_v50  ;;  %v16361_v53 = vmul.f32 0.0078125, %v5996_v47  ;;  %6821 = vmatprep.mubr.bf16.mxu1 %v18607_v35  ;;  %7014 = vmatprep.mubr.bf16.mxu0 %v18607_v35  ;;  %v7346_v12 = vmul.f32 %v7218_v44, %v16333_v2 }
0x10dc   : > { %v7731_v55 = vmul.f32 0.7978846, %v7603_v30  ;;  %v7605_v38 = vadd.f32 %v7477_v1, %v6941_v0  ;;  %v6754_v51 = vadd.f32 %v16123_v18, %v15689_v58  ;;  %v7091_v62 = vmul.f32 0.5, %v6748_v48  ;;  %v18792_v18 = vld [vmem:[#allocation103_spill] sm:$0xff] }
0x10dd   : > { %v16368_v63 = vmul.f32 %v7981_v21, %v7085_v40  ;;  %v7348_v13 = vmul.f32 %v7220_v19, %v16344_v31  ;;  %v6947_v9 = vadd.f32 %v16125_v27, %v15693_v6  ;;  %v7350_v60 = vmul.f32 %v7222_v11, %v16352_v49  ;;  %v6124_v11 = vpop.xlane.xlu0 %6123  ;;  %v18789_v21 = vld [vmem:[#allocation89_spill] sm:$0xff] }
0x10de   : > { %11401 = vtanh.f32 %v7731_v55  ;;  %v7733_v4 = vmul.f32 0.7978846, %v7605_v38  ;;  %v16376_v44 = vadd.f32 %v16141_v3, %v15695_v46  ;;  %v16381_v40 = vmul.f32 %v7344_v54, %v16320_v36 }
0x10df   : > { %18783 = vst [vmem:[#allocation51_spill] sm:$0xff] %v16368_v63  ;;  %v7093_v48 = vmul.f32 0.5, %v6941_v0  ;;  %v7223_v47 = vmul.f32 0.044715, %v6754_v51  ;;  %v16384_v50 = vmul.f32 %v7346_v12, %v16333_v2  ;;  %v6195_v27 = vmul.f32 %v16361_v53, %v16361_v53  ;;  %v6126_v2 = vpop.xlane.xlu1 %6125 }
0x10e0   : > { %18784 = vst [vmem:[#allocation59_spill] sm:$0xff] %v16376_v44  ;;  %18785 = vst [vmem:[#allocation57_spill] sm:$0xff] %v16381_v40  ;;  %11403 = vtanh.f32 %v7733_v4  ;;  %v7225_v19 = vmul.f32 0.044715, %v6947_v9  ;;  %v16389_v25 = vmul.f32 %v7348_v13, %v16344_v31  ;;  %v16391_v30 = vmul.f32 0.0078125, %v5998_v28  ;;  %v18790_v13 = vld [vmem:[#allocation104_spill] sm:$0xff] }
0x10e1   : > { %18786 = vst [vmem:[#allocation58_spill] sm:$0xff] %v16384_v50  ;;  %v7351_v3 = vmul.f32 %v7223_v47, %v6754_v51  ;;  %v6758_v1 = vadd.f32 %v16152_v23, %v15689_v58  ;;  %v16396_v0 = vmul.f32 %v7350_v60, %v16352_v49  ;;  %v7224_v55 = vmul.f32 0.044715, %v16376_v44 }
0x10e2   : > { %18787 = vst [vmem:[#allocation76_spill] sm:$0xff] %v16389_v25  ;;  %v7353_v12 = vmul.f32 %v7225_v19, %v6947_v9  ;;  %v16403_v47 = vadd.f32 %v18790_v13, %v15706_v59  ;;  %v6951_v23 = vadd.f32 %v18792_v18, %v15693_v6  ;;  %v16407_v22 = vmul.f32 0.5, %v6754_v51  ;;  %v18794_v18 = vld [vmem:[#allocation31_spill] sm:$0xff] }
0x10e3   : > { %18788 = vst [vmem:[#allocation74_spill] sm:$0xff] %v16396_v0  ;;  %v11398_v38 = vpop.eup %11397  ;;  %v7479_v4 = vmul.f32 %v7351_v3, %v6754_v51  ;;  %v7227_v28 = vmul.f32 0.044715, %v6758_v1  ;;  %v6163_v63 = vmul.f32 0.0078125, %v6124_v11  ;;  %v6196_v19 = vmul.f32 %v16391_v30, %v16391_v30  ;;  %v18793_v3 = vld [vmem:[#allocation11_spill] sm:$0xff] }
0x10e4   : > { %18791 = vst [vmem:[#allocation77_spill] sm:$0xff] %v16403_v47  ;;  %v7983_v26 = vadd.f32 1.0, %v11398_v38  ;;  %v7481_v60 = vmul.f32 %v7353_v12, %v6947_v9  ;;  %v16413_v13 = vmul.f32 0.5, %v6947_v9  ;;  %v7352_v50 = vmul.f32 %v7224_v55, %v16376_v44 }
0x10e5   : > { %v11400_v5 = vpop.eup %11399  ;;  %v7607_v54 = vadd.f32 %v7479_v4, %v6754_v51  ;;  %v7355_v0 = vmul.f32 %v7227_v28, %v6758_v1  ;;  %v16418_v38 = vadd.f32 %v18794_v18, %v15695_v46  ;;  %v7226_v11 = vmul.f32 0.044715, %v16403_v47  ;;  %v18797_v18 = vld [vmem:[#allocation14_spill] sm:$0xff] }
0x10e6   : > { %v7609_v49 = vadd.f32 %v7481_v60, %v6947_v9  ;;  %v7229_v4 = vmul.f32 0.044715, %v6951_v23  ;;  %v16422_v31 = vmul.f32 %v7983_v26, %v16329_v7  ;;  %v7985_v28 = vadd.f32 1.0, %v11400_v5 }
0x10e7   : > { %18795 = vst [vmem:[#allocation75_spill] sm:$0xff] %v16418_v38  ;;  %v7735_v12 = vmul.f32 0.7978846, %v7607_v54  ;;  %v7483_v51 = vmul.f32 %v7355_v0, %v6758_v1  ;;  %v6227_v40 = vsub.f32 %v6163_v63, %v6195_v27  ;;  %v7228_v54 = vmul.f32 0.044715, %v16418_v38 }
0x10e8   : > { %v11402_v25 = vpop.eup %11401  ;;  %18796 = vst [vmem:[#allocation80_spill] sm:$0xff] %v16422_v31  ;;  %v7737_v61 = vmul.f32 0.7978846, %v7609_v49  ;;  %v7357_v60 = vmul.f32 %v7229_v4, %v6951_v23  ;;  %v16427_v0 = vadd.f32 %v18797_v18, %v15706_v59  ;;  %v6164_v39 = vmul.f32 0.0078125, %v6126_v2  ;;  %v6000_v49 = vpop.xlane.xlu0 %5999 }
0x10e9   : > { %v7987_v9 = vadd.f32 1.0, %v11402_v25  ;;  %11405 = vtanh.f32 %v7735_v12  ;;  %v7611_v55 = vadd.f32 %v7483_v51, %v6758_v1  ;;  %v16432_v63 = vmul.f32 %v7985_v28, %v16338_v52 }
0x10ea   : > { %v11404_v36 = vpop.eup %11403  ;;  %11407 = vtanh.f32 %v7737_v61  ;;  %18798 = vst [vmem:[#allocation78_spill] sm:$0xff] %v16427_v0  ;;  %v7485_v5 = vmul.f32 %v7357_v60, %v6951_v23  ;;  %v7354_v27 = vmul.f32 %v7226_v11, %v16403_v47  ;;  %v7230_v61 = vmul.f32 0.044715, %v16427_v0  ;;  %v6002_v60 = vpop.xlane.xlu1 %6001 }
0x10eb   : > { %v16429_v37 = vmul.f32 %v7987_v9, %v7091_v62  ;;  %v7989_v7 = vadd.f32 1.0, %v11404_v36  ;;  %v7739_v26 = vmul.f32 0.7978846, %v7611_v55  ;;  %18800 = vst [vmem:[#allocation79_spill] sm:$0xff] %v16432_v63  ;;  %v6228_v25 = vsub.f32 %v6164_v39, %v6196_v19  ;;  %v18803_v19 = vld [vmem:[#allocation108_spill] sm:$0xff] }
0x10ec   : > { %v7613_v2 = vadd.f32 %v7485_v5, %v6951_v23  ;;  %v7099_v62 = vmul.f32 0.5, %v6758_v1  ;;  %v6291_v36 = vadd.f32 1e-05, %v6227_v40  ;;  %v7356_v4 = vmul.f32 %v7228_v54, %v16418_v38  ;;  %v18804_v40 = vld [vmem:[#allocation106_spill] sm:$0xff]  ;;  %v18805_v54 = vld [vmem:[#allocation28_spill] sm:$0xff] }
0x10ed   : > { %18799 = vst [vmem:[#allocation81_spill] sm:$0xff] %v16429_v37  ;;  %v16438_v51 = vmul.f32 %v7989_v7, %v7093_v48  ;;  %11409 = vtanh.f32 %v7739_v26  ;;  %v16441_v9 = vmul.f32 0.0078125, %v6000_v49  ;;  %v16446_v11 = vmul.f32 %v7352_v50, %v16376_v44 }
0x10ee   : > { %v7741_v39 = vmul.f32 0.7978846, %v7613_v2  ;;  %v6764_v28 = vadd.f32 %v18803_v19, %v15689_v58  ;;  %v7358_v48 = vmul.f32 %v7230_v61, %v16427_v0  ;;  %v6292_v55 = vadd.f32 1e-05, %v6228_v25 }
0x10ef   : > { %18801 = vst [vmem:[#allocation13_spill] sm:$0xff] %v16438_v51  ;;  %18802 = vst [vmem:[#allocation101_spill] sm:$0xff] %v16446_v11  ;;  %v16453_v1 = vadd.f32 %v18804_v40, %v15693_v6  ;;  %v16457_v18 = vadd.f32 %v18805_v54, %v15695_v46  ;;  %v16460_v7 = vmul.f32 %v7354_v27, %v16403_v47  ;;  %v7101_v50 = vmul.f32 0.5, %v6951_v23  ;;  %v18808_v27 = vld [vmem:[#allocation32_spill] sm:$0xff] }
0x10f0   : > { %11411 = vtanh.f32 %v7741_v39  ;;  %v7231_v26 = vmul.f32 0.044715, %v6764_v28  ;;  %v16463_v5 = vmul.f32 %v7356_v4, %v16418_v38  ;;  %v6197_v49 = vmul.f32 %v16441_v9, %v16441_v9  ;;  %v6128_v39 = vpop.xlane.xlu0 %6127  ;;  %v18810_v4 = vld [vmem:[#allocation4_spill] sm:$0xff] }
0x10f1   : > { %18806 = vst [vmem:[#allocation29_spill] sm:$0xff] %v16460_v7  ;;  %11413 = vrsqrt.f32 %v6291_v36  ;;  %v7233_v61 = vmul.f32 0.044715, %v16453_v1  ;;  %v16468_v19 = vmul.f32 0.0078125, %v6002_v60  ;;  %v7232_v40 = vmul.f32 0.044715, %v16457_v18 }
0x10f2   : > { %18807 = vst [vmem:[#allocation97_spill] sm:$0xff] %v16463_v5  ;;  %v7359_v2 = vmul.f32 %v7231_v26, %v6764_v28  ;;  %v6768_v23 = vadd.f32 %v18808_v27, %v15689_v58  ;;  %v16474_v36 = vmul.f32 %v7358_v48, %v16427_v0  ;;  %11415 = vrsqrt.f32 %v6292_v55  ;;  %v18811_v60 = vld [vmem:[#allocation20_spill] sm:$0xff]  ;;  %v6130_v5 = vpop.xlane.xlu1 %6129 }
0x10f3   : > { %v11406_v25 = vpop.eup %11405  ;;  %v7361_v12 = vmul.f32 %v7233_v61, %v16453_v1  ;;  %v16481_v51 = vadd.f32 %v18811_v60, %v15706_v59  ;;  %v6961_v27 = vadd.f32 %v16242_v20, %v15693_v6  ;;  %v16485_v31 = vmul.f32 0.5, %v6764_v28 }
0x10f4   : > { %v11408_v54 = vpop.eup %11407  ;;  %18809 = vst [vmem:[#allocation23_spill] sm:$0xff] %v16474_v36  ;;  %v7991_v63 = vadd.f32 1.0, %v11406_v25  ;;  %v7487_v26 = vmul.f32 %v7359_v2, %v6764_v28  ;;  %v7235_v37 = vmul.f32 0.044715, %v6768_v23  ;;  %v6165_v55 = vmul.f32 0.0078125, %v6128_v39  ;;  %v18813_v25 = vld [vmem:[#allocation15_spill] sm:$0xff]  ;;  %v6004_v29 = vpop.xlane.xlu0 %6003 }
0x10f5   : > { %18812 = vst [vmem:[#allocation104_spill] sm:$0xff] %v16481_v51  ;;  %v7489_v48 = vmul.f32 %v7361_v12, %v16453_v1  ;;  %v6198_v61 = vmul.f32 %v16468_v19, %v16468_v19  ;;  %v7360_v60 = vmul.f32 %v7232_v40, %v16457_v18  ;;  %v7993_v52 = vadd.f32 1.0, %v11408_v54 }
0x10f6   : > { %v7615_v0 = vadd.f32 %v7487_v26, %v6764_v28  ;;  %v7363_v47 = vmul.f32 %v7235_v37, %v6768_v23  ;;  %v16495_v12 = vmul.f32 %v7991_v63, %v16407_v22  ;;  %v7234_v28 = vmul.f32 0.044715, %v16481_v51 }
0x10f7   : > { %v11410_v36 = vpop.eup %11409  ;;  %v7617_v20 = vadd.f32 %v7489_v48, %v16453_v1  ;;  %v7237_v26 = vmul.f32 0.044715, %v6961_v27  ;;  %v6229_v44 = vsub.f32 %v6165_v55, %v6197_v49  ;;  %v16502_v40 = vadd.f32 %v16244_v17, %v15695_v46 }
0x10f8   : > { %v7995_v7 = vadd.f32 1.0, %v11410_v36  ;;  %18814 = vst [vmem:[#allocation103_spill] sm:$0xff] %v16495_v12  ;;  %v7743_v39 = vmul.f32 0.7978846, %v7615_v0  ;;  %v7491_v11 = vmul.f32 %v7363_v47, %v6768_v23  ;;  %v16506_v37 = vadd.f32 %v16248_v41, %v15706_v59 }
0x10f9   : > { %18816 = vst [vmem:[#allocation14_spill] sm:$0xff] %v16502_v40  ;;  %v7745_v36 = vmul.f32 0.7978846, %v7617_v20  ;;  %v7365_v48 = vmul.f32 %v7237_v26, %v6961_v27  ;;  %v6166_v22 = vmul.f32 0.0078125, %v6130_v5  ;;  %v7236_v49 = vmul.f32 0.044715, %v16502_v40 }
0x10fa   : > { %v16498_v38 = vmul.f32 %v7995_v7, %v7099_v62  ;;  %v11412_v54 = vpop.eup %11411  ;;  %18817 = vst [vmem:[#allocation108_spill] sm:$0xff] %v16506_v37  ;;  %11417 = vtanh.f32 %v7743_v39  ;;  %v7619_v47 = vadd.f32 %v7491_v11, %v6768_v23  ;;  %v16513_v7 = vmul.f32 %v7993_v52, %v16413_v13  ;;  %v6006_v52 = vpop.xlane.xlu1 %6005 }
0x10fb   : > { %v16508_v0 = vpop.eup %11413  ;;  %v7997_v62 = vadd.f32 1.0, %v11412_v54  ;;  %v7493_v17 = vmul.f32 %v7365_v48, %v6961_v27  ;;  %v7238_v55 = vmul.f32 0.044715, %v16506_v37  ;;  %v6293_v26 = vadd.f32 1e-05, %v6229_v44 }
0x10fc   : > { %18815 = vst [vmem:[#allocation31_spill] sm:$0xff] %v16498_v38  ;;  %18818 = vst [vmem:[#allocation106_spill] sm:$0xff] %v16513_v7  ;;  %v16517_v20 = vpop.eup %11415  ;;  %v7747_v5 = vmul.f32 0.7978846, %v7619_v47  ;;  %v6230_v2 = vsub.f32 %v6166_v22, %v6198_v61  ;;  %11419 = vtanh.f32 %v7745_v36  ;;  %v7362_v39 = vmul.f32 %v7234_v28, %v16481_v51 }
0x10fd   : > { %v16519_v41 = vmul.f32 %v7997_v62, %v7101_v50  ;;  %v7621_v11 = vadd.f32 %v7493_v17, %v6961_v27  ;;  %v6774_v13 = vadd.f32 %v16267_v8, %v15689_v58  ;;  %v16527_v48 = vmul.f32 0.5, %v16453_v1 }
0x10fe   : > { %v7107_v50 = vmul.f32 0.5, %v6768_v23  ;;  %11421 = vtanh.f32 %v7747_v5  ;;  %v7364_v44 = vmul.f32 %v7236_v49, %v16502_v40  ;;  %v7366_v61 = vmul.f32 %v7238_v55, %v16506_v37  ;;  %v6132_v55 = vpop.xlane.xlu0 %6131 }
0x10ff   : > { %18819 = vst [vmem:[#allocation28_spill] sm:$0xff] %v16519_v41  ;;  %v7749_v62 = vmul.f32 0.7978846, %v7621_v11  ;;  %v16531_v36 = vmul.f32 0.0078125, %v6004_v29  ;;  %11423 = vrsqrt.f32 %v6293_v26  ;;  %v6294_v28 = vadd.f32 1e-05, %v6230_v2  ;;  %v6134_v26 = vpop.xlane.xlu1 %6133 }
0x1100   : > { %v7239_v22 = vmul.f32 0.044715, %v6774_v13  ;;  %v6967_v8 = vadd.f32 %v16269_v57, %v15693_v6  ;;  %v16536_v47 = vmul.f32 %v7360_v60, %v16457_v18  ;;  %v16539_v1 = vmul.f32 %v7362_v39, %v16481_v51  ;;  %v18823_v11 = vld [vmem:[#allocation93_spill] sm:$0xff] }
0x1101   : > { %v7109_v23 = vmul.f32 0.5, %v6961_v27  ;;  %11425 = vtanh.f32 %v7749_v62  ;;  %v16541_v5 = vmul.f32 0.0078125, %v6006_v52  ;;  %v6778_v29 = vadd.f32 %v16289_v42, %v15689_v58 }
0x1102   : > { %18820 = vst [vmem:[#allocation32_spill] sm:$0xff] %v16539_v1  ;;  %v7367_v17 = vmul.f32 %v7239_v22, %v6774_v13  ;;  %v7241_v49 = vmul.f32 0.044715, %v6967_v8  ;;  %v16546_v2 = vmul.f32 %v7364_v44, %v16502_v40  ;;  %v16549_v57 = vmul.f32 %v7366_v61, %v16506_v37  ;;  %v6008_v1 = vpop.xlane.xlu0 %6007 }
0x1103   : > { %v6199_v60 = vmul.f32 %v16531_v36, %v16531_v36  ;;  %v16555_v27 = vadd.f32 %v16281_v43, %v15695_v46  ;;  %11427 = vrsqrt.f32 %v6294_v28  ;;  %v16559_v44 = vmul.f32 0.5, %v6774_v13  ;;  %v6010_v51 = vpop.xlane.xlu1 %6009 }
0x1104   : > { %18821 = vst [vmem:[#allocation20_spill] sm:$0xff] %v16546_v2  ;;  %18822 = vst [vmem:[#allocation110_spill] sm:$0xff] %v16549_v57  ;;  %v11418_v39 = vpop.eup %11417  ;;  %v7495_v52 = vmul.f32 %v7367_v17, %v6774_v13  ;;  %v7369_v62 = vmul.f32 %v7241_v49, %v6967_v8  ;;  %v16561_v61 = vmul.f32 0.5, %v6967_v8  ;;  %v16565_v22 = vadd.f32 %v16283_v32, %v15706_v59  ;;  %v18824_v17 = vld [vmem:[#allocation87_spill] sm:$0xff] }
0x1105   : > { %v7243_v54 = vmul.f32 0.044715, %v6778_v29  ;;  %v6200_v58 = vmul.f32 %v16541_v5, %v16541_v5  ;;  %v6167_v28 = vmul.f32 0.0078125, %v6132_v55  ;;  %v7999_v41 = vadd.f32 1.0, %v11418_v39 }
0x1106   : > { %v7623_v43 = vadd.f32 %v7495_v52, %v6774_v13  ;;  %v7497_v63 = vmul.f32 %v7369_v62, %v6967_v8  ;;  %v11420_v7 = vpop.eup %11419  ;;  %v7240_v42 = vmul.f32 0.044715, %v16555_v27  ;;  %v16574_v13 = vadd.f32 %v16295_v24, %v15693_v6 }
0x1107   : > { %v7371_v12 = vmul.f32 %v7243_v54, %v6778_v29  ;;  %v6231_v32 = vsub.f32 %v6167_v28, %v6199_v60  ;;  %v7242_v62 = vmul.f32 0.044715, %v16565_v22  ;;  %v16577_v55 = vmul.f32 0.5, %v6778_v29 }
0x1108   : > { %v11422_v38 = vpop.eup %11421  ;;  %v7751_v57 = vmul.f32 0.7978846, %v7623_v43  ;;  %v7625_v37 = vadd.f32 %v7497_v63, %v6967_v8  ;;  %v8001_v2 = vadd.f32 1.0, %v11420_v7  ;;  %v16580_v63 = vmul.f32 %v7999_v41, %v16485_v31 }
0x1109   : > { %v8003_v52 = vadd.f32 1.0, %v11422_v38  ;;  %v7499_v39 = vmul.f32 %v7371_v12, %v6778_v29  ;;  %v11424_v49 = vpop.eup %11423  ;;  %v6295_v40 = vadd.f32 1e-05, %v6231_v32  ;;  %v7245_v38 = vmul.f32 0.044715, %v16574_v13 }
0x110a   : > { %11429 = vtanh.f32 %v7751_v57  ;;  %v7753_v54 = vmul.f32 0.7978846, %v7625_v37  ;;  %v16587_v12 = vadd.f32 %v16297_v45, %v15695_v46  ;;  %v16591_v7 = vadd.f32 %v16307_v34, %v15706_v59 }
0x110b   : > { %v11426_v43 = vpop.eup %11425  ;;  %v16582_v8 = vmul.f32 %v8003_v52, %v7107_v50  ;;  %v7627_v24 = vadd.f32 %v7499_v39, %v6778_v29  ;;  %v6168_v37 = vmul.f32 0.0078125, %v6134_v26  ;;  %11431 = vrsqrt.f32 %v6295_v40  ;;  %v6136_v52 = vpop.xlane.xlu0 %6135 }
0x110c   : > { %v8005_v60 = vadd.f32 1.0, %v11426_v43  ;;  %v7373_v41 = vmul.f32 %v7245_v38, %v16574_v13  ;;  %v16597_v29 = vmul.f32 %v8001_v2, %v16527_v48  ;;  %11433 = vtanh.f32 %v7753_v54  ;;  %v6138_v39 = vpop.xlane.xlu1 %6137 }
0x110d   : > { %v7755_v31 = vmul.f32 0.7978846, %v7627_v24  ;;  %v11428_v50 = vpop.eup %11427  ;;  %v6232_v45 = vsub.f32 %v6168_v37, %v6200_v58  ;;  %v16602_v32 = vmul.f32 0.0078125, %v6008_v1  ;;  %v16604_v26 = vmul.f32 0.0078125, %v6010_v51 }
0x110e   : > { %v16599_v28 = vmul.f32 %v8005_v60, %v7109_v23  ;;  %v7501_v34 = vmul.f32 %v7373_v41, %v16574_v13  ;;  %v7368_v43 = vmul.f32 %v7240_v42, %v16555_v27  ;;  %v7244_v48 = vmul.f32 0.044715, %v16587_v12 }
0x110f   : > { %11435 = vtanh.f32 %v7755_v31  ;;  %v6296_v23 = vadd.f32 1e-05, %v6232_v45  ;;  %v7370_v2 = vmul.f32 %v7242_v62, %v16565_v22  ;;  %v7246_v54 = vmul.f32 0.044715, %v16591_v7 }
0x1110   : > { %v7629_v58 = vadd.f32 %v7501_v34, %v16574_v13  ;;  %v6201_v51 = vmul.f32 %v16602_v32, %v16602_v32  ;;  %v6202_v1 = vmul.f32 %v16604_v26, %v16604_v26  ;;  %v6169_v24 = vmul.f32 0.0078125, %v6136_v52 }
0x1111   : > { %11437 = vrsqrt.f32 %v6296_v23  ;;  %v6170_v38 = vmul.f32 0.0078125, %v6138_v39  ;;  %v18825_v42 = vsub.f32 %v18789_v21, %v16361_v53  ;;  %v18826_v62 = vsub.f32 %v18793_v3, %v16391_v30 }
0x1112   : > { %v7757_v60 = vmul.f32 0.7978846, %v7629_v58  ;;  %v18827_v41 = vsub.f32 %v18810_v4, %v16441_v9  ;;  %v7372_v23 = vmul.f32 %v7244_v48, %v16587_v12  ;;  %v6233_v52 = vsub.f32 %v6169_v24, %v6201_v51 }
0x1113   : > { %v6355_v37 = vmul.f32 %v16508_v0, %v18825_v42  ;;  %v6356_v31 = vmul.f32 %v16517_v20, %v18826_v62  ;;  %v6234_v39 = vsub.f32 %v6170_v38, %v6202_v1  ;;  %v18828_v58 = vsub.f32 %v18813_v25, %v16468_v19 }
0x1114   : > { %v6357_v45 = vmul.f32 %v11424_v49, %v18827_v41  ;;  %v11430_v34 = vpop.eup %11429  ;;  %v16633_v0 = vmul.f32 %v7368_v43, %v16555_v27  ;;  %11439 = vtanh.f32 %v7757_v60  ;;  %v6297_v9 = vadd.f32 1e-05, %v6233_v52  ;;  %v16646_v43 = vld [vmem:[%s17890_s7] ss:$0 sm:$0xff] }
0x1115   : > { %v6358_v53 = vmul.f32 %v11428_v50, %v18828_v58  ;;  %v6393_v30 = vmul.f32 %v16038_v16, %v6355_v37  ;;  %v6394_v20 = vmul.f32 %v16038_v16, %v6356_v31  ;;  %v8007_v42 = vadd.f32 1.0, %v11430_v34  ;;  %v11432_v48 = vpop.eup %11431  ;;  %v18830_v31 = vld [vmem:[#allocation92_spill] sm:$0xff]  ;;  %v18841_v60 = vld [vmem:[#allocation6_spill] sm:$0xff] }
0x1116   : > { %v6298_v49 = vadd.f32 1e-05, %v6234_v39  ;;  %v16639_v51 = vmul.f32 %v7370_v2, %v16565_v22  ;;  %v6395_v1 = vmul.f32 %v16646_v43, %v6357_v45  ;;  %v11434_v24 = vpop.eup %11433  ;;  %v16650_v38 = vmul.f32 %v7372_v23, %v16587_v12  ;;  %v18829_v2 = vld [vmem:[#allocation94_spill] sm:$0xff]  ;;  %v18832_v58 = vld [vmem:[#allocation96_spill] sm:$0xff] }
0x1117   : > { %v6396_v62 = vmul.f32 %v16038_v16, %v6358_v53  ;;  %v6431_v19 = vadd.f32 %v16064_v15, %v6393_v30  ;;  %v6432_v50 = vadd.f32 %v16064_v15, %v6394_v20  ;;  %v16653_v16 = vmul.f32 %v7246_v54, %v16591_v7  ;;  %v18833_v53 = vld [vmem:[#allocation19_spill] sm:$0xff] }
0x1118   : > { %11441 = vrsqrt.f32 %v6297_v9  ;;  %v6266_v41 = vsub.f32 %v18830_v31, %v16604_v26  ;;  %v16661_v45 = vmul.f32 %v8007_v42, %v16559_v44  ;;  %v18831_v54 = vsub.f32 %v18823_v11, %v16531_v36  ;;  %v16672_v26 = vld [vmem:[%s17891_s8] ss:$0 sm:$0xff]  ;;  %v18834_v44 = vld [vmem:[#allocation95_spill] sm:$0xff] }
0x1119   : > { %v11436_v37 = vpop.eup %11435  ;;  %11443 = vrsqrt.f32 %v6298_v49  ;;  %v6451_v34 = vpack.c.bf16 %v6432_v50, %v6431_v19  ;;  %v6434_v52 = vadd.f32 %v16064_v15, %v6396_v62  ;;  %v7568_v30 = vadd.f32 %v18833_v53, %v18832_v58  ;;  %v18835_v42 = vld [vmem:[#allocation99_spill] sm:$0xff]  ;;  %v18836_v49 = vld [vmem:[#allocation85_spill] sm:$0xff]  ;;  %v18837_v36 = vld [vmem:[#allocation98_spill] sm:$0xff] }
0x111a   : > { %v8011_v23 = vadd.f32 1.0, %v11436_v37  ;;  %v6359_v39 = vmul.f32 %v11432_v48, %v18831_v54  ;;  %v7117_v20 = vmul.f32 0.5, %v16574_v13  ;;  %v6433_v15 = vadd.f32 %v16672_v26, %v6395_v1  ;;  %v18838_v37 = vld [vmem:[#allocation8_spill] sm:$0xff]  ;;  %v18844_v31 = vld [vmem:[#allocation70_spill] sm:$0xff] }
0x111b   : > { %6822 = vmatmul.mubr.bf16.gmra.mrb[240].mxu1 %v6451_v34  ;;  %7015 = vmatmul.mubr.bf16.gmra.mrb[240].mxu0 %v6451_v34  ;;  %v7572_v9 = vadd.f32 %v18835_v42, %v18834_v44  ;;  %v7570_v62 = vadd.f32 %v18837_v36, %v18836_v49  ;;  %v11438_v48 = vpop.eup %11437  ;;  %v8009_v19 = vadd.f32 1.0, %v11434_v24  ;;  %v7696_v13 = vmul.f32 0.7978846, %v7568_v30  ;;  %v18839_v34 = vld [vmem:[#allocation27_spill] sm:$0xff]  ;;  %v18846_v24 = vld [vmem:[#allocation69_spill] sm:$0xff] }
0x111c   : > { %v16680_v50 = vmul.f32 %v8011_v23, %v16577_v55  ;;  %6831 = vmatprep.mubr.bf16.mxu1 %v18607_v35  ;;  %7024 = vmatprep.mubr.bf16.mxu0 %v18607_v35  ;;  %v7574_v54 = vadd.f32 %v18839_v34, %v18838_v37  ;;  %v6452_v1 = vpack.c.bf16 %v6434_v52, %v6433_v15  ;;  %v18842_v34 = vld [vmem:[#allocation10_spill] sm:$0xff]  ;;  %v18843_v15 = vld [vmem:[#allocation25_spill] sm:$0xff] }
0x111d   : > { %v18840_v53 = vsub.f32 %v18824_v17, %v16541_v5  ;;  %v7700_v40 = vmul.f32 0.7978846, %v7572_v9  ;;  %v7698_v36 = vmul.f32 0.7978846, %v7570_v62  ;;  %v6397_v55 = vmul.f32 %v16646_v43, %v6359_v39  ;;  %v18847_v17 = vld [vmem:[#allocation73_spill] sm:$0xff] }
0x111e   : > { %11445 = vtanh.f32 %v7696_v13  ;;  %v7702_v23 = vmul.f32 0.7978846, %v7574_v54  ;;  %v11440_v57 = vpop.eup %11439  ;;  %v7576_v52 = vadd.f32 %v18842_v34, %v18841_v60  ;;  %v7580_v5 = vadd.f32 %v18844_v31, %v18843_v15  ;;  %v18845_v34 = vld [vmem:[#allocation100_spill] sm:$0xff] }
0x111f   : > { %v6360_v42 = vmul.f32 %v11438_v48, %v18840_v53  ;;  %11447 = vtanh.f32 %v7700_v40  ;;  %v16698_v9 = vmul.f32 %v8009_v19, %v16561_v61  ;;  %v8013_v62 = vadd.f32 1.0, %v11440_v57  ;;  %v18848_v61 = vld [vmem:[#allocation63_spill] sm:$0xff] }
0x1120   : > { %v7056_v48 = vmul.f32 0.5, %v18832_v58  ;;  %11449 = vtanh.f32 %v7698_v36  ;;  %v7060_v39 = vmul.f32 0.5, %v18834_v44  ;;  %v7704_v13 = vmul.f32 0.7978846, %v7576_v52  ;;  %v18850_v52 = vld [vmem:[#allocation62_spill] sm:$0xff] }
0x1121   : > { %v6398_v30 = vmul.f32 %v16646_v43, %v6360_v42  ;;  %11451 = vtanh.f32 %v7702_v23  ;;  %v7708_v54 = vmul.f32 0.7978846, %v7580_v5  ;;  %v16702_v40 = vmul.f32 %v8013_v62, %v7117_v20  ;;  %v18853_v62 = vld [vmem:[#allocation33_spill] sm:$0xff] }
0x1122   : > { %v11442_v53 = vpop.eup %11441  ;;  %v7058_v42 = vmul.f32 0.5, %v18836_v49  ;;  %v7578_v31 = vadd.f32 %v18846_v24, %v18845_v34  ;;  %v7582_v19 = vadd.f32 %v18848_v61, %v18847_v17  ;;  %v6435_v58 = vadd.f32 %v16672_v26, %v6397_v55 }
0x1123   : > { %v11444_v57 = vpop.eup %11443  ;;  %6832 = vmatmul.mubr.bf16.gmra.mrb[244].mxu1 %v6452_v1  ;;  %7025 = vmatmul.mubr.bf16.gmra.mrb[244].mxu0 %v6452_v1  ;;  %v6436_v44 = vadd.f32 %v16672_v26, %v6398_v30  ;;  %v7062_v36 = vmul.f32 0.5, %v18838_v37  ;;  %11453 = vtanh.f32 %v7704_v13  ;;  %v18849_v1 = vsub.f32 %v18829_v2, %v16602_v32  ;;  %v18851_v30 = vld [vmem:[#allocation102_spill] sm:$0xff]  ;;  %v18852_v37 = vld [vmem:[#allocation56_spill] sm:$0xff]  ;;  %v18857_v2 = vld [vmem:[#allocation3_spill] sm:$0xff] }
0x1124   : > { %6841 = vmatprep.mubr.bf16.mxu1 %v18607_v35  ;;  %7034 = vmatprep.mubr.bf16.mxu0 %v18607_v35  ;;  %v6362_v49 = vmul.f32 %v11444_v57, %v6266_v41  ;;  %11455 = vtanh.f32 %v7708_v54  ;;  %v7706_v24 = vmul.f32 0.7978846, %v7578_v31  ;;  %v7710_v55 = vmul.f32 0.7978846, %v7582_v19  ;;  %v18854_v57 = vld [vmem:[#allocation52_spill] sm:$0xff] }
0x1125   : > { %v6361_v23 = vmul.f32 %v11442_v53, %v18849_v1  ;;  %v7584_v5 = vadd.f32 %v18851_v30, %v18850_v52  ;;  %v7588_v13 = vadd.f32 %v18853_v62, %v18852_v37  ;;  %v7064_v20 = vmul.f32 0.5, %v18841_v60  ;;  %v18855_v1 = vld [vmem:[#allocation105_spill] sm:$0xff] }
0x1126   : > { %v6400_v61 = vmul.f32 %v16646_v43, %v6362_v49  ;;  %v7068_v11 = vmul.f32 0.5, %v18843_v15  ;;  %11457 = vtanh.f32 %v7706_v24  ;;  %v6453_v41 = vpack.c.bf16 %v6436_v44, %v6435_v58 }
0x1127   : > { %11459 = vtanh.f32 %v7710_v55  ;;  %v7712_v54 = vmul.f32 0.7978846, %v7584_v5  ;;  %v7716_v31 = vmul.f32 0.7978846, %v7588_v13  ;;  %v7066_v53 = vmul.f32 0.5, %v18845_v34 }
0x1128   : > { %v11446_v32 = vpop.eup %11445  ;;  %v16728_v19 = vmul.f32 0.5, %v18847_v17  ;;  %v7586_v30 = vadd.f32 %v18855_v1, %v18854_v57  ;;  %v7590_v49 = vadd.f32 %v16301_v10, %v16112_v56  ;;  %v6399_v15 = vmul.f32 %v16646_v43, %v6361_v23  ;;  %v18856_v1 = vld [vmem:[#allocation109_spill] sm:$0xff] }
0x1129   : > { %v11448_v60 = vpop.eup %11447  ;;  %v7952_v24 = vadd.f32 1.0, %v11446_v32  ;;  %11461 = vtanh.f32 %v7712_v54  ;;  %v7592_v58 = vadd.f32 %v16304_v14, %v16134_v33  ;;  %v6438_v34 = vadd.f32 %v16672_v26, %v6400_v61 }
0x112a   : > { %v11450_v44 = vpop.eup %11449  ;;  %v7956_v55 = vadd.f32 1.0, %v11448_v60  ;;  %11463 = vtanh.f32 %v7716_v31  ;;  %v7714_v17 = vmul.f32 0.7978846, %v7586_v30  ;;  %v7718_v10 = vmul.f32 0.7978846, %v7590_v49 }
0x112b   : > { %v11452_v5 = vpop.eup %11451  ;;  %6842 = vmatmul.mubr.bf16.gmra.mrb[248].mxu1 %v6453_v41  ;;  %7035 = vmatmul.mubr.bf16.gmra.mrb[248].mxu0 %v6453_v41  ;;  %v8080_v62 = vmul.f32 %v7952_v24, %v7056_v48  ;;  %v7954_v13 = vadd.f32 1.0, %v11450_v44  ;;  %v7596_v43 = vadd.f32 %v18857_v2, %v18856_v1  ;;  %v7720_v61 = vmul.f32 0.7978846, %v7592_v58  ;;  %v18858_v44 = vld [vmem:[#allocation66_spill] sm:$0xff] }
0x112c   : > { %6851 = vmatprep.mubr.bf16.mxu1 %v18607_v35  ;;  %7044 = vmatprep.mubr.bf16.mxu0 %v18607_v35  ;;  %v8084_v14 = vmul.f32 %v7956_v55, %v7060_v39  ;;  %v7958_v23 = vadd.f32 1.0, %v11452_v5  ;;  %11465 = vtanh.f32 %v7714_v17  ;;  %v6437_v31 = vadd.f32 %v16672_v26, %v6399_v15  ;;  %v18859_v35 = vld [vmem:[#allocation9_spill] sm:$0xff]  ;;  %v18861_v15 = vld [vmem:[#allocation22_spill] sm:$0xff] }
0x112d   : > { %v11454_v54 = vpop.eup %11453  ;;  %v8082_v32 = vmul.f32 %v7954_v13, %v7058_v42  ;;  %11467 = vtanh.f32 %v7718_v10  ;;  %v7724_v41 = vmul.f32 0.7978846, %v7596_v43  ;;  %v7594_v39 = vadd.f32 %v18859_v35, %v18858_v44  ;;  %v18860_v42 = vld [vmem:[#allocation107_spill] sm:$0xff] }
0x112e   : > { %v11456_v48 = vpop.eup %11455  ;;  %v8208_v30 = vpack.c.bf16 %v8084_v14, %v8080_v62  ;;  %v8086_v49 = vmul.f32 %v7958_v23, %v7062_v36  ;;  %v7960_v60 = vadd.f32 1.0, %v11454_v54  ;;  %11469 = vtanh.f32 %v7720_v61  ;;  %v18862_v23 = vld [vmem:[#allocation12_spill] sm:$0xff]  ;;  %v18863_v61 = vld [vmem:[#allocation57_spill] sm:$0xff] }
0x112f   : > { %v6454_v2 = vpack.c.bf16 %v6438_v34, %v6437_v31  ;;  %v7964_v24 = vadd.f32 1.0, %v11456_v48  ;;  %11471 = vtanh.f32 %v7724_v41  ;;  %v7072_v58 = vmul.f32 0.5, %v18850_v52  ;;  %v18864_v31 = vld [vmem:[#allocation67_spill] sm:$0xff]  ;;  %v18865_v41 = vld [vmem:[#allocation76_spill] sm:$0xff] }
0x1130   : > { %v11458_v55 = vpop.eup %11457  ;;  %v8210_v17 = vpack.c.bf16 %v8086_v49, %v8082_v32  ;;  %v7076_v26 = vmul.f32 0.5, %v18852_v37  ;;  %v7598_v5 = vadd.f32 %v18861_v15, %v18860_v42  ;;  %v8088_v62 = vmul.f32 %v7960_v60, %v7064_v20  ;;  %v18866_v15 = vld [vmem:[#allocation26_spill] sm:$0xff] }
0x1131   : > { %v11460_v13 = vpop.eup %11459  ;;  %v8092_v36 = vmul.f32 %v7964_v24, %v7068_v11  ;;  %v7962_v10 = vadd.f32 1.0, %v11458_v55  ;;  %v7722_v43 = vmul.f32 0.7978846, %v7594_v39  ;;  %v7600_v54 = vadd.f32 %v18863_v61, %v18862_v23 }
0x1132   : > { %v7966_v34 = vadd.f32 1.0, %v11460_v13  ;;  %v7726_v14 = vmul.f32 0.7978846, %v7598_v5  ;;  %v7604_v32 = vadd.f32 %v18865_v41, %v18864_v31  ;;  %v7074_v49 = vmul.f32 0.5, %v18854_v57  ;;  %v18867_v5 = vld [vmem:[#allocation58_spill] sm:$0xff]  ;;  %v18868_v57 = vld [vmem:[#allocation60_spill] sm:$0xff] }
0x1133   : > { %v11462_v48 = vpop.eup %11461  ;;  %6852 = vmatmul.mubr.bf16.gmra.mrb[252].mxu1 %v6454_v2  ;;  %7045 = vmatmul.mubr.bf16.gmra.mrb[252].mxu0 %v6454_v2  ;;  %v8212_v52 = vpack.c.bf16 %v8092_v36, %v8088_v62  ;;  %v8090_v37 = vmul.f32 %v7962_v10, %v7066_v53  ;;  %11473 = vtanh.f32 %v7722_v43  ;;  %v7728_v24 = vmul.f32 0.7978846, %v7600_v54 }
0x1134   : > { %v11464_v20 = vpop.eup %11463  ;;  %8566 = vmatprep.mubr.bf16.mxu1 %v8208_v30  ;;  %8727 = vmatprep.mubr.bf16.mxu0 %v8210_v17  ;;  %v8094_v11 = vmul.f32 %v7966_v34, %v16728_v19  ;;  %v7968_v60 = vadd.f32 1.0, %v11462_v48  ;;  %11475 = vtanh.f32 %v7726_v14  ;;  %v7078_v39 = vmul.f32 0.5, %v16112_v56  ;;  %v18869_v30 = vld [vmem:[#allocation74_spill] sm:$0xff] }
0x1135   : > { %v7972_v35 = vadd.f32 1.0, %v11464_v20  ;;  %v7732_v55 = vmul.f32 0.7978846, %v7604_v32  ;;  %v7602_v2 = vadd.f32 %v18867_v5, %v18866_v15  ;;  %11477 = vtanh.f32 %v7728_v24  ;;  %v18870_v20 = vld [vmem:[#allocation59_spill] sm:$0xff]  ;;  %v18876_v5 = vld [vmem:[#allocation54_spill] sm:$0xff] }
0x1136   : > { %v11466_v13 = vpop.eup %11465  ;;  %v8214_v53 = vpack.c.bf16 %v8094_v11, %v8090_v37  ;;  %v16758_v62 = vmul.f32 %v7968_v60, %v7072_v58  ;;  %v7606_v17 = vadd.f32 %v18869_v30, %v18868_v57  ;;  %v7080_v14 = vmul.f32 0.5, %v16134_v33  ;;  %v18871_v11 = vld [vmem:[#allocation101_spill] sm:$0xff]  ;;  %v18872_v33 = vld [vmem:[#allocation71_spill] sm:$0xff] }
0x1137   : > { %v11468_v36 = vpop.eup %11467  ;;  %v16762_v19 = vmul.f32 %v7972_v35, %v7076_v26  ;;  %v7970_v10 = vadd.f32 1.0, %v11466_v13  ;;  %11479 = vtanh.f32 %v7732_v55  ;;  %v7730_v43 = vmul.f32 0.7978846, %v7602_v2  ;;  %v18875_v55 = vld [vmem:[#allocation61_spill] sm:$0xff] }
0x1138   : > { %v11470_v34 = vpop.eup %11469  ;;  %v7974_v56 = vadd.f32 1.0, %v11468_v36  ;;  %v7084_v61 = vmul.f32 0.5, %v18856_v1  ;;  %v7734_v54 = vmul.f32 0.7978846, %v7606_v17  ;;  %v7608_v60 = vadd.f32 %v18871_v11, %v18870_v20  ;;  %v18873_v1 = vld [vmem:[#allocation72_spill] sm:$0xff]  ;;  %v18879_v13 = vld [vmem:[#allocation97_spill] sm:$0xff] }
0x1139   : > { %v11472_v41 = vpop.eup %11471  ;;  %v8216_v58 = vpack.c.bf16 %v16762_v19, %v16758_v62  ;;  %v8098_v32 = vmul.f32 %v7970_v10, %v7074_v49  ;;  %v7976_v48 = vadd.f32 1.0, %v11470_v34  ;;  %11481 = vtanh.f32 %v7730_v43  ;;  %v18880_v36 = vld [vmem:[#allocation77_spill] sm:$0xff] }
0x113a   : > { %v8102_v37 = vmul.f32 %v7974_v56, %v7078_v39  ;;  %v7980_v26 = vadd.f32 1.0, %v11472_v41  ;;  %11483 = vtanh.f32 %v7734_v54  ;;  %v16772_v24 = vmul.f32 %v16653_v16, %v16591_v7  ;;  %v18878_v39 = vld [vmem:[#allocation75_spill] sm:$0xff]  ;;  %v18881_v19 = vld [vmem:[#allocation29_spill] sm:$0xff] }
0x113b   : > { %v18874_v35 = vpack.c.bf16 %v18872_v33, %v18873_v1  ;;  %v18877_v2 = vpack.c.bf16 %v18875_v55, %v18876_v5  ;;  %v16780_v49 = vmul.f32 %v7976_v48, %v7080_v14  ;;  %v7612_v62 = vadd.f32 %v18879_v13, %v18878_v39  ;;  %v18882_v14 = vld [vmem:[#allocation78_spill] sm:$0xff]  ;;  %v18883_v41 = vld [vmem:[#allocation23_spill] sm:$0xff]  ;;  %v18885_v1 = vld [vmem:[#allocation20_spill] sm:$0xff] }
0x113c   : > { %v8218_v30 = vpack.c.bf16 %v8102_v37, %v8098_v32  ;;  %v16784_v17 = vmul.f32 %v7980_v26, %v7084_v61  ;;  %v7736_v16 = vmul.f32 0.7978846, %v7608_v60  ;;  %v7610_v10 = vadd.f32 %v18881_v19, %v18880_v36  ;;  %v18884_v33 = vld [vmem:[#allocation14_spill] sm:$0xff] }
0x113d   : > { %8567 = vmatmul.mubr.bf16.vlgmr.msra.gmra.mrb[0].mxu1 %v18874_v35  ;;  %8728 = vmatmul.mubr.bf16.vlgmr.msra.gmra.mrb[0].mxu0 %v18877_v2  ;;  %v11474_v43 = vpop.eup %11473  ;;  %v7082_v34 = vmul.f32 0.5, %v18858_v44  ;;  %v7086_v56 = vmul.f32 0.5, %v18860_v42  ;;  %v7740_v54 = vmul.f32 0.7978846, %v7612_v62  ;;  %v7614_v48 = vadd.f32 %v18883_v41, %v18882_v14  ;;  %v18889_v41 = vld [vmem:[#allocation64_spill] sm:$0xff] }
0x113e   : > { %8574 = vmatprep.mubr.bf16.mxu1 %v8212_v52  ;;  %8735 = vmatprep.mubr.bf16.mxu0 %v8214_v53  ;;  %v11476_v11 = vpop.eup %11475  ;;  %v8220_v52 = vpack.c.bf16 %v16784_v17, %v16780_v49  ;;  %v7978_v53 = vadd.f32 1.0, %v11474_v43  ;;  %11485 = vtanh.f32 %v7736_v16  ;;  %v7738_v61 = vmul.f32 0.7978846, %v7610_v10  ;;  %v18886_v10 = vld [vmem:[#allocation104_spill] sm:$0xff] }
0x113f   : > { %v7982_v32 = vadd.f32 1.0, %v11476_v11  ;;  %11487 = vtanh.f32 %v7740_v54  ;;  %v7742_v37 = vmul.f32 0.7978846, %v7614_v48  ;;  %v7616_v26 = vadd.f32 %v16536_v47, %v16457_v18  ;;  %v11478_v44 = vpop.eup %11477  ;;  %v18887_v43 = vld [vmem:[#allocation32_spill] sm:$0xff]  ;;  %v18892_v11 = vld [vmem:[#allocation53_spill] sm:$0xff] }
0x1140   : > { %v8106_v60 = vmul.f32 %v7978_v53, %v7082_v34  ;;  %v7088_v42 = vmul.f32 0.5, %v18862_v23  ;;  %11489 = vtanh.f32 %v7738_v61  ;;  %v7620_v35 = vadd.f32 %v18885_v1, %v18884_v33  ;;  %v18888_v34 = vld [vmem:[#allocation65_spill] sm:$0xff]  ;;  %v18891_v48 = vld [vmem:[#allocation68_spill] sm:$0xff] }
0x1141   : > { %v11480_v55 = vpop.eup %11479  ;;  %v8110_v5 = vmul.f32 %v7982_v32, %v7086_v56  ;;  %v7984_v2 = vadd.f32 1.0, %v11478_v44  ;;  %11491 = vtanh.f32 %v7742_v37  ;;  %v7744_v13 = vmul.f32 0.7978846, %v7616_v26  ;;  %v18894_v32 = vld [vmem:[#allocation108_spill] sm:$0xff] }
0x1142   : > { %v7092_v62 = vmul.f32 0.5, %v18864_v31  ;;  %v7988_v16 = vadd.f32 1.0, %v11480_v55  ;;  %v7748_v19 = vmul.f32 0.7978846, %v7620_v35  ;;  %v7618_v47 = vadd.f32 %v18887_v43, %v18886_v10  ;;  %v18895_v31 = vld [vmem:[#allocation110_spill] sm:$0xff] }
0x1143   : > { %v11482_v54 = vpop.eup %11481  ;;  %v18890_v23 = vpack.c.bf16 %v18888_v34, %v18889_v41  ;;  %v18893_v53 = vpack.c.bf16 %v18891_v48, %v18892_v11  ;;  %v8222_v56 = vpack.c.bf16 %v8110_v5, %v8106_v60  ;;  %v16808_v61 = vmul.f32 %v7984_v2, %v7088_v42 }
0x1144   : > { %11493 = vtanh.f32 %v7744_v13  ;;  %v7622_v37 = vadd.f32 %v18895_v31, %v18894_v32  ;;  %v11484_v26 = vpop.eup %11483  ;;  %v16812_v44 = vmul.f32 %v7988_v16, %v7092_v62  ;;  %v7986_v1 = vadd.f32 1.0, %v11482_v54 }
0x1145   : > { %8575 = vmatmul.mubr.bf16.gmra.mrb[4].mxu1 %v18890_v23  ;;  %8736 = vmatmul.mubr.bf16.gmra.mrb[4].mxu0 %v18893_v53  ;;  %11495 = vtanh.f32 %v7748_v19  ;;  %v7746_v35 = vmul.f32 0.7978846, %v7618_v47  ;;  %v7090_v55 = vmul.f32 0.5, %v18866_v15  ;;  %v7094_v43 = vmul.f32 0.5, %v18868_v57 }
0x1146   : > { %8582 = vmatprep.mubr.bf16.mxu1 %v8216_v58  ;;  %8743 = vmatprep.mubr.bf16.mxu0 %v8218_v30  ;;  %v7990_v34 = vadd.f32 1.0, %v11484_v26  ;;  %v7750_v60 = vmul.f32 0.7978846, %v7622_v37  ;;  %v8224_v42 = vpack.c.bf16 %v16812_v44, %v16808_v61  ;;  %v7624_v5 = vadd.f32 %v16633_v0, %v16555_v27  ;;  %v18897_v61 = vld [vmem:[#allocation16_spill] sm:$0xff]  ;;  %v18900_v37 = vld [vmem:[#allocation5_spill] sm:$0xff] }
0x1147   : > { %11497 = vtanh.f32 %v7746_v35  ;;  %v8114_v58 = vmul.f32 %v7986_v1, %v7090_v55  ;;  %v7628_v2 = vadd.f32 %v16650_v38, %v16587_v12  ;;  %v7096_v15 = vmul.f32 0.5, %v18870_v20  ;;  %v18896_v20 = vld [vmem:[#allocation24_spill] sm:$0xff] }
0x1148   : > { %v8118_v30 = vmul.f32 %v7990_v34, %v7094_v43  ;;  %11499 = vtanh.f32 %v7750_v60  ;;  %v11486_v13 = vpop.eup %11485  ;;  %v7752_v62 = vmul.f32 0.7978846, %v7624_v5  ;;  %v7626_v57 = vadd.f32 %v16639_v51, %v16565_v22  ;;  %v18899_v51 = vld [vmem:[#allocation7_spill] sm:$0xff] }
0x1149   : > { %v7630_v16 = vadd.f32 %v16772_v24, %v16591_v7  ;;  %v11488_v19 = vpop.eup %11487  ;;  %v7100_v0 = vmul.f32 0.5, %v18878_v39  ;;  %v7992_v54 = vadd.f32 1.0, %v11486_v13  ;;  %v7756_v41 = vmul.f32 0.7978846, %v7628_v2 }
0x114a   : > { %v8226_v47 = vpack.c.bf16 %v8118_v30, %v8114_v58  ;;  %v11490_v23 = vpop.eup %11489  ;;  %v7996_v48 = vadd.f32 1.0, %v11488_v19  ;;  %11501 = vtanh.f32 %v7752_v62  ;;  %v7754_v38 = vmul.f32 0.7978846, %v7626_v57  ;;  %v18902_v19 = vld [vmem:[#allocation50_spill] sm:$0xff] }
0x114b   : > { %v7758_v11 = vmul.f32 0.7978846, %v7630_v16  ;;  %v11492_v53 = vpop.eup %11491  ;;  %v18898_v31 = vpack.c.bf16 %v18896_v20, %v18897_v61  ;;  %v18901_v26 = vpack.c.bf16 %v18899_v51, %v18900_v37  ;;  %v7098_v24 = vmul.f32 0.5, %v18880_v36 }
0x114c   : > { %v7102_v39 = vmul.f32 0.5, %v18882_v14  ;;  %v7994_v44 = vadd.f32 1.0, %v11490_v23  ;;  %11503 = vtanh.f32 %v7756_v41  ;;  %v8120_v1 = vmul.f32 %v7992_v54, %v7096_v15  ;;  %v18905_v41 = vld [vmem:[#allocation51_spill] sm:$0xff] }
0x114d   : > { %8583 = vmatmul.mubr.bf16.gmra.mrb[8].mxu1 %v18898_v31  ;;  %8744 = vmatmul.mubr.bf16.gmra.mrb[8].mxu0 %v18901_v26  ;;  %v8124_v35 = vmul.f32 %v7996_v48, %v7100_v0  ;;  %v7998_v55 = vadd.f32 1.0, %v11492_v53  ;;  %11505 = vtanh.f32 %v7754_v38  ;;  %v7104_v14 = vmul.f32 0.5, %v16457_v18  ;;  %v18903_v0 = vld [vmem:[#allocation18_spill] sm:$0xff]  ;;  %v18906_v18 = vld [vmem:[#allocation55_spill] sm:$0xff] }
0x114e   : > { %8590 = vmatprep.mubr.bf16.mxu1 %v8220_v52  ;;  %8751 = vmatprep.mubr.bf16.mxu0 %v8222_v56  ;;  %v11494_v43 = vpop.eup %11493  ;;  %11507 = vtanh.f32 %v7758_v11  ;;  %v8122_v5 = vmul.f32 %v7994_v44, %v7098_v24  ;;  %v7108_v30 = vmul.f32 0.5, %v18884_v33  ;;  %v7106_v62 = vmul.f32 0.5, %v18886_v10 }
0x114f   : > { %v11496_v34 = vpop.eup %11495  ;;  %v8228_v60 = vpack.c.bf16 %v8124_v35, %v8120_v1  ;;  %v8126_v58 = vmul.f32 %v7998_v55, %v7102_v39  ;;  %v8000_v36 = vadd.f32 1.0, %v11494_v43  ;;  %v7110_v57 = vmul.f32 0.5, %v18894_v32  ;;  %v18908_v43 = vld [vmem:[#allocation81_spill] sm:$0xff] }
0x1150   : > { %v8004_v2 = vadd.f32 1.0, %v11496_v34  ;;  %v18904_v54 = vpack.c.bf16 %v18902_v19, %v18903_v0  ;;  %v18907_v23 = vpack.c.bf16 %v18905_v41, %v18906_v18  ;;  %v7112_v32 = vmul.f32 0.5, %v16555_v27  ;;  %v18909_v34 = vld [vmem:[#allocation80_spill] sm:$0xff]  ;;  %v18911_v27 = vld [vmem:[#allocation13_spill] sm:$0xff] }
0x1151   : > { %v11498_v13 = vpop.eup %11497  ;;  %v8230_v49 = vpack.c.bf16 %v8126_v58, %v8122_v5  ;;  %v8128_v52 = vmul.f32 %v8000_v36, %v7104_v14  ;;  %v7116_v31 = vmul.f32 0.5, %v16587_v12  ;;  %v7114_v26 = vmul.f32 0.5, %v16565_v22  ;;  %v18912_v58 = vld [vmem:[#allocation79_spill] sm:$0xff] }
0x1152   : > { %v11500_v17 = vpop.eup %11499  ;;  %v8132_v56 = vmul.f32 %v8004_v2, %v7108_v30  ;;  %v8002_v15 = vadd.f32 1.0, %v11498_v13  ;;  %v18910_v5 = vpack.c.bf16 %v18908_v43, %v18909_v34  ;;  %v18913_v12 = vpack.c.bf16 %v18911_v27, %v18912_v58  ;;  %v18914_v36 = vld [vmem:[#allocation31_spill] sm:$0xff]  ;;  %v18918_v2 = vld [vmem:[#allocation106_spill] sm:$0xff] }
0x1153   : > { %v8006_v16 = vadd.f32 1.0, %v11500_v17  ;;  %v18915_v14 = vld [vmem:[#allocation103_spill] sm:$0xff]  ;;  %v18920_v17 = vpack.c.bf16 %v16582_v8, %v16580_v63 }
0x1154   : > { %v8232_v33 = vpack.c.bf16 %v8132_v56, %v8128_v52  ;;  %v11502_v48 = vpop.eup %11501  ;;  %v8130_v38 = vmul.f32 %v8002_v15, %v7106_v62  ;;  %v18916_v30 = vpack.c.bf16 %v18914_v36, %v18915_v14  ;;  %v18921_v52 = vpack.c.bf16 %v16599_v28, %v16597_v29  ;;  %v18924_v62 = vld [vmem:[#allocation2_spill] sm:$0xff] }
0x1155   : > { %8591 = vmatmul.mubr.bf16.gmra.mrb[12].mxu1 %v18904_v54  ;;  %8752 = vmatmul.mubr.bf16.gmra.mrb[12].mxu0 %v18907_v23  ;;  %v8134_v11 = vmul.f32 %v8006_v16, %v7110_v57  ;;  %v8008_v20 = vadd.f32 1.0, %v11502_v48 }
0x1156   : > { %8598 = vmatprep.mubr.bf16.mxu1 %v8224_v42  ;;  %8759 = vmatprep.mubr.bf16.mxu0 %v8226_v47  ;;  %v11504_v53 = vpop.eup %11503  ;;  %v7118_v42 = vmul.f32 0.5, %v16591_v7  ;;  %v18917_v7 = vld [vmem:[#allocation28_spill] sm:$0xff] }
0x1157   : > { %v11506_v10 = vpop.eup %11505  ;;  %v8234_v61 = vpack.c.bf16 %v8134_v11, %v8130_v38  ;;  %v8012_v51 = vadd.f32 1.0, %v11504_v53  ;;  %v8136_v39 = vmul.f32 %v8008_v20, %v7112_v32  ;;  %v18919_v13 = vpack.c.bf16 %v18917_v7, %v18918_v2 }
0x1158   : > { %v11508_v37 = vpop.eup %11507  ;;  %v8010_v24 = vadd.f32 1.0, %v11506_v10 }
0x1159   : > { %v8140_v44 = vmul.f32 %v8012_v51, %v7116_v31  ;;  %v8014_v47 = vadd.f32 1.0, %v11508_v37 }
0x115a   : > { %v8138_v35 = vmul.f32 %v8010_v24, %v7114_v26 }
0x115b   : > { %v8236_v1 = vpack.c.bf16 %v8140_v44, %v8136_v39  ;;  %v8142_v55 = vmul.f32 %v8014_v47, %v7118_v42 }
0x115d   : > { %8599 = vmatmul.mubr.bf16.gmra.mrb[16].mxu1 %v18910_v5  ;;  %8760 = vmatmul.mubr.bf16.gmra.mrb[16].mxu0 %v18913_v12  ;;  %v8238_v22 = vpack.c.bf16 %v8142_v55, %v8138_v35 }
0x115e   : > { %8606 = vmatprep.mubr.bf16.mxu1 %v8228_v60  ;;  %8767 = vmatprep.mubr.bf16.mxu0 %v8230_v49  ;;  %v18922_v60 = vpack.c.bf16 %v16680_v50, %v16661_v45  ;;  %v18923_v49 = vpack.c.bf16 %v16702_v40, %v16698_v9 }
0x1165   : > { %8607 = vmatmul.mubr.bf16.gmra.mrb[20].mxu1 %v18916_v30  ;;  %8768 = vmatmul.mubr.bf16.gmra.mrb[20].mxu0 %v18919_v13 }
0x1166   : > { %8614 = vmatprep.mubr.bf16.mxu1 %v8232_v33  ;;  %8775 = vmatprep.mubr.bf16.mxu0 %v8234_v61 }
0x116d   : > { %8615 = vmatmul.mubr.bf16.gmra.mrb[24].mxu1 %v18920_v17  ;;  %8776 = vmatmul.mubr.bf16.gmra.mrb[24].mxu0 %v18921_v52 }
0x116e   : > { %8622 = vmatprep.mubr.bf16.mxu1 %v8236_v1  ;;  %8783 = vmatprep.mubr.bf16.mxu0 %v8238_v22 }
0x1175   : > { %8623 = vmatmul.mubr.bf16.gmra.mrb[28].mxu1 %v18922_v60  ;;  %8784 = vmatmul.mubr.bf16.gmra.mrb[28].mxu0 %v18923_v49 }
0x118a   : > { %v6783_v56 = vpop.f32.mrb[224].mxu1  ;;  %v6976_v15 = vpop.f32.mrb[224].mxu0 }
0x118b   : > { %v6784_v57 = vadd.f32 %v6783_v56, %v18924_v62  ;;  %v6977_v63 = vadd.f32 %v6976_v15, %v15693_v6  ;;  %v6785_v8 = vpop.f32.mrb[225].mxu1  ;;  %v6978_v16 = vpop.f32.mrb[225].mxu0 }
0x118c   : > { %v6786_v29 = vadd.f32 %v6785_v8, %v15695_v46  ;;  %v16881_v28 = vadd.f32 %v6978_v16, %v15706_v59  ;;  %v6787_v19 = vpop.f32.mrb[226].mxu1  ;;  %v6980_v45 = vpop.f32.mrb[226].mxu0 }
0x118d   : > { %v7247_v50 = vmul.f32 0.044715, %v6784_v57  ;;  %v7249_v0 = vmul.f32 0.044715, %v6977_v63  ;;  %v6788_v40 = vadd.f32 %v6787_v19, %v18924_v62  ;;  %v6981_v41 = vadd.f32 %v6980_v45, %v15693_v6  ;;  %v6789_v18 = vpop.f32.mrb[227].mxu1  ;;  %v6982_v23 = vpop.f32.mrb[227].mxu0 }
0x118e   : > { %v7248_v54 = vmul.f32 0.044715, %v6786_v29  ;;  %v7250_v9 = vmul.f32 0.044715, %v16881_v28  ;;  %v6790_v38 = vadd.f32 %v6789_v18, %v15695_v46  ;;  %v16888_v11 = vadd.f32 %v6982_v23, %v15706_v59 }
0x118f   : > { %v7375_v33 = vmul.f32 %v7247_v50, %v6784_v57  ;;  %v7377_v48 = vmul.f32 %v7249_v0, %v6977_v63  ;;  %v7251_v53 = vmul.f32 0.044715, %v6788_v40  ;;  %v7253_v32 = vmul.f32 0.044715, %v6981_v41 }
0x1190   : > { %v7376_v61 = vmul.f32 %v7248_v54, %v6786_v29  ;;  %v7378_v31 = vmul.f32 %v7250_v9, %v16881_v28  ;;  %v7252_v37 = vmul.f32 0.044715, %v6790_v38  ;;  %v7254_v44 = vmul.f32 0.044715, %v16888_v11 }
0x1191   : > { %v7503_v20 = vmul.f32 %v7375_v33, %v6784_v57  ;;  %v7505_v10 = vmul.f32 %v7377_v48, %v6977_v63  ;;  %v7379_v51 = vmul.f32 %v7251_v53, %v6788_v40  ;;  %v7381_v39 = vmul.f32 %v7253_v32, %v6981_v41 }
0x1192   : > { %v7380_v47 = vmul.f32 %v7252_v37, %v6790_v38  ;;  %v7504_v55 = vmul.f32 %v7376_v61, %v6786_v29  ;;  %v16892_v34 = vmul.f32 0.5, %v6784_v57  ;;  %v7506_v58 = vmul.f32 %v7378_v31, %v16881_v28 }
0x1193   : > { %v7631_v26 = vadd.f32 %v7503_v20, %v6784_v57  ;;  %v7633_v24 = vadd.f32 %v7505_v10, %v6977_v63  ;;  %v7507_v42 = vmul.f32 %v7379_v51, %v6788_v40  ;;  %v7509_v43 = vmul.f32 %v7381_v39, %v6981_v41 }
0x1194   : > { %v7508_v27 = vmul.f32 %v7380_v47, %v6790_v38  ;;  %v7382_v22 = vmul.f32 %v7254_v44, %v16888_v11  ;;  %v16896_v36 = vmul.f32 0.5, %v6977_v63  ;;  %v16898_v14 = vmul.f32 0.5, %v6788_v40 }
0x1195   : > { %v7759_v1 = vmul.f32 0.7978846, %v7631_v26  ;;  %v7761_v35 = vmul.f32 0.7978846, %v7633_v24  ;;  %v7635_v5 = vadd.f32 %v7507_v42, %v6788_v40  ;;  %v7637_v12 = vadd.f32 %v7509_v43, %v6981_v41 }
0x1196   : > { %v16900_v7 = vmul.f32 0.5, %v6981_v41  ;;  %v16902_v52 = vmul.f32 0.5, %v6786_v29  ;;  %v7632_v60 = vadd.f32 %v7504_v55, %v6786_v29  ;;  %v7636_v63 = vadd.f32 %v7508_v27, %v6790_v38 }
0x1197   : > { %11509 = vtanh.f32 %v7759_v1  ;;  %v7763_v30 = vmul.f32 0.7978846, %v7635_v5  ;;  %v7765_v2 = vmul.f32 0.7978846, %v7637_v12  ;;  %v7510_v8 = vmul.f32 %v7382_v22, %v16888_v11 }
0x1198   : > { %11511 = vtanh.f32 %v7761_v35  ;;  %v7634_v50 = vadd.f32 %v7506_v58, %v16881_v28  ;;  %v16914_v9 = vmul.f32 0.5, %v6790_v38  ;;  %v16923_v33 = vmul.f32 0.5, %v16881_v28 }
0x1199   : > { %11513 = vtanh.f32 %v7763_v30  ;;  %v16926_v48 = vmul.f32 0.5, %v16888_v11  ;;  %v16928_v10 = vmul.f32 0.7978846, %v7632_v60  ;;  %v16930_v38 = vmul.f32 0.7978846, %v7636_v63 }
0x119a   : > { %11515 = vtanh.f32 %v7765_v2  ;;  %v16935_v31 = vadd.f32 %v7510_v8, %v16888_v11  ;;  %v16937_v51 = vmul.f32 0.7978846, %v7634_v50 }
0x119d   : > { %v6793_v13 = vpop.f32.mrb[228].mxu1  ;;  %v6986_v17 = vpop.f32.mrb[228].mxu0 }
0x119e   : > { %v6794_v49 = vadd.f32 %v6793_v13, %v18924_v62  ;;  %v6987_v56 = vadd.f32 %v6986_v17, %v15693_v6  ;;  %v6795_v15 = vpop.f32.mrb[229].mxu1  ;;  %v6988_v57 = vpop.f32.mrb[229].mxu0 }
0x119f   : > { %v16908_v16 = vadd.f32 %v6795_v15, %v15695_v46  ;;  %v6797_v19 = vpop.f32.mrb[230].mxu1  ;;  %v6990_v45 = vpop.f32.mrb[230].mxu0  ;;  %v16912_v54 = vadd.f32 %v6988_v57, %v15706_v59 }
0x11a0   : > { %v7255_v0 = vmul.f32 0.044715, %v6794_v49  ;;  %v7257_v29 = vmul.f32 0.044715, %v6987_v56  ;;  %v16917_v40 = vadd.f32 %v6797_v19, %v18924_v62  ;;  %v16920_v41 = vadd.f32 %v6990_v45, %v15693_v6  ;;  %v6799_v18 = vpop.f32.mrb[231].mxu1  ;;  %v6992_v23 = vpop.f32.mrb[231].mxu0 }
0x11a1   : > { %v7256_v61 = vmul.f32 0.044715, %v16908_v16  ;;  %v7258_v26 = vmul.f32 0.044715, %v16912_v54  ;;  %v11510_v39 = vpop.eup %11509  ;;  %v16941_v44 = vmul.f32 0.5, %v6794_v49  ;;  %v16945_v47 = vadd.f32 %v6799_v18, %v15695_v46 }
0x11a2   : > { %v7383_v53 = vmul.f32 %v7255_v0, %v6794_v49  ;;  %v7385_v20 = vmul.f32 %v7257_v29, %v6987_v56  ;;  %v7259_v32 = vmul.f32 0.044715, %v16917_v40  ;;  %v7261_v24 = vmul.f32 0.044715, %v16920_v41  ;;  %v11512_v55 = vpop.eup %11511 }
0x11a3   : > { %v16948_v1 = vadd.f32 %v6992_v23, %v15706_v59  ;;  %v8015_v43 = vadd.f32 1.0, %v11510_v39  ;;  %v8017_v30 = vadd.f32 1.0, %v11512_v55  ;;  %v16951_v2 = vmul.f32 0.5, %v6987_v56  ;;  %v11514_v57 = vpop.eup %11513 }
0x11a4   : > { %v7511_v28 = vmul.f32 %v7383_v53, %v6794_v49  ;;  %v7513_v37 = vmul.f32 %v7385_v20, %v6987_v56  ;;  %v7387_v42 = vmul.f32 %v7259_v32, %v16917_v40  ;;  %v7389_v58 = vmul.f32 %v7261_v24, %v16920_v41  ;;  %v11516_v0 = vpop.eup %11515 }
0x11a5   : > { %v6803_v11 = vpop.f32.mrb[232].mxu1  ;;  %v6996_v35 = vpop.f32.mrb[232].mxu0  ;;  %v7384_v13 = vmul.f32 %v7256_v61, %v16908_v16  ;;  %v7386_v19 = vmul.f32 %v7258_v26, %v16912_v54  ;;  %v8019_v29 = vadd.f32 1.0, %v11514_v57  ;;  %v7260_v18 = vmul.f32 0.044715, %v16945_v47 }
0x11a6   : > { %v7639_v5 = vadd.f32 %v7511_v28, %v6794_v49  ;;  %v7641_v27 = vadd.f32 %v7513_v37, %v6987_v56  ;;  %v6805_v12 = vpop.f32.mrb[233].mxu1  ;;  %v6998_v22 = vpop.f32.mrb[233].mxu0  ;;  %v7515_v17 = vmul.f32 %v7387_v42, %v16917_v40  ;;  %v7517_v49 = vmul.f32 %v7389_v58, %v16920_v41 }
0x11a7   : > { %v6807_v60 = vpop.f32.mrb[234].mxu1  ;;  %v7000_v15 = vpop.f32.mrb[234].mxu0  ;;  %v7262_v23 = vmul.f32 0.044715, %v16948_v1  ;;  %v16961_v53 = vmul.f32 %v8015_v43, %v16892_v34  ;;  %v8021_v20 = vadd.f32 1.0, %v11516_v0  ;;  %v16965_v32 = vmul.f32 %v8019_v29, %v16898_v14 }
0x11a8   : > { %v7767_v63 = vmul.f32 0.7978846, %v7639_v5  ;;  %v7769_v8 = vmul.f32 0.7978846, %v7641_v27  ;;  %v6809_v45 = vpop.f32.mrb[235].mxu1  ;;  %v7002_v50 = vpop.f32.mrb[235].mxu0  ;;  %v7643_v56 = vadd.f32 %v7515_v17, %v16917_v40  ;;  %v7645_v61 = vadd.f32 %v7517_v49, %v16920_v41 }
0x11a9   : > { %v6804_v37 = vadd.f32 %v6803_v11, %v18924_v62  ;;  %v16969_v26 = vmul.f32 %v8017_v30, %v16896_v36  ;;  %v16972_v24 = vmul.f32 %v8021_v20, %v16900_v7  ;;  %v6997_v34 = vadd.f32 %v6996_v35, %v15693_v6 }
0x11aa   : > { %11517 = vtanh.f32 %v7767_v63  ;;  %v7771_v28 = vmul.f32 0.7978846, %v7643_v56  ;;  %v7773_v39 = vmul.f32 0.7978846, %v7645_v61  ;;  %v7388_v14 = vmul.f32 %v7260_v18, %v16945_v47 }
0x11ab   : > { %11519 = vtanh.f32 %v7769_v8  ;;  %18925 = vst [vmem:[#allocation96_spill] sm:$0xff] %v16969_v26  ;;  %v7263_v55 = vmul.f32 0.044715, %v6804_v37  ;;  %v7390_v36 = vmul.f32 %v7262_v23, %v16948_v1  ;;  %v7265_v7 = vmul.f32 0.044715, %v6997_v34 }
0x11ac   : > { %11521 = vtanh.f32 %v7771_v28  ;;  %v16984_v30 = vadd.f32 %v6805_v12, %v15695_v46  ;;  %v16987_v17 = vadd.f32 %v6998_v22, %v15706_v59  ;;  %v16990_v57 = vadd.f32 %v6807_v60, %v18924_v62 }
0x11ad   : > { %v6813_v43 = vpop.f32.mrb[236].mxu1  ;;  %v7006_v5 = vpop.f32.mrb[236].mxu0  ;;  %11523 = vtanh.f32 %v7773_v39  ;;  %v7391_v35 = vmul.f32 %v7263_v55, %v6804_v37  ;;  %v7131_v49 = vmul.f32 0.5, %v16917_v40  ;;  %v7133_v0 = vmul.f32 0.5, %v16920_v41 }
0x11ae   : > { %v6815_v27 = vpop.f32.mrb[237].mxu1  ;;  %v16981_v58 = vpop.f32.mrb[237].mxu0  ;;  %v7393_v29 = vmul.f32 %v7265_v7, %v6997_v34  ;;  %v7001_v56 = vadd.f32 %v7000_v15, %v15693_v6  ;;  %v17004_v22 = vmul.f32 %v7384_v13, %v16908_v16  ;;  %v17007_v60 = vmul.f32 %v7386_v19, %v16912_v54 }
0x11af   : > { %v16992_v63 = vpop.f32.mrb[238].mxu1  ;;  %v16994_v8 = vpop.f32.mrb[238].mxu0  ;;  %v7519_v23 = vmul.f32 %v7391_v35, %v6804_v37  ;;  %v17010_v20 = vadd.f32 %v6809_v45, %v15695_v46  ;;  %v17013_v40 = vmul.f32 %v7388_v14, %v16945_v47  ;;  %v7267_v15 = vmul.f32 0.044715, %v16990_v57 }
0x11b0   : > { %v16999_v18 = vpop.f32.mrb[239].mxu1  ;;  %v17001_v12 = vpop.f32.mrb[239].mxu0  ;;  %v7521_v41 = vmul.f32 %v7393_v29, %v6997_v34  ;;  %v7269_v61 = vmul.f32 0.044715, %v7001_v56  ;;  %v17017_v28 = vmul.f32 %v7390_v36, %v16948_v1  ;;  %v7264_v13 = vmul.f32 0.044715, %v16984_v30 }
0x11b1   : > { %v7647_v39 = vadd.f32 %v7519_v23, %v6804_v37  ;;  %v7266_v19 = vmul.f32 0.044715, %v16987_v17  ;;  %v7395_v45 = vmul.f32 %v7267_v15, %v16990_v57  ;;  %v17023_v14 = vadd.f32 %v7002_v50, %v15706_v59 }
0x11b2   : > { %v7649_v7 = vadd.f32 %v7521_v41, %v6997_v34  ;;  %v7397_v35 = vmul.f32 %v7269_v61, %v7001_v56  ;;  %v17025_v42 = vmul.f32 0.5, %v6804_v37  ;;  %v7268_v36 = vmul.f32 0.044715, %v17010_v20 }
0x11b3   : > { %v7775_v25 = vmul.f32 0.7978846, %v7647_v39  ;;  %v17028_v23 = vmul.f32 0.5, %v6997_v34  ;;  %v7523_v3 = vmul.f32 %v7395_v45, %v16990_v57  ;;  %v7392_v15 = vmul.f32 %v7264_v13, %v16984_v30 }
0x11b4   : > { %v11518_v55 = vpop.eup %11517  ;;  %v7777_v4 = vmul.f32 0.7978846, %v7649_v7  ;;  %v7525_v21 = vmul.f32 %v7397_v35, %v7001_v56  ;;  %v7394_v50 = vmul.f32 %v7266_v19, %v16987_v17  ;;  %v7270_v34 = vmul.f32 0.044715, %v17023_v14 }
0x11b5   : > { %v11520_v29 = vpop.eup %11519  ;;  %v8023_v11 = vadd.f32 1.0, %v11518_v55  ;;  %11525 = vtanh.f32 %v7775_v25  ;;  %v7651_v55 = vadd.f32 %v7523_v3, %v16990_v57  ;;  %v7396_v35 = vmul.f32 %v7268_v36, %v17010_v20 }
0x11b6   : > { %v11522_v41 = vpop.eup %11521  ;;  %v8025_v26 = vadd.f32 1.0, %v11520_v29  ;;  %11527 = vtanh.f32 %v7777_v4  ;;  %v7653_v45 = vadd.f32 %v7525_v21, %v7001_v56  ;;  %v6814_v13 = vadd.f32 %v6813_v43, %v18924_v62 }
0x11b7   : > { %v11524_v61 = vpop.eup %11523  ;;  %v17034_v37 = vmul.f32 %v8023_v11, %v16941_v44  ;;  %v8027_v39 = vadd.f32 1.0, %v11522_v41  ;;  %v7779_v25 = vmul.f32 0.7978846, %v7651_v55  ;;  %v7007_v19 = vadd.f32 %v7006_v5, %v15693_v6 }
0x11b8   : > { %v8029_v7 = vadd.f32 1.0, %v11524_v61  ;;  %v17044_v44 = vmul.f32 %v8025_v26, %v16951_v2  ;;  %v7781_v3 = vmul.f32 0.7978846, %v7653_v45  ;;  %v17049_v41 = vadd.f32 %v6815_v27, %v15695_v46 }
0x11b9   : > { %v17039_v29 = vmul.f32 %v8027_v39, %v7131_v49  ;;  %11529 = vtanh.f32 %v7779_v25  ;;  %v7271_v4 = vmul.f32 0.044715, %v6814_v13  ;;  %v17055_v49 = vadd.f32 %v16981_v58, %v15706_v59 }
0x11ba   : > { %18926 = vst [vmem:[#allocation19_spill] sm:$0xff] %v17044_v44  ;;  %v17046_v11 = vmul.f32 %v8029_v7, %v7133_v0  ;;  %11531 = vtanh.f32 %v7781_v3  ;;  %v7398_v2 = vmul.f32 %v7270_v34, %v17023_v14  ;;  %v7273_v26 = vmul.f32 0.044715, %v7007_v19 }
0x11bb   : > { %v7139_v5 = vmul.f32 0.5, %v16990_v57  ;;  %v7141_v27 = vmul.f32 0.5, %v7001_v56  ;;  %v7399_v0 = vmul.f32 %v7271_v4, %v6814_v13  ;;  %v6818_v36 = vadd.f32 %v16992_v63, %v18924_v62 }
0x11bc   : > { %18927 = vst [vmem:[#allocation95_spill] sm:$0xff] %v17046_v11  ;;  %v17064_v61 = vmul.f32 %v7392_v15, %v16984_v30  ;;  %v17067_v58 = vmul.f32 %v7394_v50, %v16987_v17  ;;  %v7401_v39 = vmul.f32 %v7273_v26, %v7007_v19  ;;  %v7011_v55 = vadd.f32 %v16994_v8, %v15693_v6 }
0x11bd   : > { %v17072_v34 = vmul.f32 %v7396_v35, %v17010_v20  ;;  %v7527_v7 = vmul.f32 %v7399_v0, %v6814_v13  ;;  %v7272_v57 = vmul.f32 0.044715, %v17049_v41  ;;  %v7274_v56 = vmul.f32 0.044715, %v17055_v49 }
0x11be   : > { %v17077_v63 = vmul.f32 %v7398_v2, %v17023_v14  ;;  %v7529_v15 = vmul.f32 %v7401_v39, %v7007_v19  ;;  %v7275_v25 = vmul.f32 0.044715, %v6818_v36  ;;  %v7277_v50 = vmul.f32 0.044715, %v7011_v55 }
0x11bf   : > { %v11526_v45 = vpop.eup %11525  ;;  %v17079_v4 = vmul.f32 0.5, %v6814_v13  ;;  %v7655_v26 = vadd.f32 %v7527_v7, %v6814_v13  ;;  %v17083_v8 = vadd.f32 %v16999_v18, %v15695_v46  ;;  %v17085_v0 = vmul.f32 0.5, %v7007_v19 }
0x11c0   : > { %v8031_v3 = vadd.f32 1.0, %v11526_v45  ;;  %v11528_v35 = vpop.eup %11527  ;;  %v7657_v43 = vadd.f32 %v7529_v15, %v7007_v19  ;;  %v7403_v21 = vmul.f32 %v7275_v25, %v6818_v36  ;;  %v7405_v6 = vmul.f32 %v7277_v50, %v7011_v55 }
0x11c1   : > { %v7783_v62 = vmul.f32 0.7978846, %v7655_v26  ;;  %v7400_v2 = vmul.f32 %v7272_v57, %v17049_v41  ;;  %v7402_v39 = vmul.f32 %v7274_v56, %v17055_v49  ;;  %v17091_v45 = vadd.f32 %v17001_v12, %v15706_v59 }
0x11c2   : > { %v7785_v13 = vmul.f32 0.7978846, %v7657_v43  ;;  %v17093_v7 = vmul.f32 0.5, %v6818_v36  ;;  %v7531_v18 = vmul.f32 %v7403_v21, %v6818_v36  ;;  %v7533_v46 = vmul.f32 %v7405_v6, %v7011_v55 }
0x11c3   : > { %v11530_v44 = vpop.eup %11529  ;;  %v17096_v11 = vmul.f32 %v8031_v3, %v17025_v42  ;;  %v8033_v19 = vadd.f32 1.0, %v11528_v35  ;;  %11533 = vtanh.f32 %v7783_v62  ;;  %v7276_v15 = vmul.f32 0.044715, %v17083_v8 }
0x11c4   : > { %v11532_v57 = vpop.eup %11531  ;;  %v8035_v25 = vadd.f32 1.0, %v11530_v44  ;;  %11535 = vtanh.f32 %v7785_v13  ;;  %v7659_v56 = vadd.f32 %v7531_v18, %v6818_v36  ;;  %v7661_v50 = vadd.f32 %v7533_v46, %v7011_v55 }
0x11c5   : > { %v8037_v12 = vadd.f32 1.0, %v11532_v57  ;;  %v7278_v43 = vmul.f32 0.044715, %v17091_v45  ;;  %11537 = vtanh.f32 %v16928_v10  ;;  %v7766_v6 = vmul.f32 0.7978846, %v16935_v31 }
0x11c6   : > { %v17102_v21 = vmul.f32 %v8035_v25, %v7139_v5  ;;  %v7787_v42 = vmul.f32 0.7978846, %v7659_v56  ;;  %v7789_v3 = vmul.f32 0.7978846, %v7661_v50  ;;  %11539 = vtanh.f32 %v16930_v38 }
0x11c7   : > { %v17106_v62 = vmul.f32 %v8033_v19, %v17028_v23  ;;  %v17108_v44 = vmul.f32 %v8037_v12, %v7141_v27  ;;  %v7404_v46 = vmul.f32 %v7276_v15, %v17083_v8  ;;  %11541 = vtanh.f32 %v16937_v51 }
0x11c8   : > { %v8247_v10 = vpack.c.bf16 %v17102_v21, %v17096_v11  ;;  %11543 = vtanh.f32 %v7787_v42  ;;  %v7640_v31 = vadd.f32 %v17004_v22, %v16908_v16  ;;  %v7644_v5 = vadd.f32 %v17013_v40, %v16945_v47 }
0x11c9   : > { %v8249_v38 = vpack.c.bf16 %v17108_v44, %v17106_v62  ;;  %v7149_v23 = vmul.f32 0.5, %v7011_v55  ;;  %11545 = vtanh.f32 %v7789_v3  ;;  %v7406_v27 = vmul.f32 %v7278_v43, %v17091_v45 }
0x11ca   : > { %11547 = vtanh.f32 %v7766_v6  ;;  %v7768_v36 = vmul.f32 0.7978846, %v7640_v31  ;;  %v7772_v51 = vmul.f32 0.7978846, %v7644_v5  ;;  %v7642_v26 = vadd.f32 %v17007_v60, %v16912_v54 }
0x11cb   : > { %v7528_v35 = vmul.f32 %v7400_v2, %v17049_v41  ;;  %v7530_v22 = vmul.f32 %v7402_v39, %v17055_v49  ;;  %v7646_v40 = vadd.f32 %v17017_v28, %v16948_v1  ;;  %v7648_v13 = vadd.f32 %v17064_v61, %v16984_v30 }
0x11cc   : > { %v7532_v55 = vmul.f32 %v7404_v46, %v17083_v8  ;;  %11549 = vtanh.f32 %v7768_v36  ;;  %v7770_v18 = vmul.f32 0.7978846, %v7642_v26  ;;  %v7652_v19 = vadd.f32 %v17072_v34, %v17010_v20 }
0x11cd   : > { %v11534_v15 = vpop.eup %11533  ;;  %v7534_v60 = vmul.f32 %v7406_v27, %v17091_v45  ;;  %11551 = vtanh.f32 %v7772_v51  ;;  %v7774_v2 = vmul.f32 0.7978846, %v7646_v40  ;;  %v7776_v57 = vmul.f32 0.7978846, %v7648_v13 }
0x11ce   : > { %v11536_v39 = vpop.eup %11535  ;;  %v7128_v25 = vmul.f32 0.5, %v16908_v16  ;;  %11553 = vtanh.f32 %v7770_v18  ;;  %v7780_v28 = vmul.f32 0.7978846, %v7652_v19  ;;  %v7650_v61 = vadd.f32 %v17067_v58, %v16987_v17 }
0x11cf   : > { %v11538_v56 = vpop.eup %11537  ;;  %v8039_v50 = vadd.f32 1.0, %v11534_v15  ;;  %v7132_v12 = vmul.f32 0.5, %v16945_v47  ;;  %11555 = vtanh.f32 %v7774_v2  ;;  %v7654_v34 = vadd.f32 %v17077_v63, %v17023_v14 }
0x11d0   : > { %v11540_v43 = vpop.eup %11539  ;;  %v8041_v6 = vadd.f32 1.0, %v11536_v39  ;;  %v8016_v42 = vadd.f32 1.0, %v11538_v56  ;;  %11557 = vtanh.f32 %v7776_v57  ;;  %v7778_v3 = vmul.f32 0.7978846, %v7650_v61 }
0x11d1   : > { %v11542_v46 = vpop.eup %11541  ;;  %v8020_v16 = vadd.f32 1.0, %v11540_v43  ;;  %v7130_v31 = vmul.f32 0.5, %v16912_v54  ;;  %11559 = vtanh.f32 %v7780_v28  ;;  %v7782_v5 = vmul.f32 0.7978846, %v7654_v34 }
0x11d2   : > { %v11544_v58 = vpop.eup %11543  ;;  %v8144_v27 = vmul.f32 %v8016_v42, %v16902_v52  ;;  %v8018_v36 = vadd.f32 1.0, %v11542_v46  ;;  %v7134_v47 = vmul.f32 0.5, %v16948_v1  ;;  %11561 = vtanh.f32 %v7778_v3 }
0x11d3   : > { %v11546_v51 = vpop.eup %11545  ;;  %v8043_v63 = vadd.f32 1.0, %v11544_v58  ;;  %v8148_v26 = vmul.f32 %v8020_v16, %v16914_v9  ;;  %11563 = vtanh.f32 %v7782_v5  ;;  %v7656_v40 = vadd.f32 %v7528_v35, %v17049_v41 }
0x11d4   : > { %v11548_v13 = vpop.eup %11547  ;;  %v17145_v18 = vmul.f32 %v8039_v50, %v17079_v4  ;;  %v17148_v54 = vmul.f32 %v8041_v6, %v17085_v0  ;;  %v8045_v19 = vadd.f32 1.0, %v11546_v51  ;;  %v7660_v52 = vadd.f32 %v7532_v55, %v17083_v8 }
0x11d5   : > { %v17152_v1 = vmul.f32 %v8043_v63, %v17093_v7  ;;  %v8240_v15 = vpack.c.bf16 %v8148_v26, %v8144_v27  ;;  %v8022_v2 = vadd.f32 1.0, %v11548_v13  ;;  %v7784_v57 = vmul.f32 0.7978846, %v7656_v40 }
0x11d6   : > { %v11550_v9 = vpop.eup %11549  ;;  %v17154_v39 = vmul.f32 %v8045_v19, %v7149_v23  ;;  %v8146_v35 = vmul.f32 %v8018_v36, %v16923_v33  ;;  %v7788_v28 = vmul.f32 0.7978846, %v7660_v52  ;;  %v7658_v4 = vadd.f32 %v7530_v22, %v17055_v49 }
0x11d7   : > { %v11552_v61 = vpop.eup %11551  ;;  %v8251_v0 = vpack.c.bf16 %v17152_v1, %v17145_v18  ;;  %8630 = vmatprep.mubr.bf16.mxu1 %v8240_v15  ;;  %v8150_v55 = vmul.f32 %v8022_v2, %v16926_v48  ;;  %v8024_v7 = vadd.f32 1.0, %v11550_v9  ;;  %11565 = vtanh.f32 %v7784_v57 }
0x11d8   : > { %v11554_v56 = vpop.eup %11553  ;;  %v8253_v50 = vpack.c.bf16 %v17154_v39, %v17148_v54  ;;  %v18928_v23 = vpack.c.bf16 %v16965_v32, %v16961_v53  ;;  %v8028_v33 = vadd.f32 1.0, %v11552_v61  ;;  %11567 = vtanh.f32 %v7788_v28 }
0x11d9   : > { %v7662_v22 = vadd.f32 %v7534_v60, %v17091_v45  ;;  %v11556_v34 = vpop.eup %11555  ;;  %v8242_v43 = vpack.c.bf16 %v8150_v55, %v8146_v35  ;;  %v8026_v6 = vadd.f32 1.0, %v11554_v56  ;;  %v7136_v42 = vmul.f32 0.5, %v16984_v30  ;;  %v18929_v60 = vld [vmem:[#allocation96_spill] sm:$0xff]  ;;  %v18932_v55 = vld [vmem:[#allocation95_spill] sm:$0xff] }
0x11da   : > { %8631 = vmatmul.mubr.bf16.gmra.mrb[32].mxu1 %v18928_v23  ;;  %v7786_v48 = vmul.f32 0.7978846, %v7658_v4  ;;  %v11558_v3 = vpop.eup %11557  ;;  %v8152_v46 = vmul.f32 %v8024_v7, %v7128_v25  ;;  %v8156_v16 = vmul.f32 %v8028_v33, %v7132_v12  ;;  %v8030_v5 = vadd.f32 1.0, %v11556_v34  ;;  %v18933_v7 = vld [vmem:[#allocation19_spill] sm:$0xff] }
0x11db   : > { %v7790_v58 = vmul.f32 0.7978846, %v7662_v22  ;;  %v11560_v27 = vpop.eup %11559  ;;  %8791 = vmatprep.mubr.bf16.mxu0 %v8242_v43  ;;  %v8154_v36 = vmul.f32 %v8026_v6, %v7130_v31  ;;  %v7140_v53 = vmul.f32 0.5, %v17010_v20  ;;  %v8032_v32 = vadd.f32 1.0, %v11558_v3 }
0x11dc   : > { %11569 = vtanh.f32 %v7786_v48  ;;  %v11562_v51 = vpop.eup %11561  ;;  %v18930_v63 = vpack.c.bf16 %v16972_v24, %v18929_v60  ;;  %v8244_v26 = vpack.c.bf16 %v8156_v16, %v8152_v46  ;;  %v8158_v30 = vmul.f32 %v8030_v5, %v7134_v47  ;;  %v18935_v16 = vld [vmem:[#allocation2_spill] sm:$0xff]  ;;  %v18936_v5 = vld [vmem:[#allocation21_spill] sm:$0xff] }
0x11dd   : > { %v8036_v40 = vadd.f32 1.0, %v11560_v27  ;;  %11571 = vtanh.f32 %v7790_v58  ;;  %v11564_v25 = vpop.eup %11563  ;;  %v7138_v12 = vmul.f32 0.5, %v16987_v17  ;;  %v7142_v13 = vmul.f32 0.5, %v17023_v14 }
0x11de   : > { %8792 = vmatmul.mubr.bf16.gmra.mrb[32].mxu0 %v18930_v63  ;;  %v8034_v19 = vadd.f32 1.0, %v11562_v51  ;;  %8638 = vmatprep.mubr.bf16.mxu1 %v8244_v26  ;;  %v8246_v31 = vpack.c.bf16 %v8158_v30, %v8154_v36  ;;  %v8160_v20 = vmul.f32 %v8032_v32, %v7136_v42  ;;  %v8038_v15 = vadd.f32 1.0, %v11564_v25  ;;  %v18937_v36 = vld [vmem:[#allocation17_spill] sm:$0xff] }
0x11df   : > { %v8164_v52 = vmul.f32 %v8036_v40, %v7140_v53  ;;  %v18931_v24 = vpack.c.bf16 %v17039_v29, %v17034_v37  ;;  %v7144_v14 = vmul.f32 0.5, %v17049_v41  ;;  %v7148_v4 = vmul.f32 0.5, %v17083_v8 }
0x11e0   : > { %8799 = vmatprep.mubr.bf16.mxu0 %v8246_v31  ;;  %v8162_v47 = vmul.f32 %v8034_v19, %v7138_v12  ;;  %v8166_v57 = vmul.f32 %v8038_v15, %v7142_v13  ;;  %v18934_v56 = vpack.c.bf16 %v18932_v55, %v18933_v7  ;;  %v7146_v43 = vmul.f32 0.5, %v17055_v49 }
0x11e1   : > { %v8248_v2 = vpack.c.bf16 %v8164_v52, %v8160_v20  ;;  %v11566_v9 = vpop.eup %11565  ;;  %v7150_v6 = vmul.f32 0.5, %v17091_v45 }
0x11e2   : > { %8639 = vmatmul.mubr.bf16.gmra.mrb[36].mxu1 %v18931_v24  ;;  %v11568_v35 = vpop.eup %11567  ;;  %v8250_v17 = vpack.c.bf16 %v8166_v57, %v8162_v47  ;;  %v8040_v28 = vadd.f32 1.0, %v11566_v9 }
0x11e3   : > { %8646 = vmatprep.mubr.bf16.mxu1 %v8248_v2  ;;  %v8044_v61 = vadd.f32 1.0, %v11568_v35 }
0x11e4   : > { %v8168_v37 = vmul.f32 %v8040_v28, %v7144_v14 }
0x11e5   : > { %v8172_v29 = vmul.f32 %v8044_v61, %v7148_v4 }
0x11e6   : > { %8800 = vmatmul.mubr.bf16.gmra.mrb[36].mxu0 %v18934_v56  ;;  %v11570_v23 = vpop.eup %11569 }
0x11e7   : > { %8807 = vmatprep.mubr.bf16.mxu0 %v8250_v17  ;;  %v11572_v33 = vpop.eup %11571  ;;  %v8042_v22 = vadd.f32 1.0, %v11570_v23  ;;  %v8252_v34 = vpack.c.bf16 %v8172_v29, %v8168_v37 }
0x11e8   : > { %v8046_v42 = vadd.f32 1.0, %v11572_v33 }
0x11e9   : > { %v8170_v41 = vmul.f32 %v8042_v22, %v7146_v43 }
0x11ea   : > { %8647 = vmatmul.mubr.bf16.gmra.mrb[40].mxu1 %v8247_v10  ;;  %v8174_v8 = vmul.f32 %v8046_v42, %v7150_v6 }
0x11eb   : > { %8654 = vmatprep.mubr.bf16.mxu1 %v8252_v34 }
0x11ec   : > { %v8254_v48 = vpack.c.bf16 %v8174_v8, %v8170_v41 }
0x11ee   : > { %8808 = vmatmul.mubr.bf16.gmra.mrb[40].mxu0 %v8249_v38  ;;  %v6823_v3 = vpop.f32.mrb[240].mxu1  ;;  %v7016_v46 = vpop.f32.mrb[240].mxu0 }
0x11ef   : > { %8815 = vmatprep.mubr.bf16.mxu0 %v8254_v48  ;;  %v6824_v49 = vadd.f32 %v6823_v3, %v18935_v16  ;;  %v7017_v45 = vadd.f32 %v7016_v46, %v18936_v5  ;;  %v6825_v58 = vpop.f32.mrb[241].mxu1  ;;  %v7018_v27 = vpop.f32.mrb[241].mxu0 }
0x11f0   : > { %v17193_v11 = vadd.f32 %v6825_v58, %v18937_v36  ;;  %v17196_v21 = vadd.f32 %v7018_v27, %v15706_v59  ;;  %v6827_v10 = vpop.f32.mrb[242].mxu1  ;;  %v7020_v53 = vpop.f32.mrb[242].mxu0 }
0x11f1   : > { %v17201_v62 = vmul.f32 0.5, %v6824_v49  ;;  %v7279_v44 = vmul.f32 0.044715, %v6824_v49  ;;  %v17203_v38 = vmul.f32 0.5, %v7017_v45  ;;  %v7281_v32 = vmul.f32 0.044715, %v7017_v45 }
0x11f2   : > { %8655 = vmatmul.mubr.bf16.gmra.mrb[44].mxu1 %v8251_v0  ;;  %v7280_v51 = vmul.f32 0.044715, %v17193_v11  ;;  %v7282_v60 = vmul.f32 0.044715, %v17196_v21  ;;  %v6828_v63 = vadd.f32 %v6827_v10, %v18935_v16  ;;  %v7021_v26 = vadd.f32 %v7020_v53, %v18936_v5  ;;  %v6829_v30 = vpop.f32.mrb[243].mxu1  ;;  %v7022_v40 = vpop.f32.mrb[243].mxu0 }
0x11f3   : > { %v7407_v25 = vmul.f32 %v7279_v44, %v6824_v49  ;;  %v7409_v12 = vmul.f32 %v7281_v32, %v7017_v45  ;;  %v17210_v18 = vadd.f32 %v6829_v30, %v18937_v36  ;;  %v17213_v1 = vadd.f32 %v7022_v40, %v15706_v59 }
0x11f4   : > { %v7408_v0 = vmul.f32 %v7280_v51, %v17193_v11  ;;  %v7410_v13 = vmul.f32 %v7282_v60, %v17196_v21  ;;  %v17217_v19 = vmul.f32 0.5, %v6828_v63  ;;  %v7283_v31 = vmul.f32 0.044715, %v6828_v63 }
0x11f5   : > { %v7535_v20 = vmul.f32 %v7407_v25, %v6824_v49  ;;  %v7537_v52 = vmul.f32 %v7409_v12, %v7017_v45  ;;  %v17222_v15 = vmul.f32 0.5, %v7021_v26  ;;  %v7285_v24 = vmul.f32 0.044715, %v7021_v26 }
0x11f6   : > { %8816 = vmatmul.mubr.bf16.gmra.mrb[44].mxu0 %v8253_v50  ;;  %v17225_v2 = vmul.f32 %v7408_v0, %v17193_v11  ;;  %v17228_v47 = vmul.f32 %v7410_v13, %v17196_v21  ;;  %v7411_v57 = vmul.f32 %v7283_v31, %v6828_v63  ;;  %v7284_v9 = vmul.f32 0.044715, %v17210_v18  ;;  %v6833_v35 = vpop.f32.mrb[244].mxu1  ;;  %v7026_v17 = vpop.f32.mrb[244].mxu0 }
0x11f7   : > { %v7663_v28 = vadd.f32 %v7535_v20, %v6824_v49  ;;  %v7665_v14 = vadd.f32 %v7537_v52, %v7017_v45  ;;  %v7413_v54 = vmul.f32 %v7285_v24, %v7021_v26  ;;  %v7286_v39 = vmul.f32 0.044715, %v17213_v1  ;;  %v6835_v50 = vpop.f32.mrb[245].mxu1  ;;  %v7028_v4 = vpop.f32.mrb[245].mxu0 }
0x11f8   : > { %v7539_v61 = vmul.f32 %v7411_v57, %v6828_v63  ;;  %v7412_v55 = vmul.f32 %v7284_v9, %v17210_v18  ;;  %v6834_v7 = vadd.f32 %v6833_v35, %v18935_v16  ;;  %v7027_v56 = vadd.f32 %v7026_v17, %v18936_v5  ;;  %v6837_v23 = vpop.f32.mrb[246].mxu1  ;;  %v7030_v37 = vpop.f32.mrb[246].mxu0 }
0x11f9   : > { %v7791_v29 = vmul.f32 0.7978846, %v7663_v28  ;;  %v7793_v33 = vmul.f32 0.7978846, %v7665_v14  ;;  %v7541_v22 = vmul.f32 %v7413_v54, %v7021_v26  ;;  %v7414_v34 = vmul.f32 %v7286_v39, %v17213_v1  ;;  %v6839_v43 = vpop.f32.mrb[247].mxu1  ;;  %v7032_v6 = vpop.f32.mrb[247].mxu0 }
0x11fa   : > { %v7667_v42 = vadd.f32 %v7539_v61, %v6828_v63  ;;  %v17237_v41 = vmul.f32 %v7412_v55, %v17210_v18  ;;  %v17239_v8 = vmul.f32 0.5, %v6834_v7  ;;  %v7287_v48 = vmul.f32 0.044715, %v6834_v7 }
0x11fb   : > { %11573 = vtanh.f32 %v7791_v29  ;;  %v7669_v3 = vadd.f32 %v7541_v22, %v7021_v26  ;;  %v17242_v46 = vmul.f32 %v7414_v34, %v17213_v1  ;;  %v17244_v49 = vmul.f32 0.5, %v7027_v56 }
0x11fc   : > { %11575 = vtanh.f32 %v7793_v33  ;;  %v7795_v45 = vmul.f32 0.7978846, %v7667_v42  ;;  %v7415_v58 = vmul.f32 %v7287_v48, %v6834_v7  ;;  %v7289_v27 = vmul.f32 0.044715, %v7027_v56 }
0x11fd   : > { %v7797_v10 = vmul.f32 0.7978846, %v7669_v3  ;;  %v17247_v53 = vadd.f32 %v6835_v50, %v18937_v36  ;;  %v17250_v44 = vadd.f32 %v7028_v4, %v15706_v59  ;;  %v6838_v32 = vadd.f32 %v6837_v23, %v18935_v16 }
0x11fe   : > { %11577 = vtanh.f32 %v7795_v45  ;;  %v7543_v51 = vmul.f32 %v7415_v58, %v6834_v7  ;;  %v7417_v60 = vmul.f32 %v7289_v27, %v7027_v56  ;;  %v7031_v63 = vadd.f32 %v7030_v37, %v18936_v5  ;;  %v6843_v26 = vpop.f32.mrb[248].mxu1  ;;  %v7036_v30 = vpop.f32.mrb[248].mxu0 }
0x11ff   : > { %18938 = vst [vmem:[#allocation99_spill] sm:$0xff] %v17250_v44  ;;  %11579 = vtanh.f32 %v7797_v10  ;;  %v7288_v40 = vmul.f32 0.044715, %v17247_v53  ;;  %v7290_v25 = vmul.f32 0.044715, %v17250_v44  ;;  %v17256_v12 = vmul.f32 0.5, %v6838_v32 }
0x1200   : > { %v17258_v0 = vpop.f32.mrb[249].mxu1  ;;  %v7671_v13 = vadd.f32 %v7543_v51, %v6834_v7  ;;  %v7545_v31 = vmul.f32 %v7417_v60, %v7027_v56  ;;  %v7291_v20 = vmul.f32 0.044715, %v6838_v32  ;;  %v17260_v52 = vmul.f32 0.5, %v7031_v63  ;;  %v7038_v24 = vpop.f32.mrb[249].mxu0 }
0x1201   : > { %v17262_v57 = vpop.f32.mrb[250].mxu1  ;;  %v7416_v9 = vmul.f32 %v7288_v40, %v17247_v53  ;;  %v7418_v35 = vmul.f32 %v7290_v25, %v17250_v44  ;;  %v7293_v17 = vmul.f32 0.044715, %v7031_v63  ;;  %v17267_v28 = vadd.f32 %v6839_v43, %v18937_v36  ;;  %v7040_v14 = vpop.f32.mrb[250].mxu0 }
0x1202   : > { %v17269_v54 = vpop.f32.mrb[251].mxu1  ;;  %v7799_v39 = vmul.f32 0.7978846, %v7671_v13  ;;  %v7673_v50 = vadd.f32 %v7545_v31, %v7027_v56  ;;  %v7419_v4 = vmul.f32 %v7291_v20, %v6838_v32  ;;  %v17272_v61 = vadd.f32 %v7032_v6, %v15706_v59  ;;  %v17274_v55 = vpop.f32.mrb[251].mxu0 }
0x1203   : > { %v17277_v7 = vmul.f32 %v7416_v9, %v17247_v53  ;;  %v17280_v23 = vmul.f32 %v7418_v35, %v17250_v44  ;;  %v7421_v37 = vmul.f32 %v7293_v17, %v7031_v63  ;;  %v7292_v29 = vmul.f32 0.044715, %v17267_v28 }
0x1204   : > { %18939 = vst [vmem:[#allocation85_spill] sm:$0xff] %v17272_v61  ;;  %11581 = vtanh.f32 %v7799_v39  ;;  %v7801_v33 = vmul.f32 0.7978846, %v7673_v50  ;;  %v7547_v22 = vmul.f32 %v7419_v4, %v6838_v32  ;;  %v7294_v56 = vmul.f32 0.044715, %v17272_v61 }
0x1205   : > { %18940 = vst [vmem:[#allocation98_spill] sm:$0xff] %v17280_v23  ;;  %v11574_v34 = vpop.eup %11573  ;;  %v7549_v43 = vmul.f32 %v7421_v37, %v7031_v63  ;;  %v7420_v6 = vmul.f32 %v7292_v29, %v17267_v28  ;;  %v6844_v42 = vadd.f32 %v6843_v26, %v18935_v16  ;;  %v7037_v48 = vadd.f32 %v7036_v30, %v18936_v5 }
0x1206   : > { %v11576_v3 = vpop.eup %11575  ;;  %v8047_v45 = vadd.f32 1.0, %v11574_v34  ;;  %11583 = vtanh.f32 %v7801_v33  ;;  %v7675_v58 = vadd.f32 %v7547_v22, %v6838_v32  ;;  %v7422_v27 = vmul.f32 %v7294_v56, %v17272_v61  ;;  %v17288_v10 = vpop.f32.mrb[252].mxu1 }
0x1207   : > { %v17290_v51 = vpop.f32.mrb[252].mxu0  ;;  %v8049_v60 = vadd.f32 1.0, %v11576_v3  ;;  %v7677_v40 = vadd.f32 %v7549_v43, %v7031_v63  ;;  %v17293_v25 = vmul.f32 %v7420_v6, %v17267_v28  ;;  %v17295_v13 = vmul.f32 0.5, %v6844_v42  ;;  %v17297_v26 = vpop.f32.mrb[253].mxu1 }
0x1208   : > { %v17299_v30 = vpop.f32.mrb[253].mxu0  ;;  %v11578_v31 = vpop.eup %11577  ;;  %v17302_v32 = vmul.f32 %v8047_v45, %v17201_v62  ;;  %v7803_v20 = vmul.f32 0.7978846, %v7675_v58  ;;  %v17305_v9 = vmul.f32 %v7422_v27, %v17272_v61  ;;  %v7295_v35 = vmul.f32 0.044715, %v6844_v42 }
0x1209   : > { %v17307_v17 = vpop.f32.mrb[254].mxu1  ;;  %v17309_v63 = vpop.f32.mrb[254].mxu0  ;;  %v17312_v50 = vmul.f32 %v8049_v60, %v17203_v38  ;;  %v8051_v4 = vadd.f32 1.0, %v11578_v31  ;;  %v7805_v37 = vmul.f32 0.7978846, %v7677_v40  ;;  %v17314_v29 = vmul.f32 0.5, %v7037_v48 }
0x120a   : > { %18941 = vst [vmem:[#allocation8_spill] sm:$0xff] %v17302_v32  ;;  %18942 = vst [vmem:[#allocation27_spill] sm:$0xff] %v17305_v9  ;;  %v11580_v39 = vpop.eup %11579  ;;  %v17316_v33 = vpop.f32.mrb[255].mxu1  ;;  %11585 = vtanh.f32 %v7803_v20  ;;  %v7423_v56 = vmul.f32 %v7295_v35, %v6844_v42  ;;  %v7297_v34 = vmul.f32 0.044715, %v7037_v48  ;;  %v17325_v38 = vadd.f32 %v17258_v0, %v18937_v36 }
0x120b   : > { %18943 = vst [vmem:[#allocation6_spill] sm:$0xff] %v17312_v50  ;;  %v17318_v62 = vpop.f32.mrb[255].mxu0  ;;  %v8053_v22 = vadd.f32 1.0, %v11580_v39  ;;  %v17321_v43 = vmul.f32 %v8051_v4, %v17217_v19  ;;  %11587 = vtanh.f32 %v7805_v37  ;;  %v17328_v6 = vadd.f32 %v7038_v24, %v15706_v59 }
0x120c   : > { %18945 = vst [vmem:[#allocation25_spill] sm:$0xff] %v17325_v38  ;;  %v7551_v45 = vmul.f32 %v7423_v56, %v6844_v42  ;;  %v7425_v58 = vmul.f32 %v7297_v34, %v7037_v48  ;;  %v6848_v27 = vadd.f32 %v17262_v57, %v18935_v16  ;;  %v7296_v60 = vmul.f32 0.044715, %v17325_v38 }
0x120d   : > { %18944 = vst [vmem:[#allocation10_spill] sm:$0xff] %v17321_v43  ;;  %18946 = vst [vmem:[#allocation70_spill] sm:$0xff] %v17328_v6  ;;  %v17331_v3 = vmul.f32 %v8053_v22, %v17222_v15  ;;  %v7298_v40 = vmul.f32 0.044715, %v17328_v6  ;;  %v7041_v0 = vadd.f32 %v7040_v14, %v18936_v5 }
0x120e   : > { %v11582_v31 = vpop.eup %11581  ;;  %v7679_v15 = vadd.f32 %v7551_v45, %v6844_v42  ;;  %v7553_v20 = vmul.f32 %v7425_v58, %v7037_v48  ;;  %v17342_v35 = vmul.f32 0.5, %v6848_v27  ;;  %v7424_v37 = vmul.f32 %v7296_v60, %v17325_v38 }
0x120f   : > { %18947 = vst [vmem:[#allocation100_spill] sm:$0xff] %v17331_v3  ;;  %v8055_v4 = vadd.f32 1.0, %v11582_v31  ;;  %v7426_v22 = vmul.f32 %v7298_v40, %v17328_v6  ;;  %v7299_v56 = vmul.f32 0.044715, %v6848_v27  ;;  %v17354_v45 = vmul.f32 0.5, %v7041_v0 }
0x1210   : > { %v17344_v39 = vpop.f32.mrb[0].mxu1  ;;  %v17346_v57 = vpop.f32.mrb[0].mxu0  ;;  %v7807_v24 = vmul.f32 0.7978846, %v7679_v15  ;;  %v7681_v42 = vadd.f32 %v7553_v20, %v7037_v48  ;;  %v7301_v58 = vmul.f32 0.044715, %v7041_v0  ;;  %v17362_v60 = vmul.f32 %v7424_v37, %v17325_v38 }
0x1211   : > { %v17350_v34 = vpop.f32.mrb[1].mxu1  ;;  %v17352_v14 = vpop.f32.mrb[1].mxu0  ;;  %v17359_v3 = vmul.f32 %v8055_v4, %v17239_v8  ;;  %v17365_v40 = vmul.f32 %v7426_v22, %v17328_v6  ;;  %v7427_v15 = vmul.f32 %v7299_v56, %v6848_v27  ;;  %v17382_v4 = vadd.f32 %v17274_v55, %v15706_v59 }
0x1212   : > { %v11584_v19 = vpop.eup %11583  ;;  %v17356_v50 = vpop.f32.mrb[2].mxu1  ;;  %18949 = vst [vmem:[#allocation73_spill] sm:$0xff] %v17362_v60  ;;  %11589 = vtanh.f32 %v7807_v24  ;;  %v7809_v48 = vmul.f32 0.7978846, %v7681_v42  ;;  %v7429_v20 = vmul.f32 %v7301_v58, %v7041_v0  ;;  %v6854_v37 = vadd.f32 %v17288_v10, %v18935_v16 }
0x1213   : > { %18948 = vst [vmem:[#allocation69_spill] sm:$0xff] %v17359_v3  ;;  %v8057_v31 = vadd.f32 1.0, %v11584_v19  ;;  %18950 = vst [vmem:[#allocation63_spill] sm:$0xff] %v17365_v40  ;;  %v17367_v32 = vpop.f32.mrb[2].mxu0  ;;  %v17369_v43 = vpop.f32.mrb[3].mxu1  ;;  %v17378_v19 = vadd.f32 %v17269_v54, %v18937_v36  ;;  %v7555_v22 = vmul.f32 %v7427_v15, %v6848_v27  ;;  %v7047_v42 = vadd.f32 %v17290_v51, %v18936_v5 }
0x1214   : > { %v17371_v9 = vpop.f32.mrb[3].mxu0  ;;  %v11586_v24 = vpop.eup %11585  ;;  %11591 = vtanh.f32 %v7809_v48  ;;  %v7557_v56 = vmul.f32 %v7429_v20, %v7041_v0  ;;  %v7302_v54 = vmul.f32 0.044715, %v17382_v4  ;;  %v17390_v40 = vmul.f32 0.5, %v6854_v37 }
0x1215   : > { %v17374_v8 = vmul.f32 %v8057_v31, %v17244_v49  ;;  %v11588_v49 = vpop.eup %11587  ;;  %v8059_v58 = vadd.f32 1.0, %v11586_v24  ;;  %v7300_v31 = vmul.f32 0.044715, %v17378_v19  ;;  %v7683_v6 = vadd.f32 %v7555_v22, %v6848_v27 }
0x1216   : > { %v8061_v55 = vadd.f32 1.0, %v11588_v49  ;;  %v7685_v60 = vadd.f32 %v7557_v56, %v7041_v0  ;;  %v7303_v38 = vmul.f32 0.044715, %v6854_v37  ;;  %v7430_v20 = vmul.f32 %v7302_v54, %v17382_v4 }
0x1217   : > { %18951 = vst [vmem:[#allocation62_spill] sm:$0xff] %v17374_v8  ;;  %v17397_v15 = vmul.f32 %v8059_v58, %v17256_v12  ;;  %v7428_v51 = vmul.f32 %v7300_v31, %v17378_v19  ;;  %v17401_v24 = vmul.f32 0.5, %v7047_v42  ;;  %v7811_v0 = vmul.f32 0.7978846, %v7683_v6 }
0x1218   : > { %v17392_v10 = vpop.f32.mrb[4].mxu1  ;;  %v17394_v48 = vpop.f32.mrb[4].mxu0  ;;  %v17408_v27 = vmul.f32 %v8061_v55, %v17260_v52  ;;  %v7813_v22 = vmul.f32 0.7978846, %v7685_v60  ;;  %v7431_v56 = vmul.f32 %v7303_v38, %v6854_v37  ;;  %v17420_v54 = vmul.f32 %v7430_v20, %v17382_v4 }
0x1219   : > { %18952 = vst [vmem:[#allocation102_spill] sm:$0xff] %v17397_v15  ;;  %18953 = vst [vmem:[#allocation56_spill] sm:$0xff] %v17401_v24  ;;  %v17403_v23 = vpop.f32.mrb[5].mxu1  ;;  %v17405_v61 = vpop.f32.mrb[5].mxu0  ;;  %v17417_v31 = vmul.f32 %v7428_v51, %v17378_v19  ;;  %v7305_v44 = vmul.f32 0.044715, %v7047_v42  ;;  %11593 = vtanh.f32 %v7811_v0  ;;  %v17430_v60 = vadd.f32 %v17297_v26, %v18937_v36 }
0x121a   : > { %18954 = vst [vmem:[#allocation33_spill] sm:$0xff] %v17408_v27  ;;  %v17410_v49 = vpop.f32.mrb[6].mxu1  ;;  %v17412_v12 = vpop.f32.mrb[6].mxu0  ;;  %18955 = vst [vmem:[#allocation52_spill] sm:$0xff] %v17420_v54  ;;  %v7559_v6 = vmul.f32 %v7431_v56, %v6854_v37  ;;  %11595 = vtanh.f32 %v7813_v22  ;;  %v17434_v51 = vadd.f32 %v17299_v30, %v15706_v59  ;;  %v6858_v20 = vadd.f32 %v17307_v17, %v18935_v16  ;;  %v17467_v54 = vld [vmem:[%s17895_s12] ss:$0 sm:$0xff] }
0x121b   : > { %v17422_v24 = vpop.f32.mrb[7].mxu1  ;;  %v17424_v52 = vpop.f32.mrb[7].mxu0  ;;  %18956 = vst [vmem:[#allocation105_spill] sm:$0xff] %v17430_v60  ;;  %v7433_v55 = vmul.f32 %v7305_v44, %v7047_v42  ;;  %v7304_v15 = vmul.f32 0.044715, %v17430_v60  ;;  %v7051_v0 = vadd.f32 %v17309_v63, %v18936_v5  ;;  %v17443_v26 = vadd.f32 %v17316_v33, %v18937_v36 }
0x121c   : > { %18957 = vst [vmem:[#allocation109_spill] sm:$0xff] %v17434_v51  ;;  %v11590_v58 = vpop.eup %11589  ;;  %v7687_v3 = vadd.f32 %v7559_v6, %v6854_v37  ;;  %v7306_v56 = vmul.f32 0.044715, %v17434_v51  ;;  %v17446_v30 = vmul.f32 0.5, %v6858_v20  ;;  %v7307_v17 = vmul.f32 0.044715, %v6858_v20 }
0x121d   : > { %v8063_v22 = vadd.f32 1.0, %v11590_v58  ;;  %v7561_v44 = vmul.f32 %v7433_v55, %v7047_v42  ;;  %v7432_v16 = vmul.f32 %v7304_v15, %v17430_v60  ;;  %v17449_v37 = vmul.f32 0.5, %v7051_v0 }
0x121e   : > { %v11592_v38 = vpop.eup %11591  ;;  %v7815_v8 = vmul.f32 0.7978846, %v7687_v3  ;;  %v7434_v33 = vmul.f32 %v7306_v56, %v17434_v51  ;;  %v7435_v15 = vmul.f32 %v7307_v17, %v6858_v20  ;;  %v7309_v27 = vmul.f32 0.044715, %v7051_v0 }
0x121f   : > { %v17454_v5 = vmul.f32 %v8063_v22, %v17295_v13  ;;  %v8065_v36 = vadd.f32 1.0, %v11592_v38  ;;  %v7689_v63 = vadd.f32 %v7561_v44, %v7047_v42  ;;  %v17462_v3 = vmul.f32 %v7432_v16, %v17430_v60 }
0x1220   : > { %v17451_v6 = vpop.f32.mrb[8].mxu1  ;;  %v17457_v58 = vpop.f32.mrb[8].mxu0  ;;  %11597 = vtanh.f32 %v7815_v8  ;;  %v17477_v8 = vmul.f32 %v7434_v33, %v17434_v51  ;;  %v7308_v44 = vmul.f32 0.044715, %v17443_v26  ;;  %v7563_v17 = vmul.f32 %v7435_v15, %v6858_v20 }
0x1221   : > { %18958 = vst [vmem:[#allocation3_spill] sm:$0xff] %v17454_v5  ;;  %v17459_v55 = vpop.f32.mrb[9].mxu1  ;;  %18959 = vst [vmem:[#allocation66_spill] sm:$0xff] %v17462_v3  ;;  %v17469_v13 = vpop.f32.mrb[9].mxu0  ;;  %v17474_v38 = vmul.f32 %v8065_v36, %v17314_v29  ;;  %v7817_v22 = vmul.f32 0.7978846, %v7689_v63  ;;  %v7437_v3 = vmul.f32 %v7309_v27, %v7051_v0  ;;  %v17486_v60 = vadd.f32 %v17318_v62, %v15706_v59 }
0x1222   : > { %v17471_v42 = vpop.f32.mrb[10].mxu1  ;;  %18962 = vst [vmem:[#allocation22_spill] sm:$0xff] %v17477_v8  ;;  %v17480_v56 = vpop.f32.mrb[10].mxu0  ;;  %v9475_v29 = vadd.f32 %v17350_v34, %v17344_v39  ;;  %v7436_v63 = vmul.f32 %v7308_v44, %v17443_v26  ;;  %v17494_v33 = vmul.f32 0.5, %v17193_v11  ;;  %v17497_v8 = vmul.f32 0.5, %v17210_v18 }
0x1223   : > { %18960 = vst [vmem:[#allocation9_spill] sm:$0xff] %v17471_v42  ;;  %18961 = vst [vmem:[#allocation107_spill] sm:$0xff] %v17474_v38  ;;  %v17482_v16 = vpop.f32.mrb[11].mxu1  ;;  %v17490_v36 = vpop.f32.mrb[11].mxu0  ;;  %11599 = vtanh.f32 %v7817_v22  ;;  %v7691_v27 = vadd.f32 %v7563_v17, %v6858_v20  ;;  %v7565_v51 = vmul.f32 %v7437_v3, %v7051_v0  ;;  %v7310_v59 = vmul.f32 0.044715, %v17486_v60 }
0x1224   : > { %18963 = vst [vmem:[#allocation12_spill] sm:$0xff] %v17480_v56  ;;  %18964 = vst [vmem:[#allocation57_spill] sm:$0xff] %v17482_v16  ;;  %v11594_v15 = vpop.eup %11593  ;;  %v8569_v62 = vadd.f32 %v9475_v29, %v17467_v54  ;;  %v17502_v34 = vmul.f32 %v7436_v63, %v17443_v26  ;;  %v7664_v22 = vadd.f32 %v17225_v2, %v17193_v11 }
0x1225   : > { %18965 = vst [vmem:[#allocation67_spill] sm:$0xff] %v17490_v36  ;;  %v11596_v56 = vpop.eup %11595  ;;  %v8067_v39 = vadd.f32 1.0, %v11594_v15  ;;  %v7668_v44 = vadd.f32 %v17237_v41, %v17210_v18  ;;  %v7819_v16 = vmul.f32 0.7978846, %v7691_v27  ;;  %v7693_v42 = vadd.f32 %v7565_v51, %v7051_v0 }
0x1226   : > { %v8069_v36 = vadd.f32 1.0, %v11596_v56  ;;  %v7438_v20 = vmul.f32 %v7310_v59, %v17486_v60  ;;  %v7792_v63 = vmul.f32 0.7978846, %v7664_v22  ;;  %v9587_v11 = vadd.f32 %v17352_v14, %v17346_v57  ;;  %v18968_v22 = vld [vmem:[#allocation30_spill] sm:$0xff] }
0x1227   : > { %v17514_v29 = vmul.f32 %v8067_v39, %v17342_v35  ;;  %v7796_v15 = vmul.f32 0.7978846, %v7668_v44  ;;  %11601 = vtanh.f32 %v7819_v16  ;;  %v7821_v51 = vmul.f32 0.7978846, %v7693_v42 }
0x1228   : > { %v17509_v3 = vpop.f32.mrb[12].mxu1  ;;  %v17511_v17 = vpop.f32.mrb[12].mxu0  ;;  %v17523_v41 = vmul.f32 %v8069_v36, %v17354_v45  ;;  %v17526_v0 = vmul.f32 %v7438_v20, %v17486_v60  ;;  %11603 = vtanh.f32 %v7792_v63  ;;  %v8730_v14 = vadd.f32 %v9587_v11, %v8569_v62 }
0x1229   : > { %18966 = vst [vmem:[#allocation76_spill] sm:$0xff] %v17514_v29  ;;  %v17518_v2 = vpop.f32.mrb[13].mxu1  ;;  %v17520_v18 = vpop.f32.mrb[13].mxu0  ;;  %v17535_v27 = vmul.f32 0.5, %v17196_v21  ;;  %11605 = vtanh.f32 %v7821_v51  ;;  %v17551_v36 = vmul.f32 0.5, %v17213_v1  ;;  %v7666_v62 = vadd.f32 %v17228_v47, %v17196_v21 }
0x122a   : > { %18967 = vst [vmem:[#allocation26_spill] sm:$0xff] %v17523_v41  ;;  %v17528_v35 = vpop.f32.mrb[14].mxu1  ;;  %v17530_v56 = vpop.f32.mrb[14].mxu0  ;;  %11607 = vtanh.f32 %v7796_v15  ;;  %v8856_v44 = vadd.f32 %v8730_v14, %v18968_v22  ;;  %v7670_v20 = vadd.f32 %v17242_v46, %v17213_v1  ;;  %v9478_v11 = vadd.f32 %v17369_v43, %v17356_v50 }
0x122b   : > { %v17537_v59 = vpop.f32.mrb[15].mxu1  ;;  %v17539_v45 = vpop.f32.mrb[15].mxu0  ;;  %v7794_v63 = vmul.f32 0.7978846, %v7666_v62  ;;  %v9590_v51 = vadd.f32 %v17371_v9, %v17367_v32  ;;  %v9481_v16 = vadd.f32 %v17403_v23, %v17392_v10  ;;  %v17569_v15 = vmul.f32 0.5, %v17247_v53 }
0x122c   : > { %v11598_v42 = vpop.eup %11597  ;;  %8888 = vst [vmem:[%s17548_s22] sm:$0xff] %v8856_v44  ;;  %v7798_v47 = vmul.f32 0.7978846, %v7670_v20  ;;  %v17572_v1 = vmul.f32 0.5, %v17267_v28  ;;  %v8572_v50 = vadd.f32 %v9478_v11, %v17467_v54  ;;  %v7672_v43 = vadd.f32 %v17277_v7, %v17247_v53  ;;  %v18973_v44 = vld [vmem:[#allocation85_spill] sm:$0xff] }
0x122d   : > { %v8071_v39 = vadd.f32 1.0, %v11598_v42  ;;  %v11600_v57 = vpop.eup %11599  ;;  %11609 = vtanh.f32 %v7794_v63  ;;  %v8577_v32 = vadd.f32 %v9481_v16, %v17467_v54  ;;  %v9593_v10 = vadd.f32 %v17405_v61, %v17394_v48  ;;  %v18970_v42 = vld [vmem:[#allocation56_spill] sm:$0xff]  ;;  %v18974_v48 = vld [vmem:[#allocation98_spill] sm:$0xff] }
0x122e   : > { %v8073_v46 = vadd.f32 1.0, %v11600_v57  ;;  %11611 = vtanh.f32 %v7798_v47  ;;  %v8733_v62 = vadd.f32 %v9590_v51, %v8572_v50  ;;  %v17597_v20 = vmul.f32 0.5, %v18973_v44 }
0x122f   : > { %v17565_v21 = vmul.f32 %v8071_v39, %v17390_v40  ;;  %v7676_v40 = vadd.f32 %v17293_v25, %v17267_v28  ;;  %v18972_v39 = vld [vmem:[#allocation99_spill] sm:$0xff]  ;;  %v7800_v7 = vmul.f32 0.7978846, %v7672_v43  ;;  %v8738_v25 = vadd.f32 %v9593_v10, %v8577_v32 }
0x1230   : > { %v17576_v9 = vpop.f32.mrb[16].mxu1  ;;  %v17578_v23 = vpop.f32.mrb[16].mxu0  ;;  %v17591_v16 = vmul.f32 %v8073_v46, %v18970_v42  ;;  %v17594_v22 = vmul.f32 0.5, %v18972_v39  ;;  %v7674_v63 = vadd.f32 %v18974_v48, %v18972_v39  ;;  %v18975_v46 = vld [vmem:[#allocation34_spill] sm:$0xff]  ;;  %v18976_v42 = vld [vmem:[#allocation27_spill] sm:$0xff]  ;;  %v9484_v41 = vadd.f32 %v17422_v24, %v17410_v49 }
0x1231   : > { %18969 = vst [vmem:[#allocation58_spill] sm:$0xff] %v17565_v21  ;;  %v17586_v57 = vpop.f32.mrb[17].mxu1  ;;  %v17588_v14 = vpop.f32.mrb[17].mxu0  ;;  %v7804_v61 = vmul.f32 0.7978846, %v7676_v40  ;;  %v8857_v50 = vadd.f32 %v8733_v62, %v18975_v46  ;;  %v7678_v38 = vadd.f32 %v18976_v42, %v18973_v44  ;;  %v9596_v32 = vadd.f32 %v17424_v52, %v17412_v12  ;;  %v18977_v10 = vld [vmem:[#allocation39_spill] sm:$0xff] }
0x1232   : > { %18971 = vst [vmem:[#allocation60_spill] sm:$0xff] %v17591_v16  ;;  %v17599_v53 = vpop.f32.mrb[18].mxu1  ;;  %v17601_v28 = vpop.f32.mrb[18].mxu0  ;;  %11613 = vtanh.f32 %v7800_v7  ;;  %v8858_v39 = vadd.f32 %v8738_v25, %v18977_v10  ;;  %v7802_v48 = vmul.f32 0.7978846, %v7674_v63  ;;  %v8580_v44 = vadd.f32 %v9484_v41, %v17467_v54 }
0x1233   : > { %v17605_v11 = vpop.f32.mrb[19].mxu1  ;;  %v17607_v51 = vpop.f32.mrb[19].mxu0  ;;  %8889 = vst [vmem:[%s17548_s22 + $0x8] sm:$0xff] %v8857_v50  ;;  %11615 = vtanh.f32 %v7804_v61  ;;  %v7806_v62 = vmul.f32 0.7978846, %v7678_v38  ;;  %v9487_v12 = vadd.f32 %v17459_v55, %v17451_v6  ;;  %v18979_v61 = vld [vmem:[#allocation25_spill] sm:$0xff] }
0x1234   : > { %v11602_v47 = vpop.eup %11601  ;;  %8890 = vst [vmem:[%s17548_s22 + $0x10] sm:$0xff] %v8858_v39  ;;  %11617 = vtanh.f32 %v7802_v48  ;;  %v8741_v25 = vadd.f32 %v9596_v32, %v8580_v44  ;;  %v18980_v50 = vld [vmem:[#allocation35_spill] sm:$0xff]  ;;  %v17646_v32 = vmul.f32 0.5, %v17378_v19  ;;  %v9599_v44 = vadd.f32 %v17469_v13, %v17457_v58 }
0x1235   : > { %v11604_v43 = vpop.eup %11603  ;;  %v8075_v40 = vadd.f32 1.0, %v11602_v47  ;;  %11619 = vtanh.f32 %v7806_v62  ;;  %v17637_v47 = vmul.f32 0.5, %v18979_v61  ;;  %v18983_v58 = vld [vmem:[#allocation63_spill] sm:$0xff] }
0x1236   : > { %v11606_v5 = vpop.eup %11605  ;;  %v8048_v29 = vadd.f32 1.0, %v11604_v43  ;;  %v8859_v42 = vadd.f32 %v8741_v25, %v18980_v50 }
0x1237   : > { %v11608_v46 = vpop.eup %11607  ;;  %v17620_v24 = vmul.f32 %v8075_v40, %v17446_v30  ;;  %v8077_v49 = vadd.f32 1.0, %v11606_v5  ;;  %v8585_v5 = vadd.f32 %v9487_v12, %v17467_v54 }
0x1238   : > { %v8052_v52 = vadd.f32 1.0, %v11608_v46  ;;  %v8176_v7 = vmul.f32 %v8048_v29, %v17494_v33  ;;  %v17626_v63 = vpop.f32.mrb[20].mxu1  ;;  %v17628_v38 = vpop.f32.mrb[20].mxu0  ;;  %8891 = vst [vmem:[%s17548_s22 + $0x18] sm:$0xff] %v8859_v42 }
0x1239   : > { %v17633_v30 = vmul.f32 %v8077_v49, %v17449_v37  ;;  %v17639_v6 = vpop.f32.mrb[21].mxu1  ;;  %v17641_v55 = vpop.f32.mrb[21].mxu0  ;;  %v18981_v37 = vld [vmem:[#allocation73_spill] sm:$0xff]  ;;  %v8746_v48 = vadd.f32 %v9599_v44, %v8585_v5 }
0x123a   : > { %v11610_v33 = vpop.eup %11609  ;;  %v8180_v29 = vmul.f32 %v8052_v52, %v17497_v8  ;;  %v7680_v43 = vadd.f32 %v18981_v37, %v18979_v61  ;;  %v17650_v40 = vpop.f32.mrb[22].mxu1  ;;  %v7684_v8 = vadd.f32 %v17417_v31, %v17378_v19  ;;  %v18982_v61 = vld [vmem:[#allocation70_spill] sm:$0xff]  ;;  %v17670_v19 = vmul.f32 0.5, %v17382_v4  ;;  %v18988_v5 = vld [vmem:[#allocation37_spill] sm:$0xff] }
0x123b   : > { %18978 = vst [vmem:[#allocation74_spill] sm:$0xff] %v17633_v30  ;;  %v17652_v10 = vpop.f32.mrb[22].mxu0  ;;  %v11612_v39 = vpop.eup %11611  ;;  %v8050_v62 = vadd.f32 1.0, %v11610_v33  ;;  %v17666_v50 = vmul.f32 0.5, %v18982_v61  ;;  %v7682_v13 = vadd.f32 %v18983_v58, %v18982_v61  ;;  %v18990_v44 = vld [vmem:[#allocation57_spill] sm:$0xff] }
0x123c   : > { %v17660_v46 = vpop.f32.mrb[23].mxu1  ;;  %v17662_v49 = vpop.f32.mrb[23].mxu0  ;;  %v8256_v12 = vpack.c.bf16 %v8180_v29, %v8176_v7  ;;  %v8054_v52 = vadd.f32 1.0, %v11612_v39  ;;  %v7808_v25 = vmul.f32 0.7978846, %v7680_v43  ;;  %v18984_v7 = vld [vmem:[#allocation52_spill] sm:$0xff] }
0x123d   : > { %v8178_v37 = vmul.f32 %v8050_v62, %v17535_v27  ;;  %v7812_v33 = vmul.f32 0.7978846, %v7684_v8  ;;  %v7686_v29 = vadd.f32 %v18984_v7, %v17382_v4  ;;  %v11614_v42 = vpop.eup %11613  ;;  %v18985_v43 = vld [vmem:[#allocation10_spill] sm:$0xff]  ;;  %v18986_v39 = vld [vmem:[#allocation8_spill] sm:$0xff]  ;;  %v8860_v62 = vadd.f32 %v8746_v48, %v18988_v5  ;;  %v18989_v8 = vld [vmem:[#allocation9_spill] sm:$0xff] }
0x123e   : > { %8662 = vmatprep.mubr.bf16.mxu1 %v8256_v12  ;;  %v8182_v31 = vmul.f32 %v8054_v52, %v17551_v36  ;;  %11621 = vtanh.f32 %v7808_v25  ;;  %v18987_v27 = vpack.c.bf16 %v18985_v43, %v18986_v39  ;;  %v9490_v12 = vadd.f32 %v18990_v44, %v18989_v8  ;;  %v18991_v36 = vld [vmem:[#allocation12_spill] sm:$0xff]  ;;  %v18992_v52 = vld [vmem:[#allocation67_spill] sm:$0xff]  ;;  %v11616_v41 = vpop.eup %11615  ;;  %v18993_v43 = vld [vmem:[#allocation105_spill] sm:$0xff] }
0x123f   : > { %11623 = vtanh.f32 %v7812_v33  ;;  %v9602_v25 = vadd.f32 %v18992_v52, %v18991_v36  ;;  %v8056_v58 = vadd.f32 1.0, %v11614_v42  ;;  %v7810_v16 = vmul.f32 0.7978846, %v7682_v13  ;;  %v11618_v7 = vpop.eup %11617  ;;  %8892 = vst [vmem:[%s17548_s22 + $0x20] sm:$0xff] %v8860_v62 }
0x1240   : > { %8663 = vmatmul.mubr.bf16.gmra.mrb[48].mxu1 %v18987_v27  ;;  %v8258_v61 = vpack.c.bf16 %v8182_v31, %v8178_v37  ;;  %v7814_v30 = vmul.f32 0.7978846, %v7686_v29  ;;  %v17685_v4 = vpop.f32.mrb[24].mxu1  ;;  %v8060_v21 = vadd.f32 1.0, %v11616_v41  ;;  %v8588_v33 = vadd.f32 %v9490_v12, %v17467_v54  ;;  %v17694_v27 = vpop.f32.mrb[24].mxu0 }
0x1241   : > { %v9493_v48 = vadd.f32 %v17518_v2, %v17509_v3  ;;  %v17692_v39 = vmul.f32 0.5, %v18993_v43  ;;  %v17696_v5 = vpop.f32.mrb[25].mxu1  ;;  %v11620_v37 = vpop.eup %11619  ;;  %v8184_v31 = vmul.f32 %v8056_v58, %v17569_v15  ;;  %v8058_v13 = vadd.f32 1.0, %v11618_v7  ;;  %v18994_v3 = vld [vmem:[#allocation100_spill] sm:$0xff]  ;;  %v18995_v2 = vld [vmem:[#allocation6_spill] sm:$0xff] }
0x1242   : > { %8823 = vmatprep.mubr.bf16.mxu0 %v8258_v61  ;;  %11625 = vtanh.f32 %v7810_v16  ;;  %v17700_v41 = vmul.f32 0.5, %v17443_v26  ;;  %v17702_v29 = vpop.f32.mrb[25].mxu0  ;;  %v17704_v42 = vpop.f32.mrb[26].mxu1  ;;  %v18996_v62 = vpack.c.bf16 %v18994_v3, %v18995_v2  ;;  %v8188_v8 = vmul.f32 %v8060_v21, %v17572_v1  ;;  %v18997_v61 = vld [vmem:[#allocation66_spill] sm:$0xff] }
0x1243   : > { %v8062_v44 = vadd.f32 1.0, %v11620_v37  ;;  %11627 = vtanh.f32 %v7814_v30  ;;  %v8749_v12 = vadd.f32 %v9602_v25, %v8588_v33  ;;  %v17710_v36 = vpop.f32.mrb[26].mxu0  ;;  %v17712_v15 = vpop.f32.mrb[27].mxu1  ;;  %v8186_v16 = vmul.f32 %v8058_v13, %v17594_v22  ;;  %v18998_v30 = vld [vmem:[#allocation38_spill] sm:$0xff]  ;;  %v18999_v13 = vld [vmem:[#allocation109_spill] sm:$0xff] }
0x1244   : > { %8824 = vmatmul.mubr.bf16.gmra.mrb[48].mxu0 %v18996_v62  ;;  %v8593_v52 = vadd.f32 %v9493_v48, %v17467_v54  ;;  %v7688_v58 = vadd.f32 %v18997_v61, %v18993_v43  ;;  %v7692_v7 = vadd.f32 %v17502_v34, %v17443_v26  ;;  %v17720_v3 = vpop.f32.mrb[27].mxu0  ;;  %v8260_v21 = vpack.c.bf16 %v8188_v8, %v8184_v31  ;;  %v19000_v31 = vld [vmem:[#allocation22_spill] sm:$0xff] }
0x1245   : > { %v8190_v1 = vmul.f32 %v8062_v44, %v17597_v20  ;;  %v8861_v25 = vadd.f32 %v8749_v12, %v18998_v30  ;;  %v9605_v33 = vadd.f32 %v17520_v18, %v17511_v17  ;;  %v17727_v48 = vmul.f32 0.5, %v18999_v13  ;;  %v19001_v17 = vld [vmem:[#allocation102_spill] sm:$0xff]  ;;  %v19002_v18 = vld [vmem:[#allocation69_spill] sm:$0xff] }
0x1246   : > { %v7816_v37 = vmul.f32 0.7978846, %v7688_v58  ;;  %v7820_v22 = vmul.f32 0.7978846, %v7692_v7  ;;  %v17730_v43 = vmul.f32 0.5, %v17486_v60  ;;  %8670 = vmatprep.mubr.bf16.mxu1 %v8260_v21  ;;  %v7690_v20 = vadd.f32 %v19000_v31, %v18999_v13  ;;  %v19004_v58 = vld [vmem:[#allocation40_spill] sm:$0xff] }
0x1247   : > { %v8262_v26 = vpack.c.bf16 %v8190_v1, %v8186_v16  ;;  %8893 = vst [vmem:[%s17548_s22 + $0x28] sm:$0xff] %v8861_v25  ;;  %v8754_v34 = vadd.f32 %v9605_v33, %v8593_v52  ;;  %v7694_v2 = vadd.f32 %v17526_v0, %v17486_v60  ;;  %v19003_v8 = vpack.c.bf16 %v19001_v17, %v19002_v18  ;;  %v19005_v25 = vld [vmem:[#allocation33_spill] sm:$0xff]  ;;  %v19006_v33 = vld [vmem:[#allocation62_spill] sm:$0xff] }
0x1248   : > { %v11622_v62 = vpop.eup %11621  ;;  %11629 = vtanh.f32 %v7816_v37  ;;  %v9496_v44 = vadd.f32 %v17537_v59, %v17528_v35  ;;  %v9608_v12 = vadd.f32 %v17539_v45, %v17530_v56  ;;  %v9499_v16 = vadd.f32 %v17586_v57, %v17576_v9  ;;  %v17746_v52 = vpop.f32.mrb[28].mxu1 }
0x1249   : > { %8671 = vmatmul.mubr.bf16.gmra.mrb[52].mxu1 %v19003_v8  ;;  %v17748_v61 = vpop.f32.mrb[28].mxu0  ;;  %v11624_v60 = vpop.eup %11623  ;;  %8831 = vmatprep.mubr.bf16.mxu0 %v8262_v26  ;;  %v8064_v0 = vadd.f32 1.0, %v11622_v62  ;;  %11631 = vtanh.f32 %v7820_v22  ;;  %v8862_v7 = vadd.f32 %v8754_v34, %v19004_v58  ;;  %v7818_v21 = vmul.f32 0.7978846, %v7690_v20 }
0x124a   : > { %v9516_v1 = vpop.f32.mrb[29].mxu1  ;;  %v9628_v35 = vpop.f32.mrb[29].mxu0  ;;  %v8068_v59 = vadd.f32 1.0, %v11624_v60  ;;  %v7822_v30 = vmul.f32 0.7978846, %v7694_v2  ;;  %v8596_v56 = vadd.f32 %v9496_v44, %v17467_v54  ;;  %v8601_v45 = vadd.f32 %v9499_v16, %v17467_v54  ;;  %v19008_v44 = vld [vmem:[#allocation36_spill] sm:$0xff] }
0x124b   : > { %v9518_v9 = vpop.f32.mrb[30].mxu1  ;;  %v17753_v57 = vpop.f32.mrb[30].mxu0  ;;  %v19007_v37 = vpack.c.bf16 %v19005_v25, %v19006_v33  ;;  %v8192_v22 = vmul.f32 %v8064_v0, %v17637_v47  ;;  %8894 = vst [vmem:[%s17548_s22 + $0x30] sm:$0xff] %v8862_v7  ;;  %11633 = vtanh.f32 %v7818_v21  ;;  %v9611_v13 = vadd.f32 %v17588_v14, %v17578_v23  ;;  %v19013_v21 = vld [vmem:[#allocation42_spill] sm:$0xff]  ;;  %v19014_v25 = vld [vmem:[#allocation43_spill] sm:$0xff] }
0x124c   : > { %v9502_v26 = vadd.f32 %v17605_v11, %v17599_v53  ;;  %v9519_v34 = vpop.f32.mrb[31].mxu1  ;;  %v17764_v31 = vpop.f32.mrb[31].mxu0  ;;  %v8196_v2 = vmul.f32 %v8068_v59, %v17646_v32  ;;  %11635 = vtanh.f32 %v7822_v30  ;;  %v8757_v62 = vadd.f32 %v9608_v12, %v8596_v56 }
0x124d   : > { %8832 = vmatmul.mubr.bf16.gmra.mrb[52].mxu0 %v19007_v37  ;;  %v11626_v20 = vpop.eup %11625  ;;  %v9614_v17 = vadd.f32 %v17607_v51, %v17601_v28  ;;  %v8762_v8 = vadd.f32 %v9611_v13, %v8601_v45  ;;  %v9505_v14 = vadd.f32 %v17639_v6, %v17626_v63  ;;  %v9617_v32 = vadd.f32 %v17641_v55, %v17628_v38  ;;  %v19009_v28 = vld [vmem:[#allocation41_spill] sm:$0xff]  ;;  %v19010_v55 = vld [vmem:[#allocation76_spill] sm:$0xff] }
0x124e   : > { %v11628_v47 = vpop.eup %11627  ;;  %v8066_v18 = vadd.f32 1.0, %v11626_v20  ;;  %v8604_v23 = vadd.f32 %v9502_v26, %v17467_v54  ;;  %v8264_v53 = vpack.c.bf16 %v8196_v2, %v8192_v22  ;;  %v8863_v16 = vadd.f32 %v8757_v62, %v19008_v44  ;;  %v19015_v26 = vld [vmem:[#allocation26_spill] sm:$0xff]  ;;  %v19016_v20 = vld [vmem:[#allocation107_spill] sm:$0xff] }
0x124f   : > { %v8070_v11 = vadd.f32 1.0, %v11628_v47  ;;  %v8864_v51 = vadd.f32 %v8762_v8, %v19009_v28  ;;  %v8609_v0 = vadd.f32 %v9505_v14, %v17467_v54  ;;  %v9508_v63 = vadd.f32 %v17660_v46, %v17650_v40  ;;  %v19020_v14 = vld [vmem:[#allocation46_spill] sm:$0xff] }
0x1250   : > { %v8194_v12 = vmul.f32 %v8066_v18, %v17666_v50  ;;  %v8765_v60 = vadd.f32 %v9614_v17, %v8604_v23  ;;  %8678 = vmatprep.mubr.bf16.mxu1 %v8264_v53  ;;  %8895 = vst [vmem:[%s17548_s22 + $0x38] sm:$0xff] %v8863_v16  ;;  %v9620_v6 = vadd.f32 %v17662_v49, %v17652_v10  ;;  %v19011_v50 = vld [vmem:[#allocation3_spill] sm:$0xff]  ;;  %v19021_v16 = vld [vmem:[#allocation44_spill] sm:$0xff] }
0x1251   : > { %v8198_v58 = vmul.f32 %v8070_v11, %v17670_v19  ;;  %v9511_v38 = vadd.f32 %v17696_v5, %v17685_v4  ;;  %v19012_v7 = vpack.c.bf16 %v19010_v55, %v19011_v50  ;;  %8896 = vst [vmem:[%s17548_s22 + $0x40] sm:$0xff] %v8864_v51  ;;  %v8770_v30 = vadd.f32 %v9617_v32, %v8609_v0  ;;  %v19019_v18 = vld [vmem:[#allocation47_spill] sm:$0xff]  ;;  %v19022_v51 = vld [vmem:[#allocation58_spill] sm:$0xff]  ;;  %v19024_v0 = vld [vmem:[#allocation49_spill] sm:$0xff] }
0x1252   : > { %v8865_v59 = vadd.f32 %v8765_v60, %v19013_v21  ;;  %v9623_v19 = vadd.f32 %v17702_v29, %v17694_v27  ;;  %v9514_v40 = vadd.f32 %v17712_v15, %v17704_v42  ;;  %v11630_v46 = vpop.eup %11629  ;;  %v8612_v10 = vadd.f32 %v9508_v63, %v17467_v54  ;;  %v19025_v63 = vld [vmem:[#allocation74_spill] sm:$0xff] }
0x1253   : > { %8679 = vmatmul.mubr.bf16.gmra.mrb[56].mxu1 %v19012_v7  ;;  %v8266_v56 = vpack.c.bf16 %v8198_v58, %v8194_v12  ;;  %v8617_v49 = vadd.f32 %v9511_v38, %v17467_v54  ;;  %v9626_v4 = vadd.f32 %v17720_v3, %v17710_v36  ;;  %v11632_v5 = vpop.eup %11631  ;;  %v8072_v45 = vadd.f32 1.0, %v11630_v46 }
0x1254   : > { %8897 = vst [vmem:[%s17548_s22 + $0x48] sm:$0xff] %v8865_v59  ;;  %v8866_v33 = vadd.f32 %v8770_v30, %v19014_v25  ;;  %v8620_v27 = vadd.f32 %v9514_v40, %v17467_v54  ;;  %v9517_v29 = vadd.f32 %v9516_v1, %v17746_v52  ;;  %v8076_v42 = vadd.f32 1.0, %v11632_v5 }
0x1255   : > { %8839 = vmatprep.mubr.bf16.mxu0 %v8266_v56  ;;  %v8773_v15 = vadd.f32 %v9620_v6, %v8612_v10  ;;  %v8778_v37 = vadd.f32 %v9623_v19, %v8617_v49  ;;  %v9629_v22 = vadd.f32 %v9628_v35, %v17748_v61  ;;  %v11634_v13 = vpop.eup %11633  ;;  %v19017_v2 = vpack.c.bf16 %v19015_v26, %v19016_v20  ;;  %v19018_v61 = vld [vmem:[#allocation45_spill] sm:$0xff] }
0x1256   : > { %v8200_v36 = vmul.f32 %v8072_v45, %v17692_v39  ;;  %8898 = vst [vmem:[%s17548_s22 + $0x50] sm:$0xff] %v8866_v33  ;;  %v8781_v3 = vadd.f32 %v9626_v4, %v8620_v27  ;;  %v8625_v62 = vadd.f32 %v9517_v29, %v17467_v54  ;;  %v9520_v52 = vadd.f32 %v9519_v34, %v9518_v9  ;;  %v11636_v1 = vpop.eup %11635  ;;  %v19028_v4 = vld [vmem:[#allocation48_spill] sm:$0xff] }
0x1257   : > { %8840 = vmatmul.mubr.bf16.gmra.mrb[56].mxu0 %v19017_v2  ;;  %v8204_v17 = vmul.f32 %v8076_v42, %v17700_v41  ;;  %v8074_v47 = vadd.f32 1.0, %v11634_v13  ;;  %v8867_v35 = vadd.f32 %v8773_v15, %v19018_v61  ;;  %v8868_v8 = vadd.f32 %v8778_v37, %v19019_v18  ;;  %v19029_v29 = vld [vmem:[#allocation88_spill] sm:$0xff] }
0x1258   : > { %v8078_v23 = vadd.f32 1.0, %v11636_v1  ;;  %v8869_v53 = vadd.f32 %v8781_v3, %v19020_v14  ;;  %v8786_v39 = vadd.f32 %v9629_v22, %v8625_v62  ;;  %v8628_v11 = vadd.f32 %v9520_v52, %v17467_v54 }
0x1259   : > { %v8268_v44 = vpack.c.bf16 %v8204_v17, %v8200_v36  ;;  %8899 = vst [vmem:[%s17548_s22 + $0x58] sm:$0xff] %v8867_v35  ;;  %8900 = vst [vmem:[%s17548_s22 + $0x60] sm:$0xff] %v8868_v8  ;;  %v9632_v9 = vadd.f32 %v17764_v31, %v17753_v57  ;;  %v8202_v41 = vmul.f32 %v8074_v47, %v17727_v48  ;;  %v19026_v57 = vld [vmem:[#allocation60_spill] sm:$0xff]  ;;  %v19030_v17 = vld [vmem:[#allocation83_spill] sm:$0xff] }
0x125a   : > { %v8206_v34 = vmul.f32 %v8078_v23, %v17730_v43  ;;  %8901 = vst [vmem:[%s17548_s22 + $0x68] sm:$0xff] %v8869_v53  ;;  %v8870_v32 = vadd.f32 %v8786_v39, %v19021_v16  ;;  %v19023_v60 = vpack.c.bf16 %v17620_v24, %v19022_v51  ;;  %v19027_v31 = vpack.c.bf16 %v19025_v63, %v19026_v57  ;;  %v19031_v23 = vld [vmem:[#allocation86_spill] sm:$0xff] }
0x125b   : > { %8686 = vmatprep.mubr.bf16.mxu1 %v8268_v44  ;;  %v8789_v12 = vadd.f32 %v9632_v9, %v8628_v11 }
0x125c   : > { %v8270_v28 = vpack.c.bf16 %v8206_v34, %v8202_v41  ;;  %8687 = vmatmul.mubr.bf16.gmra.mrb[60].mxu1 %v19023_v60  ;;  %8902 = vst [vmem:[%s17548_s22 + $0x70] sm:$0xff] %v8870_v32  ;;  %v19032_v60 = vld [vmem:[#allocation82_spill] sm:$0xff] }
0x125d   : > { %v8871_v58 = vadd.f32 %v8789_v12, %v19024_v0 }
0x125e   : > { %8847 = vmatprep.mubr.bf16.mxu0 %v8270_v28 }
0x125f   : > { %8848 = vmatmul.mubr.bf16.gmra.mrb[60].mxu0 %v19027_v31  ;;  %8903 = vst [vmem:[%s17548_s22 + $0x78] sm:$0xff] %v8871_v58 }
0x12ad   : > { %v9521_v48 = vpop.f32.mrb[32].mxu1 }
0x12ae   : > { %v9522_v43 = vpop.f32.mrb[33].mxu1 }
0x12af   : > { %v9523_v6 = vadd.f32 %v9522_v43, %v9521_v48  ;;  %v9524_v38 = vpop.f32.mrb[34].mxu1  ;;  %v19033_v48 = vld [vmem:[#allocation90_spill] sm:$0xff] }
0x12b0   : > { %v9525_v55 = vpop.f32.mrb[35].mxu1 }
0x12b1   : > { %v9633_v50 = vpop.f32.mrb[32].mxu0  ;;  %v8633_v7 = vadd.f32 %v9523_v6, %v17467_v54  ;;  %v9526_v24 = vadd.f32 %v9525_v55, %v9524_v38 }
0x12b2   : > { %v9634_v21 = vpop.f32.mrb[33].mxu0 }
0x12b3   : > { %v9635_v59 = vadd.f32 %v9634_v21, %v9633_v50  ;;  %v9636_v30 = vpop.f32.mrb[34].mxu0  ;;  %v8636_v19 = vadd.f32 %v9526_v24, %v17467_v54 }
0x12b4   : > { %v9637_v40 = vpop.f32.mrb[35].mxu0 }
0x12b5   : > { %v8794_v46 = vadd.f32 %v9635_v59, %v8633_v7  ;;  %v9638_v56 = vadd.f32 %v9637_v40, %v9636_v30  ;;  %v9527_v10 = vpop.f32.mrb[36].mxu1  ;;  %v19034_v40 = vld [vmem:[#allocation84_spill] sm:$0xff] }
0x12b6   : > { %v9528_v49 = vpop.f32.mrb[37].mxu1 }
0x12b7   : > { %v8872_v5 = vadd.f32 %v8794_v46, %v19028_v4  ;;  %v8797_v45 = vadd.f32 %v9638_v56, %v8636_v19  ;;  %v9529_v25 = vadd.f32 %v9528_v49, %v9527_v10  ;;  %v9530_v33 = vpop.f32.mrb[38].mxu1  ;;  %v19035_v10 = vld [vmem:[#allocation91_spill] sm:$0xff] }
0x12b8   : > { %v9531_v27 = vpop.f32.mrb[39].mxu1 }
0x12b9   : > { %8904 = vst [vmem:[%s17548_s22 + $0x80] sm:$0xff] %v8872_v5  ;;  %v8873_v42 = vadd.f32 %v8797_v45, %v19029_v29  ;;  %v9639_v15 = vpop.f32.mrb[36].mxu0  ;;  %v8641_v37 = vadd.f32 %v9529_v25, %v17467_v54  ;;  %v9532_v22 = vadd.f32 %v9531_v27, %v9530_v33 }
0x12ba   : > { %v9640_v13 = vpop.f32.mrb[37].mxu0 }
0x12bb   : > { %8905 = vst [vmem:[%s17548_s22 + $0x88] sm:$0xff] %v8873_v42  ;;  %v9641_v26 = vadd.f32 %v9640_v13, %v9639_v15  ;;  %v9642_v20 = vpop.f32.mrb[38].mxu0  ;;  %v8644_v2 = vadd.f32 %v9532_v22, %v17467_v54 }
0x12bc   : > { %v9643_v36 = vpop.f32.mrb[39].mxu0 }
0x12bd   : > { %v8802_v3 = vadd.f32 %v9641_v26, %v8641_v37  ;;  %v9644_v62 = vadd.f32 %v9643_v36, %v9642_v20  ;;  %v9533_v52 = vpop.f32.mrb[40].mxu1 }
0x12be   : > { %v9534_v1 = vpop.f32.mrb[41].mxu1 }
0x12bf   : > { %v8874_v47 = vadd.f32 %v8802_v3, %v19030_v17  ;;  %v8805_v61 = vadd.f32 %v9644_v62, %v8644_v2  ;;  %v9535_v35 = vadd.f32 %v9534_v1, %v9533_v52  ;;  %v9536_v18 = vpop.f32.mrb[42].mxu1  ;;  %v19036_v3 = vld [vmem:[#allocation89_spill] sm:$0xff] }
0x12c0   : > { %v9537_v8 = vpop.f32.mrb[43].mxu1 }
0x12c1   : > { %8906 = vst [vmem:[%s17548_s22 + $0x90] sm:$0xff] %v8874_v47  ;;  %v8875_v14 = vadd.f32 %v8805_v61, %v19031_v23  ;;  %v9645_v53 = vpop.f32.mrb[40].mxu0  ;;  %v8649_v39 = vadd.f32 %v9535_v35, %v17467_v54  ;;  %v9538_v11 = vadd.f32 %v9537_v8, %v9536_v18  ;;  %v19037_v61 = vld [vmem:[#allocation11_spill] sm:$0xff] }
0x12c2   : > { %v9646_v44 = vpop.f32.mrb[41].mxu0 }
0x12c3   : > { %8907 = vst [vmem:[%s17548_s22 + $0x98] sm:$0xff] %v8875_v14  ;;  %v9647_v9 = vadd.f32 %v9646_v44, %v9645_v53  ;;  %v9648_v41 = vpop.f32.mrb[42].mxu0  ;;  %v8652_v34 = vadd.f32 %v9538_v11, %v17467_v54 }
0x12c4   : > { %v9649_v16 = vpop.f32.mrb[43].mxu0 }
0x12c5   : > { %v8810_v32 = vadd.f32 %v9647_v9, %v8649_v39  ;;  %v9650_v12 = vadd.f32 %v9649_v16, %v9648_v41  ;;  %v9539_v28 = vpop.f32.mrb[44].mxu1  ;;  %v19038_v16 = vld [vmem:[#allocation4_spill] sm:$0xff] }
0x12c6   : > { %v9540_v51 = vpop.f32.mrb[45].mxu1 }
0x12c7   : > { %v8876_v0 = vadd.f32 %v8810_v32, %v19032_v60  ;;  %v8813_v58 = vadd.f32 %v9650_v12, %v8652_v34  ;;  %v9541_v63 = vadd.f32 %v9540_v51, %v9539_v28  ;;  %v9542_v57 = vpop.f32.mrb[46].mxu1  ;;  %v19039_v60 = vld [vmem:[#allocation15_spill] sm:$0xff] }
0x12c8   : > { %v9543_v31 = vpop.f32.mrb[47].mxu1 }
0x12c9   : > { %8908 = vst [vmem:[%s17548_s22 + $0xa0] sm:$0xff] %v8876_v0  ;;  %v8877_v43 = vadd.f32 %v8813_v58, %v19033_v48  ;;  %v9651_v6 = vpop.f32.mrb[44].mxu0  ;;  %v8657_v38 = vadd.f32 %v9541_v63, %v17467_v54  ;;  %v9544_v55 = vadd.f32 %v9543_v31, %v9542_v57 }
0x12ca   : > { %v9652_v50 = vpop.f32.mrb[45].mxu0 }
0x12cb   : > { %8909 = vst [vmem:[%s17548_s22 + $0xa8] sm:$0xff] %v8877_v43  ;;  %v9653_v7 = vadd.f32 %v9652_v50, %v9651_v6  ;;  %v9654_v24 = vpop.f32.mrb[46].mxu0  ;;  %v8660_v21 = vadd.f32 %v9544_v55, %v17467_v54 }
0x12cc   : > { %v9655_v59 = vpop.f32.mrb[47].mxu0 }
0x12cd   : > { %v8818_v30 = vadd.f32 %v9653_v7, %v8657_v38  ;;  %v9656_v19 = vadd.f32 %v9655_v59, %v9654_v24  ;;  %v19040_v59 = vld [vmem:[#allocation93_spill] sm:$0xff] }
0x12cf   : > { %v8878_v46 = vadd.f32 %v8818_v30, %v19034_v40  ;;  %v8821_v56 = vadd.f32 %v9656_v19, %v8660_v21 }
0x12d1   : > { %8910 = vst [vmem:[%s17548_s22 + $0xb0] sm:$0xff] %v8878_v46  ;;  %v8879_v49 = vadd.f32 %v8821_v56, %v19035_v10  ;;  %v19041_v56 = vld [vmem:[#allocation87_spill] sm:$0xff] }
0x12d3   : > { %8911 = vst [vmem:[%s17548_s22 + $0xb8] sm:$0xff] %v8879_v49 }
0x1313   : > { %v9545_v4 = vpop.f32.mrb[48].mxu1 }
0x1314   : > { %v9546_v5 = vpop.f32.mrb[49].mxu1 }
0x1315   : > { %v9547_v45 = vadd.f32 %v9546_v5, %v9545_v4  ;;  %v9548_v25 = vpop.f32.mrb[50].mxu1 }
0x1316   : > { %v9549_v33 = vpop.f32.mrb[51].mxu1 }
0x1317   : > { %v9657_v27 = vpop.f32.mrb[48].mxu0  ;;  %v8665_v29 = vadd.f32 %v9547_v45, %v17467_v54  ;;  %v9550_v42 = vadd.f32 %v9549_v33, %v9548_v25 }
0x1318   : > { %v9658_v15 = vpop.f32.mrb[49].mxu0 }
0x1319   : > { %v9659_v37 = vadd.f32 %v9658_v15, %v9657_v27  ;;  %v9660_v22 = vpop.f32.mrb[50].mxu0  ;;  %v8668_v13 = vadd.f32 %v9550_v42, %v17467_v54 }
0x131a   : > { %v9661_v26 = vpop.f32.mrb[51].mxu0 }
0x131b   : > { %v8826_v20 = vadd.f32 %v9659_v37, %v8665_v29  ;;  %v9662_v2 = vadd.f32 %v9661_v26, %v9660_v22  ;;  %v19042_v26 = vld [vmem:[#allocation94_spill] sm:$0xff] }
0x131c   : > { %v9551_v36 = vpop.f32.mrb[52].mxu1 }
0x131d   : > { %v8880_v62 = vadd.f32 %v8826_v20, %v19036_v3  ;;  %v8829_v52 = vadd.f32 %v9662_v2, %v8668_v13  ;;  %v9552_v1 = vpop.f32.mrb[53].mxu1 }
0x131e   : > { %v9553_v17 = vadd.f32 %v9552_v1, %v9551_v36  ;;  %v9554_v47 = vpop.f32.mrb[54].mxu1  ;;  %v19043_v36 = vld [vmem:[#allocation92_spill] sm:$0xff] }
0x131f   : > { %8912 = vst [vmem:[%s17548_s22 + $0xc0] sm:$0xff] %v8880_v62  ;;  %v8881_v35 = vadd.f32 %v8829_v52, %v19037_v61  ;;  %v9555_v8 = vpop.f32.mrb[55].mxu1 }
0x1320   : > { %v9663_v18 = vpop.f32.mrb[52].mxu0  ;;  %v8673_v23 = vadd.f32 %v9553_v17, %v17467_v54  ;;  %v9556_v53 = vadd.f32 %v9555_v8, %v9554_v47 }
0x1321   : > { %v9664_v14 = vpop.f32.mrb[53].mxu0  ;;  %8913 = vst [vmem:[%s17548_s22 + $0xc8] sm:$0xff] %v8881_v35 }
0x1322   : > { %v9665_v39 = vadd.f32 %v9664_v14, %v9663_v18  ;;  %v9666_v11 = vpop.f32.mrb[54].mxu0  ;;  %v8676_v44 = vadd.f32 %v9556_v53, %v17467_v54 }
0x1323   : > { %v9667_v9 = vpop.f32.mrb[55].mxu0 }
0x1324   : > { %v8834_v41 = vadd.f32 %v9665_v39, %v8673_v23  ;;  %v9668_v34 = vadd.f32 %v9667_v9, %v9666_v11 }
0x1326   : > { %v8882_v32 = vadd.f32 %v8834_v41, %v19038_v16  ;;  %v8837_v12 = vadd.f32 %v9668_v34, %v8676_v44  ;;  %v9557_v28 = vpop.f32.mrb[56].mxu1 }
0x1327   : > { %v9558_v51 = vpop.f32.mrb[57].mxu1 }
0x1328   : > { %8914 = vst [vmem:[%s17548_s22 + $0xd0] sm:$0xff] %v8882_v32  ;;  %v8883_v0 = vadd.f32 %v8837_v12, %v19039_v60  ;;  %v9559_v58 = vadd.f32 %v9558_v51, %v9557_v28  ;;  %v9560_v63 = vpop.f32.mrb[58].mxu1 }
0x1329   : > { %v9561_v57 = vpop.f32.mrb[59].mxu1 }
0x132a   : > { %8915 = vst [vmem:[%s17548_s22 + $0xd8] sm:$0xff] %v8883_v0  ;;  %v9669_v31 = vpop.f32.mrb[56].mxu0  ;;  %v8681_v48 = vadd.f32 %v9559_v58, %v17467_v54  ;;  %v9562_v43 = vadd.f32 %v9561_v57, %v9560_v63 }
0x132b   : > { %v9670_v6 = vpop.f32.mrb[57].mxu0 }
0x132c   : > { %v9671_v38 = vadd.f32 %v9670_v6, %v9669_v31  ;;  %v9672_v55 = vpop.f32.mrb[58].mxu0  ;;  %v8684_v50 = vadd.f32 %v9562_v43, %v17467_v54 }
0x132d   : > { %v9673_v7 = vpop.f32.mrb[59].mxu0 }
0x132e   : > { %v8842_v24 = vadd.f32 %v9671_v38, %v8681_v48  ;;  %v9674_v21 = vadd.f32 %v9673_v7, %v9672_v55 }
0x132f   : > { %v9563_v40 = vpop.f32.mrb[60].mxu1 }
0x1330   : > { %v8884_v30 = vadd.f32 %v8842_v24, %v19040_v59  ;;  %v8845_v19 = vadd.f32 %v9674_v21, %v8684_v50  ;;  %v9564_v46 = vpop.f32.mrb[61].mxu1 }
0x1331   : > { %v9565_v49 = vadd.f32 %v9564_v46, %v9563_v40  ;;  %v9566_v4 = vpop.f32.mrb[62].mxu1 }
0x1332   : > { %8916 = vst [vmem:[%s17548_s22 + $0xe0] sm:$0xff] %v8884_v30  ;;  %v8885_v10 = vadd.f32 %v8845_v19, %v19041_v56  ;;  %v9675_v5 = vpop.f32.mrb[60].mxu0  ;;  %v9567_v45 = vpop.f32.mrb[63].mxu1 }
0x1333   : > { %v8689_v25 = vadd.f32 %v9565_v49, %v17467_v54  ;;  %v9676_v33 = vpop.f32.mrb[61].mxu0  ;;  %v9568_v27 = vadd.f32 %v9567_v45, %v9566_v4 }
0x1334   : > { %8917 = vst [vmem:[%s17548_s22 + $0xe8] sm:$0xff] %v8885_v10  ;;  %v9677_v29 = vadd.f32 %v9676_v33, %v9675_v5  ;;  %v9678_v42 = vpop.f32.mrb[62].mxu0 }
0x1335   : > { %v8692_v15 = vadd.f32 %v9568_v27, %v17467_v54  ;;  %v9679_v37 = vpop.f32.mrb[63].mxu0 }
0x1336   : > { %v8850_v22 = vadd.f32 %v9677_v29, %v8689_v25  ;;  %v9680_v13 = vadd.f32 %v9679_v37, %v9678_v42 }
0x1338   : > { %v8886_v20 = vadd.f32 %v8850_v22, %v19042_v26  ;;  %v8853_v2 = vadd.f32 %v9680_v13, %v8692_v15 }
0x133a   : > { %8918 = vst [vmem:[%s17548_s22 + $0xf0] sm:$0xff] %v8886_v20  ;;  %v8887_v3 = vadd.f32 %v8853_v2, %v19043_v36 }
0x133c   : > { %8919 = vst [vmem:[%s17548_s22 + $0xf8] sm:$0xff] %v8887_v3 }
0x133d PF: > { %s23_s25 = sadd.s32 1, %s11692_s25  }
0x133e   : > { %p20_p4 = scmp.ge.s32.totalorder %s23_s25, 4  }
0x1340   :  { %22 = sbr.rel (!%p20_p4) target bundleno = 1 (0x1), region = 102 }

</bundles_post_ra>
